<compile_context>
chip_gen: v7x
topology: tpu7x:2x2x1
jax: 0.10.0
libtpu: 0.0.40
codegen_flags: <defaults>
</compile_context>

<pallas_src>
import numpy as np
import jax
import jax.numpy as jnp
from jax.experimental import pallas as pl
from jax.experimental.pallas import tpu as pltpu

SHIFT = 0
REDUCE = 1

# small, module-consistent sizes
B, T, E, H, O = 2, 8, 16, 32, 5
VOCAB = 20
S = 2 * T - 1           # number of transitions
STACK_ROWS = T + 2      # per-example stack slab (2 pad rows -> no pointer clamps)


def tree_lstm_kernel(emb_ref, trans_ref, wxg_ref, bxg_ref,
                     wr_ref, br_ref, wo_ref, bo_ref,
                     out_ref, buf_ref, stack_ref):
    f32 = jnp.float32

    # ---- fused buffer projections: (proj_x | proj_x_gate) in one matmul ----
    emb2 = emb_ref[...].reshape(B * T, E)                               # [B*T, E]
    pxg = jnp.dot(emb2, wxg_ref[...], preferred_element_type=f32) + bxg_ref[...]
    bc = pxg[:, :H]                                                     # cell (pre-act)
    bh = jax.nn.sigmoid(pxg[:, H:]) * jnp.tanh(bc)                      # gated hidden
    # fused (h | c) buffer; row (b*T + t) holds token t of example b
    buf_ref[...] = jnp.concatenate([bh, bc], axis=-1)                   # [B*T, 2H]

    # fused (h | c) stacks; row (b*STACK_ROWS + 2 + depth)
    stack_ref[...] = jnp.zeros_like(stack_ref)

    wr = wr_ref[...]                                                    # [4H, 5H]
    br_b = jnp.broadcast_to(br_ref[...], (B, 5 * H))                    # hoisted

    # per-example stack-size / buffer pointers as scalar values
    # stack pointer is offset by 2 (slab rows 0,1 are permanent zero pads)
    sp = [jnp.array(2, jnp.int32) for _ in range(B)]
    bp = [jnp.array(T, jnp.int32) for _ in range(B)]

    # static unroll over the (compile-time) number of transitions
    for t in range(S):
        tr = [trans_ref[b, t] for b in range(B)]                        # SMEM scalars
        is_shift = [tr[b] == SHIFT for b in range(B)]
        is_red = [tr[b] == REDUCE for b in range(B)]

        any_red = is_red[0]
        for b in range(1, B):
            any_red = jnp.logical_or(any_red, is_red[b])

        # -- reduce path: only runs when at least one example reduces --
        @pl.when(any_red)
        def _reduce_step(sp=tuple(sp), is_red=tuple(is_red)):
            rows = []
            for b in range(B):
                base = b * STACK_ROWS
                l_hc = stack_ref[pl.ds(base + sp[b] - 2, 1), :]          # [1, 2H] left
                r_hc = stack_ref[pl.ds(base + sp[b] - 1, 1), :]          # [1, 2H] right
                rows.append(jnp.concatenate([l_hc, r_hc], axis=1))       # [1, 4H]
            lr = jnp.concatenate(rows, axis=0)                           # [B, 4H] = [B,128]
            # weight rows for the c halves are zero -> matmul sees only (l_h, r_h)
            proj = jnp.dot(lr, wr, preferred_element_type=f32) + br_b    # [B, 5H]
            # columns permuted on the host to (i, f_l, f_r, o, g)
            sig = jax.nn.sigmoid(proj[:, :4 * H])                        # one EUP op, 128 lanes
            i_g = sig[:, 0 * H:1 * H]
            f_l = sig[:, 1 * H:2 * H]
            f_r = sig[:, 2 * H:3 * H]
            o_g = sig[:, 3 * H:4 * H]
            g_g = jnp.tanh(proj[:, 4 * H:])
            c_new = i_g * g_g + f_l * lr[:, H:2 * H] + f_r * lr[:, 3 * H:]
            h_new = o_g * jnp.tanh(c_new)
            hc_new = jnp.concatenate([h_new, c_new], axis=1)             # [B, 2H]
            for b in range(B):
                wrow = b * STACK_ROWS + sp[b] - 2
                @pl.when(is_red[b])
                def _write(b=b, wrow=wrow):
                    stack_ref[pl.ds(wrow, 1), :] = hc_new[b:b + 1, :]

        # -- shift path + pointer updates (scalar-unit driven) --
        for b in range(B):
            @pl.when(is_shift[b])
            def _shift(b=b, src=bp[b] - 1, dst=sp[b]):
                stack_ref[pl.ds(b * STACK_ROWS + dst, 1), :] = \
                    buf_ref[pl.ds(b * T + src, 1), :]
            sp[b] = sp[b] + is_shift[b].astype(jnp.int32) - is_red[b].astype(jnp.int32)
            bp[b] = bp[b] - is_shift[b].astype(jnp.int32)

    # ---- root (h|c) stack rows + output projection (c rows of wo are zero) ----
    rows = []
    for b in range(B):
        top = b * STACK_ROWS + sp[b] - 1
        rows.append(stack_ref[pl.ds(top, 1), :])                         # [1, 2H]
    final_hc = jnp.concatenate(rows, axis=0)                             # [B, 2H]

    # output layer (dropout p=0.5 is identity in eval mode)
    out_ref[...] = (jnp.dot(final_hc, wo_ref[...], preferred_element_type=f32)
                    + bo_ref[...])


def tree_lstm_classifier(tokens, transitions, params):
    # host-side glue: embedding gather, transition transpose, weight re-layouts
    emb = params["embed"][tokens].astype(jnp.float32)            # [B, T, E]
    trans_bs = jnp.transpose(transitions).astype(jnp.int32)      # [B, S]
    wxg = jnp.concatenate([params["wx"], params["wg"]], axis=1)  # [E, 2H]
    bxg = jnp.concatenate([params["bx"], params["bg"]], axis=1)  # [1, 2H]

    # Reduce layer: permute gate columns (i, f_l, f_r, g, o) -> (i, f_l, f_r, o, g)
    # so one sigmoid covers a lane-aligned 4H block; expand input rows to the fused
    # (l_h | l_c | r_h | r_c) layout with zero rows for the c halves.
    def perm_cols(m):
        i_, fl_, fr_, g_, o_ = jnp.split(m, 5, axis=1)
        return jnp.concatenate([i_, fl_, fr_, o_, g_], axis=1)

    wr_p = perm_cols(params["wr"])                               # [2H, 5H]
    br_p = perm_cols(params["br"])                               # [1, 5H]
    zero_h = jnp.zeros((H, 5 * H), jnp.float32)
    wr4 = jnp.concatenate([wr_p[:H], zero_h, wr_p[H:], zero_h], axis=0)  # [4H, 5H]

    # Output layer: zero-pad so the fused (h|c) root row projects directly.
    wo2 = jnp.concatenate([params["wo"], jnp.zeros((H, O), jnp.float32)], axis=0)  # [2H, O]

    vmem = pl.BlockSpec(memory_space=pltpu.MemorySpace.VMEM)
    smem = pl.BlockSpec(memory_space=pltpu.MemorySpace.SMEM)
    call = pl.pallas_call(
        tree_lstm_kernel,
        out_shape=jax.ShapeDtypeStruct((B, O), jnp.float32),
        in_specs=[vmem, smem, vmem, vmem, vmem, vmem, vmem, vmem],
        out_specs=vmem,
        scratch_shapes=[pltpu.VMEM((B * T, 2 * H), jnp.float32),          # buffers (h|c)
                        pltpu.VMEM((B * STACK_ROWS, 2 * H), jnp.float32)],# stacks  (h|c)
    )
    # TODO(synk): for large batched inference, add a grid over batch blocks with
    # dimension_semantics=("parallel",) so the second TensorCore on v7x is used.
    return call(emb, trans_bs, wxg, bxg, wr4, br_p, wo2, params["bo"])


def init_params(key):
    ks = jax.random.split(key, 9)
    stdv_x = 1.0 / np.sqrt(E)
    stdv_h = 1.0 / np.sqrt(H)

    def uni(k, shape, s):
        return jax.random.uniform(k, shape, jnp.float32, -s, s)

    embed = jax.random.normal(ks[0], (VOCAB, E), jnp.float32)
    embed = embed.at[1].set(0.0)  # padding_idx=1
    return {
        "embed": embed,
        "wx": uni(ks[1], (E, H), stdv_x), "bx": uni(ks[2], (1, H), stdv_x),
        "wg": uni(ks[3], (E, H), stdv_x), "bg": uni(ks[4], (1, H), stdv_x),
        "wr": uni(ks[5], (2 * H, 5 * H), stdv_h), "br": uni(ks[6], (1, 5 * H), stdv_h),
        "wo": uni(ks[7], (H, O), stdv_h), "bo": uni(ks[8], (1, O), stdv_h),
    }


def reference_forward(tokens, transitions, params):
    """Pure-numpy re-implementation of the PyTorch forward (eval mode)."""
    def sigmoid(x):
        return 1.0 / (1.0 + np.exp(-x))

    p = {k: np.asarray(v, np.float32) for k, v in params.items()}
    tokens = np.asarray(tokens)
    transitions = np.asarray(transitions)

    emb = p["embed"][tokens]                                 # [B, T, E]
    bc = emb @ p["wx"] + p["bx"][0]
    bh = np.tanh(bc)
    gate = sigmoid(emb @ p["wg"] + p["bg"][0])
    bh = gate * bh

    bufs = [[(bh[b, t], bc[b, t]) for t in range(T)] for b in range(B)]
    stacks = [[] for _ in range(B)]
    for t in range(S):
        for b in range(B):
            tr = transitions[t, b]
            if tr == SHIFT:
                stacks[b].append(bufs[b].pop())
            elif tr == REDUCE:
                rh, rc = stacks[b].pop()
                lh, lc = stacks[b].pop()
                proj = np.concatenate([lh, rh]) @ p["wr"] + p["br"][0]
                i, fl, fr, g, o = np.split(proj, 5)
                c = sigmoid(i) * np.tanh(g) + sigmoid(fl) * lc + sigmoid(fr) * rc
                h = sigmoid(o) * np.tanh(c)
                stacks[b].append((h, c))
    final = np.stack([stacks[b][-1][0] for b in range(B)])
    return final @ p["wo"] + p["bo"][0]


if __name__ == "__main__":
    key = jax.random.PRNGKey(0)
    kp, kt = jax.random.split(key)
    params = init_params(kp)

    tokens = jax.random.randint(kt, (B, T), 0, VOCAB, dtype=jnp.int32)

    # valid shift/reduce sequences (T shifts, T-1 reduces)
    seq0 = [SHIFT] + [SHIFT, REDUCE] * (T - 1)               # S, (S R) x (T-1)
    seq1 = [SHIFT] * T + [REDUCE] * (T - 1)                  # all shifts then reduces
    transitions = jnp.asarray(np.stack([seq0, seq1], axis=1), dtype=jnp.int32)  # [S, B]

    logits = tree_lstm_classifier(tokens, transitions, params)
    logits = jax.block_until_ready(logits)

    ref = reference_forward(tokens, transitions, params)
    # Default (single-pass bf16) MXU precision replaces Precision.HIGHEST, so
    # allow bf16-level rounding in the comparison.
    np.testing.assert_allclose(np.asarray(logits), ref, rtol=2e-2, atol=2e-2)

    print("KERNEL_OK")
</pallas_src>

<mosaic_0001>
module attributes {stable_mosaic.version = 11 : i64} {
  func.func @tree_lstm_kernel(%arg0: memref<2x8x16xf32, #tpu.memory_space<vmem>>, %arg1: memref<2x15xi32, #tpu.memory_space<smem>>, %arg2: memref<16x64xf32, #tpu.memory_space<vmem>>, %arg3: memref<1x64xf32, #tpu.memory_space<vmem>>, %arg4: memref<128x160xf32, #tpu.memory_space<vmem>>, %arg5: memref<1x160xf32, #tpu.memory_space<vmem>>, %arg6: memref<64x5xf32, #tpu.memory_space<vmem>>, %arg7: memref<1x5xf32, #tpu.memory_space<vmem>>, %arg8: memref<2x5xf32, #tpu.memory_space<vmem>>, %arg9: memref<16x64xf32, #tpu.memory_space<vmem>>, %arg10: memref<20x64xf32, #tpu.memory_space<vmem>>) attributes {dimension_semantics = [], scalar_prefetch = 0 : i64, scratch_operands = 2 : i64, tpu.core_type = #tpu.core_type<tc>} {
    %c0 = arith.constant 0 : index
    %c0_0 = arith.constant 0 : index
    %c0_1 = arith.constant 0 : index
    %0 = vector.load %arg0[%c0, %c0_0, %c0_1] : memref<2x8x16xf32, #tpu.memory_space<vmem>>, vector<2x8x16xf32>
    %1 = vector.shape_cast %0 : vector<2x8x16xf32> to vector<16x16xf32>
    %c0_2 = arith.constant 0 : index
    %c0_3 = arith.constant 0 : index
    %2 = vector.load %arg2[%c0_2, %c0_3] : memref<16x64xf32, #tpu.memory_space<vmem>>, vector<16x64xf32>
    %cst = arith.constant dense<0.000000e+00> : vector<16x64xf32>
    %3 = tpu.matmul %1, %2, %cst {dimension_numbers = #tpu.dot_dimension_numbers<[1], [0], [0], [1], [0, 0, 1, 1], [], []>} : vector<16x16xf32>, vector<16x64xf32>, vector<16x64xf32> -> vector<16x64xf32>
    %c0_4 = arith.constant 0 : index
    %c0_5 = arith.constant 0 : index
    %4 = vector.load %arg3[%c0_4, %c0_5] : memref<1x64xf32, #tpu.memory_space<vmem>>, vector<1x64xf32>
    %5 = vector.broadcast %4 : vector<1x64xf32> to vector<16x64xf32>
    %6 = arith.addf %3, %5 : vector<16x64xf32>
    %7 = vector.extract_strided_slice %6 {offsets = [0, 0], sizes = [16, 32], strides = [1, 1]} : vector<16x64xf32> to vector<16x32xf32>
    %8 = vector.extract_strided_slice %6 {offsets = [0, 32], sizes = [16, 32], strides = [1, 1]} : vector<16x64xf32> to vector<16x32xf32>
    %9 = arith.negf %8 : vector<16x32xf32>
    %10 = math.exp %9 : vector<16x32xf32>
    %cst_6 = arith.constant 1.000000e+00 : f32
    %11 = vector.broadcast %cst_6 : f32 to vector<16x32xf32>
    %12 = arith.addf %11, %10 : vector<16x32xf32>
    %13 = arith.divf %11, %12 : vector<16x32xf32>
    %14 = math.tanh %7 : vector<16x32xf32>
    %15 = arith.mulf %13, %14 : vector<16x32xf32>
    %16 = tpu.concatenate %15, %7 in 1 : vector<16x32xf32>, vector<16x32xf32> -> vector<16x64xf32>
    %c0_7 = arith.constant 0 : index
    %c0_8 = arith.constant 0 : index
    %17 = vector.load %arg9[%c0_7, %c0_8] : memref<16x64xf32, #tpu.memory_space<vmem>>, vector<16x64xf32>
    tpu.vector_store %arg9[%c0_7, %c0_8], %16 {strides = array<i32>} : memref<16x64xf32, #tpu.memory_space<vmem>>, vector<16x64xf32>,
    %cst_9 = arith.constant 0.000000e+00 : f32
    %18 = vector.broadcast %cst_9 : f32 to vector<20x64xf32>
    %c0_10 = arith.constant 0 : index
    %c0_11 = arith.constant 0 : index
    %19 = vector.load %arg10[%c0_10, %c0_11] : memref<20x64xf32, #tpu.memory_space<vmem>>, vector<20x64xf32>
    tpu.vector_store %arg10[%c0_10, %c0_11], %18 {strides = array<i32>} : memref<20x64xf32, #tpu.memory_space<vmem>>, vector<20x64xf32>,
    %c0_12 = arith.constant 0 : index
    %c0_13 = arith.constant 0 : index
    %20 = vector.load %arg4[%c0_12, %c0_13] : memref<128x160xf32, #tpu.memory_space<vmem>>, vector<128x160xf32>
    %c0_14 = arith.constant 0 : index
    %c0_15 = arith.constant 0 : index
    %21 = vector.load %arg5[%c0_14, %c0_15] : memref<1x160xf32, #tpu.memory_space<vmem>>, vector<1x160xf32>
    %22 = vector.shape_cast %21 : vector<1x160xf32> to vector<1x160xf32>
    %23 = vector.broadcast %22 : vector<1x160xf32> to vector<2x160xf32>
    %c0_16 = arith.constant 0 : index
    %c0_17 = arith.constant 0 : index
    %24 = memref.load %arg1[%c0_16, %c0_17] : memref<2x15xi32, #tpu.memory_space<smem>>
    %c1 = arith.constant 1 : index
    %c0_18 = arith.constant 0 : index
    %25 = memref.load %arg1[%c1, %c0_18] : memref<2x15xi32, #tpu.memory_space<smem>>
    %c0_i32 = arith.constant 0 : i32
    %26 = arith.cmpi eq, %24, %c0_i32 : i32
    %c0_i32_19 = arith.constant 0 : i32
    %27 = arith.cmpi eq, %25, %c0_i32_19 : i32
    %c1_i32 = arith.constant 1 : i32
    %28 = arith.cmpi eq, %24, %c1_i32 : i32
    %c1_i32_20 = arith.constant 1 : i32
    %29 = arith.cmpi eq, %25, %c1_i32_20 : i32
    %30 = arith.ori %28, %29 : i1
    %31 = arith.extui %30 : i1 to i32
    %c2_i32 = arith.constant 2 : i32
    %c2_i32_21 = arith.constant 2 : i32
    %c0_i32_22 = arith.constant 0 : i32
    %32 = arith.cmpi ne, %31, %c0_i32_22 : i32
    scf.if %32 {
      %c0_i32_215 = arith.constant 0 : i32
      %440 = arith.addi %c0_i32_215, %c2_i32 : i32
      %c2_i32_216 = arith.constant 2 : i32
      %441 = arith.subi %440, %c2_i32_216 : i32
      %442 = arith.index_cast %441 : i32 to index
      %c0_217 = arith.constant 0 : index
      %443 = vector.load %arg10[%442, %c0_217] : memref<20x64xf32, #tpu.memory_space<vmem>>, vector<1x64xf32>
      %c0_i32_218 = arith.constant 0 : i32
      %444 = arith.addi %c0_i32_218, %c2_i32 : i32
      %c1_i32_219 = arith.constant 1 : i32
      %445 = arith.subi %444, %c1_i32_219 : i32
      %446 = arith.index_cast %445 : i32 to index
      %c0_220 = arith.constant 0 : index
      %447 = vector.load %arg10[%446, %c0_220] : memref<20x64xf32, #tpu.memory_space<vmem>>, vector<1x64xf32>
      %448 = tpu.concatenate %443, %447 in 1 : vector<1x64xf32>, vector<1x64xf32> -> vector<1x128xf32>
      %c10_i32_221 = arith.constant 10 : i32
      %449 = arith.addi %c10_i32_221, %c2_i32_21 : i32
      %c2_i32_222 = arith.constant 2 : i32
      %450 = arith.subi %449, %c2_i32_222 : i32
      %451 = arith.index_cast %450 : i32 to index
      %c0_223 = arith.constant 0 : index
      %452 = vector.load %arg10[%451, %c0_223] : memref<20x64xf32, #tpu.memory_space<vmem>>, vector<1x64xf32>
      %c10_i32_224 = arith.constant 10 : i32
      %453 = arith.addi %c10_i32_224, %c2_i32_21 : i32
      %c1_i32_225 = arith.constant 1 : i32
      %454 = arith.subi %453, %c1_i32_225 : i32
      %455 = arith.index_cast %454 : i32 to index
      %c0_226 = arith.constant 0 : index
      %456 = vector.load %arg10[%455, %c0_226] : memref<20x64xf32, #tpu.memory_space<vmem>>, vector<1x64xf32>
      %457 = tpu.concatenate %452, %456 in 1 : vector<1x64xf32>, vector<1x64xf32> -> vector<1x128xf32>
      %458 = tpu.concatenate %448, %457 in 0 : vector<1x128xf32>, vector<1x128xf32> -> vector<2x128xf32>
      %cst_227 = arith.constant dense<0.000000e+00> : vector<2x160xf32>
      %459 = tpu.matmul %458, %20, %cst_227 {dimension_numbers = #tpu.dot_dimension_numbers<[1], [0], [0], [1], [0, 0, 1, 1], [], []>} : vector<2x128xf32>, vector<128x160xf32>, vector<2x160xf32> -> vector<2x160xf32>
      %460 = arith.addf %459, %23 : vector<2x160xf32>
      %461 = vector.extract_strided_slice %460 {offsets = [0, 0], sizes = [2, 128], strides = [1, 1]} : vector<2x160xf32> to vector<2x128xf32>
      %462 = arith.negf %461 : vector<2x128xf32>
      %463 = math.exp %462 : vector<2x128xf32>
      %cst_228 = arith.constant 1.000000e+00 : f32
      %464 = vector.broadcast %cst_228 : f32 to vector<2x128xf32>
      %465 = arith.addf %464, %463 : vector<2x128xf32>
      %466 = arith.divf %464, %465 : vector<2x128xf32>
      %467 = vector.extract_strided_slice %466 {offsets = [0, 0], sizes = [2, 32], strides = [1, 1]} : vector<2x128xf32> to vector<2x32xf32>
      %468 = vector.extract_strided_slice %466 {offsets = [0, 32], sizes = [2, 32], strides = [1, 1]} : vector<2x128xf32> to vector<2x32xf32>
      %469 = vector.extract_strided_slice %466 {offsets = [0, 64], sizes = [2, 32], strides = [1, 1]} : vector<2x128xf32> to vector<2x32xf32>
      %470 = vector.extract_strided_slice %466 {offsets = [0, 96], sizes = [2, 32], strides = [1, 1]} : vector<2x128xf32> to vector<2x32xf32>
      %471 = vector.extract_strided_slice %460 {offsets = [0, 128], sizes = [2, 32], strides = [1, 1]} : vector<2x160xf32> to vector<2x32xf32>
      %472 = math.tanh %471 : vector<2x32xf32>
      %473 = arith.mulf %467, %472 : vector<2x32xf32>
      %474 = vector.extract_strided_slice %458 {offsets = [0, 32], sizes = [2, 32], strides = [1, 1]} : vector<2x128xf32> to vector<2x32xf32>
      %475 = arith.mulf %468, %474 : vector<2x32xf32>
      %476 = arith.addf %473, %475 : vector<2x32xf32>
      %477 = vector.extract_strided_slice %458 {offsets = [0, 96], sizes = [2, 32], strides = [1, 1]} : vector<2x128xf32> to vector<2x32xf32>
      %478 = arith.mulf %469, %477 : vector<2x32xf32>
      %479 = arith.addf %476, %478 : vector<2x32xf32>
      %480 = math.tanh %479 : vector<2x32xf32>
      %481 = arith.mulf %470, %480 : vector<2x32xf32>
      %482 = tpu.concatenate %481, %479 in 1 : vector<2x32xf32>, vector<2x32xf32> -> vector<2x64xf32>
      %c0_i32_229 = arith.constant 0 : i32
      %483 = arith.addi %c0_i32_229, %c2_i32 : i32
      %c2_i32_230 = arith.constant 2 : i32
      %484 = arith.subi %483, %c2_i32_230 : i32
      %485 = arith.extui %28 : i1 to i32
      %c0_i32_231 = arith.constant 0 : i32
      %486 = arith.cmpi ne, %485, %c0_i32_231 : i32
      scf.if %486 {
        %491 = vector.extract_strided_slice %482 {offsets = [0, 0], sizes = [1, 64], strides = [1, 1]} : vector<2x64xf32> to vector<1x64xf32>
        %492 = arith.index_cast %484 : i32 to index
        %c0_235 = arith.constant 0 : index
        %493 = vector.load %arg10[%492, %c0_235] : memref<20x64xf32, #tpu.memory_space<vmem>>, vector<1x64xf32>
        tpu.vector_store %arg10[%492, %c0_235], %491 {strides = array<i32>} : memref<20x64xf32, #tpu.memory_space<vmem>>, vector<1x64xf32>,
      } else {
      }
      %c10_i32_232 = arith.constant 10 : i32
      %487 = arith.addi %c10_i32_232, %c2_i32_21 : i32
      %c2_i32_233 = arith.constant 2 : i32
      %488 = arith.subi %487, %c2_i32_233 : i32
      %489 = arith.extui %29 : i1 to i32
      %c0_i32_234 = arith.constant 0 : i32
      %490 = arith.cmpi ne, %489, %c0_i32_234 : i32
      scf.if %490 {
        %491 = vector.extract_strided_slice %482 {offsets = [1, 0], sizes = [1, 64], strides = [1, 1]} : vector<2x64xf32> to vector<1x64xf32>
        %492 = arith.index_cast %488 : i32 to index
        %c0_235 = arith.constant 0 : index
        %493 = vector.load %arg10[%492, %c0_235] : memref<20x64xf32, #tpu.memory_space<vmem>>, vector<1x64xf32>
        tpu.vector_store %arg10[%492, %c0_235], %491 {strides = array<i32>} : memref<20x64xf32, #tpu.memory_space<vmem>>, vector<1x64xf32>,
      } else {
      }
    } else {
    }
    %c8_i32 = arith.constant 8 : i32
    %c1_i32_23 = arith.constant 1 : i32
    %33 = arith.subi %c8_i32, %c1_i32_23 : i32
    %34 = arith.extui %26 : i1 to i32
    %c2_i32_24 = arith.constant 2 : i32
    %c0_i32_25 = arith.constant 0 : i32
    %35 = arith.cmpi ne, %34, %c0_i32_25 : i32
    scf.if %35 {
      %c0_i32_215 = arith.constant 0 : i32
      %440 = arith.addi %c0_i32_215, %33 : i32
      %441 = arith.index_cast %440 : i32 to index
      %c0_216 = arith.constant 0 : index
      %442 = vector.load %arg9[%441, %c0_216] : memref<16x64xf32, #tpu.memory_space<vmem>>, vector<1x64xf32>
      %c0_i32_217 = arith.constant 0 : i32
      %443 = arith.addi %c0_i32_217, %c2_i32_24 : i32
      %444 = arith.index_cast %443 : i32 to index
      %c0_218 = arith.constant 0 : index
      %445 = vector.load %arg10[%444, %c0_218] : memref<20x64xf32, #tpu.memory_space<vmem>>, vector<1x64xf32>
      tpu.vector_store %arg10[%444, %c0_218], %442 {strides = array<i32>} : memref<20x64xf32, #tpu.memory_space<vmem>>, vector<1x64xf32>,
    } else {
    }
    %36 = arith.extui %26 : i1 to i32
    %c2_i32_26 = arith.constant 2 : i32
    %37 = arith.addi %c2_i32_26, %36 : i32
    %38 = arith.extui %28 : i1 to i32
    %39 = arith.subi %37, %38 : i32
    %40 = arith.extui %26 : i1 to i32
    %c8_i32_27 = arith.constant 8 : i32
    %41 = arith.subi %c8_i32_27, %40 : i32
    %c8_i32_28 = arith.constant 8 : i32
    %c1_i32_29 = arith.constant 1 : i32
    %42 = arith.subi %c8_i32_28, %c1_i32_29 : i32
    %43 = arith.extui %27 : i1 to i32
    %c2_i32_30 = arith.constant 2 : i32
    %c0_i32_31 = arith.constant 0 : i32
    %44 = arith.cmpi ne, %43, %c0_i32_31 : i32
    scf.if %44 {
      %c8_i32_215 = arith.constant 8 : i32
      %440 = arith.addi %c8_i32_215, %42 : i32
      %441 = arith.index_cast %440 : i32 to index
      %c0_216 = arith.constant 0 : index
      %442 = vector.load %arg9[%441, %c0_216] : memref<16x64xf32, #tpu.memory_space<vmem>>, vector<1x64xf32>
      %c10_i32_217 = arith.constant 10 : i32
      %443 = arith.addi %c10_i32_217, %c2_i32_30 : i32
      %444 = arith.index_cast %443 : i32 to index
      %c0_218 = arith.constant 0 : index
      %445 = vector.load %arg10[%444, %c0_218] : memref<20x64xf32, #tpu.memory_space<vmem>>, vector<1x64xf32>
      tpu.vector_store %arg10[%444, %c0_218], %442 {strides = array<i32>} : memref<20x64xf32, #tpu.memory_space<vmem>>, vector<1x64xf32>,
    } else {
    }
    %45 = arith.extui %27 : i1 to i32
    %c2_i32_32 = arith.constant 2 : i32
    %46 = arith.addi %c2_i32_32, %45 : i32
    %47 = arith.extui %29 : i1 to i32
    %48 = arith.subi %46, %47 : i32
    %49 = arith.extui %27 : i1 to i32
    %c8_i32_33 = arith.constant 8 : i32
    %50 = arith.subi %c8_i32_33, %49 : i32
    %c0_34 = arith.constant 0 : index
    %c1_35 = arith.constant 1 : index
    %51 = memref.load %arg1[%c0_34, %c1_35] : memref<2x15xi32, #tpu.memory_space<smem>>
    %c1_36 = arith.constant 1 : index
    %c1_37 = arith.constant 1 : index
    %52 = memref.load %arg1[%c1_36, %c1_37] : memref<2x15xi32, #tpu.memory_space<smem>>
    %c0_i32_38 = arith.constant 0 : i32
    %53 = arith.cmpi eq, %51, %c0_i32_38 : i32
    %c0_i32_39 = arith.constant 0 : i32
    %54 = arith.cmpi eq, %52, %c0_i32_39 : i32
    %c1_i32_40 = arith.constant 1 : i32
    %55 = arith.cmpi eq, %51, %c1_i32_40 : i32
    %c1_i32_41 = arith.constant 1 : i32
    %56 = arith.cmpi eq, %52, %c1_i32_41 : i32
    %57 = arith.ori %55, %56 : i1
    %58 = arith.extui %57 : i1 to i32
    %c0_i32_42 = arith.constant 0 : i32
    %59 = arith.cmpi ne, %58, %c0_i32_42 : i32
    scf.if %59 {
      %c0_i32_215 = arith.constant 0 : i32
      %440 = arith.addi %c0_i32_215, %39 : i32
      %c2_i32_216 = arith.constant 2 : i32
      %441 = arith.subi %440, %c2_i32_216 : i32
      %442 = arith.index_cast %441 : i32 to index
      %c0_217 = arith.constant 0 : index
      %443 = vector.load %arg10[%442, %c0_217] : memref<20x64xf32, #tpu.memory_space<vmem>>, vector<1x64xf32>
      %c0_i32_218 = arith.constant 0 : i32
      %444 = arith.addi %c0_i32_218, %39 : i32
      %c1_i32_219 = arith.constant 1 : i32
      %445 = arith.subi %444, %c1_i32_219 : i32
      %446 = arith.index_cast %445 : i32 to index
      %c0_220 = arith.constant 0 : index
      %447 = vector.load %arg10[%446, %c0_220] : memref<20x64xf32, #tpu.memory_space<vmem>>, vector<1x64xf32>
      %448 = tpu.concatenate %443, %447 in 1 : vector<1x64xf32>, vector<1x64xf32> -> vector<1x128xf32>
      %c10_i32_221 = arith.constant 10 : i32
      %449 = arith.addi %c10_i32_221, %48 : i32
      %c2_i32_222 = arith.constant 2 : i32
      %450 = arith.subi %449, %c2_i32_222 : i32
      %451 = arith.index_cast %450 : i32 to index
      %c0_223 = arith.constant 0 : index
      %452 = vector.load %arg10[%451, %c0_223] : memref<20x64xf32, #tpu.memory_space<vmem>>, vector<1x64xf32>
      %c10_i32_224 = arith.constant 10 : i32
      %453 = arith.addi %c10_i32_224, %48 : i32
      %c1_i32_225 = arith.constant 1 : i32
      %454 = arith.subi %453, %c1_i32_225 : i32
      %455 = arith.index_cast %454 : i32 to index
      %c0_226 = arith.constant 0 : index
      %456 = vector.load %arg10[%455, %c0_226] : memref<20x64xf32, #tpu.memory_space<vmem>>, vector<1x64xf32>
      %457 = tpu.concatenate %452, %456 in 1 : vector<1x64xf32>, vector<1x64xf32> -> vector<1x128xf32>
      %458 = tpu.concatenate %448, %457 in 0 : vector<1x128xf32>, vector<1x128xf32> -> vector<2x128xf32>
      %cst_227 = arith.constant dense<0.000000e+00> : vector<2x160xf32>
      %459 = tpu.matmul %458, %20, %cst_227 {dimension_numbers = #tpu.dot_dimension_numbers<[1], [0], [0], [1], [0, 0, 1, 1], [], []>} : vector<2x128xf32>, vector<128x160xf32>, vector<2x160xf32> -> vector<2x160xf32>
      %460 = arith.addf %459, %23 : vector<2x160xf32>
      %461 = vector.extract_strided_slice %460 {offsets = [0, 0], sizes = [2, 128], strides = [1, 1]} : vector<2x160xf32> to vector<2x128xf32>
      %462 = arith.negf %461 : vector<2x128xf32>
      %463 = math.exp %462 : vector<2x128xf32>
      %cst_228 = arith.constant 1.000000e+00 : f32
      %464 = vector.broadcast %cst_228 : f32 to vector<2x128xf32>
      %465 = arith.addf %464, %463 : vector<2x128xf32>
      %466 = arith.divf %464, %465 : vector<2x128xf32>
      %467 = vector.extract_strided_slice %466 {offsets = [0, 0], sizes = [2, 32], strides = [1, 1]} : vector<2x128xf32> to vector<2x32xf32>
      %468 = vector.extract_strided_slice %466 {offsets = [0, 32], sizes = [2, 32], strides = [1, 1]} : vector<2x128xf32> to vector<2x32xf32>
      %469 = vector.extract_strided_slice %466 {offsets = [0, 64], sizes = [2, 32], strides = [1, 1]} : vector<2x128xf32> to vector<2x32xf32>
      %470 = vector.extract_strided_slice %466 {offsets = [0, 96], sizes = [2, 32], strides = [1, 1]} : vector<2x128xf32> to vector<2x32xf32>
      %471 = vector.extract_strided_slice %460 {offsets = [0, 128], sizes = [2, 32], strides = [1, 1]} : vector<2x160xf32> to vector<2x32xf32>
      %472 = math.tanh %471 : vector<2x32xf32>
      %473 = arith.mulf %467, %472 : vector<2x32xf32>
      %474 = vector.extract_strided_slice %458 {offsets = [0, 32], sizes = [2, 32], strides = [1, 1]} : vector<2x128xf32> to vector<2x32xf32>
      %475 = arith.mulf %468, %474 : vector<2x32xf32>
      %476 = arith.addf %473, %475 : vector<2x32xf32>
      %477 = vector.extract_strided_slice %458 {offsets = [0, 96], sizes = [2, 32], strides = [1, 1]} : vector<2x128xf32> to vector<2x32xf32>
      %478 = arith.mulf %469, %477 : vector<2x32xf32>
      %479 = arith.addf %476, %478 : vector<2x32xf32>
      %480 = math.tanh %479 : vector<2x32xf32>
      %481 = arith.mulf %470, %480 : vector<2x32xf32>
      %482 = tpu.concatenate %481, %479 in 1 : vector<2x32xf32>, vector<2x32xf32> -> vector<2x64xf32>
      %c0_i32_229 = arith.constant 0 : i32
      %483 = arith.addi %c0_i32_229, %39 : i32
      %c2_i32_230 = arith.constant 2 : i32
      %484 = arith.subi %483, %c2_i32_230 : i32
      %485 = arith.extui %55 : i1 to i32
      %c0_i32_231 = arith.constant 0 : i32
      %486 = arith.cmpi ne, %485, %c0_i32_231 : i32
      scf.if %486 {
        %491 = vector.extract_strided_slice %482 {offsets = [0, 0], sizes = [1, 64], strides = [1, 1]} : vector<2x64xf32> to vector<1x64xf32>
        %492 = arith.index_cast %484 : i32 to index
        %c0_235 = arith.constant 0 : index
        %493 = vector.load %arg10[%492, %c0_235] : memref<20x64xf32, #tpu.memory_space<vmem>>, vector<1x64xf32>
        tpu.vector_store %arg10[%492, %c0_235], %491 {strides = array<i32>} : memref<20x64xf32, #tpu.memory_space<vmem>>, vector<1x64xf32>,
      } else {
      }
      %c10_i32_232 = arith.constant 10 : i32
      %487 = arith.addi %c10_i32_232, %48 : i32
      %c2_i32_233 = arith.constant 2 : i32
      %488 = arith.subi %487, %c2_i32_233 : i32
      %489 = arith.extui %56 : i1 to i32
      %c0_i32_234 = arith.constant 0 : i32
      %490 = arith.cmpi ne, %489, %c0_i32_234 : i32
      scf.if %490 {
        %491 = vector.extract_strided_slice %482 {offsets = [1, 0], sizes = [1, 64], strides = [1, 1]} : vector<2x64xf32> to vector<1x64xf32>
        %492 = arith.index_cast %488 : i32 to index
        %c0_235 = arith.constant 0 : index
        %493 = vector.load %arg10[%492, %c0_235] : memref<20x64xf32, #tpu.memory_space<vmem>>, vector<1x64xf32>
        tpu.vector_store %arg10[%492, %c0_235], %491 {strides = array<i32>} : memref<20x64xf32, #tpu.memory_space<vmem>>, vector<1x64xf32>,
      } else {
      }
    } else {
    }
    %c1_i32_43 = arith.constant 1 : i32
    %60 = arith.subi %41, %c1_i32_43 : i32
    %61 = arith.extui %53 : i1 to i32
    %c0_i32_44 = arith.constant 0 : i32
    %62 = arith.cmpi ne, %61, %c0_i32_44 : i32
    scf.if %62 {
      %c0_i32_215 = arith.constant 0 : i32
      %440 = arith.addi %c0_i32_215, %60 : i32
      %441 = arith.index_cast %440 : i32 to index
      %c0_216 = arith.constant 0 : index
      %442 = vector.load %arg9[%441, %c0_216] : memref<16x64xf32, #tpu.memory_space<vmem>>, vector<1x64xf32>
      %c0_i32_217 = arith.constant 0 : i32
      %443 = arith.addi %c0_i32_217, %39 : i32
      %444 = arith.index_cast %443 : i32 to index
      %c0_218 = arith.constant 0 : index
      %445 = vector.load %arg10[%444, %c0_218] : memref<20x64xf32, #tpu.memory_space<vmem>>, vector<1x64xf32>
      tpu.vector_store %arg10[%444, %c0_218], %442 {strides = array<i32>} : memref<20x64xf32, #tpu.memory_space<vmem>>, vector<1x64xf32>,
    } else {
    }
    %63 = arith.extui %53 : i1 to i32
    %64 = arith.addi %39, %63 : i32
    %65 = arith.extui %55 : i1 to i32
    %66 = arith.subi %64, %65 : i32
    %67 = arith.extui %53 : i1 to i32
    %68 = arith.subi %41, %67 : i32
    %c1_i32_45 = arith.constant 1 : i32
    %69 = arith.subi %50, %c1_i32_45 : i32
    %70 = arith.extui %54 : i1 to i32
    %c0_i32_46 = arith.constant 0 : i32
    %71 = arith.cmpi ne, %70, %c0_i32_46 : i32
    scf.if %71 {
      %c8_i32_215 = arith.constant 8 : i32
      %440 = arith.addi %c8_i32_215, %69 : i32
      %441 = arith.index_cast %440 : i32 to index
      %c0_216 = arith.constant 0 : index
      %442 = vector.load %arg9[%441, %c0_216] : memref<16x64xf32, #tpu.memory_space<vmem>>, vector<1x64xf32>
      %c10_i32_217 = arith.constant 10 : i32
      %443 = arith.addi %c10_i32_217, %48 : i32
      %444 = arith.index_cast %443 : i32 to index
      %c0_218 = arith.constant 0 : index
      %445 = vector.load %arg10[%444, %c0_218] : memref<20x64xf32, #tpu.memory_space<vmem>>, vector<1x64xf32>
      tpu.vector_store %arg10[%444, %c0_218], %442 {strides = array<i32>} : memref<20x64xf32, #tpu.memory_space<vmem>>, vector<1x64xf32>,
    } else {
    }
    %72 = arith.extui %54 : i1 to i32
    %73 = arith.addi %48, %72 : i32
    %74 = arith.extui %56 : i1 to i32
    %75 = arith.subi %73, %74 : i32
    %76 = arith.extui %54 : i1 to i32
    %77 = arith.subi %50, %76 : i32
    %c0_47 = arith.constant 0 : index
    %c2 = arith.constant 2 : index
    %78 = memref.load %arg1[%c0_47, %c2] : memref<2x15xi32, #tpu.memory_space<smem>>
    %c1_48 = arith.constant 1 : index
    %c2_49 = arith.constant 2 : index
    %79 = memref.load %arg1[%c1_48, %c2_49] : memref<2x15xi32, #tpu.memory_space<smem>>
    %c0_i32_50 = arith.constant 0 : i32
    %80 = arith.cmpi eq, %78, %c0_i32_50 : i32
    %c0_i32_51 = arith.constant 0 : i32
    %81 = arith.cmpi eq, %79, %c0_i32_51 : i32
    %c1_i32_52 = arith.constant 1 : i32
    %82 = arith.cmpi eq, %78, %c1_i32_52 : i32
    %c1_i32_53 = arith.constant 1 : i32
    %83 = arith.cmpi eq, %79, %c1_i32_53 : i32
    %84 = arith.ori %82, %83 : i1
    %85 = arith.extui %84 : i1 to i32
    %c0_i32_54 = arith.constant 0 : i32
    %86 = arith.cmpi ne, %85, %c0_i32_54 : i32
    scf.if %86 {
      %c0_i32_215 = arith.constant 0 : i32
      %440 = arith.addi %c0_i32_215, %66 : i32
      %c2_i32_216 = arith.constant 2 : i32
      %441 = arith.subi %440, %c2_i32_216 : i32
      %442 = arith.index_cast %441 : i32 to index
      %c0_217 = arith.constant 0 : index
      %443 = vector.load %arg10[%442, %c0_217] : memref<20x64xf32, #tpu.memory_space<vmem>>, vector<1x64xf32>
      %c0_i32_218 = arith.constant 0 : i32
      %444 = arith.addi %c0_i32_218, %66 : i32
      %c1_i32_219 = arith.constant 1 : i32
      %445 = arith.subi %444, %c1_i32_219 : i32
      %446 = arith.index_cast %445 : i32 to index
      %c0_220 = arith.constant 0 : index
      %447 = vector.load %arg10[%446, %c0_220] : memref<20x64xf32, #tpu.memory_space<vmem>>, vector<1x64xf32>
      %448 = tpu.concatenate %443, %447 in 1 : vector<1x64xf32>, vector<1x64xf32> -> vector<1x128xf32>
      %c10_i32_221 = arith.constant 10 : i32
      %449 = arith.addi %c10_i32_221, %75 : i32
      %c2_i32_222 = arith.constant 2 : i32
      %450 = arith.subi %449, %c2_i32_222 : i32
      %451 = arith.index_cast %450 : i32 to index
      %c0_223 = arith.constant 0 : index
      %452 = vector.load %arg10[%451, %c0_223] : memref<20x64xf32, #tpu.memory_space<vmem>>, vector<1x64xf32>
      %c10_i32_224 = arith.constant 10 : i32
      %453 = arith.addi %c10_i32_224, %75 : i32
      %c1_i32_225 = arith.constant 1 : i32
      %454 = arith.subi %453, %c1_i32_225 : i32
      %455 = arith.index_cast %454 : i32 to index
      %c0_226 = arith.constant 0 : index
      %456 = vector.load %arg10[%455, %c0_226] : memref<20x64xf32, #tpu.memory_space<vmem>>, vector<1x64xf32>
      %457 = tpu.concatenate %452, %456 in 1 : vector<1x64xf32>, vector<1x64xf32> -> vector<1x128xf32>
      %458 = tpu.concatenate %448, %457 in 0 : vector<1x128xf32>, vector<1x128xf32> -> vector<2x128xf32>
      %cst_227 = arith.constant dense<0.000000e+00> : vector<2x160xf32>
      %459 = tpu.matmul %458, %20, %cst_227 {dimension_numbers = #tpu.dot_dimension_numbers<[1], [0], [0], [1], [0, 0, 1, 1], [], []>} : vector<2x128xf32>, vector<128x160xf32>, vector<2x160xf32> -> vector<2x160xf32>
      %460 = arith.addf %459, %23 : vector<2x160xf32>
      %461 = vector.extract_strided_slice %460 {offsets = [0, 0], sizes = [2, 128], strides = [1, 1]} : vector<2x160xf32> to vector<2x128xf32>
      %462 = arith.negf %461 : vector<2x128xf32>
      %463 = math.exp %462 : vector<2x128xf32>
      %cst_228 = arith.constant 1.000000e+00 : f32
      %464 = vector.broadcast %cst_228 : f32 to vector<2x128xf32>
      %465 = arith.addf %464, %463 : vector<2x128xf32>
      %466 = arith.divf %464, %465 : vector<2x128xf32>
      %467 = vector.extract_strided_slice %466 {offsets = [0, 0], sizes = [2, 32], strides = [1, 1]} : vector<2x128xf32> to vector<2x32xf32>
      %468 = vector.extract_strided_slice %466 {offsets = [0, 32], sizes = [2, 32], strides = [1, 1]} : vector<2x128xf32> to vector<2x32xf32>
      %469 = vector.extract_strided_slice %466 {offsets = [0, 64], sizes = [2, 32], strides = [1, 1]} : vector<2x128xf32> to vector<2x32xf32>
      %470 = vector.extract_strided_slice %466 {offsets = [0, 96], sizes = [2, 32], strides = [1, 1]} : vector<2x128xf32> to vector<2x32xf32>
      %471 = vector.extract_strided_slice %460 {offsets = [0, 128], sizes = [2, 32], strides = [1, 1]} : vector<2x160xf32> to vector<2x32xf32>
      %472 = math.tanh %471 : vector<2x32xf32>
      %473 = arith.mulf %467, %472 : vector<2x32xf32>
      %474 = vector.extract_strided_slice %458 {offsets = [0, 32], sizes = [2, 32], strides = [1, 1]} : vector<2x128xf32> to vector<2x32xf32>
      %475 = arith.mulf %468, %474 : vector<2x32xf32>
      %476 = arith.addf %473, %475 : vector<2x32xf32>
      %477 = vector.extract_strided_slice %458 {offsets = [0, 96], sizes = [2, 32], strides = [1, 1]} : vector<2x128xf32> to vector<2x32xf32>
      %478 = arith.mulf %469, %477 : vector<2x32xf32>
      %479 = arith.addf %476, %478 : vector<2x32xf32>
      %480 = math.tanh %479 : vector<2x32xf32>
      %481 = arith.mulf %470, %480 : vector<2x32xf32>
      %482 = tpu.concatenate %481, %479 in 1 : vector<2x32xf32>, vector<2x32xf32> -> vector<2x64xf32>
      %c0_i32_229 = arith.constant 0 : i32
      %483 = arith.addi %c0_i32_229, %66 : i32
      %c2_i32_230 = arith.constant 2 : i32
      %484 = arith.subi %483, %c2_i32_230 : i32
      %485 = arith.extui %82 : i1 to i32
      %c0_i32_231 = arith.constant 0 : i32
      %486 = arith.cmpi ne, %485, %c0_i32_231 : i32
      scf.if %486 {
        %491 = vector.extract_strided_slice %482 {offsets = [0, 0], sizes = [1, 64], strides = [1, 1]} : vector<2x64xf32> to vector<1x64xf32>
        %492 = arith.index_cast %484 : i32 to index
        %c0_235 = arith.constant 0 : index
        %493 = vector.load %arg10[%492, %c0_235] : memref<20x64xf32, #tpu.memory_space<vmem>>, vector<1x64xf32>
        tpu.vector_store %arg10[%492, %c0_235], %491 {strides = array<i32>} : memref<20x64xf32, #tpu.memory_space<vmem>>, vector<1x64xf32>,
      } else {
      }
      %c10_i32_232 = arith.constant 10 : i32
      %487 = arith.addi %c10_i32_232, %75 : i32
      %c2_i32_233 = arith.constant 2 : i32
      %488 = arith.subi %487, %c2_i32_233 : i32
      %489 = arith.extui %83 : i1 to i32
      %c0_i32_234 = arith.constant 0 : i32
      %490 = arith.cmpi ne, %489, %c0_i32_234 : i32
      scf.if %490 {
        %491 = vector.extract_strided_slice %482 {offsets = [1, 0], sizes = [1, 64], strides = [1, 1]} : vector<2x64xf32> to vector<1x64xf32>
        %492 = arith.index_cast %488 : i32 to index
        %c0_235 = arith.constant 0 : index
        %493 = vector.load %arg10[%492, %c0_235] : memref<20x64xf32, #tpu.memory_space<vmem>>, vector<1x64xf32>
        tpu.vector_store %arg10[%492, %c0_235], %491 {strides = array<i32>} : memref<20x64xf32, #tpu.memory_space<vmem>>, vector<1x64xf32>,
      } else {
      }
    } else {
    }
    %c1_i32_55 = arith.constant 1 : i32
    %87 = arith.subi %68, %c1_i32_55 : i32
    %88 = arith.extui %80 : i1 to i32
    %c0_i32_56 = arith.constant 0 : i32
    %89 = arith.cmpi ne, %88, %c0_i32_56 : i32
    scf.if %89 {
      %c0_i32_215 = arith.constant 0 : i32
      %440 = arith.addi %c0_i32_215, %87 : i32
      %441 = arith.index_cast %440 : i32 to index
      %c0_216 = arith.constant 0 : index
      %442 = vector.load %arg9[%441, %c0_216] : memref<16x64xf32, #tpu.memory_space<vmem>>, vector<1x64xf32>
      %c0_i32_217 = arith.constant 0 : i32
      %443 = arith.addi %c0_i32_217, %66 : i32
      %444 = arith.index_cast %443 : i32 to index
      %c0_218 = arith.constant 0 : index
      %445 = vector.load %arg10[%444, %c0_218] : memref<20x64xf32, #tpu.memory_space<vmem>>, vector<1x64xf32>
      tpu.vector_store %arg10[%444, %c0_218], %442 {strides = array<i32>} : memref<20x64xf32, #tpu.memory_space<vmem>>, vector<1x64xf32>,
    } else {
    }
    %90 = arith.extui %80 : i1 to i32
    %91 = arith.addi %66, %90 : i32
    %92 = arith.extui %82 : i1 to i32
    %93 = arith.subi %91, %92 : i32
    %94 = arith.extui %80 : i1 to i32
    %95 = arith.subi %68, %94 : i32
    %c1_i32_57 = arith.constant 1 : i32
    %96 = arith.subi %77, %c1_i32_57 : i32
    %97 = arith.extui %81 : i1 to i32
    %c0_i32_58 = arith.constant 0 : i32
    %98 = arith.cmpi ne, %97, %c0_i32_58 : i32
    scf.if %98 {
      %c8_i32_215 = arith.constant 8 : i32
      %440 = arith.addi %c8_i32_215, %96 : i32
      %441 = arith.index_cast %440 : i32 to index
      %c0_216 = arith.constant 0 : index
      %442 = vector.load %arg9[%441, %c0_216] : memref<16x64xf32, #tpu.memory_space<vmem>>, vector<1x64xf32>
      %c10_i32_217 = arith.constant 10 : i32
      %443 = arith.addi %c10_i32_217, %75 : i32
      %444 = arith.index_cast %443 : i32 to index
      %c0_218 = arith.constant 0 : index
      %445 = vector.load %arg10[%444, %c0_218] : memref<20x64xf32, #tpu.memory_space<vmem>>, vector<1x64xf32>
      tpu.vector_store %arg10[%444, %c0_218], %442 {strides = array<i32>} : memref<20x64xf32, #tpu.memory_space<vmem>>, vector<1x64xf32>,
    } else {
    }
    %99 = arith.extui %81 : i1 to i32
    %100 = arith.addi %75, %99 : i32
    %101 = arith.extui %83 : i1 to i32
    %102 = arith.subi %100, %101 : i32
    %103 = arith.extui %81 : i1 to i32
    %104 = arith.subi %77, %103 : i32
    %c0_59 = arith.constant 0 : index
    %c3 = arith.constant 3 : index
    %105 = memref.load %arg1[%c0_59, %c3] : memref<2x15xi32, #tpu.memory_space<smem>>
    %c1_60 = arith.constant 1 : index
    %c3_61 = arith.constant 3 : index
    %106 = memref.load %arg1[%c1_60, %c3_61] : memref<2x15xi32, #tpu.memory_space<smem>>
    %c0_i32_62 = arith.constant 0 : i32
    %107 = arith.cmpi eq, %105, %c0_i32_62 : i32
    %c0_i32_63 = arith.constant 0 : i32
    %108 = arith.cmpi eq, %106, %c0_i32_63 : i32
    %c1_i32_64 = arith.constant 1 : i32
    %109 = arith.cmpi eq, %105, %c1_i32_64 : i32
    %c1_i32_65 = arith.constant 1 : i32
    %110 = arith.cmpi eq, %106, %c1_i32_65 : i32
    %111 = arith.ori %109, %110 : i1
    %112 = arith.extui %111 : i1 to i32
    %c0_i32_66 = arith.constant 0 : i32
    %113 = arith.cmpi ne, %112, %c0_i32_66 : i32
    scf.if %113 {
      %c0_i32_215 = arith.constant 0 : i32
      %440 = arith.addi %c0_i32_215, %93 : i32
      %c2_i32_216 = arith.constant 2 : i32
      %441 = arith.subi %440, %c2_i32_216 : i32
      %442 = arith.index_cast %441 : i32 to index
      %c0_217 = arith.constant 0 : index
      %443 = vector.load %arg10[%442, %c0_217] : memref<20x64xf32, #tpu.memory_space<vmem>>, vector<1x64xf32>
      %c0_i32_218 = arith.constant 0 : i32
      %444 = arith.addi %c0_i32_218, %93 : i32
      %c1_i32_219 = arith.constant 1 : i32
      %445 = arith.subi %444, %c1_i32_219 : i32
      %446 = arith.index_cast %445 : i32 to index
      %c0_220 = arith.constant 0 : index
      %447 = vector.load %arg10[%446, %c0_220] : memref<20x64xf32, #tpu.memory_space<vmem>>, vector<1x64xf32>
      %448 = tpu.concatenate %443, %447 in 1 : vector<1x64xf32>, vector<1x64xf32> -> vector<1x128xf32>
      %c10_i32_221 = arith.constant 10 : i32
      %449 = arith.addi %c10_i32_221, %102 : i32
      %c2_i32_222 = arith.constant 2 : i32
      %450 = arith.subi %449, %c2_i32_222 : i32
      %451 = arith.index_cast %450 : i32 to index
      %c0_223 = arith.constant 0 : index
      %452 = vector.load %arg10[%451, %c0_223] : memref<20x64xf32, #tpu.memory_space<vmem>>, vector<1x64xf32>
      %c10_i32_224 = arith.constant 10 : i32
      %453 = arith.addi %c10_i32_224, %102 : i32
      %c1_i32_225 = arith.constant 1 : i32
      %454 = arith.subi %453, %c1_i32_225 : i32
      %455 = arith.index_cast %454 : i32 to index
      %c0_226 = arith.constant 0 : index
      %456 = vector.load %arg10[%455, %c0_226] : memref<20x64xf32, #tpu.memory_space<vmem>>, vector<1x64xf32>
      %457 = tpu.concatenate %452, %456 in 1 : vector<1x64xf32>, vector<1x64xf32> -> vector<1x128xf32>
      %458 = tpu.concatenate %448, %457 in 0 : vector<1x128xf32>, vector<1x128xf32> -> vector<2x128xf32>
      %cst_227 = arith.constant dense<0.000000e+00> : vector<2x160xf32>
      %459 = tpu.matmul %458, %20, %cst_227 {dimension_numbers = #tpu.dot_dimension_numbers<[1], [0], [0], [1], [0, 0, 1, 1], [], []>} : vector<2x128xf32>, vector<128x160xf32>, vector<2x160xf32> -> vector<2x160xf32>
      %460 = arith.addf %459, %23 : vector<2x160xf32>
      %461 = vector.extract_strided_slice %460 {offsets = [0, 0], sizes = [2, 128], strides = [1, 1]} : vector<2x160xf32> to vector<2x128xf32>
      %462 = arith.negf %461 : vector<2x128xf32>
      %463 = math.exp %462 : vector<2x128xf32>
      %cst_228 = arith.constant 1.000000e+00 : f32
      %464 = vector.broadcast %cst_228 : f32 to vector<2x128xf32>
      %465 = arith.addf %464, %463 : vector<2x128xf32>
      %466 = arith.divf %464, %465 : vector<2x128xf32>
      %467 = vector.extract_strided_slice %466 {offsets = [0, 0], sizes = [2, 32], strides = [1, 1]} : vector<2x128xf32> to vector<2x32xf32>
      %468 = vector.extract_strided_slice %466 {offsets = [0, 32], sizes = [2, 32], strides = [1, 1]} : vector<2x128xf32> to vector<2x32xf32>
      %469 = vector.extract_strided_slice %466 {offsets = [0, 64], sizes = [2, 32], strides = [1, 1]} : vector<2x128xf32> to vector<2x32xf32>
      %470 = vector.extract_strided_slice %466 {offsets = [0, 96], sizes = [2, 32], strides = [1, 1]} : vector<2x128xf32> to vector<2x32xf32>
      %471 = vector.extract_strided_slice %460 {offsets = [0, 128], sizes = [2, 32], strides = [1, 1]} : vector<2x160xf32> to vector<2x32xf32>
      %472 = math.tanh %471 : vector<2x32xf32>
      %473 = arith.mulf %467, %472 : vector<2x32xf32>
      %474 = vector.extract_strided_slice %458 {offsets = [0, 32], sizes = [2, 32], strides = [1, 1]} : vector<2x128xf32> to vector<2x32xf32>
      %475 = arith.mulf %468, %474 : vector<2x32xf32>
      %476 = arith.addf %473, %475 : vector<2x32xf32>
      %477 = vector.extract_strided_slice %458 {offsets = [0, 96], sizes = [2, 32], strides = [1, 1]} : vector<2x128xf32> to vector<2x32xf32>
      %478 = arith.mulf %469, %477 : vector<2x32xf32>
      %479 = arith.addf %476, %478 : vector<2x32xf32>
      %480 = math.tanh %479 : vector<2x32xf32>
      %481 = arith.mulf %470, %480 : vector<2x32xf32>
      %482 = tpu.concatenate %481, %479 in 1 : vector<2x32xf32>, vector<2x32xf32> -> vector<2x64xf32>
      %c0_i32_229 = arith.constant 0 : i32
      %483 = arith.addi %c0_i32_229, %93 : i32
      %c2_i32_230 = arith.constant 2 : i32
      %484 = arith.subi %483, %c2_i32_230 : i32
      %485 = arith.extui %109 : i1 to i32
      %c0_i32_231 = arith.constant 0 : i32
      %486 = arith.cmpi ne, %485, %c0_i32_231 : i32
      scf.if %486 {
        %491 = vector.extract_strided_slice %482 {offsets = [0, 0], sizes = [1, 64], strides = [1, 1]} : vector<2x64xf32> to vector<1x64xf32>
        %492 = arith.index_cast %484 : i32 to index
        %c0_235 = arith.constant 0 : index
        %493 = vector.load %arg10[%492, %c0_235] : memref<20x64xf32, #tpu.memory_space<vmem>>, vector<1x64xf32>
        tpu.vector_store %arg10[%492, %c0_235], %491 {strides = array<i32>} : memref<20x64xf32, #tpu.memory_space<vmem>>, vector<1x64xf32>,
      } else {
      }
      %c10_i32_232 = arith.constant 10 : i32
      %487 = arith.addi %c10_i32_232, %102 : i32
      %c2_i32_233 = arith.constant 2 : i32
      %488 = arith.subi %487, %c2_i32_233 : i32
      %489 = arith.extui %110 : i1 to i32
      %c0_i32_234 = arith.constant 0 : i32
      %490 = arith.cmpi ne, %489, %c0_i32_234 : i32
      scf.if %490 {
        %491 = vector.extract_strided_slice %482 {offsets = [1, 0], sizes = [1, 64], strides = [1, 1]} : vector<2x64xf32> to vector<1x64xf32>
        %492 = arith.index_cast %488 : i32 to index
        %c0_235 = arith.constant 0 : index
        %493 = vector.load %arg10[%492, %c0_235] : memref<20x64xf32, #tpu.memory_space<vmem>>, vector<1x64xf32>
        tpu.vector_store %arg10[%492, %c0_235], %491 {strides = array<i32>} : memref<20x64xf32, #tpu.memory_space<vmem>>, vector<1x64xf32>,
      } else {
      }
    } else {
    }
    %c1_i32_67 = arith.constant 1 : i32
    %114 = arith.subi %95, %c1_i32_67 : i32
    %115 = arith.extui %107 : i1 to i32
    %c0_i32_68 = arith.constant 0 : i32
    %116 = arith.cmpi ne, %115, %c0_i32_68 : i32
    scf.if %116 {
      %c0_i32_215 = arith.constant 0 : i32
      %440 = arith.addi %c0_i32_215, %114 : i32
      %441 = arith.index_cast %440 : i32 to index
      %c0_216 = arith.constant 0 : index
      %442 = vector.load %arg9[%441, %c0_216] : memref<16x64xf32, #tpu.memory_space<vmem>>, vector<1x64xf32>
      %c0_i32_217 = arith.constant 0 : i32
      %443 = arith.addi %c0_i32_217, %93 : i32
      %444 = arith.index_cast %443 : i32 to index
      %c0_218 = arith.constant 0 : index
      %445 = vector.load %arg10[%444, %c0_218] : memref<20x64xf32, #tpu.memory_space<vmem>>, vector<1x64xf32>
      tpu.vector_store %arg10[%444, %c0_218], %442 {strides = array<i32>} : memref<20x64xf32, #tpu.memory_space<vmem>>, vector<1x64xf32>,
    } else {
    }
    %117 = arith.extui %107 : i1 to i32
    %118 = arith.addi %93, %117 : i32
    %119 = arith.extui %109 : i1 to i32
    %120 = arith.subi %118, %119 : i32
    %121 = arith.extui %107 : i1 to i32
    %122 = arith.subi %95, %121 : i32
    %c1_i32_69 = arith.constant 1 : i32
    %123 = arith.subi %104, %c1_i32_69 : i32
    %124 = arith.extui %108 : i1 to i32
    %c0_i32_70 = arith.constant 0 : i32
    %125 = arith.cmpi ne, %124, %c0_i32_70 : i32
    scf.if %125 {
      %c8_i32_215 = arith.constant 8 : i32
      %440 = arith.addi %c8_i32_215, %123 : i32
      %441 = arith.index_cast %440 : i32 to index
      %c0_216 = arith.constant 0 : index
      %442 = vector.load %arg9[%441, %c0_216] : memref<16x64xf32, #tpu.memory_space<vmem>>, vector<1x64xf32>
      %c10_i32_217 = arith.constant 10 : i32
      %443 = arith.addi %c10_i32_217, %102 : i32
      %444 = arith.index_cast %443 : i32 to index
      %c0_218 = arith.constant 0 : index
      %445 = vector.load %arg10[%444, %c0_218] : memref<20x64xf32, #tpu.memory_space<vmem>>, vector<1x64xf32>
      tpu.vector_store %arg10[%444, %c0_218], %442 {strides = array<i32>} : memref<20x64xf32, #tpu.memory_space<vmem>>, vector<1x64xf32>,
    } else {
    }
    %126 = arith.extui %108 : i1 to i32
    %127 = arith.addi %102, %126 : i32
    %128 = arith.extui %110 : i1 to i32
    %129 = arith.subi %127, %128 : i32
    %130 = arith.extui %108 : i1 to i32
    %131 = arith.subi %104, %130 : i32
    %c0_71 = arith.constant 0 : index
    %c4 = arith.constant 4 : index
    %132 = memref.load %arg1[%c0_71, %c4] : memref<2x15xi32, #tpu.memory_space<smem>>
    %c1_72 = arith.constant 1 : index
    %c4_73 = arith.constant 4 : index
    %133 = memref.load %arg1[%c1_72, %c4_73] : memref<2x15xi32, #tpu.memory_space<smem>>
    %c0_i32_74 = arith.constant 0 : i32
    %134 = arith.cmpi eq, %132, %c0_i32_74 : i32
    %c0_i32_75 = arith.constant 0 : i32
    %135 = arith.cmpi eq, %133, %c0_i32_75 : i32
    %c1_i32_76 = arith.constant 1 : i32
    %136 = arith.cmpi eq, %132, %c1_i32_76 : i32
    %c1_i32_77 = arith.constant 1 : i32
    %137 = arith.cmpi eq, %133, %c1_i32_77 : i32
    %138 = arith.ori %136, %137 : i1
    %139 = arith.extui %138 : i1 to i32
    %c0_i32_78 = arith.constant 0 : i32
    %140 = arith.cmpi ne, %139, %c0_i32_78 : i32
    scf.if %140 {
      %c0_i32_215 = arith.constant 0 : i32
      %440 = arith.addi %c0_i32_215, %120 : i32
      %c2_i32_216 = arith.constant 2 : i32
      %441 = arith.subi %440, %c2_i32_216 : i32
      %442 = arith.index_cast %441 : i32 to index
      %c0_217 = arith.constant 0 : index
      %443 = vector.load %arg10[%442, %c0_217] : memref<20x64xf32, #tpu.memory_space<vmem>>, vector<1x64xf32>
      %c0_i32_218 = arith.constant 0 : i32
      %444 = arith.addi %c0_i32_218, %120 : i32
      %c1_i32_219 = arith.constant 1 : i32
      %445 = arith.subi %444, %c1_i32_219 : i32
      %446 = arith.index_cast %445 : i32 to index
      %c0_220 = arith.constant 0 : index
      %447 = vector.load %arg10[%446, %c0_220] : memref<20x64xf32, #tpu.memory_space<vmem>>, vector<1x64xf32>
      %448 = tpu.concatenate %443, %447 in 1 : vector<1x64xf32>, vector<1x64xf32> -> vector<1x128xf32>
      %c10_i32_221 = arith.constant 10 : i32
      %449 = arith.addi %c10_i32_221, %129 : i32
      %c2_i32_222 = arith.constant 2 : i32
      %450 = arith.subi %449, %c2_i32_222 : i32
      %451 = arith.index_cast %450 : i32 to index
      %c0_223 = arith.constant 0 : index
      %452 = vector.load %arg10[%451, %c0_223] : memref<20x64xf32, #tpu.memory_space<vmem>>, vector<1x64xf32>
      %c10_i32_224 = arith.constant 10 : i32
      %453 = arith.addi %c10_i32_224, %129 : i32
      %c1_i32_225 = arith.constant 1 : i32
      %454 = arith.subi %453, %c1_i32_225 : i32
      %455 = arith.index_cast %454 : i32 to index
      %c0_226 = arith.constant 0 : index
      %456 = vector.load %arg10[%455, %c0_226] : memref<20x64xf32, #tpu.memory_space<vmem>>, vector<1x64xf32>
      %457 = tpu.concatenate %452, %456 in 1 : vector<1x64xf32>, vector<1x64xf32> -> vector<1x128xf32>
      %458 = tpu.concatenate %448, %457 in 0 : vector<1x128xf32>, vector<1x128xf32> -> vector<2x128xf32>
      %cst_227 = arith.constant dense<0.000000e+00> : vector<2x160xf32>
      %459 = tpu.matmul %458, %20, %cst_227 {dimension_numbers = #tpu.dot_dimension_numbers<[1], [0], [0], [1], [0, 0, 1, 1], [], []>} : vector<2x128xf32>, vector<128x160xf32>, vector<2x160xf32> -> vector<2x160xf32>
      %460 = arith.addf %459, %23 : vector<2x160xf32>
      %461 = vector.extract_strided_slice %460 {offsets = [0, 0], sizes = [2, 128], strides = [1, 1]} : vector<2x160xf32> to vector<2x128xf32>
      %462 = arith.negf %461 : vector<2x128xf32>
      %463 = math.exp %462 : vector<2x128xf32>
      %cst_228 = arith.constant 1.000000e+00 : f32
      %464 = vector.broadcast %cst_228 : f32 to vector<2x128xf32>
      %465 = arith.addf %464, %463 : vector<2x128xf32>
      %466 = arith.divf %464, %465 : vector<2x128xf32>
      %467 = vector.extract_strided_slice %466 {offsets = [0, 0], sizes = [2, 32], strides = [1, 1]} : vector<2x128xf32> to vector<2x32xf32>
      %468 = vector.extract_strided_slice %466 {offsets = [0, 32], sizes = [2, 32], strides = [1, 1]} : vector<2x128xf32> to vector<2x32xf32>
      %469 = vector.extract_strided_slice %466 {offsets = [0, 64], sizes = [2, 32], strides = [1, 1]} : vector<2x128xf32> to vector<2x32xf32>
      %470 = vector.extract_strided_slice %466 {offsets = [0, 96], sizes = [2, 32], strides = [1, 1]} : vector<2x128xf32> to vector<2x32xf32>
      %471 = vector.extract_strided_slice %460 {offsets = [0, 128], sizes = [2, 32], strides = [1, 1]} : vector<2x160xf32> to vector<2x32xf32>
      %472 = math.tanh %471 : vector<2x32xf32>
      %473 = arith.mulf %467, %472 : vector<2x32xf32>
      %474 = vector.extract_strided_slice %458 {offsets = [0, 32], sizes = [2, 32], strides = [1, 1]} : vector<2x128xf32> to vector<2x32xf32>
      %475 = arith.mulf %468, %474 : vector<2x32xf32>
      %476 = arith.addf %473, %475 : vector<2x32xf32>
      %477 = vector.extract_strided_slice %458 {offsets = [0, 96], sizes = [2, 32], strides = [1, 1]} : vector<2x128xf32> to vector<2x32xf32>
      %478 = arith.mulf %469, %477 : vector<2x32xf32>
      %479 = arith.addf %476, %478 : vector<2x32xf32>
      %480 = math.tanh %479 : vector<2x32xf32>
      %481 = arith.mulf %470, %480 : vector<2x32xf32>
      %482 = tpu.concatenate %481, %479 in 1 : vector<2x32xf32>, vector<2x32xf32> -> vector<2x64xf32>
      %c0_i32_229 = arith.constant 0 : i32
      %483 = arith.addi %c0_i32_229, %120 : i32
      %c2_i32_230 = arith.constant 2 : i32
      %484 = arith.subi %483, %c2_i32_230 : i32
      %485 = arith.extui %136 : i1 to i32
      %c0_i32_231 = arith.constant 0 : i32
      %486 = arith.cmpi ne, %485, %c0_i32_231 : i32
      scf.if %486 {
        %491 = vector.extract_strided_slice %482 {offsets = [0, 0], sizes = [1, 64], strides = [1, 1]} : vector<2x64xf32> to vector<1x64xf32>
        %492 = arith.index_cast %484 : i32 to index
        %c0_235 = arith.constant 0 : index
        %493 = vector.load %arg10[%492, %c0_235] : memref<20x64xf32, #tpu.memory_space<vmem>>, vector<1x64xf32>
        tpu.vector_store %arg10[%492, %c0_235], %491 {strides = array<i32>} : memref<20x64xf32, #tpu.memory_space<vmem>>, vector<1x64xf32>,
      } else {
      }
      %c10_i32_232 = arith.constant 10 : i32
      %487 = arith.addi %c10_i32_232, %129 : i32
      %c2_i32_233 = arith.constant 2 : i32
      %488 = arith.subi %487, %c2_i32_233 : i32
      %489 = arith.extui %137 : i1 to i32
      %c0_i32_234 = arith.constant 0 : i32
      %490 = arith.cmpi ne, %489, %c0_i32_234 : i32
      scf.if %490 {
        %491 = vector.extract_strided_slice %482 {offsets = [1, 0], sizes = [1, 64], strides = [1, 1]} : vector<2x64xf32> to vector<1x64xf32>
        %492 = arith.index_cast %488 : i32 to index
        %c0_235 = arith.constant 0 : index
        %493 = vector.load %arg10[%492, %c0_235] : memref<20x64xf32, #tpu.memory_space<vmem>>, vector<1x64xf32>
        tpu.vector_store %arg10[%492, %c0_235], %491 {strides = array<i32>} : memref<20x64xf32, #tpu.memory_space<vmem>>, vector<1x64xf32>,
      } else {
      }
    } else {
    }
    %c1_i32_79 = arith.constant 1 : i32
    %141 = arith.subi %122, %c1_i32_79 : i32
    %142 = arith.extui %134 : i1 to i32
    %c0_i32_80 = arith.constant 0 : i32
    %143 = arith.cmpi ne, %142, %c0_i32_80 : i32
    scf.if %143 {
      %c0_i32_215 = arith.constant 0 : i32
      %440 = arith.addi %c0_i32_215, %141 : i32
      %441 = arith.index_cast %440 : i32 to index
      %c0_216 = arith.constant 0 : index
      %442 = vector.load %arg9[%441, %c0_216] : memref<16x64xf32, #tpu.memory_space<vmem>>, vector<1x64xf32>
      %c0_i32_217 = arith.constant 0 : i32
      %443 = arith.addi %c0_i32_217, %120 : i32
      %444 = arith.index_cast %443 : i32 to index
      %c0_218 = arith.constant 0 : index
      %445 = vector.load %arg10[%444, %c0_218] : memref<20x64xf32, #tpu.memory_space<vmem>>, vector<1x64xf32>
      tpu.vector_store %arg10[%444, %c0_218], %442 {strides = array<i32>} : memref<20x64xf32, #tpu.memory_space<vmem>>, vector<1x64xf32>,
    } else {
    }
    %144 = arith.extui %134 : i1 to i32
    %145 = arith.addi %120, %144 : i32
    %146 = arith.extui %136 : i1 to i32
    %147 = arith.subi %145, %146 : i32
    %148 = arith.extui %134 : i1 to i32
    %149 = arith.subi %122, %148 : i32
    %c1_i32_81 = arith.constant 1 : i32
    %150 = arith.subi %131, %c1_i32_81 : i32
    %151 = arith.extui %135 : i1 to i32
    %c0_i32_82 = arith.constant 0 : i32
    %152 = arith.cmpi ne, %151, %c0_i32_82 : i32
    scf.if %152 {
      %c8_i32_215 = arith.constant 8 : i32
      %440 = arith.addi %c8_i32_215, %150 : i32
      %441 = arith.index_cast %440 : i32 to index
      %c0_216 = arith.constant 0 : index
      %442 = vector.load %arg9[%441, %c0_216] : memref<16x64xf32, #tpu.memory_space<vmem>>, vector<1x64xf32>
      %c10_i32_217 = arith.constant 10 : i32
      %443 = arith.addi %c10_i32_217, %129 : i32
      %444 = arith.index_cast %443 : i32 to index
      %c0_218 = arith.constant 0 : index
      %445 = vector.load %arg10[%444, %c0_218] : memref<20x64xf32, #tpu.memory_space<vmem>>, vector<1x64xf32>
      tpu.vector_store %arg10[%444, %c0_218], %442 {strides = array<i32>} : memref<20x64xf32, #tpu.memory_space<vmem>>, vector<1x64xf32>,
    } else {
    }
    %153 = arith.extui %135 : i1 to i32
    %154 = arith.addi %129, %153 : i32
    %155 = arith.extui %137 : i1 to i32
    %156 = arith.subi %154, %155 : i32
    %157 = arith.extui %135 : i1 to i32
    %158 = arith.subi %131, %157 : i32
    %c0_83 = arith.constant 0 : index
    %c5 = arith.constant 5 : index
    %159 = memref.load %arg1[%c0_83, %c5] : memref<2x15xi32, #tpu.memory_space<smem>>
    %c1_84 = arith.constant 1 : index
    %c5_85 = arith.constant 5 : index
    %160 = memref.load %arg1[%c1_84, %c5_85] : memref<2x15xi32, #tpu.memory_space<smem>>
    %c0_i32_86 = arith.constant 0 : i32
    %161 = arith.cmpi eq, %159, %c0_i32_86 : i32
    %c0_i32_87 = arith.constant 0 : i32
    %162 = arith.cmpi eq, %160, %c0_i32_87 : i32
    %c1_i32_88 = arith.constant 1 : i32
    %163 = arith.cmpi eq, %159, %c1_i32_88 : i32
    %c1_i32_89 = arith.constant 1 : i32
    %164 = arith.cmpi eq, %160, %c1_i32_89 : i32
    %165 = arith.ori %163, %164 : i1
    %166 = arith.extui %165 : i1 to i32
    %c0_i32_90 = arith.constant 0 : i32
    %167 = arith.cmpi ne, %166, %c0_i32_90 : i32
    scf.if %167 {
      %c0_i32_215 = arith.constant 0 : i32
      %440 = arith.addi %c0_i32_215, %147 : i32
      %c2_i32_216 = arith.constant 2 : i32
      %441 = arith.subi %440, %c2_i32_216 : i32
      %442 = arith.index_cast %441 : i32 to index
      %c0_217 = arith.constant 0 : index
      %443 = vector.load %arg10[%442, %c0_217] : memref<20x64xf32, #tpu.memory_space<vmem>>, vector<1x64xf32>
      %c0_i32_218 = arith.constant 0 : i32
      %444 = arith.addi %c0_i32_218, %147 : i32
      %c1_i32_219 = arith.constant 1 : i32
      %445 = arith.subi %444, %c1_i32_219 : i32
      %446 = arith.index_cast %445 : i32 to index
      %c0_220 = arith.constant 0 : index
      %447 = vector.load %arg10[%446, %c0_220] : memref<20x64xf32, #tpu.memory_space<vmem>>, vector<1x64xf32>
      %448 = tpu.concatenate %443, %447 in 1 : vector<1x64xf32>, vector<1x64xf32> -> vector<1x128xf32>
      %c10_i32_221 = arith.constant 10 : i32
      %449 = arith.addi %c10_i32_221, %156 : i32
      %c2_i32_222 = arith.constant 2 : i32
      %450 = arith.subi %449, %c2_i32_222 : i32
      %451 = arith.index_cast %450 : i32 to index
      %c0_223 = arith.constant 0 : index
      %452 = vector.load %arg10[%451, %c0_223] : memref<20x64xf32, #tpu.memory_space<vmem>>, vector<1x64xf32>
      %c10_i32_224 = arith.constant 10 : i32
      %453 = arith.addi %c10_i32_224, %156 : i32
      %c1_i32_225 = arith.constant 1 : i32
      %454 = arith.subi %453, %c1_i32_225 : i32
      %455 = arith.index_cast %454 : i32 to index
      %c0_226 = arith.constant 0 : index
      %456 = vector.load %arg10[%455, %c0_226] : memref<20x64xf32, #tpu.memory_space<vmem>>, vector<1x64xf32>
      %457 = tpu.concatenate %452, %456 in 1 : vector<1x64xf32>, vector<1x64xf32> -> vector<1x128xf32>
      %458 = tpu.concatenate %448, %457 in 0 : vector<1x128xf32>, vector<1x128xf32> -> vector<2x128xf32>
      %cst_227 = arith.constant dense<0.000000e+00> : vector<2x160xf32>
      %459 = tpu.matmul %458, %20, %cst_227 {dimension_numbers = #tpu.dot_dimension_numbers<[1], [0], [0], [1], [0, 0, 1, 1], [], []>} : vector<2x128xf32>, vector<128x160xf32>, vector<2x160xf32> -> vector<2x160xf32>
      %460 = arith.addf %459, %23 : vector<2x160xf32>
      %461 = vector.extract_strided_slice %460 {offsets = [0, 0], sizes = [2, 128], strides = [1, 1]} : vector<2x160xf32> to vector<2x128xf32>
      %462 = arith.negf %461 : vector<2x128xf32>
      %463 = math.exp %462 : vector<2x128xf32>
      %cst_228 = arith.constant 1.000000e+00 : f32
      %464 = vector.broadcast %cst_228 : f32 to vector<2x128xf32>
      %465 = arith.addf %464, %463 : vector<2x128xf32>
      %466 = arith.divf %464, %465 : vector<2x128xf32>
      %467 = vector.extract_strided_slice %466 {offsets = [0, 0], sizes = [2, 32], strides = [1, 1]} : vector<2x128xf32> to vector<2x32xf32>
      %468 = vector.extract_strided_slice %466 {offsets = [0, 32], sizes = [2, 32], strides = [1, 1]} : vector<2x128xf32> to vector<2x32xf32>
      %469 = vector.extract_strided_slice %466 {offsets = [0, 64], sizes = [2, 32], strides = [1, 1]} : vector<2x128xf32> to vector<2x32xf32>
      %470 = vector.extract_strided_slice %466 {offsets = [0, 96], sizes = [2, 32], strides = [1, 1]} : vector<2x128xf32> to vector<2x32xf32>
      %471 = vector.extract_strided_slice %460 {offsets = [0, 128], sizes = [2, 32], strides = [1, 1]} : vector<2x160xf32> to vector<2x32xf32>
      %472 = math.tanh %471 : vector<2x32xf32>
      %473 = arith.mulf %467, %472 : vector<2x32xf32>
      %474 = vector.extract_strided_slice %458 {offsets = [0, 32], sizes = [2, 32], strides = [1, 1]} : vector<2x128xf32> to vector<2x32xf32>
      %475 = arith.mulf %468, %474 : vector<2x32xf32>
      %476 = arith.addf %473, %475 : vector<2x32xf32>
      %477 = vector.extract_strided_slice %458 {offsets = [0, 96], sizes = [2, 32], strides = [1, 1]} : vector<2x128xf32> to vector<2x32xf32>
      %478 = arith.mulf %469, %477 : vector<2x32xf32>
      %479 = arith.addf %476, %478 : vector<2x32xf32>
      %480 = math.tanh %479 : vector<2x32xf32>
      %481 = arith.mulf %470, %480 : vector<2x32xf32>
      %482 = tpu.concatenate %481, %479 in 1 : vector<2x32xf32>, vector<2x32xf32> -> vector<2x64xf32>
      %c0_i32_229 = arith.constant 0 : i32
      %483 = arith.addi %c0_i32_229, %147 : i32
      %c2_i32_230 = arith.constant 2 : i32
      %484 = arith.subi %483, %c2_i32_230 : i32
      %485 = arith.extui %163 : i1 to i32
      %c0_i32_231 = arith.constant 0 : i32
      %486 = arith.cmpi ne, %485, %c0_i32_231 : i32
      scf.if %486 {
        %491 = vector.extract_strided_slice %482 {offsets = [0, 0], sizes = [1, 64], strides = [1, 1]} : vector<2x64xf32> to vector<1x64xf32>
        %492 = arith.index_cast %484 : i32 to index
        %c0_235 = arith.constant 0 : index
        %493 = vector.load %arg10[%492, %c0_235] : memref<20x64xf32, #tpu.memory_space<vmem>>, vector<1x64xf32>
        tpu.vector_store %arg10[%492, %c0_235], %491 {strides = array<i32>} : memref<20x64xf32, #tpu.memory_space<vmem>>, vector<1x64xf32>,
      } else {
      }
      %c10_i32_232 = arith.constant 10 : i32
      %487 = arith.addi %c10_i32_232, %156 : i32
      %c2_i32_233 = arith.constant 2 : i32
      %488 = arith.subi %487, %c2_i32_233 : i32
      %489 = arith.extui %164 : i1 to i32
      %c0_i32_234 = arith.constant 0 : i32
      %490 = arith.cmpi ne, %489, %c0_i32_234 : i32
      scf.if %490 {
        %491 = vector.extract_strided_slice %482 {offsets = [1, 0], sizes = [1, 64], strides = [1, 1]} : vector<2x64xf32> to vector<1x64xf32>
        %492 = arith.index_cast %488 : i32 to index
        %c0_235 = arith.constant 0 : index
        %493 = vector.load %arg10[%492, %c0_235] : memref<20x64xf32, #tpu.memory_space<vmem>>, vector<1x64xf32>
        tpu.vector_store %arg10[%492, %c0_235], %491 {strides = array<i32>} : memref<20x64xf32, #tpu.memory_space<vmem>>, vector<1x64xf32>,
      } else {
      }
    } else {
    }
    %c1_i32_91 = arith.constant 1 : i32
    %168 = arith.subi %149, %c1_i32_91 : i32
    %169 = arith.extui %161 : i1 to i32
    %c0_i32_92 = arith.constant 0 : i32
    %170 = arith.cmpi ne, %169, %c0_i32_92 : i32
    scf.if %170 {
      %c0_i32_215 = arith.constant 0 : i32
      %440 = arith.addi %c0_i32_215, %168 : i32
      %441 = arith.index_cast %440 : i32 to index
      %c0_216 = arith.constant 0 : index
      %442 = vector.load %arg9[%441, %c0_216] : memref<16x64xf32, #tpu.memory_space<vmem>>, vector<1x64xf32>
      %c0_i32_217 = arith.constant 0 : i32
      %443 = arith.addi %c0_i32_217, %147 : i32
      %444 = arith.index_cast %443 : i32 to index
      %c0_218 = arith.constant 0 : index
      %445 = vector.load %arg10[%444, %c0_218] : memref<20x64xf32, #tpu.memory_space<vmem>>, vector<1x64xf32>
      tpu.vector_store %arg10[%444, %c0_218], %442 {strides = array<i32>} : memref<20x64xf32, #tpu.memory_space<vmem>>, vector<1x64xf32>,
    } else {
    }
    %171 = arith.extui %161 : i1 to i32
    %172 = arith.addi %147, %171 : i32
    %173 = arith.extui %163 : i1 to i32
    %174 = arith.subi %172, %173 : i32
    %175 = arith.extui %161 : i1 to i32
    %176 = arith.subi %149, %175 : i32
    %c1_i32_93 = arith.constant 1 : i32
    %177 = arith.subi %158, %c1_i32_93 : i32
    %178 = arith.extui %162 : i1 to i32
    %c0_i32_94 = arith.constant 0 : i32
    %179 = arith.cmpi ne, %178, %c0_i32_94 : i32
    scf.if %179 {
      %c8_i32_215 = arith.constant 8 : i32
      %440 = arith.addi %c8_i32_215, %177 : i32
      %441 = arith.index_cast %440 : i32 to index
      %c0_216 = arith.constant 0 : index
      %442 = vector.load %arg9[%441, %c0_216] : memref<16x64xf32, #tpu.memory_space<vmem>>, vector<1x64xf32>
      %c10_i32_217 = arith.constant 10 : i32
      %443 = arith.addi %c10_i32_217, %156 : i32
      %444 = arith.index_cast %443 : i32 to index
      %c0_218 = arith.constant 0 : index
      %445 = vector.load %arg10[%444, %c0_218] : memref<20x64xf32, #tpu.memory_space<vmem>>, vector<1x64xf32>
      tpu.vector_store %arg10[%444, %c0_218], %442 {strides = array<i32>} : memref<20x64xf32, #tpu.memory_space<vmem>>, vector<1x64xf32>,
    } else {
    }
    %180 = arith.extui %162 : i1 to i32
    %181 = arith.addi %156, %180 : i32
    %182 = arith.extui %164 : i1 to i32
    %183 = arith.subi %181, %182 : i32
    %184 = arith.extui %162 : i1 to i32
    %185 = arith.subi %158, %184 : i32
    %c0_95 = arith.constant 0 : index
    %c6 = arith.constant 6 : index
    %186 = memref.load %arg1[%c0_95, %c6] : memref<2x15xi32, #tpu.memory_space<smem>>
    %c1_96 = arith.constant 1 : index
    %c6_97 = arith.constant 6 : index
    %187 = memref.load %arg1[%c1_96, %c6_97] : memref<2x15xi32, #tpu.memory_space<smem>>
    %c0_i32_98 = arith.constant 0 : i32
    %188 = arith.cmpi eq, %186, %c0_i32_98 : i32
    %c0_i32_99 = arith.constant 0 : i32
    %189 = arith.cmpi eq, %187, %c0_i32_99 : i32
    %c1_i32_100 = arith.constant 1 : i32
    %190 = arith.cmpi eq, %186, %c1_i32_100 : i32
    %c1_i32_101 = arith.constant 1 : i32
    %191 = arith.cmpi eq, %187, %c1_i32_101 : i32
    %192 = arith.ori %190, %191 : i1
    %193 = arith.extui %192 : i1 to i32
    %c0_i32_102 = arith.constant 0 : i32
    %194 = arith.cmpi ne, %193, %c0_i32_102 : i32
    scf.if %194 {
      %c0_i32_215 = arith.constant 0 : i32
      %440 = arith.addi %c0_i32_215, %174 : i32
      %c2_i32_216 = arith.constant 2 : i32
      %441 = arith.subi %440, %c2_i32_216 : i32
      %442 = arith.index_cast %441 : i32 to index
      %c0_217 = arith.constant 0 : index
      %443 = vector.load %arg10[%442, %c0_217] : memref<20x64xf32, #tpu.memory_space<vmem>>, vector<1x64xf32>
      %c0_i32_218 = arith.constant 0 : i32
      %444 = arith.addi %c0_i32_218, %174 : i32
      %c1_i32_219 = arith.constant 1 : i32
      %445 = arith.subi %444, %c1_i32_219 : i32
      %446 = arith.index_cast %445 : i32 to index
      %c0_220 = arith.constant 0 : index
      %447 = vector.load %arg10[%446, %c0_220] : memref<20x64xf32, #tpu.memory_space<vmem>>, vector<1x64xf32>
      %448 = tpu.concatenate %443, %447 in 1 : vector<1x64xf32>, vector<1x64xf32> -> vector<1x128xf32>
      %c10_i32_221 = arith.constant 10 : i32
      %449 = arith.addi %c10_i32_221, %183 : i32
      %c2_i32_222 = arith.constant 2 : i32
      %450 = arith.subi %449, %c2_i32_222 : i32
      %451 = arith.index_cast %450 : i32 to index
      %c0_223 = arith.constant 0 : index
      %452 = vector.load %arg10[%451, %c0_223] : memref<20x64xf32, #tpu.memory_space<vmem>>, vector<1x64xf32>
      %c10_i32_224 = arith.constant 10 : i32
      %453 = arith.addi %c10_i32_224, %183 : i32
      %c1_i32_225 = arith.constant 1 : i32
      %454 = arith.subi %453, %c1_i32_225 : i32
      %455 = arith.index_cast %454 : i32 to index
      %c0_226 = arith.constant 0 : index
      %456 = vector.load %arg10[%455, %c0_226] : memref<20x64xf32, #tpu.memory_space<vmem>>, vector<1x64xf32>
      %457 = tpu.concatenate %452, %456 in 1 : vector<1x64xf32>, vector<1x64xf32> -> vector<1x128xf32>
      %458 = tpu.concatenate %448, %457 in 0 : vector<1x128xf32>, vector<1x128xf32> -> vector<2x128xf32>
      %cst_227 = arith.constant dense<0.000000e+00> : vector<2x160xf32>
      %459 = tpu.matmul %458, %20, %cst_227 {dimension_numbers = #tpu.dot_dimension_numbers<[1], [0], [0], [1], [0, 0, 1, 1], [], []>} : vector<2x128xf32>, vector<128x160xf32>, vector<2x160xf32> -> vector<2x160xf32>
      %460 = arith.addf %459, %23 : vector<2x160xf32>
      %461 = vector.extract_strided_slice %460 {offsets = [0, 0], sizes = [2, 128], strides = [1, 1]} : vector<2x160xf32> to vector<2x128xf32>
      %462 = arith.negf %461 : vector<2x128xf32>
      %463 = math.exp %462 : vector<2x128xf32>
      %cst_228 = arith.constant 1.000000e+00 : f32
      %464 = vector.broadcast %cst_228 : f32 to vector<2x128xf32>
      %465 = arith.addf %464, %463 : vector<2x128xf32>
      %466 = arith.divf %464, %465 : vector<2x128xf32>
      %467 = vector.extract_strided_slice %466 {offsets = [0, 0], sizes = [2, 32], strides = [1, 1]} : vector<2x128xf32> to vector<2x32xf32>
      %468 = vector.extract_strided_slice %466 {offsets = [0, 32], sizes = [2, 32], strides = [1, 1]} : vector<2x128xf32> to vector<2x32xf32>
      %469 = vector.extract_strided_slice %466 {offsets = [0, 64], sizes = [2, 32], strides = [1, 1]} : vector<2x128xf32> to vector<2x32xf32>
      %470 = vector.extract_strided_slice %466 {offsets = [0, 96], sizes = [2, 32], strides = [1, 1]} : vector<2x128xf32> to vector<2x32xf32>
      %471 = vector.extract_strided_slice %460 {offsets = [0, 128], sizes = [2, 32], strides = [1, 1]} : vector<2x160xf32> to vector<2x32xf32>
      %472 = math.tanh %471 : vector<2x32xf32>
      %473 = arith.mulf %467, %472 : vector<2x32xf32>
      %474 = vector.extract_strided_slice %458 {offsets = [0, 32], sizes = [2, 32], strides = [1, 1]} : vector<2x128xf32> to vector<2x32xf32>
      %475 = arith.mulf %468, %474 : vector<2x32xf32>
      %476 = arith.addf %473, %475 : vector<2x32xf32>
      %477 = vector.extract_strided_slice %458 {offsets = [0, 96], sizes = [2, 32], strides = [1, 1]} : vector<2x128xf32> to vector<2x32xf32>
      %478 = arith.mulf %469, %477 : vector<2x32xf32>
      %479 = arith.addf %476, %478 : vector<2x32xf32>
      %480 = math.tanh %479 : vector<2x32xf32>
      %481 = arith.mulf %470, %480 : vector<2x32xf32>
      %482 = tpu.concatenate %481, %479 in 1 : vector<2x32xf32>, vector<2x32xf32> -> vector<2x64xf32>
      %c0_i32_229 = arith.constant 0 : i32
      %483 = arith.addi %c0_i32_229, %174 : i32
      %c2_i32_230 = arith.constant 2 : i32
      %484 = arith.subi %483, %c2_i32_230 : i32
      %485 = arith.extui %190 : i1 to i32
      %c0_i32_231 = arith.constant 0 : i32
      %486 = arith.cmpi ne, %485, %c0_i32_231 : i32
      scf.if %486 {
        %491 = vector.extract_strided_slice %482 {offsets = [0, 0], sizes = [1, 64], strides = [1, 1]} : vector<2x64xf32> to vector<1x64xf32>
        %492 = arith.index_cast %484 : i32 to index
        %c0_235 = arith.constant 0 : index
        %493 = vector.load %arg10[%492, %c0_235] : memref<20x64xf32, #tpu.memory_space<vmem>>, vector<1x64xf32>
        tpu.vector_store %arg10[%492, %c0_235], %491 {strides = array<i32>} : memref<20x64xf32, #tpu.memory_space<vmem>>, vector<1x64xf32>,
      } else {
      }
      %c10_i32_232 = arith.constant 10 : i32
      %487 = arith.addi %c10_i32_232, %183 : i32
      %c2_i32_233 = arith.constant 2 : i32
      %488 = arith.subi %487, %c2_i32_233 : i32
      %489 = arith.extui %191 : i1 to i32
      %c0_i32_234 = arith.constant 0 : i32
      %490 = arith.cmpi ne, %489, %c0_i32_234 : i32
      scf.if %490 {
        %491 = vector.extract_strided_slice %482 {offsets = [1, 0], sizes = [1, 64], strides = [1, 1]} : vector<2x64xf32> to vector<1x64xf32>
        %492 = arith.index_cast %488 : i32 to index
        %c0_235 = arith.constant 0 : index
        %493 = vector.load %arg10[%492, %c0_235] : memref<20x64xf32, #tpu.memory_space<vmem>>, vector<1x64xf32>
        tpu.vector_store %arg10[%492, %c0_235], %491 {strides = array<i32>} : memref<20x64xf32, #tpu.memory_space<vmem>>, vector<1x64xf32>,
      } else {
      }
    } else {
    }
    %c1_i32_103 = arith.constant 1 : i32
    %195 = arith.subi %176, %c1_i32_103 : i32
    %196 = arith.extui %188 : i1 to i32
    %c0_i32_104 = arith.constant 0 : i32
    %197 = arith.cmpi ne, %196, %c0_i32_104 : i32
    scf.if %197 {
      %c0_i32_215 = arith.constant 0 : i32
      %440 = arith.addi %c0_i32_215, %195 : i32
      %441 = arith.index_cast %440 : i32 to index
      %c0_216 = arith.constant 0 : index
      %442 = vector.load %arg9[%441, %c0_216] : memref<16x64xf32, #tpu.memory_space<vmem>>, vector<1x64xf32>
      %c0_i32_217 = arith.constant 0 : i32
      %443 = arith.addi %c0_i32_217, %174 : i32
      %444 = arith.index_cast %443 : i32 to index
      %c0_218 = arith.constant 0 : index
      %445 = vector.load %arg10[%444, %c0_218] : memref<20x64xf32, #tpu.memory_space<vmem>>, vector<1x64xf32>
      tpu.vector_store %arg10[%444, %c0_218], %442 {strides = array<i32>} : memref<20x64xf32, #tpu.memory_space<vmem>>, vector<1x64xf32>,
    } else {
    }
    %198 = arith.extui %188 : i1 to i32
    %199 = arith.addi %174, %198 : i32
    %200 = arith.extui %190 : i1 to i32
    %201 = arith.subi %199, %200 : i32
    %202 = arith.extui %188 : i1 to i32
    %203 = arith.subi %176, %202 : i32
    %c1_i32_105 = arith.constant 1 : i32
    %204 = arith.subi %185, %c1_i32_105 : i32
    %205 = arith.extui %189 : i1 to i32
    %c0_i32_106 = arith.constant 0 : i32
    %206 = arith.cmpi ne, %205, %c0_i32_106 : i32
    scf.if %206 {
      %c8_i32_215 = arith.constant 8 : i32
      %440 = arith.addi %c8_i32_215, %204 : i32
      %441 = arith.index_cast %440 : i32 to index
      %c0_216 = arith.constant 0 : index
      %442 = vector.load %arg9[%441, %c0_216] : memref<16x64xf32, #tpu.memory_space<vmem>>, vector<1x64xf32>
      %c10_i32_217 = arith.constant 10 : i32
      %443 = arith.addi %c10_i32_217, %183 : i32
      %444 = arith.index_cast %443 : i32 to index
      %c0_218 = arith.constant 0 : index
      %445 = vector.load %arg10[%444, %c0_218] : memref<20x64xf32, #tpu.memory_space<vmem>>, vector<1x64xf32>
      tpu.vector_store %arg10[%444, %c0_218], %442 {strides = array<i32>} : memref<20x64xf32, #tpu.memory_space<vmem>>, vector<1x64xf32>,
    } else {
    }
    %207 = arith.extui %189 : i1 to i32
    %208 = arith.addi %183, %207 : i32
    %209 = arith.extui %191 : i1 to i32
    %210 = arith.subi %208, %209 : i32
    %211 = arith.extui %189 : i1 to i32
    %212 = arith.subi %185, %211 : i32
    %c0_107 = arith.constant 0 : index
    %c7 = arith.constant 7 : index
    %213 = memref.load %arg1[%c0_107, %c7] : memref<2x15xi32, #tpu.memory_space<smem>>
    %c1_108 = arith.constant 1 : index
    %c7_109 = arith.constant 7 : index
    %214 = memref.load %arg1[%c1_108, %c7_109] : memref<2x15xi32, #tpu.memory_space<smem>>
    %c0_i32_110 = arith.constant 0 : i32
    %215 = arith.cmpi eq, %213, %c0_i32_110 : i32
    %c0_i32_111 = arith.constant 0 : i32
    %216 = arith.cmpi eq, %214, %c0_i32_111 : i32
    %c1_i32_112 = arith.constant 1 : i32
    %217 = arith.cmpi eq, %213, %c1_i32_112 : i32
    %c1_i32_113 = arith.constant 1 : i32
    %218 = arith.cmpi eq, %214, %c1_i32_113 : i32
    %219 = arith.ori %217, %218 : i1
    %220 = arith.extui %219 : i1 to i32
    %c0_i32_114 = arith.constant 0 : i32
    %221 = arith.cmpi ne, %220, %c0_i32_114 : i32
    scf.if %221 {
      %c0_i32_215 = arith.constant 0 : i32
      %440 = arith.addi %c0_i32_215, %201 : i32
      %c2_i32_216 = arith.constant 2 : i32
      %441 = arith.subi %440, %c2_i32_216 : i32
      %442 = arith.index_cast %441 : i32 to index
      %c0_217 = arith.constant 0 : index
      %443 = vector.load %arg10[%442, %c0_217] : memref<20x64xf32, #tpu.memory_space<vmem>>, vector<1x64xf32>
      %c0_i32_218 = arith.constant 0 : i32
      %444 = arith.addi %c0_i32_218, %201 : i32
      %c1_i32_219 = arith.constant 1 : i32
      %445 = arith.subi %444, %c1_i32_219 : i32
      %446 = arith.index_cast %445 : i32 to index
      %c0_220 = arith.constant 0 : index
      %447 = vector.load %arg10[%446, %c0_220] : memref<20x64xf32, #tpu.memory_space<vmem>>, vector<1x64xf32>
      %448 = tpu.concatenate %443, %447 in 1 : vector<1x64xf32>, vector<1x64xf32> -> vector<1x128xf32>
      %c10_i32_221 = arith.constant 10 : i32
      %449 = arith.addi %c10_i32_221, %210 : i32
      %c2_i32_222 = arith.constant 2 : i32
      %450 = arith.subi %449, %c2_i32_222 : i32
      %451 = arith.index_cast %450 : i32 to index
      %c0_223 = arith.constant 0 : index
      %452 = vector.load %arg10[%451, %c0_223] : memref<20x64xf32, #tpu.memory_space<vmem>>, vector<1x64xf32>
      %c10_i32_224 = arith.constant 10 : i32
      %453 = arith.addi %c10_i32_224, %210 : i32
      %c1_i32_225 = arith.constant 1 : i32
      %454 = arith.subi %453, %c1_i32_225 : i32
      %455 = arith.index_cast %454 : i32 to index
      %c0_226 = arith.constant 0 : index
      %456 = vector.load %arg10[%455, %c0_226] : memref<20x64xf32, #tpu.memory_space<vmem>>, vector<1x64xf32>
      %457 = tpu.concatenate %452, %456 in 1 : vector<1x64xf32>, vector<1x64xf32> -> vector<1x128xf32>
      %458 = tpu.concatenate %448, %457 in 0 : vector<1x128xf32>, vector<1x128xf32> -> vector<2x128xf32>
      %cst_227 = arith.constant dense<0.000000e+00> : vector<2x160xf32>
      %459 = tpu.matmul %458, %20, %cst_227 {dimension_numbers = #tpu.dot_dimension_numbers<[1], [0], [0], [1], [0, 0, 1, 1], [], []>} : vector<2x128xf32>, vector<128x160xf32>, vector<2x160xf32> -> vector<2x160xf32>
      %460 = arith.addf %459, %23 : vector<2x160xf32>
      %461 = vector.extract_strided_slice %460 {offsets = [0, 0], sizes = [2, 128], strides = [1, 1]} : vector<2x160xf32> to vector<2x128xf32>
      %462 = arith.negf %461 : vector<2x128xf32>
      %463 = math.exp %462 : vector<2x128xf32>
      %cst_228 = arith.constant 1.000000e+00 : f32
      %464 = vector.broadcast %cst_228 : f32 to vector<2x128xf32>
      %465 = arith.addf %464, %463 : vector<2x128xf32>
      %466 = arith.divf %464, %465 : vector<2x128xf32>
      %467 = vector.extract_strided_slice %466 {offsets = [0, 0], sizes = [2, 32], strides = [1, 1]} : vector<2x128xf32> to vector<2x32xf32>
      %468 = vector.extract_strided_slice %466 {offsets = [0, 32], sizes = [2, 32], strides = [1, 1]} : vector<2x128xf32> to vector<2x32xf32>
      %469 = vector.extract_strided_slice %466 {offsets = [0, 64], sizes = [2, 32], strides = [1, 1]} : vector<2x128xf32> to vector<2x32xf32>
      %470 = vector.extract_strided_slice %466 {offsets = [0, 96], sizes = [2, 32], strides = [1, 1]} : vector<2x128xf32> to vector<2x32xf32>
      %471 = vector.extract_strided_slice %460 {offsets = [0, 128], sizes = [2, 32], strides = [1, 1]} : vector<2x160xf32> to vector<2x32xf32>
      %472 = math.tanh %471 : vector<2x32xf32>
      %473 = arith.mulf %467, %472 : vector<2x32xf32>
      %474 = vector.extract_strided_slice %458 {offsets = [0, 32], sizes = [2, 32], strides = [1, 1]} : vector<2x128xf32> to vector<2x32xf32>
      %475 = arith.mulf %468, %474 : vector<2x32xf32>
      %476 = arith.addf %473, %475 : vector<2x32xf32>
      %477 = vector.extract_strided_slice %458 {offsets = [0, 96], sizes = [2, 32], strides = [1, 1]} : vector<2x128xf32> to vector<2x32xf32>
      %478 = arith.mulf %469, %477 : vector<2x32xf32>
      %479 = arith.addf %476, %478 : vector<2x32xf32>
      %480 = math.tanh %479 : vector<2x32xf32>
      %481 = arith.mulf %470, %480 : vector<2x32xf32>
      %482 = tpu.concatenate %481, %479 in 1 : vector<2x32xf32>, vector<2x32xf32> -> vector<2x64xf32>
      %c0_i32_229 = arith.constant 0 : i32
      %483 = arith.addi %c0_i32_229, %201 : i32
      %c2_i32_230 = arith.constant 2 : i32
      %484 = arith.subi %483, %c2_i32_230 : i32
      %485 = arith.extui %217 : i1 to i32
      %c0_i32_231 = arith.constant 0 : i32
      %486 = arith.cmpi ne, %485, %c0_i32_231 : i32
      scf.if %486 {
        %491 = vector.extract_strided_slice %482 {offsets = [0, 0], sizes = [1, 64], strides = [1, 1]} : vector<2x64xf32> to vector<1x64xf32>
        %492 = arith.index_cast %484 : i32 to index
        %c0_235 = arith.constant 0 : index
        %493 = vector.load %arg10[%492, %c0_235] : memref<20x64xf32, #tpu.memory_space<vmem>>, vector<1x64xf32>
        tpu.vector_store %arg10[%492, %c0_235], %491 {strides = array<i32>} : memref<20x64xf32, #tpu.memory_space<vmem>>, vector<1x64xf32>,
      } else {
      }
      %c10_i32_232 = arith.constant 10 : i32
      %487 = arith.addi %c10_i32_232, %210 : i32
      %c2_i32_233 = arith.constant 2 : i32
      %488 = arith.subi %487, %c2_i32_233 : i32
      %489 = arith.extui %218 : i1 to i32
      %c0_i32_234 = arith.constant 0 : i32
      %490 = arith.cmpi ne, %489, %c0_i32_234 : i32
      scf.if %490 {
        %491 = vector.extract_strided_slice %482 {offsets = [1, 0], sizes = [1, 64], strides = [1, 1]} : vector<2x64xf32> to vector<1x64xf32>
        %492 = arith.index_cast %488 : i32 to index
        %c0_235 = arith.constant 0 : index
        %493 = vector.load %arg10[%492, %c0_235] : memref<20x64xf32, #tpu.memory_space<vmem>>, vector<1x64xf32>
        tpu.vector_store %arg10[%492, %c0_235], %491 {strides = array<i32>} : memref<20x64xf32, #tpu.memory_space<vmem>>, vector<1x64xf32>,
      } else {
      }
    } else {
    }
    %c1_i32_115 = arith.constant 1 : i32
    %222 = arith.subi %203, %c1_i32_115 : i32
    %223 = arith.extui %215 : i1 to i32
    %c0_i32_116 = arith.constant 0 : i32
    %224 = arith.cmpi ne, %223, %c0_i32_116 : i32
    scf.if %224 {
      %c0_i32_215 = arith.constant 0 : i32
      %440 = arith.addi %c0_i32_215, %222 : i32
      %441 = arith.index_cast %440 : i32 to index
      %c0_216 = arith.constant 0 : index
      %442 = vector.load %arg9[%441, %c0_216] : memref<16x64xf32, #tpu.memory_space<vmem>>, vector<1x64xf32>
      %c0_i32_217 = arith.constant 0 : i32
      %443 = arith.addi %c0_i32_217, %201 : i32
      %444 = arith.index_cast %443 : i32 to index
      %c0_218 = arith.constant 0 : index
      %445 = vector.load %arg10[%444, %c0_218] : memref<20x64xf32, #tpu.memory_space<vmem>>, vector<1x64xf32>
      tpu.vector_store %arg10[%444, %c0_218], %442 {strides = array<i32>} : memref<20x64xf32, #tpu.memory_space<vmem>>, vector<1x64xf32>,
    } else {
    }
    %225 = arith.extui %215 : i1 to i32
    %226 = arith.addi %201, %225 : i32
    %227 = arith.extui %217 : i1 to i32
    %228 = arith.subi %226, %227 : i32
    %229 = arith.extui %215 : i1 to i32
    %230 = arith.subi %203, %229 : i32
    %c1_i32_117 = arith.constant 1 : i32
    %231 = arith.subi %212, %c1_i32_117 : i32
    %232 = arith.extui %216 : i1 to i32
    %c0_i32_118 = arith.constant 0 : i32
    %233 = arith.cmpi ne, %232, %c0_i32_118 : i32
    scf.if %233 {
      %c8_i32_215 = arith.constant 8 : i32
      %440 = arith.addi %c8_i32_215, %231 : i32
      %441 = arith.index_cast %440 : i32 to index
      %c0_216 = arith.constant 0 : index
      %442 = vector.load %arg9[%441, %c0_216] : memref<16x64xf32, #tpu.memory_space<vmem>>, vector<1x64xf32>
      %c10_i32_217 = arith.constant 10 : i32
      %443 = arith.addi %c10_i32_217, %210 : i32
      %444 = arith.index_cast %443 : i32 to index
      %c0_218 = arith.constant 0 : index
      %445 = vector.load %arg10[%444, %c0_218] : memref<20x64xf32, #tpu.memory_space<vmem>>, vector<1x64xf32>
      tpu.vector_store %arg10[%444, %c0_218], %442 {strides = array<i32>} : memref<20x64xf32, #tpu.memory_space<vmem>>, vector<1x64xf32>,
    } else {
    }
    %234 = arith.extui %216 : i1 to i32
    %235 = arith.addi %210, %234 : i32
    %236 = arith.extui %218 : i1 to i32
    %237 = arith.subi %235, %236 : i32
    %238 = arith.extui %216 : i1 to i32
    %239 = arith.subi %212, %238 : i32
    %c0_119 = arith.constant 0 : index
    %c8 = arith.constant 8 : index
    %240 = memref.load %arg1[%c0_119, %c8] : memref<2x15xi32, #tpu.memory_space<smem>>
    %c1_120 = arith.constant 1 : index
    %c8_121 = arith.constant 8 : index
    %241 = memref.load %arg1[%c1_120, %c8_121] : memref<2x15xi32, #tpu.memory_space<smem>>
    %c0_i32_122 = arith.constant 0 : i32
    %242 = arith.cmpi eq, %240, %c0_i32_122 : i32
    %c0_i32_123 = arith.constant 0 : i32
    %243 = arith.cmpi eq, %241, %c0_i32_123 : i32
    %c1_i32_124 = arith.constant 1 : i32
    %244 = arith.cmpi eq, %240, %c1_i32_124 : i32
    %c1_i32_125 = arith.constant 1 : i32
    %245 = arith.cmpi eq, %241, %c1_i32_125 : i32
    %246 = arith.ori %244, %245 : i1
    %247 = arith.extui %246 : i1 to i32
    %c0_i32_126 = arith.constant 0 : i32
    %248 = arith.cmpi ne, %247, %c0_i32_126 : i32
    scf.if %248 {
      %c0_i32_215 = arith.constant 0 : i32
      %440 = arith.addi %c0_i32_215, %228 : i32
      %c2_i32_216 = arith.constant 2 : i32
      %441 = arith.subi %440, %c2_i32_216 : i32
      %442 = arith.index_cast %441 : i32 to index
      %c0_217 = arith.constant 0 : index
      %443 = vector.load %arg10[%442, %c0_217] : memref<20x64xf32, #tpu.memory_space<vmem>>, vector<1x64xf32>
      %c0_i32_218 = arith.constant 0 : i32
      %444 = arith.addi %c0_i32_218, %228 : i32
      %c1_i32_219 = arith.constant 1 : i32
      %445 = arith.subi %444, %c1_i32_219 : i32
      %446 = arith.index_cast %445 : i32 to index
      %c0_220 = arith.constant 0 : index
      %447 = vector.load %arg10[%446, %c0_220] : memref<20x64xf32, #tpu.memory_space<vmem>>, vector<1x64xf32>
      %448 = tpu.concatenate %443, %447 in 1 : vector<1x64xf32>, vector<1x64xf32> -> vector<1x128xf32>
      %c10_i32_221 = arith.constant 10 : i32
      %449 = arith.addi %c10_i32_221, %237 : i32
      %c2_i32_222 = arith.constant 2 : i32
      %450 = arith.subi %449, %c2_i32_222 : i32
      %451 = arith.index_cast %450 : i32 to index
      %c0_223 = arith.constant 0 : index
      %452 = vector.load %arg10[%451, %c0_223] : memref<20x64xf32, #tpu.memory_space<vmem>>, vector<1x64xf32>
      %c10_i32_224 = arith.constant 10 : i32
      %453 = arith.addi %c10_i32_224, %237 : i32
      %c1_i32_225 = arith.constant 1 : i32
      %454 = arith.subi %453, %c1_i32_225 : i32
      %455 = arith.index_cast %454 : i32 to index
      %c0_226 = arith.constant 0 : index
      %456 = vector.load %arg10[%455, %c0_226] : memref<20x64xf32, #tpu.memory_space<vmem>>, vector<1x64xf32>
      %457 = tpu.concatenate %452, %456 in 1 : vector<1x64xf32>, vector<1x64xf32> -> vector<1x128xf32>
      %458 = tpu.concatenate %448, %457 in 0 : vector<1x128xf32>, vector<1x128xf32> -> vector<2x128xf32>
      %cst_227 = arith.constant dense<0.000000e+00> : vector<2x160xf32>
      %459 = tpu.matmul %458, %20, %cst_227 {dimension_numbers = #tpu.dot_dimension_numbers<[1], [0], [0], [1], [0, 0, 1, 1], [], []>} : vector<2x128xf32>, vector<128x160xf32>, vector<2x160xf32> -> vector<2x160xf32>
      %460 = arith.addf %459, %23 : vector<2x160xf32>
      %461 = vector.extract_strided_slice %460 {offsets = [0, 0], sizes = [2, 128], strides = [1, 1]} : vector<2x160xf32> to vector<2x128xf32>
      %462 = arith.negf %461 : vector<2x128xf32>
      %463 = math.exp %462 : vector<2x128xf32>
      %cst_228 = arith.constant 1.000000e+00 : f32
      %464 = vector.broadcast %cst_228 : f32 to vector<2x128xf32>
      %465 = arith.addf %464, %463 : vector<2x128xf32>
      %466 = arith.divf %464, %465 : vector<2x128xf32>
      %467 = vector.extract_strided_slice %466 {offsets = [0, 0], sizes = [2, 32], strides = [1, 1]} : vector<2x128xf32> to vector<2x32xf32>
      %468 = vector.extract_strided_slice %466 {offsets = [0, 32], sizes = [2, 32], strides = [1, 1]} : vector<2x128xf32> to vector<2x32xf32>
      %469 = vector.extract_strided_slice %466 {offsets = [0, 64], sizes = [2, 32], strides = [1, 1]} : vector<2x128xf32> to vector<2x32xf32>
      %470 = vector.extract_strided_slice %466 {offsets = [0, 96], sizes = [2, 32], strides = [1, 1]} : vector<2x128xf32> to vector<2x32xf32>
      %471 = vector.extract_strided_slice %460 {offsets = [0, 128], sizes = [2, 32], strides = [1, 1]} : vector<2x160xf32> to vector<2x32xf32>
      %472 = math.tanh %471 : vector<2x32xf32>
      %473 = arith.mulf %467, %472 : vector<2x32xf32>
      %474 = vector.extract_strided_slice %458 {offsets = [0, 32], sizes = [2, 32], strides = [1, 1]} : vector<2x128xf32> to vector<2x32xf32>
      %475 = arith.mulf %468, %474 : vector<2x32xf32>
      %476 = arith.addf %473, %475 : vector<2x32xf32>
      %477 = vector.extract_strided_slice %458 {offsets = [0, 96], sizes = [2, 32], strides = [1, 1]} : vector<2x128xf32> to vector<2x32xf32>
      %478 = arith.mulf %469, %477 : vector<2x32xf32>
      %479 = arith.addf %476, %478 : vector<2x32xf32>
      %480 = math.tanh %479 : vector<2x32xf32>
      %481 = arith.mulf %470, %480 : vector<2x32xf32>
      %482 = tpu.concatenate %481, %479 in 1 : vector<2x32xf32>, vector<2x32xf32> -> vector<2x64xf32>
      %c0_i32_229 = arith.constant 0 : i32
      %483 = arith.addi %c0_i32_229, %228 : i32
      %c2_i32_230 = arith.constant 2 : i32
      %484 = arith.subi %483, %c2_i32_230 : i32
      %485 = arith.extui %244 : i1 to i32
      %c0_i32_231 = arith.constant 0 : i32
      %486 = arith.cmpi ne, %485, %c0_i32_231 : i32
      scf.if %486 {
        %491 = vector.extract_strided_slice %482 {offsets = [0, 0], sizes = [1, 64], strides = [1, 1]} : vector<2x64xf32> to vector<1x64xf32>
        %492 = arith.index_cast %484 : i32 to index
        %c0_235 = arith.constant 0 : index
        %493 = vector.load %arg10[%492, %c0_235] : memref<20x64xf32, #tpu.memory_space<vmem>>, vector<1x64xf32>
        tpu.vector_store %arg10[%492, %c0_235], %491 {strides = array<i32>} : memref<20x64xf32, #tpu.memory_space<vmem>>, vector<1x64xf32>,
      } else {
      }
      %c10_i32_232 = arith.constant 10 : i32
      %487 = arith.addi %c10_i32_232, %237 : i32
      %c2_i32_233 = arith.constant 2 : i32
      %488 = arith.subi %487, %c2_i32_233 : i32
      %489 = arith.extui %245 : i1 to i32
      %c0_i32_234 = arith.constant 0 : i32
      %490 = arith.cmpi ne, %489, %c0_i32_234 : i32
      scf.if %490 {
        %491 = vector.extract_strided_slice %482 {offsets = [1, 0], sizes = [1, 64], strides = [1, 1]} : vector<2x64xf32> to vector<1x64xf32>
        %492 = arith.index_cast %488 : i32 to index
        %c0_235 = arith.constant 0 : index
        %493 = vector.load %arg10[%492, %c0_235] : memref<20x64xf32, #tpu.memory_space<vmem>>, vector<1x64xf32>
        tpu.vector_store %arg10[%492, %c0_235], %491 {strides = array<i32>} : memref<20x64xf32, #tpu.memory_space<vmem>>, vector<1x64xf32>,
      } else {
      }
    } else {
    }
    %c1_i32_127 = arith.constant 1 : i32
    %249 = arith.subi %230, %c1_i32_127 : i32
    %250 = arith.extui %242 : i1 to i32
    %c0_i32_128 = arith.constant 0 : i32
    %251 = arith.cmpi ne, %250, %c0_i32_128 : i32
    scf.if %251 {
      %c0_i32_215 = arith.constant 0 : i32
      %440 = arith.addi %c0_i32_215, %249 : i32
      %441 = arith.index_cast %440 : i32 to index
      %c0_216 = arith.constant 0 : index
      %442 = vector.load %arg9[%441, %c0_216] : memref<16x64xf32, #tpu.memory_space<vmem>>, vector<1x64xf32>
      %c0_i32_217 = arith.constant 0 : i32
      %443 = arith.addi %c0_i32_217, %228 : i32
      %444 = arith.index_cast %443 : i32 to index
      %c0_218 = arith.constant 0 : index
      %445 = vector.load %arg10[%444, %c0_218] : memref<20x64xf32, #tpu.memory_space<vmem>>, vector<1x64xf32>
      tpu.vector_store %arg10[%444, %c0_218], %442 {strides = array<i32>} : memref<20x64xf32, #tpu.memory_space<vmem>>, vector<1x64xf32>,
    } else {
    }
    %252 = arith.extui %242 : i1 to i32
    %253 = arith.addi %228, %252 : i32
    %254 = arith.extui %244 : i1 to i32
    %255 = arith.subi %253, %254 : i32
    %256 = arith.extui %242 : i1 to i32
    %257 = arith.subi %230, %256 : i32
    %c1_i32_129 = arith.constant 1 : i32
    %258 = arith.subi %239, %c1_i32_129 : i32
    %259 = arith.extui %243 : i1 to i32
    %c0_i32_130 = arith.constant 0 : i32
    %260 = arith.cmpi ne, %259, %c0_i32_130 : i32
    scf.if %260 {
      %c8_i32_215 = arith.constant 8 : i32
      %440 = arith.addi %c8_i32_215, %258 : i32
      %441 = arith.index_cast %440 : i32 to index
      %c0_216 = arith.constant 0 : index
      %442 = vector.load %arg9[%441, %c0_216] : memref<16x64xf32, #tpu.memory_space<vmem>>, vector<1x64xf32>
      %c10_i32_217 = arith.constant 10 : i32
      %443 = arith.addi %c10_i32_217, %237 : i32
      %444 = arith.index_cast %443 : i32 to index
      %c0_218 = arith.constant 0 : index
      %445 = vector.load %arg10[%444, %c0_218] : memref<20x64xf32, #tpu.memory_space<vmem>>, vector<1x64xf32>
      tpu.vector_store %arg10[%444, %c0_218], %442 {strides = array<i32>} : memref<20x64xf32, #tpu.memory_space<vmem>>, vector<1x64xf32>,
    } else {
    }
    %261 = arith.extui %243 : i1 to i32
    %262 = arith.addi %237, %261 : i32
    %263 = arith.extui %245 : i1 to i32
    %264 = arith.subi %262, %263 : i32
    %265 = arith.extui %243 : i1 to i32
    %266 = arith.subi %239, %265 : i32
    %c0_131 = arith.constant 0 : index
    %c9 = arith.constant 9 : index
    %267 = memref.load %arg1[%c0_131, %c9] : memref<2x15xi32, #tpu.memory_space<smem>>
    %c1_132 = arith.constant 1 : index
    %c9_133 = arith.constant 9 : index
    %268 = memref.load %arg1[%c1_132, %c9_133] : memref<2x15xi32, #tpu.memory_space<smem>>
    %c0_i32_134 = arith.constant 0 : i32
    %269 = arith.cmpi eq, %267, %c0_i32_134 : i32
    %c0_i32_135 = arith.constant 0 : i32
    %270 = arith.cmpi eq, %268, %c0_i32_135 : i32
    %c1_i32_136 = arith.constant 1 : i32
    %271 = arith.cmpi eq, %267, %c1_i32_136 : i32
    %c1_i32_137 = arith.constant 1 : i32
    %272 = arith.cmpi eq, %268, %c1_i32_137 : i32
    %273 = arith.ori %271, %272 : i1
    %274 = arith.extui %273 : i1 to i32
    %c0_i32_138 = arith.constant 0 : i32
    %275 = arith.cmpi ne, %274, %c0_i32_138 : i32
    scf.if %275 {
      %c0_i32_215 = arith.constant 0 : i32
      %440 = arith.addi %c0_i32_215, %255 : i32
      %c2_i32_216 = arith.constant 2 : i32
      %441 = arith.subi %440, %c2_i32_216 : i32
      %442 = arith.index_cast %441 : i32 to index
      %c0_217 = arith.constant 0 : index
      %443 = vector.load %arg10[%442, %c0_217] : memref<20x64xf32, #tpu.memory_space<vmem>>, vector<1x64xf32>
      %c0_i32_218 = arith.constant 0 : i32
      %444 = arith.addi %c0_i32_218, %255 : i32
      %c1_i32_219 = arith.constant 1 : i32
      %445 = arith.subi %444, %c1_i32_219 : i32
      %446 = arith.index_cast %445 : i32 to index
      %c0_220 = arith.constant 0 : index
      %447 = vector.load %arg10[%446, %c0_220] : memref<20x64xf32, #tpu.memory_space<vmem>>, vector<1x64xf32>
      %448 = tpu.concatenate %443, %447 in 1 : vector<1x64xf32>, vector<1x64xf32> -> vector<1x128xf32>
      %c10_i32_221 = arith.constant 10 : i32
      %449 = arith.addi %c10_i32_221, %264 : i32
      %c2_i32_222 = arith.constant 2 : i32
      %450 = arith.subi %449, %c2_i32_222 : i32
      %451 = arith.index_cast %450 : i32 to index
      %c0_223 = arith.constant 0 : index
      %452 = vector.load %arg10[%451, %c0_223] : memref<20x64xf32, #tpu.memory_space<vmem>>, vector<1x64xf32>
      %c10_i32_224 = arith.constant 10 : i32
      %453 = arith.addi %c10_i32_224, %264 : i32
      %c1_i32_225 = arith.constant 1 : i32
      %454 = arith.subi %453, %c1_i32_225 : i32
      %455 = arith.index_cast %454 : i32 to index
      %c0_226 = arith.constant 0 : index
      %456 = vector.load %arg10[%455, %c0_226] : memref<20x64xf32, #tpu.memory_space<vmem>>, vector<1x64xf32>
      %457 = tpu.concatenate %452, %456 in 1 : vector<1x64xf32>, vector<1x64xf32> -> vector<1x128xf32>
      %458 = tpu.concatenate %448, %457 in 0 : vector<1x128xf32>, vector<1x128xf32> -> vector<2x128xf32>
      %cst_227 = arith.constant dense<0.000000e+00> : vector<2x160xf32>
      %459 = tpu.matmul %458, %20, %cst_227 {dimension_numbers = #tpu.dot_dimension_numbers<[1], [0], [0], [1], [0, 0, 1, 1], [], []>} : vector<2x128xf32>, vector<128x160xf32>, vector<2x160xf32> -> vector<2x160xf32>
      %460 = arith.addf %459, %23 : vector<2x160xf32>
      %461 = vector.extract_strided_slice %460 {offsets = [0, 0], sizes = [2, 128], strides = [1, 1]} : vector<2x160xf32> to vector<2x128xf32>
      %462 = arith.negf %461 : vector<2x128xf32>
      %463 = math.exp %462 : vector<2x128xf32>
      %cst_228 = arith.constant 1.000000e+00 : f32
      %464 = vector.broadcast %cst_228 : f32 to vector<2x128xf32>
      %465 = arith.addf %464, %463 : vector<2x128xf32>
      %466 = arith.divf %464, %465 : vector<2x128xf32>
      %467 = vector.extract_strided_slice %466 {offsets = [0, 0], sizes = [2, 32], strides = [1, 1]} : vector<2x128xf32> to vector<2x32xf32>
      %468 = vector.extract_strided_slice %466 {offsets = [0, 32], sizes = [2, 32], strides = [1, 1]} : vector<2x128xf32> to vector<2x32xf32>
      %469 = vector.extract_strided_slice %466 {offsets = [0, 64], sizes = [2, 32], strides = [1, 1]} : vector<2x128xf32> to vector<2x32xf32>
      %470 = vector.extract_strided_slice %466 {offsets = [0, 96], sizes = [2, 32], strides = [1, 1]} : vector<2x128xf32> to vector<2x32xf32>
      %471 = vector.extract_strided_slice %460 {offsets = [0, 128], sizes = [2, 32], strides = [1, 1]} : vector<2x160xf32> to vector<2x32xf32>
      %472 = math.tanh %471 : vector<2x32xf32>
      %473 = arith.mulf %467, %472 : vector<2x32xf32>
      %474 = vector.extract_strided_slice %458 {offsets = [0, 32], sizes = [2, 32], strides = [1, 1]} : vector<2x128xf32> to vector<2x32xf32>
      %475 = arith.mulf %468, %474 : vector<2x32xf32>
      %476 = arith.addf %473, %475 : vector<2x32xf32>
      %477 = vector.extract_strided_slice %458 {offsets = [0, 96], sizes = [2, 32], strides = [1, 1]} : vector<2x128xf32> to vector<2x32xf32>
      %478 = arith.mulf %469, %477 : vector<2x32xf32>
      %479 = arith.addf %476, %478 : vector<2x32xf32>
      %480 = math.tanh %479 : vector<2x32xf32>
      %481 = arith.mulf %470, %480 : vector<2x32xf32>
      %482 = tpu.concatenate %481, %479 in 1 : vector<2x32xf32>, vector<2x32xf32> -> vector<2x64xf32>
      %c0_i32_229 = arith.constant 0 : i32
      %483 = arith.addi %c0_i32_229, %255 : i32
      %c2_i32_230 = arith.constant 2 : i32
      %484 = arith.subi %483, %c2_i32_230 : i32
      %485 = arith.extui %271 : i1 to i32
      %c0_i32_231 = arith.constant 0 : i32
      %486 = arith.cmpi ne, %485, %c0_i32_231 : i32
      scf.if %486 {
        %491 = vector.extract_strided_slice %482 {offsets = [0, 0], sizes = [1, 64], strides = [1, 1]} : vector<2x64xf32> to vector<1x64xf32>
        %492 = arith.index_cast %484 : i32 to index
        %c0_235 = arith.constant 0 : index
        %493 = vector.load %arg10[%492, %c0_235] : memref<20x64xf32, #tpu.memory_space<vmem>>, vector<1x64xf32>
        tpu.vector_store %arg10[%492, %c0_235], %491 {strides = array<i32>} : memref<20x64xf32, #tpu.memory_space<vmem>>, vector<1x64xf32>,
      } else {
      }
      %c10_i32_232 = arith.constant 10 : i32
      %487 = arith.addi %c10_i32_232, %264 : i32
      %c2_i32_233 = arith.constant 2 : i32
      %488 = arith.subi %487, %c2_i32_233 : i32
      %489 = arith.extui %272 : i1 to i32
      %c0_i32_234 = arith.constant 0 : i32
      %490 = arith.cmpi ne, %489, %c0_i32_234 : i32
      scf.if %490 {
        %491 = vector.extract_strided_slice %482 {offsets = [1, 0], sizes = [1, 64], strides = [1, 1]} : vector<2x64xf32> to vector<1x64xf32>
        %492 = arith.index_cast %488 : i32 to index
        %c0_235 = arith.constant 0 : index
        %493 = vector.load %arg10[%492, %c0_235] : memref<20x64xf32, #tpu.memory_space<vmem>>, vector<1x64xf32>
        tpu.vector_store %arg10[%492, %c0_235], %491 {strides = array<i32>} : memref<20x64xf32, #tpu.memory_space<vmem>>, vector<1x64xf32>,
      } else {
      }
    } else {
    }
    %c1_i32_139 = arith.constant 1 : i32
    %276 = arith.subi %257, %c1_i32_139 : i32
    %277 = arith.extui %269 : i1 to i32
    %c0_i32_140 = arith.constant 0 : i32
    %278 = arith.cmpi ne, %277, %c0_i32_140 : i32
    scf.if %278 {
      %c0_i32_215 = arith.constant 0 : i32
      %440 = arith.addi %c0_i32_215, %276 : i32
      %441 = arith.index_cast %440 : i32 to index
      %c0_216 = arith.constant 0 : index
      %442 = vector.load %arg9[%441, %c0_216] : memref<16x64xf32, #tpu.memory_space<vmem>>, vector<1x64xf32>
      %c0_i32_217 = arith.constant 0 : i32
      %443 = arith.addi %c0_i32_217, %255 : i32
      %444 = arith.index_cast %443 : i32 to index
      %c0_218 = arith.constant 0 : index
      %445 = vector.load %arg10[%444, %c0_218] : memref<20x64xf32, #tpu.memory_space<vmem>>, vector<1x64xf32>
      tpu.vector_store %arg10[%444, %c0_218], %442 {strides = array<i32>} : memref<20x64xf32, #tpu.memory_space<vmem>>, vector<1x64xf32>,
    } else {
    }
    %279 = arith.extui %269 : i1 to i32
    %280 = arith.addi %255, %279 : i32
    %281 = arith.extui %271 : i1 to i32
    %282 = arith.subi %280, %281 : i32
    %283 = arith.extui %269 : i1 to i32
    %284 = arith.subi %257, %283 : i32
    %c1_i32_141 = arith.constant 1 : i32
    %285 = arith.subi %266, %c1_i32_141 : i32
    %286 = arith.extui %270 : i1 to i32
    %c0_i32_142 = arith.constant 0 : i32
    %287 = arith.cmpi ne, %286, %c0_i32_142 : i32
    scf.if %287 {
      %c8_i32_215 = arith.constant 8 : i32
      %440 = arith.addi %c8_i32_215, %285 : i32
      %441 = arith.index_cast %440 : i32 to index
      %c0_216 = arith.constant 0 : index
      %442 = vector.load %arg9[%441, %c0_216] : memref<16x64xf32, #tpu.memory_space<vmem>>, vector<1x64xf32>
      %c10_i32_217 = arith.constant 10 : i32
      %443 = arith.addi %c10_i32_217, %264 : i32
      %444 = arith.index_cast %443 : i32 to index
      %c0_218 = arith.constant 0 : index
      %445 = vector.load %arg10[%444, %c0_218] : memref<20x64xf32, #tpu.memory_space<vmem>>, vector<1x64xf32>
      tpu.vector_store %arg10[%444, %c0_218], %442 {strides = array<i32>} : memref<20x64xf32, #tpu.memory_space<vmem>>, vector<1x64xf32>,
    } else {
    }
    %288 = arith.extui %270 : i1 to i32
    %289 = arith.addi %264, %288 : i32
    %290 = arith.extui %272 : i1 to i32
    %291 = arith.subi %289, %290 : i32
    %292 = arith.extui %270 : i1 to i32
    %293 = arith.subi %266, %292 : i32
    %c0_143 = arith.constant 0 : index
    %c10 = arith.constant 10 : index
    %294 = memref.load %arg1[%c0_143, %c10] : memref<2x15xi32, #tpu.memory_space<smem>>
    %c1_144 = arith.constant 1 : index
    %c10_145 = arith.constant 10 : index
    %295 = memref.load %arg1[%c1_144, %c10_145] : memref<2x15xi32, #tpu.memory_space<smem>>
    %c0_i32_146 = arith.constant 0 : i32
    %296 = arith.cmpi eq, %294, %c0_i32_146 : i32
    %c0_i32_147 = arith.constant 0 : i32
    %297 = arith.cmpi eq, %295, %c0_i32_147 : i32
    %c1_i32_148 = arith.constant 1 : i32
    %298 = arith.cmpi eq, %294, %c1_i32_148 : i32
    %c1_i32_149 = arith.constant 1 : i32
    %299 = arith.cmpi eq, %295, %c1_i32_149 : i32
    %300 = arith.ori %298, %299 : i1
    %301 = arith.extui %300 : i1 to i32
    %c0_i32_150 = arith.constant 0 : i32
    %302 = arith.cmpi ne, %301, %c0_i32_150 : i32
    scf.if %302 {
      %c0_i32_215 = arith.constant 0 : i32
      %440 = arith.addi %c0_i32_215, %282 : i32
      %c2_i32_216 = arith.constant 2 : i32
      %441 = arith.subi %440, %c2_i32_216 : i32
      %442 = arith.index_cast %441 : i32 to index
      %c0_217 = arith.constant 0 : index
      %443 = vector.load %arg10[%442, %c0_217] : memref<20x64xf32, #tpu.memory_space<vmem>>, vector<1x64xf32>
      %c0_i32_218 = arith.constant 0 : i32
      %444 = arith.addi %c0_i32_218, %282 : i32
      %c1_i32_219 = arith.constant 1 : i32
      %445 = arith.subi %444, %c1_i32_219 : i32
      %446 = arith.index_cast %445 : i32 to index
      %c0_220 = arith.constant 0 : index
      %447 = vector.load %arg10[%446, %c0_220] : memref<20x64xf32, #tpu.memory_space<vmem>>, vector<1x64xf32>
      %448 = tpu.concatenate %443, %447 in 1 : vector<1x64xf32>, vector<1x64xf32> -> vector<1x128xf32>
      %c10_i32_221 = arith.constant 10 : i32
      %449 = arith.addi %c10_i32_221, %291 : i32
      %c2_i32_222 = arith.constant 2 : i32
      %450 = arith.subi %449, %c2_i32_222 : i32
      %451 = arith.index_cast %450 : i32 to index
      %c0_223 = arith.constant 0 : index
      %452 = vector.load %arg10[%451, %c0_223] : memref<20x64xf32, #tpu.memory_space<vmem>>, vector<1x64xf32>
      %c10_i32_224 = arith.constant 10 : i32
      %453 = arith.addi %c10_i32_224, %291 : i32
      %c1_i32_225 = arith.constant 1 : i32
      %454 = arith.subi %453, %c1_i32_225 : i32
      %455 = arith.index_cast %454 : i32 to index
      %c0_226 = arith.constant 0 : index
      %456 = vector.load %arg10[%455, %c0_226] : memref<20x64xf32, #tpu.memory_space<vmem>>, vector<1x64xf32>
      %457 = tpu.concatenate %452, %456 in 1 : vector<1x64xf32>, vector<1x64xf32> -> vector<1x128xf32>
      %458 = tpu.concatenate %448, %457 in 0 : vector<1x128xf32>, vector<1x128xf32> -> vector<2x128xf32>
      %cst_227 = arith.constant dense<0.000000e+00> : vector<2x160xf32>
      %459 = tpu.matmul %458, %20, %cst_227 {dimension_numbers = #tpu.dot_dimension_numbers<[1], [0], [0], [1], [0, 0, 1, 1], [], []>} : vector<2x128xf32>, vector<128x160xf32>, vector<2x160xf32> -> vector<2x160xf32>
      %460 = arith.addf %459, %23 : vector<2x160xf32>
      %461 = vector.extract_strided_slice %460 {offsets = [0, 0], sizes = [2, 128], strides = [1, 1]} : vector<2x160xf32> to vector<2x128xf32>
      %462 = arith.negf %461 : vector<2x128xf32>
      %463 = math.exp %462 : vector<2x128xf32>
      %cst_228 = arith.constant 1.000000e+00 : f32
      %464 = vector.broadcast %cst_228 : f32 to vector<2x128xf32>
      %465 = arith.addf %464, %463 : vector<2x128xf32>
      %466 = arith.divf %464, %465 : vector<2x128xf32>
      %467 = vector.extract_strided_slice %466 {offsets = [0, 0], sizes = [2, 32], strides = [1, 1]} : vector<2x128xf32> to vector<2x32xf32>
      %468 = vector.extract_strided_slice %466 {offsets = [0, 32], sizes = [2, 32], strides = [1, 1]} : vector<2x128xf32> to vector<2x32xf32>
      %469 = vector.extract_strided_slice %466 {offsets = [0, 64], sizes = [2, 32], strides = [1, 1]} : vector<2x128xf32> to vector<2x32xf32>
      %470 = vector.extract_strided_slice %466 {offsets = [0, 96], sizes = [2, 32], strides = [1, 1]} : vector<2x128xf32> to vector<2x32xf32>
      %471 = vector.extract_strided_slice %460 {offsets = [0, 128], sizes = [2, 32], strides = [1, 1]} : vector<2x160xf32> to vector<2x32xf32>
      %472 = math.tanh %471 : vector<2x32xf32>
      %473 = arith.mulf %467, %472 : vector<2x32xf32>
      %474 = vector.extract_strided_slice %458 {offsets = [0, 32], sizes = [2, 32], strides = [1, 1]} : vector<2x128xf32> to vector<2x32xf32>
      %475 = arith.mulf %468, %474 : vector<2x32xf32>
      %476 = arith.addf %473, %475 : vector<2x32xf32>
      %477 = vector.extract_strided_slice %458 {offsets = [0, 96], sizes = [2, 32], strides = [1, 1]} : vector<2x128xf32> to vector<2x32xf32>
      %478 = arith.mulf %469, %477 : vector<2x32xf32>
      %479 = arith.addf %476, %478 : vector<2x32xf32>
      %480 = math.tanh %479 : vector<2x32xf32>
      %481 = arith.mulf %470, %480 : vector<2x32xf32>
      %482 = tpu.concatenate %481, %479 in 1 : vector<2x32xf32>, vector<2x32xf32> -> vector<2x64xf32>
      %c0_i32_229 = arith.constant 0 : i32
      %483 = arith.addi %c0_i32_229, %282 : i32
      %c2_i32_230 = arith.constant 2 : i32
      %484 = arith.subi %483, %c2_i32_230 : i32
      %485 = arith.extui %298 : i1 to i32
      %c0_i32_231 = arith.constant 0 : i32
      %486 = arith.cmpi ne, %485, %c0_i32_231 : i32
      scf.if %486 {
        %491 = vector.extract_strided_slice %482 {offsets = [0, 0], sizes = [1, 64], strides = [1, 1]} : vector<2x64xf32> to vector<1x64xf32>
        %492 = arith.index_cast %484 : i32 to index
        %c0_235 = arith.constant 0 : index
        %493 = vector.load %arg10[%492, %c0_235] : memref<20x64xf32, #tpu.memory_space<vmem>>, vector<1x64xf32>
        tpu.vector_store %arg10[%492, %c0_235], %491 {strides = array<i32>} : memref<20x64xf32, #tpu.memory_space<vmem>>, vector<1x64xf32>,
      } else {
      }
      %c10_i32_232 = arith.constant 10 : i32
      %487 = arith.addi %c10_i32_232, %291 : i32
      %c2_i32_233 = arith.constant 2 : i32
      %488 = arith.subi %487, %c2_i32_233 : i32
      %489 = arith.extui %299 : i1 to i32
      %c0_i32_234 = arith.constant 0 : i32
      %490 = arith.cmpi ne, %489, %c0_i32_234 : i32
      scf.if %490 {
        %491 = vector.extract_strided_slice %482 {offsets = [1, 0], sizes = [1, 64], strides = [1, 1]} : vector<2x64xf32> to vector<1x64xf32>
        %492 = arith.index_cast %488 : i32 to index
        %c0_235 = arith.constant 0 : index
        %493 = vector.load %arg10[%492, %c0_235] : memref<20x64xf32, #tpu.memory_space<vmem>>, vector<1x64xf32>
        tpu.vector_store %arg10[%492, %c0_235], %491 {strides = array<i32>} : memref<20x64xf32, #tpu.memory_space<vmem>>, vector<1x64xf32>,
      } else {
      }
    } else {
    }
    %c1_i32_151 = arith.constant 1 : i32
    %303 = arith.subi %284, %c1_i32_151 : i32
    %304 = arith.extui %296 : i1 to i32
    %c0_i32_152 = arith.constant 0 : i32
    %305 = arith.cmpi ne, %304, %c0_i32_152 : i32
    scf.if %305 {
      %c0_i32_215 = arith.constant 0 : i32
      %440 = arith.addi %c0_i32_215, %303 : i32
      %441 = arith.index_cast %440 : i32 to index
      %c0_216 = arith.constant 0 : index
      %442 = vector.load %arg9[%441, %c0_216] : memref<16x64xf32, #tpu.memory_space<vmem>>, vector<1x64xf32>
      %c0_i32_217 = arith.constant 0 : i32
      %443 = arith.addi %c0_i32_217, %282 : i32
      %444 = arith.index_cast %443 : i32 to index
      %c0_218 = arith.constant 0 : index
      %445 = vector.load %arg10[%444, %c0_218] : memref<20x64xf32, #tpu.memory_space<vmem>>, vector<1x64xf32>
      tpu.vector_store %arg10[%444, %c0_218], %442 {strides = array<i32>} : memref<20x64xf32, #tpu.memory_space<vmem>>, vector<1x64xf32>,
    } else {
    }
    %306 = arith.extui %296 : i1 to i32
    %307 = arith.addi %282, %306 : i32
    %308 = arith.extui %298 : i1 to i32
    %309 = arith.subi %307, %308 : i32
    %310 = arith.extui %296 : i1 to i32
    %311 = arith.subi %284, %310 : i32
    %c1_i32_153 = arith.constant 1 : i32
    %312 = arith.subi %293, %c1_i32_153 : i32
    %313 = arith.extui %297 : i1 to i32
    %c0_i32_154 = arith.constant 0 : i32
    %314 = arith.cmpi ne, %313, %c0_i32_154 : i32
    scf.if %314 {
      %c8_i32_215 = arith.constant 8 : i32
      %440 = arith.addi %c8_i32_215, %312 : i32
      %441 = arith.index_cast %440 : i32 to index
      %c0_216 = arith.constant 0 : index
      %442 = vector.load %arg9[%441, %c0_216] : memref<16x64xf32, #tpu.memory_space<vmem>>, vector<1x64xf32>
      %c10_i32_217 = arith.constant 10 : i32
      %443 = arith.addi %c10_i32_217, %291 : i32
      %444 = arith.index_cast %443 : i32 to index
      %c0_218 = arith.constant 0 : index
      %445 = vector.load %arg10[%444, %c0_218] : memref<20x64xf32, #tpu.memory_space<vmem>>, vector<1x64xf32>
      tpu.vector_store %arg10[%444, %c0_218], %442 {strides = array<i32>} : memref<20x64xf32, #tpu.memory_space<vmem>>, vector<1x64xf32>,
    } else {
    }
    %315 = arith.extui %297 : i1 to i32
    %316 = arith.addi %291, %315 : i32
    %317 = arith.extui %299 : i1 to i32
    %318 = arith.subi %316, %317 : i32
    %319 = arith.extui %297 : i1 to i32
    %320 = arith.subi %293, %319 : i32
    %c0_155 = arith.constant 0 : index
    %c11 = arith.constant 11 : index
    %321 = memref.load %arg1[%c0_155, %c11] : memref<2x15xi32, #tpu.memory_space<smem>>
    %c1_156 = arith.constant 1 : index
    %c11_157 = arith.constant 11 : index
    %322 = memref.load %arg1[%c1_156, %c11_157] : memref<2x15xi32, #tpu.memory_space<smem>>
    %c0_i32_158 = arith.constant 0 : i32
    %323 = arith.cmpi eq, %321, %c0_i32_158 : i32
    %c0_i32_159 = arith.constant 0 : i32
    %324 = arith.cmpi eq, %322, %c0_i32_159 : i32
    %c1_i32_160 = arith.constant 1 : i32
    %325 = arith.cmpi eq, %321, %c1_i32_160 : i32
    %c1_i32_161 = arith.constant 1 : i32
    %326 = arith.cmpi eq, %322, %c1_i32_161 : i32
    %327 = arith.ori %325, %326 : i1
    %328 = arith.extui %327 : i1 to i32
    %c0_i32_162 = arith.constant 0 : i32
    %329 = arith.cmpi ne, %328, %c0_i32_162 : i32
    scf.if %329 {
      %c0_i32_215 = arith.constant 0 : i32
      %440 = arith.addi %c0_i32_215, %309 : i32
      %c2_i32_216 = arith.constant 2 : i32
      %441 = arith.subi %440, %c2_i32_216 : i32
      %442 = arith.index_cast %441 : i32 to index
      %c0_217 = arith.constant 0 : index
      %443 = vector.load %arg10[%442, %c0_217] : memref<20x64xf32, #tpu.memory_space<vmem>>, vector<1x64xf32>
      %c0_i32_218 = arith.constant 0 : i32
      %444 = arith.addi %c0_i32_218, %309 : i32
      %c1_i32_219 = arith.constant 1 : i32
      %445 = arith.subi %444, %c1_i32_219 : i32
      %446 = arith.index_cast %445 : i32 to index
      %c0_220 = arith.constant 0 : index
      %447 = vector.load %arg10[%446, %c0_220] : memref<20x64xf32, #tpu.memory_space<vmem>>, vector<1x64xf32>
      %448 = tpu.concatenate %443, %447 in 1 : vector<1x64xf32>, vector<1x64xf32> -> vector<1x128xf32>
      %c10_i32_221 = arith.constant 10 : i32
      %449 = arith.addi %c10_i32_221, %318 : i32
      %c2_i32_222 = arith.constant 2 : i32
      %450 = arith.subi %449, %c2_i32_222 : i32
      %451 = arith.index_cast %450 : i32 to index
      %c0_223 = arith.constant 0 : index
      %452 = vector.load %arg10[%451, %c0_223] : memref<20x64xf32, #tpu.memory_space<vmem>>, vector<1x64xf32>
      %c10_i32_224 = arith.constant 10 : i32
      %453 = arith.addi %c10_i32_224, %318 : i32
      %c1_i32_225 = arith.constant 1 : i32
      %454 = arith.subi %453, %c1_i32_225 : i32
      %455 = arith.index_cast %454 : i32 to index
      %c0_226 = arith.constant 0 : index
      %456 = vector.load %arg10[%455, %c0_226] : memref<20x64xf32, #tpu.memory_space<vmem>>, vector<1x64xf32>
      %457 = tpu.concatenate %452, %456 in 1 : vector<1x64xf32>, vector<1x64xf32> -> vector<1x128xf32>
      %458 = tpu.concatenate %448, %457 in 0 : vector<1x128xf32>, vector<1x128xf32> -> vector<2x128xf32>
      %cst_227 = arith.constant dense<0.000000e+00> : vector<2x160xf32>
      %459 = tpu.matmul %458, %20, %cst_227 {dimension_numbers = #tpu.dot_dimension_numbers<[1], [0], [0], [1], [0, 0, 1, 1], [], []>} : vector<2x128xf32>, vector<128x160xf32>, vector<2x160xf32> -> vector<2x160xf32>
      %460 = arith.addf %459, %23 : vector<2x160xf32>
      %461 = vector.extract_strided_slice %460 {offsets = [0, 0], sizes = [2, 128], strides = [1, 1]} : vector<2x160xf32> to vector<2x128xf32>
      %462 = arith.negf %461 : vector<2x128xf32>
      %463 = math.exp %462 : vector<2x128xf32>
      %cst_228 = arith.constant 1.000000e+00 : f32
      %464 = vector.broadcast %cst_228 : f32 to vector<2x128xf32>
      %465 = arith.addf %464, %463 : vector<2x128xf32>
      %466 = arith.divf %464, %465 : vector<2x128xf32>
      %467 = vector.extract_strided_slice %466 {offsets = [0, 0], sizes = [2, 32], strides = [1, 1]} : vector<2x128xf32> to vector<2x32xf32>
      %468 = vector.extract_strided_slice %466 {offsets = [0, 32], sizes = [2, 32], strides = [1, 1]} : vector<2x128xf32> to vector<2x32xf32>
      %469 = vector.extract_strided_slice %466 {offsets = [0, 64], sizes = [2, 32], strides = [1, 1]} : vector<2x128xf32> to vector<2x32xf32>
      %470 = vector.extract_strided_slice %466 {offsets = [0, 96], sizes = [2, 32], strides = [1, 1]} : vector<2x128xf32> to vector<2x32xf32>
      %471 = vector.extract_strided_slice %460 {offsets = [0, 128], sizes = [2, 32], strides = [1, 1]} : vector<2x160xf32> to vector<2x32xf32>
      %472 = math.tanh %471 : vector<2x32xf32>
      %473 = arith.mulf %467, %472 : vector<2x32xf32>
      %474 = vector.extract_strided_slice %458 {offsets = [0, 32], sizes = [2, 32], strides = [1, 1]} : vector<2x128xf32> to vector<2x32xf32>
      %475 = arith.mulf %468, %474 : vector<2x32xf32>
      %476 = arith.addf %473, %475 : vector<2x32xf32>
      %477 = vector.extract_strided_slice %458 {offsets = [0, 96], sizes = [2, 32], strides = [1, 1]} : vector<2x128xf32> to vector<2x32xf32>
      %478 = arith.mulf %469, %477 : vector<2x32xf32>
      %479 = arith.addf %476, %478 : vector<2x32xf32>
      %480 = math.tanh %479 : vector<2x32xf32>
      %481 = arith.mulf %470, %480 : vector<2x32xf32>
      %482 = tpu.concatenate %481, %479 in 1 : vector<2x32xf32>, vector<2x32xf32> -> vector<2x64xf32>
      %c0_i32_229 = arith.constant 0 : i32
      %483 = arith.addi %c0_i32_229, %309 : i32
      %c2_i32_230 = arith.constant 2 : i32
      %484 = arith.subi %483, %c2_i32_230 : i32
      %485 = arith.extui %325 : i1 to i32
      %c0_i32_231 = arith.constant 0 : i32
      %486 = arith.cmpi ne, %485, %c0_i32_231 : i32
      scf.if %486 {
        %491 = vector.extract_strided_slice %482 {offsets = [0, 0], sizes = [1, 64], strides = [1, 1]} : vector<2x64xf32> to vector<1x64xf32>
        %492 = arith.index_cast %484 : i32 to index
        %c0_235 = arith.constant 0 : index
        %493 = vector.load %arg10[%492, %c0_235] : memref<20x64xf32, #tpu.memory_space<vmem>>, vector<1x64xf32>
        tpu.vector_store %arg10[%492, %c0_235], %491 {strides = array<i32>} : memref<20x64xf32, #tpu.memory_space<vmem>>, vector<1x64xf32>,
      } else {
      }
      %c10_i32_232 = arith.constant 10 : i32
      %487 = arith.addi %c10_i32_232, %318 : i32
      %c2_i32_233 = arith.constant 2 : i32
      %488 = arith.subi %487, %c2_i32_233 : i32
      %489 = arith.extui %326 : i1 to i32
      %c0_i32_234 = arith.constant 0 : i32
      %490 = arith.cmpi ne, %489, %c0_i32_234 : i32
      scf.if %490 {
        %491 = vector.extract_strided_slice %482 {offsets = [1, 0], sizes = [1, 64], strides = [1, 1]} : vector<2x64xf32> to vector<1x64xf32>
        %492 = arith.index_cast %488 : i32 to index
        %c0_235 = arith.constant 0 : index
        %493 = vector.load %arg10[%492, %c0_235] : memref<20x64xf32, #tpu.memory_space<vmem>>, vector<1x64xf32>
        tpu.vector_store %arg10[%492, %c0_235], %491 {strides = array<i32>} : memref<20x64xf32, #tpu.memory_space<vmem>>, vector<1x64xf32>,
      } else {
      }
    } else {
    }
    %c1_i32_163 = arith.constant 1 : i32
    %330 = arith.subi %311, %c1_i32_163 : i32
    %331 = arith.extui %323 : i1 to i32
    %c0_i32_164 = arith.constant 0 : i32
    %332 = arith.cmpi ne, %331, %c0_i32_164 : i32
    scf.if %332 {
      %c0_i32_215 = arith.constant 0 : i32
      %440 = arith.addi %c0_i32_215, %330 : i32
      %441 = arith.index_cast %440 : i32 to index
      %c0_216 = arith.constant 0 : index
      %442 = vector.load %arg9[%441, %c0_216] : memref<16x64xf32, #tpu.memory_space<vmem>>, vector<1x64xf32>
      %c0_i32_217 = arith.constant 0 : i32
      %443 = arith.addi %c0_i32_217, %309 : i32
      %444 = arith.index_cast %443 : i32 to index
      %c0_218 = arith.constant 0 : index
      %445 = vector.load %arg10[%444, %c0_218] : memref<20x64xf32, #tpu.memory_space<vmem>>, vector<1x64xf32>
      tpu.vector_store %arg10[%444, %c0_218], %442 {strides = array<i32>} : memref<20x64xf32, #tpu.memory_space<vmem>>, vector<1x64xf32>,
    } else {
    }
    %333 = arith.extui %323 : i1 to i32
    %334 = arith.addi %309, %333 : i32
    %335 = arith.extui %325 : i1 to i32
    %336 = arith.subi %334, %335 : i32
    %337 = arith.extui %323 : i1 to i32
    %338 = arith.subi %311, %337 : i32
    %c1_i32_165 = arith.constant 1 : i32
    %339 = arith.subi %320, %c1_i32_165 : i32
    %340 = arith.extui %324 : i1 to i32
    %c0_i32_166 = arith.constant 0 : i32
    %341 = arith.cmpi ne, %340, %c0_i32_166 : i32
    scf.if %341 {
      %c8_i32_215 = arith.constant 8 : i32
      %440 = arith.addi %c8_i32_215, %339 : i32
      %441 = arith.index_cast %440 : i32 to index
      %c0_216 = arith.constant 0 : index
      %442 = vector.load %arg9[%441, %c0_216] : memref<16x64xf32, #tpu.memory_space<vmem>>, vector<1x64xf32>
      %c10_i32_217 = arith.constant 10 : i32
      %443 = arith.addi %c10_i32_217, %318 : i32
      %444 = arith.index_cast %443 : i32 to index
      %c0_218 = arith.constant 0 : index
      %445 = vector.load %arg10[%444, %c0_218] : memref<20x64xf32, #tpu.memory_space<vmem>>, vector<1x64xf32>
      tpu.vector_store %arg10[%444, %c0_218], %442 {strides = array<i32>} : memref<20x64xf32, #tpu.memory_space<vmem>>, vector<1x64xf32>,
    } else {
    }
    %342 = arith.extui %324 : i1 to i32
    %343 = arith.addi %318, %342 : i32
    %344 = arith.extui %326 : i1 to i32
    %345 = arith.subi %343, %344 : i32
    %346 = arith.extui %324 : i1 to i32
    %347 = arith.subi %320, %346 : i32
    %c0_167 = arith.constant 0 : index
    %c12 = arith.constant 12 : index
    %348 = memref.load %arg1[%c0_167, %c12] : memref<2x15xi32, #tpu.memory_space<smem>>
    %c1_168 = arith.constant 1 : index
    %c12_169 = arith.constant 12 : index
    %349 = memref.load %arg1[%c1_168, %c12_169] : memref<2x15xi32, #tpu.memory_space<smem>>
    %c0_i32_170 = arith.constant 0 : i32
    %350 = arith.cmpi eq, %348, %c0_i32_170 : i32
    %c0_i32_171 = arith.constant 0 : i32
    %351 = arith.cmpi eq, %349, %c0_i32_171 : i32
    %c1_i32_172 = arith.constant 1 : i32
    %352 = arith.cmpi eq, %348, %c1_i32_172 : i32
    %c1_i32_173 = arith.constant 1 : i32
    %353 = arith.cmpi eq, %349, %c1_i32_173 : i32
    %354 = arith.ori %352, %353 : i1
    %355 = arith.extui %354 : i1 to i32
    %c0_i32_174 = arith.constant 0 : i32
    %356 = arith.cmpi ne, %355, %c0_i32_174 : i32
    scf.if %356 {
      %c0_i32_215 = arith.constant 0 : i32
      %440 = arith.addi %c0_i32_215, %336 : i32
      %c2_i32_216 = arith.constant 2 : i32
      %441 = arith.subi %440, %c2_i32_216 : i32
      %442 = arith.index_cast %441 : i32 to index
      %c0_217 = arith.constant 0 : index
      %443 = vector.load %arg10[%442, %c0_217] : memref<20x64xf32, #tpu.memory_space<vmem>>, vector<1x64xf32>
      %c0_i32_218 = arith.constant 0 : i32
      %444 = arith.addi %c0_i32_218, %336 : i32
      %c1_i32_219 = arith.constant 1 : i32
      %445 = arith.subi %444, %c1_i32_219 : i32
      %446 = arith.index_cast %445 : i32 to index
      %c0_220 = arith.constant 0 : index
      %447 = vector.load %arg10[%446, %c0_220] : memref<20x64xf32, #tpu.memory_space<vmem>>, vector<1x64xf32>
      %448 = tpu.concatenate %443, %447 in 1 : vector<1x64xf32>, vector<1x64xf32> -> vector<1x128xf32>
      %c10_i32_221 = arith.constant 10 : i32
      %449 = arith.addi %c10_i32_221, %345 : i32
      %c2_i32_222 = arith.constant 2 : i32
      %450 = arith.subi %449, %c2_i32_222 : i32
      %451 = arith.index_cast %450 : i32 to index
      %c0_223 = arith.constant 0 : index
      %452 = vector.load %arg10[%451, %c0_223] : memref<20x64xf32, #tpu.memory_space<vmem>>, vector<1x64xf32>
      %c10_i32_224 = arith.constant 10 : i32
      %453 = arith.addi %c10_i32_224, %345 : i32
      %c1_i32_225 = arith.constant 1 : i32
      %454 = arith.subi %453, %c1_i32_225 : i32
      %455 = arith.index_cast %454 : i32 to index
      %c0_226 = arith.constant 0 : index
      %456 = vector.load %arg10[%455, %c0_226] : memref<20x64xf32, #tpu.memory_space<vmem>>, vector<1x64xf32>
      %457 = tpu.concatenate %452, %456 in 1 : vector<1x64xf32>, vector<1x64xf32> -> vector<1x128xf32>
      %458 = tpu.concatenate %448, %457 in 0 : vector<1x128xf32>, vector<1x128xf32> -> vector<2x128xf32>
      %cst_227 = arith.constant dense<0.000000e+00> : vector<2x160xf32>
      %459 = tpu.matmul %458, %20, %cst_227 {dimension_numbers = #tpu.dot_dimension_numbers<[1], [0], [0], [1], [0, 0, 1, 1], [], []>} : vector<2x128xf32>, vector<128x160xf32>, vector<2x160xf32> -> vector<2x160xf32>
      %460 = arith.addf %459, %23 : vector<2x160xf32>
      %461 = vector.extract_strided_slice %460 {offsets = [0, 0], sizes = [2, 128], strides = [1, 1]} : vector<2x160xf32> to vector<2x128xf32>
      %462 = arith.negf %461 : vector<2x128xf32>
      %463 = math.exp %462 : vector<2x128xf32>
      %cst_228 = arith.constant 1.000000e+00 : f32
      %464 = vector.broadcast %cst_228 : f32 to vector<2x128xf32>
      %465 = arith.addf %464, %463 : vector<2x128xf32>
      %466 = arith.divf %464, %465 : vector<2x128xf32>
      %467 = vector.extract_strided_slice %466 {offsets = [0, 0], sizes = [2, 32], strides = [1, 1]} : vector<2x128xf32> to vector<2x32xf32>
      %468 = vector.extract_strided_slice %466 {offsets = [0, 32], sizes = [2, 32], strides = [1, 1]} : vector<2x128xf32> to vector<2x32xf32>
      %469 = vector.extract_strided_slice %466 {offsets = [0, 64], sizes = [2, 32], strides = [1, 1]} : vector<2x128xf32> to vector<2x32xf32>
      %470 = vector.extract_strided_slice %466 {offsets = [0, 96], sizes = [2, 32], strides = [1, 1]} : vector<2x128xf32> to vector<2x32xf32>
      %471 = vector.extract_strided_slice %460 {offsets = [0, 128], sizes = [2, 32], strides = [1, 1]} : vector<2x160xf32> to vector<2x32xf32>
      %472 = math.tanh %471 : vector<2x32xf32>
      %473 = arith.mulf %467, %472 : vector<2x32xf32>
      %474 = vector.extract_strided_slice %458 {offsets = [0, 32], sizes = [2, 32], strides = [1, 1]} : vector<2x128xf32> to vector<2x32xf32>
      %475 = arith.mulf %468, %474 : vector<2x32xf32>
      %476 = arith.addf %473, %475 : vector<2x32xf32>
      %477 = vector.extract_strided_slice %458 {offsets = [0, 96], sizes = [2, 32], strides = [1, 1]} : vector<2x128xf32> to vector<2x32xf32>
      %478 = arith.mulf %469, %477 : vector<2x32xf32>
      %479 = arith.addf %476, %478 : vector<2x32xf32>
      %480 = math.tanh %479 : vector<2x32xf32>
      %481 = arith.mulf %470, %480 : vector<2x32xf32>
      %482 = tpu.concatenate %481, %479 in 1 : vector<2x32xf32>, vector<2x32xf32> -> vector<2x64xf32>
      %c0_i32_229 = arith.constant 0 : i32
      %483 = arith.addi %c0_i32_229, %336 : i32
      %c2_i32_230 = arith.constant 2 : i32
      %484 = arith.subi %483, %c2_i32_230 : i32
      %485 = arith.extui %352 : i1 to i32
      %c0_i32_231 = arith.constant 0 : i32
      %486 = arith.cmpi ne, %485, %c0_i32_231 : i32
      scf.if %486 {
        %491 = vector.extract_strided_slice %482 {offsets = [0, 0], sizes = [1, 64], strides = [1, 1]} : vector<2x64xf32> to vector<1x64xf32>
        %492 = arith.index_cast %484 : i32 to index
        %c0_235 = arith.constant 0 : index
        %493 = vector.load %arg10[%492, %c0_235] : memref<20x64xf32, #tpu.memory_space<vmem>>, vector<1x64xf32>
        tpu.vector_store %arg10[%492, %c0_235], %491 {strides = array<i32>} : memref<20x64xf32, #tpu.memory_space<vmem>>, vector<1x64xf32>,
      } else {
      }
      %c10_i32_232 = arith.constant 10 : i32
      %487 = arith.addi %c10_i32_232, %345 : i32
      %c2_i32_233 = arith.constant 2 : i32
      %488 = arith.subi %487, %c2_i32_233 : i32
      %489 = arith.extui %353 : i1 to i32
      %c0_i32_234 = arith.constant 0 : i32
      %490 = arith.cmpi ne, %489, %c0_i32_234 : i32
      scf.if %490 {
        %491 = vector.extract_strided_slice %482 {offsets = [1, 0], sizes = [1, 64], strides = [1, 1]} : vector<2x64xf32> to vector<1x64xf32>
        %492 = arith.index_cast %488 : i32 to index
        %c0_235 = arith.constant 0 : index
        %493 = vector.load %arg10[%492, %c0_235] : memref<20x64xf32, #tpu.memory_space<vmem>>, vector<1x64xf32>
        tpu.vector_store %arg10[%492, %c0_235], %491 {strides = array<i32>} : memref<20x64xf32, #tpu.memory_space<vmem>>, vector<1x64xf32>,
      } else {
      }
    } else {
    }
    %c1_i32_175 = arith.constant 1 : i32
    %357 = arith.subi %338, %c1_i32_175 : i32
    %358 = arith.extui %350 : i1 to i32
    %c0_i32_176 = arith.constant 0 : i32
    %359 = arith.cmpi ne, %358, %c0_i32_176 : i32
    scf.if %359 {
      %c0_i32_215 = arith.constant 0 : i32
      %440 = arith.addi %c0_i32_215, %357 : i32
      %441 = arith.index_cast %440 : i32 to index
      %c0_216 = arith.constant 0 : index
      %442 = vector.load %arg9[%441, %c0_216] : memref<16x64xf32, #tpu.memory_space<vmem>>, vector<1x64xf32>
      %c0_i32_217 = arith.constant 0 : i32
      %443 = arith.addi %c0_i32_217, %336 : i32
      %444 = arith.index_cast %443 : i32 to index
      %c0_218 = arith.constant 0 : index
      %445 = vector.load %arg10[%444, %c0_218] : memref<20x64xf32, #tpu.memory_space<vmem>>, vector<1x64xf32>
      tpu.vector_store %arg10[%444, %c0_218], %442 {strides = array<i32>} : memref<20x64xf32, #tpu.memory_space<vmem>>, vector<1x64xf32>,
    } else {
    }
    %360 = arith.extui %350 : i1 to i32
    %361 = arith.addi %336, %360 : i32
    %362 = arith.extui %352 : i1 to i32
    %363 = arith.subi %361, %362 : i32
    %364 = arith.extui %350 : i1 to i32
    %365 = arith.subi %338, %364 : i32
    %c1_i32_177 = arith.constant 1 : i32
    %366 = arith.subi %347, %c1_i32_177 : i32
    %367 = arith.extui %351 : i1 to i32
    %c0_i32_178 = arith.constant 0 : i32
    %368 = arith.cmpi ne, %367, %c0_i32_178 : i32
    scf.if %368 {
      %c8_i32_215 = arith.constant 8 : i32
      %440 = arith.addi %c8_i32_215, %366 : i32
      %441 = arith.index_cast %440 : i32 to index
      %c0_216 = arith.constant 0 : index
      %442 = vector.load %arg9[%441, %c0_216] : memref<16x64xf32, #tpu.memory_space<vmem>>, vector<1x64xf32>
      %c10_i32_217 = arith.constant 10 : i32
      %443 = arith.addi %c10_i32_217, %345 : i32
      %444 = arith.index_cast %443 : i32 to index
      %c0_218 = arith.constant 0 : index
      %445 = vector.load %arg10[%444, %c0_218] : memref<20x64xf32, #tpu.memory_space<vmem>>, vector<1x64xf32>
      tpu.vector_store %arg10[%444, %c0_218], %442 {strides = array<i32>} : memref<20x64xf32, #tpu.memory_space<vmem>>, vector<1x64xf32>,
    } else {
    }
    %369 = arith.extui %351 : i1 to i32
    %370 = arith.addi %345, %369 : i32
    %371 = arith.extui %353 : i1 to i32
    %372 = arith.subi %370, %371 : i32
    %373 = arith.extui %351 : i1 to i32
    %374 = arith.subi %347, %373 : i32
    %c0_179 = arith.constant 0 : index
    %c13 = arith.constant 13 : index
    %375 = memref.load %arg1[%c0_179, %c13] : memref<2x15xi32, #tpu.memory_space<smem>>
    %c1_180 = arith.constant 1 : index
    %c13_181 = arith.constant 13 : index
    %376 = memref.load %arg1[%c1_180, %c13_181] : memref<2x15xi32, #tpu.memory_space<smem>>
    %c0_i32_182 = arith.constant 0 : i32
    %377 = arith.cmpi eq, %375, %c0_i32_182 : i32
    %c0_i32_183 = arith.constant 0 : i32
    %378 = arith.cmpi eq, %376, %c0_i32_183 : i32
    %c1_i32_184 = arith.constant 1 : i32
    %379 = arith.cmpi eq, %375, %c1_i32_184 : i32
    %c1_i32_185 = arith.constant 1 : i32
    %380 = arith.cmpi eq, %376, %c1_i32_185 : i32
    %381 = arith.ori %379, %380 : i1
    %382 = arith.extui %381 : i1 to i32
    %c0_i32_186 = arith.constant 0 : i32
    %383 = arith.cmpi ne, %382, %c0_i32_186 : i32
    scf.if %383 {
      %c0_i32_215 = arith.constant 0 : i32
      %440 = arith.addi %c0_i32_215, %363 : i32
      %c2_i32_216 = arith.constant 2 : i32
      %441 = arith.subi %440, %c2_i32_216 : i32
      %442 = arith.index_cast %441 : i32 to index
      %c0_217 = arith.constant 0 : index
      %443 = vector.load %arg10[%442, %c0_217] : memref<20x64xf32, #tpu.memory_space<vmem>>, vector<1x64xf32>
      %c0_i32_218 = arith.constant 0 : i32
      %444 = arith.addi %c0_i32_218, %363 : i32
      %c1_i32_219 = arith.constant 1 : i32
      %445 = arith.subi %444, %c1_i32_219 : i32
      %446 = arith.index_cast %445 : i32 to index
      %c0_220 = arith.constant 0 : index
      %447 = vector.load %arg10[%446, %c0_220] : memref<20x64xf32, #tpu.memory_space<vmem>>, vector<1x64xf32>
      %448 = tpu.concatenate %443, %447 in 1 : vector<1x64xf32>, vector<1x64xf32> -> vector<1x128xf32>
      %c10_i32_221 = arith.constant 10 : i32
      %449 = arith.addi %c10_i32_221, %372 : i32
      %c2_i32_222 = arith.constant 2 : i32
      %450 = arith.subi %449, %c2_i32_222 : i32
      %451 = arith.index_cast %450 : i32 to index
      %c0_223 = arith.constant 0 : index
      %452 = vector.load %arg10[%451, %c0_223] : memref<20x64xf32, #tpu.memory_space<vmem>>, vector<1x64xf32>
      %c10_i32_224 = arith.constant 10 : i32
      %453 = arith.addi %c10_i32_224, %372 : i32
      %c1_i32_225 = arith.constant 1 : i32
      %454 = arith.subi %453, %c1_i32_225 : i32
      %455 = arith.index_cast %454 : i32 to index
      %c0_226 = arith.constant 0 : index
      %456 = vector.load %arg10[%455, %c0_226] : memref<20x64xf32, #tpu.memory_space<vmem>>, vector<1x64xf32>
      %457 = tpu.concatenate %452, %456 in 1 : vector<1x64xf32>, vector<1x64xf32> -> vector<1x128xf32>
      %458 = tpu.concatenate %448, %457 in 0 : vector<1x128xf32>, vector<1x128xf32> -> vector<2x128xf32>
      %cst_227 = arith.constant dense<0.000000e+00> : vector<2x160xf32>
      %459 = tpu.matmul %458, %20, %cst_227 {dimension_numbers = #tpu.dot_dimension_numbers<[1], [0], [0], [1], [0, 0, 1, 1], [], []>} : vector<2x128xf32>, vector<128x160xf32>, vector<2x160xf32> -> vector<2x160xf32>
      %460 = arith.addf %459, %23 : vector<2x160xf32>
      %461 = vector.extract_strided_slice %460 {offsets = [0, 0], sizes = [2, 128], strides = [1, 1]} : vector<2x160xf32> to vector<2x128xf32>
      %462 = arith.negf %461 : vector<2x128xf32>
      %463 = math.exp %462 : vector<2x128xf32>
      %cst_228 = arith.constant 1.000000e+00 : f32
      %464 = vector.broadcast %cst_228 : f32 to vector<2x128xf32>
      %465 = arith.addf %464, %463 : vector<2x128xf32>
      %466 = arith.divf %464, %465 : vector<2x128xf32>
      %467 = vector.extract_strided_slice %466 {offsets = [0, 0], sizes = [2, 32], strides = [1, 1]} : vector<2x128xf32> to vector<2x32xf32>
      %468 = vector.extract_strided_slice %466 {offsets = [0, 32], sizes = [2, 32], strides = [1, 1]} : vector<2x128xf32> to vector<2x32xf32>
      %469 = vector.extract_strided_slice %466 {offsets = [0, 64], sizes = [2, 32], strides = [1, 1]} : vector<2x128xf32> to vector<2x32xf32>
      %470 = vector.extract_strided_slice %466 {offsets = [0, 96], sizes = [2, 32], strides = [1, 1]} : vector<2x128xf32> to vector<2x32xf32>
      %471 = vector.extract_strided_slice %460 {offsets = [0, 128], sizes = [2, 32], strides = [1, 1]} : vector<2x160xf32> to vector<2x32xf32>
      %472 = math.tanh %471 : vector<2x32xf32>
      %473 = arith.mulf %467, %472 : vector<2x32xf32>
      %474 = vector.extract_strided_slice %458 {offsets = [0, 32], sizes = [2, 32], strides = [1, 1]} : vector<2x128xf32> to vector<2x32xf32>
      %475 = arith.mulf %468, %474 : vector<2x32xf32>
      %476 = arith.addf %473, %475 : vector<2x32xf32>
      %477 = vector.extract_strided_slice %458 {offsets = [0, 96], sizes = [2, 32], strides = [1, 1]} : vector<2x128xf32> to vector<2x32xf32>
      %478 = arith.mulf %469, %477 : vector<2x32xf32>
      %479 = arith.addf %476, %478 : vector<2x32xf32>
      %480 = math.tanh %479 : vector<2x32xf32>
      %481 = arith.mulf %470, %480 : vector<2x32xf32>
      %482 = tpu.concatenate %481, %479 in 1 : vector<2x32xf32>, vector<2x32xf32> -> vector<2x64xf32>
      %c0_i32_229 = arith.constant 0 : i32
      %483 = arith.addi %c0_i32_229, %363 : i32
      %c2_i32_230 = arith.constant 2 : i32
      %484 = arith.subi %483, %c2_i32_230 : i32
      %485 = arith.extui %379 : i1 to i32
      %c0_i32_231 = arith.constant 0 : i32
      %486 = arith.cmpi ne, %485, %c0_i32_231 : i32
      scf.if %486 {
        %491 = vector.extract_strided_slice %482 {offsets = [0, 0], sizes = [1, 64], strides = [1, 1]} : vector<2x64xf32> to vector<1x64xf32>
        %492 = arith.index_cast %484 : i32 to index
        %c0_235 = arith.constant 0 : index
        %493 = vector.load %arg10[%492, %c0_235] : memref<20x64xf32, #tpu.memory_space<vmem>>, vector<1x64xf32>
        tpu.vector_store %arg10[%492, %c0_235], %491 {strides = array<i32>} : memref<20x64xf32, #tpu.memory_space<vmem>>, vector<1x64xf32>,
      } else {
      }
      %c10_i32_232 = arith.constant 10 : i32
      %487 = arith.addi %c10_i32_232, %372 : i32
      %c2_i32_233 = arith.constant 2 : i32
      %488 = arith.subi %487, %c2_i32_233 : i32
      %489 = arith.extui %380 : i1 to i32
      %c0_i32_234 = arith.constant 0 : i32
      %490 = arith.cmpi ne, %489, %c0_i32_234 : i32
      scf.if %490 {
        %491 = vector.extract_strided_slice %482 {offsets = [1, 0], sizes = [1, 64], strides = [1, 1]} : vector<2x64xf32> to vector<1x64xf32>
        %492 = arith.index_cast %488 : i32 to index
        %c0_235 = arith.constant 0 : index
        %493 = vector.load %arg10[%492, %c0_235] : memref<20x64xf32, #tpu.memory_space<vmem>>, vector<1x64xf32>
        tpu.vector_store %arg10[%492, %c0_235], %491 {strides = array<i32>} : memref<20x64xf32, #tpu.memory_space<vmem>>, vector<1x64xf32>,
      } else {
      }
    } else {
    }
    %c1_i32_187 = arith.constant 1 : i32
    %384 = arith.subi %365, %c1_i32_187 : i32
    %385 = arith.extui %377 : i1 to i32
    %c0_i32_188 = arith.constant 0 : i32
    %386 = arith.cmpi ne, %385, %c0_i32_188 : i32
    scf.if %386 {
      %c0_i32_215 = arith.constant 0 : i32
      %440 = arith.addi %c0_i32_215, %384 : i32
      %441 = arith.index_cast %440 : i32 to index
      %c0_216 = arith.constant 0 : index
      %442 = vector.load %arg9[%441, %c0_216] : memref<16x64xf32, #tpu.memory_space<vmem>>, vector<1x64xf32>
      %c0_i32_217 = arith.constant 0 : i32
      %443 = arith.addi %c0_i32_217, %363 : i32
      %444 = arith.index_cast %443 : i32 to index
      %c0_218 = arith.constant 0 : index
      %445 = vector.load %arg10[%444, %c0_218] : memref<20x64xf32, #tpu.memory_space<vmem>>, vector<1x64xf32>
      tpu.vector_store %arg10[%444, %c0_218], %442 {strides = array<i32>} : memref<20x64xf32, #tpu.memory_space<vmem>>, vector<1x64xf32>,
    } else {
    }
    %387 = arith.extui %377 : i1 to i32
    %388 = arith.addi %363, %387 : i32
    %389 = arith.extui %379 : i1 to i32
    %390 = arith.subi %388, %389 : i32
    %391 = arith.extui %377 : i1 to i32
    %392 = arith.subi %365, %391 : i32
    %c1_i32_189 = arith.constant 1 : i32
    %393 = arith.subi %374, %c1_i32_189 : i32
    %394 = arith.extui %378 : i1 to i32
    %c0_i32_190 = arith.constant 0 : i32
    %395 = arith.cmpi ne, %394, %c0_i32_190 : i32
    scf.if %395 {
      %c8_i32_215 = arith.constant 8 : i32
      %440 = arith.addi %c8_i32_215, %393 : i32
      %441 = arith.index_cast %440 : i32 to index
      %c0_216 = arith.constant 0 : index
      %442 = vector.load %arg9[%441, %c0_216] : memref<16x64xf32, #tpu.memory_space<vmem>>, vector<1x64xf32>
      %c10_i32_217 = arith.constant 10 : i32
      %443 = arith.addi %c10_i32_217, %372 : i32
      %444 = arith.index_cast %443 : i32 to index
      %c0_218 = arith.constant 0 : index
      %445 = vector.load %arg10[%444, %c0_218] : memref<20x64xf32, #tpu.memory_space<vmem>>, vector<1x64xf32>
      tpu.vector_store %arg10[%444, %c0_218], %442 {strides = array<i32>} : memref<20x64xf32, #tpu.memory_space<vmem>>, vector<1x64xf32>,
    } else {
    }
    %396 = arith.extui %378 : i1 to i32
    %397 = arith.addi %372, %396 : i32
    %398 = arith.extui %380 : i1 to i32
    %399 = arith.subi %397, %398 : i32
    %400 = arith.extui %378 : i1 to i32
    %401 = arith.subi %374, %400 : i32
    %c0_191 = arith.constant 0 : index
    %c14 = arith.constant 14 : index
    %402 = memref.load %arg1[%c0_191, %c14] : memref<2x15xi32, #tpu.memory_space<smem>>
    %c1_192 = arith.constant 1 : index
    %c14_193 = arith.constant 14 : index
    %403 = memref.load %arg1[%c1_192, %c14_193] : memref<2x15xi32, #tpu.memory_space<smem>>
    %c0_i32_194 = arith.constant 0 : i32
    %404 = arith.cmpi eq, %402, %c0_i32_194 : i32
    %c0_i32_195 = arith.constant 0 : i32
    %405 = arith.cmpi eq, %403, %c0_i32_195 : i32
    %c1_i32_196 = arith.constant 1 : i32
    %406 = arith.cmpi eq, %402, %c1_i32_196 : i32
    %c1_i32_197 = arith.constant 1 : i32
    %407 = arith.cmpi eq, %403, %c1_i32_197 : i32
    %408 = arith.ori %406, %407 : i1
    %409 = arith.extui %408 : i1 to i32
    %c0_i32_198 = arith.constant 0 : i32
    %410 = arith.cmpi ne, %409, %c0_i32_198 : i32
    scf.if %410 {
      %c0_i32_215 = arith.constant 0 : i32
      %440 = arith.addi %c0_i32_215, %390 : i32
      %c2_i32_216 = arith.constant 2 : i32
      %441 = arith.subi %440, %c2_i32_216 : i32
      %442 = arith.index_cast %441 : i32 to index
      %c0_217 = arith.constant 0 : index
      %443 = vector.load %arg10[%442, %c0_217] : memref<20x64xf32, #tpu.memory_space<vmem>>, vector<1x64xf32>
      %c0_i32_218 = arith.constant 0 : i32
      %444 = arith.addi %c0_i32_218, %390 : i32
      %c1_i32_219 = arith.constant 1 : i32
      %445 = arith.subi %444, %c1_i32_219 : i32
      %446 = arith.index_cast %445 : i32 to index
      %c0_220 = arith.constant 0 : index
      %447 = vector.load %arg10[%446, %c0_220] : memref<20x64xf32, #tpu.memory_space<vmem>>, vector<1x64xf32>
      %448 = tpu.concatenate %443, %447 in 1 : vector<1x64xf32>, vector<1x64xf32> -> vector<1x128xf32>
      %c10_i32_221 = arith.constant 10 : i32
      %449 = arith.addi %c10_i32_221, %399 : i32
      %c2_i32_222 = arith.constant 2 : i32
      %450 = arith.subi %449, %c2_i32_222 : i32
      %451 = arith.index_cast %450 : i32 to index
      %c0_223 = arith.constant 0 : index
      %452 = vector.load %arg10[%451, %c0_223] : memref<20x64xf32, #tpu.memory_space<vmem>>, vector<1x64xf32>
      %c10_i32_224 = arith.constant 10 : i32
      %453 = arith.addi %c10_i32_224, %399 : i32
      %c1_i32_225 = arith.constant 1 : i32
      %454 = arith.subi %453, %c1_i32_225 : i32
      %455 = arith.index_cast %454 : i32 to index
      %c0_226 = arith.constant 0 : index
      %456 = vector.load %arg10[%455, %c0_226] : memref<20x64xf32, #tpu.memory_space<vmem>>, vector<1x64xf32>
      %457 = tpu.concatenate %452, %456 in 1 : vector<1x64xf32>, vector<1x64xf32> -> vector<1x128xf32>
      %458 = tpu.concatenate %448, %457 in 0 : vector<1x128xf32>, vector<1x128xf32> -> vector<2x128xf32>
      %cst_227 = arith.constant dense<0.000000e+00> : vector<2x160xf32>
      %459 = tpu.matmul %458, %20, %cst_227 {dimension_numbers = #tpu.dot_dimension_numbers<[1], [0], [0], [1], [0, 0, 1, 1], [], []>} : vector<2x128xf32>, vector<128x160xf32>, vector<2x160xf32> -> vector<2x160xf32>
      %460 = arith.addf %459, %23 : vector<2x160xf32>
      %461 = vector.extract_strided_slice %460 {offsets = [0, 0], sizes = [2, 128], strides = [1, 1]} : vector<2x160xf32> to vector<2x128xf32>
      %462 = arith.negf %461 : vector<2x128xf32>
      %463 = math.exp %462 : vector<2x128xf32>
      %cst_228 = arith.constant 1.000000e+00 : f32
      %464 = vector.broadcast %cst_228 : f32 to vector<2x128xf32>
      %465 = arith.addf %464, %463 : vector<2x128xf32>
      %466 = arith.divf %464, %465 : vector<2x128xf32>
      %467 = vector.extract_strided_slice %466 {offsets = [0, 0], sizes = [2, 32], strides = [1, 1]} : vector<2x128xf32> to vector<2x32xf32>
      %468 = vector.extract_strided_slice %466 {offsets = [0, 32], sizes = [2, 32], strides = [1, 1]} : vector<2x128xf32> to vector<2x32xf32>
      %469 = vector.extract_strided_slice %466 {offsets = [0, 64], sizes = [2, 32], strides = [1, 1]} : vector<2x128xf32> to vector<2x32xf32>
      %470 = vector.extract_strided_slice %466 {offsets = [0, 96], sizes = [2, 32], strides = [1, 1]} : vector<2x128xf32> to vector<2x32xf32>
      %471 = vector.extract_strided_slice %460 {offsets = [0, 128], sizes = [2, 32], strides = [1, 1]} : vector<2x160xf32> to vector<2x32xf32>
      %472 = math.tanh %471 : vector<2x32xf32>
      %473 = arith.mulf %467, %472 : vector<2x32xf32>
      %474 = vector.extract_strided_slice %458 {offsets = [0, 32], sizes = [2, 32], strides = [1, 1]} : vector<2x128xf32> to vector<2x32xf32>
      %475 = arith.mulf %468, %474 : vector<2x32xf32>
      %476 = arith.addf %473, %475 : vector<2x32xf32>
      %477 = vector.extract_strided_slice %458 {offsets = [0, 96], sizes = [2, 32], strides = [1, 1]} : vector<2x128xf32> to vector<2x32xf32>
      %478 = arith.mulf %469, %477 : vector<2x32xf32>
      %479 = arith.addf %476, %478 : vector<2x32xf32>
      %480 = math.tanh %479 : vector<2x32xf32>
      %481 = arith.mulf %470, %480 : vector<2x32xf32>
      %482 = tpu.concatenate %481, %479 in 1 : vector<2x32xf32>, vector<2x32xf32> -> vector<2x64xf32>
      %c0_i32_229 = arith.constant 0 : i32
      %483 = arith.addi %c0_i32_229, %390 : i32
      %c2_i32_230 = arith.constant 2 : i32
      %484 = arith.subi %483, %c2_i32_230 : i32
      %485 = arith.extui %406 : i1 to i32
      %c0_i32_231 = arith.constant 0 : i32
      %486 = arith.cmpi ne, %485, %c0_i32_231 : i32
      scf.if %486 {
        %491 = vector.extract_strided_slice %482 {offsets = [0, 0], sizes = [1, 64], strides = [1, 1]} : vector<2x64xf32> to vector<1x64xf32>
        %492 = arith.index_cast %484 : i32 to index
        %c0_235 = arith.constant 0 : index
        %493 = vector.load %arg10[%492, %c0_235] : memref<20x64xf32, #tpu.memory_space<vmem>>, vector<1x64xf32>
        tpu.vector_store %arg10[%492, %c0_235], %491 {strides = array<i32>} : memref<20x64xf32, #tpu.memory_space<vmem>>, vector<1x64xf32>,
      } else {
      }
      %c10_i32_232 = arith.constant 10 : i32
      %487 = arith.addi %c10_i32_232, %399 : i32
      %c2_i32_233 = arith.constant 2 : i32
      %488 = arith.subi %487, %c2_i32_233 : i32
      %489 = arith.extui %407 : i1 to i32
      %c0_i32_234 = arith.constant 0 : i32
      %490 = arith.cmpi ne, %489, %c0_i32_234 : i32
      scf.if %490 {
        %491 = vector.extract_strided_slice %482 {offsets = [1, 0], sizes = [1, 64], strides = [1, 1]} : vector<2x64xf32> to vector<1x64xf32>
        %492 = arith.index_cast %488 : i32 to index
        %c0_235 = arith.constant 0 : index
        %493 = vector.load %arg10[%492, %c0_235] : memref<20x64xf32, #tpu.memory_space<vmem>>, vector<1x64xf32>
        tpu.vector_store %arg10[%492, %c0_235], %491 {strides = array<i32>} : memref<20x64xf32, #tpu.memory_space<vmem>>, vector<1x64xf32>,
      } else {
      }
    } else {
    }
    %c1_i32_199 = arith.constant 1 : i32
    %411 = arith.subi %392, %c1_i32_199 : i32
    %412 = arith.extui %404 : i1 to i32
    %c0_i32_200 = arith.constant 0 : i32
    %413 = arith.cmpi ne, %412, %c0_i32_200 : i32
    scf.if %413 {
      %c0_i32_215 = arith.constant 0 : i32
      %440 = arith.addi %c0_i32_215, %411 : i32
      %441 = arith.index_cast %440 : i32 to index
      %c0_216 = arith.constant 0 : index
      %442 = vector.load %arg9[%441, %c0_216] : memref<16x64xf32, #tpu.memory_space<vmem>>, vector<1x64xf32>
      %c0_i32_217 = arith.constant 0 : i32
      %443 = arith.addi %c0_i32_217, %390 : i32
      %444 = arith.index_cast %443 : i32 to index
      %c0_218 = arith.constant 0 : index
      %445 = vector.load %arg10[%444, %c0_218] : memref<20x64xf32, #tpu.memory_space<vmem>>, vector<1x64xf32>
      tpu.vector_store %arg10[%444, %c0_218], %442 {strides = array<i32>} : memref<20x64xf32, #tpu.memory_space<vmem>>, vector<1x64xf32>,
    } else {
    }
    %414 = arith.extui %404 : i1 to i32
    %415 = arith.addi %390, %414 : i32
    %416 = arith.extui %406 : i1 to i32
    %417 = arith.subi %415, %416 : i32
    %c1_i32_201 = arith.constant 1 : i32
    %418 = arith.subi %401, %c1_i32_201 : i32
    %419 = arith.extui %405 : i1 to i32
    %c0_i32_202 = arith.constant 0 : i32
    %420 = arith.cmpi ne, %419, %c0_i32_202 : i32
    scf.if %420 {
      %c8_i32_215 = arith.constant 8 : i32
      %440 = arith.addi %c8_i32_215, %418 : i32
      %441 = arith.index_cast %440 : i32 to index
      %c0_216 = arith.constant 0 : index
      %442 = vector.load %arg9[%441, %c0_216] : memref<16x64xf32, #tpu.memory_space<vmem>>, vector<1x64xf32>
      %c10_i32_217 = arith.constant 10 : i32
      %443 = arith.addi %c10_i32_217, %399 : i32
      %444 = arith.index_cast %443 : i32 to index
      %c0_218 = arith.constant 0 : index
      %445 = vector.load %arg10[%444, %c0_218] : memref<20x64xf32, #tpu.memory_space<vmem>>, vector<1x64xf32>
      tpu.vector_store %arg10[%444, %c0_218], %442 {strides = array<i32>} : memref<20x64xf32, #tpu.memory_space<vmem>>, vector<1x64xf32>,
    } else {
    }
    %421 = arith.extui %405 : i1 to i32
    %422 = arith.addi %399, %421 : i32
    %423 = arith.extui %407 : i1 to i32
    %424 = arith.subi %422, %423 : i32
    %c0_i32_203 = arith.constant 0 : i32
    %425 = arith.addi %c0_i32_203, %417 : i32
    %c1_i32_204 = arith.constant 1 : i32
    %426 = arith.subi %425, %c1_i32_204 : i32
    %427 = arith.index_cast %426 : i32 to index
    %c0_205 = arith.constant 0 : index
    %428 = vector.load %arg10[%427, %c0_205] : memref<20x64xf32, #tpu.memory_space<vmem>>, vector<1x64xf32>
    %c10_i32 = arith.constant 10 : i32
    %429 = arith.addi %c10_i32, %424 : i32
    %c1_i32_206 = arith.constant 1 : i32
    %430 = arith.subi %429, %c1_i32_206 : i32
    %431 = arith.index_cast %430 : i32 to index
    %c0_207 = arith.constant 0 : index
    %432 = vector.load %arg10[%431, %c0_207] : memref<20x64xf32, #tpu.memory_space<vmem>>, vector<1x64xf32>
    %433 = tpu.concatenate %428, %432 in 0 : vector<1x64xf32>, vector<1x64xf32> -> vector<2x64xf32>
    %c0_208 = arith.constant 0 : index
    %c0_209 = arith.constant 0 : index
    %434 = vector.load %arg6[%c0_208, %c0_209] : memref<64x5xf32, #tpu.memory_space<vmem>>, vector<64x5xf32>
    %cst_210 = arith.constant dense<0.000000e+00> : vector<2x5xf32>
    %435 = tpu.matmul %433, %434, %cst_210 {dimension_numbers = #tpu.dot_dimension_numbers<[1], [0], [0], [1], [0, 0, 1, 1], [], []>} : vector<2x64xf32>, vector<64x5xf32>, vector<2x5xf32> -> vector<2x5xf32>
    %c0_211 = arith.constant 0 : index
    %c0_212 = arith.constant 0 : index
    %436 = vector.load %arg7[%c0_211, %c0_212] : memref<1x5xf32, #tpu.memory_space<vmem>>, vector<1x5xf32>
    %437 = vector.broadcast %436 : vector<1x5xf32> to vector<2x5xf32>
    %438 = arith.addf %435, %437 : vector<2x5xf32>
    %c0_213 = arith.constant 0 : index
    %c0_214 = arith.constant 0 : index
    %439 = vector.load %arg8[%c0_213, %c0_214] : memref<2x5xf32, #tpu.memory_space<vmem>>, vector<2x5xf32>
    tpu.vector_store %arg8[%c0_213, %c0_214], %438 {strides = array<i32>} : memref<2x5xf32, #tpu.memory_space<vmem>>, vector<2x5xf32>,
    return
  }
}

</mosaic_0001>

<bundles_post_ra>
// kernel: tpu_custom_call.1
= control target key start
LH: loop header
LB: loop body
LE: loop exit
PB: predicated region body
PF: predicated region fallthrough
CT: control target
= control target key end

     0   :  { %13 = vsyncpa [#allocation6], 0  ;;  %s6195_s0 = inlined_call_operand.vmem [shape: f32[2,8,16], index: 0, kind: input, shape index: {}]   ;;  %s6196_s1 = inlined_call_operand.vmem [shape: s32[2,15], index: 1, kind: input, shape index: {}]   ;;  %s6197_s2 = inlined_call_operand.vmem [shape: f32[16,64], index: 2, kind: input, shape index: {}]   ;;  %s6198_s3 = inlined_call_operand.vmem [shape: f32[1,64], index: 3, kind: input, shape index: {}]   ;;  %s6199_s4 = inlined_call_operand.vmem [shape: f32[128,160], index: 4, kind: input, shape index: {}]   ;;  %s6200_s5 = inlined_call_operand.vmem [shape: f32[1,160], index: 5, kind: input, shape index: {}]   ;;  %s6201_s6 = inlined_call_operand.vmem [shape: f32[64,5], index: 6, kind: input, shape index: {}]   ;;  %s6202_s7 = inlined_call_operand.vmem [shape: f32[1,5], index: 7, kind: input, shape index: {}]   ;;  %s6203_s8 = inlined_call_operand.hbm [shape: f32[2,5], index: 8, kind: output, shape index: {}]  }
   0x1   :  { %14 = vsyncpa [#allocation5], 0  ;;  %s23_s29 = sshll.u32 %s6196_s1, 4  ;;  %s24_s29 = int_to_ptr.vmem [resolvable:$true] %s23_s29 }
   0x2   :  { %s4428_s30 = scalar_lea.vmem %s24_s29, 32  ;;  %p4433_p1 = scmp.lt.s32.totalorder %s24_s29, %s24_s29 }
   0x3   :  { %p4429_p0 = scmp.ne.s32.totalorder %s24_s29, %s4428_s30  ;;  %p4434_p2 = scmp.lt.s32.totalorder %s4428_s30, %s4428_s30 }
   0x5   :  { %p4435_p3 = por %p4434_p2, %p4433_p1 }
   0x7   :  { %p4436_p4 = pnand %p4435_p3, %p4429_p0 }
   0x9   :  { %4439 = shalt.err (!%p4436_p4)
}
   0xa   :  { %s4466_s9 = smov [#allocation4]  }
   0xb   :  { %26 = dma.vmem_to_smem %s24_s29, 32, %s4466_s9, [#allocation6]  }
   0xc   :  { %4462 = dma.done.wait [#allocation6], 32  }
   0xd   :  { %4463 = vsyncadd [#allocation6], 4294967264 }
   0xe   :  { %42 = sfence }
   0xf   :  { %v45_v0 = vld [vmem:[%s6197_s2] sm:$0xff]  ;;  %v46_v1 = vld [vmem:[%s6197_s2 + $0x8] sm:$0xff]  ;;  %vm54_vm0 = vcmask 130048   ;;  %s4467_s2 = smov 32   ;;  %vm179_vm1 = vcmask 523264   ;;  %vm184_vm2 = vcmask 519168   ;;  %v220_v19 = vlaneseq }
  0x10   :  { %v43_v2 = vld [vmem:[%s6195_s0] sm:$0xff]  ;;  %v3733_v3 = vpack.c.bf16 %v46_v1, %v45_v0  ;;  %v44_v4 = vld [vmem:[%s6195_s0 + $0x8] sm:$0xff]  ;;  %v4468_v18 = vmov 0.0   ;;  %s4608_s0 = sld [smem:[#allocation4]]  ;;  %v4630_v27 = vld [vmem:[%s6199_s4 + $0x10] sm:$0xff]  ;;  %s4469_s22 = smov 96  }
  0x11   :  { %3711 = vmatprep.mubr.msk.f32.mxu0 %vm54_vm0, %v43_v2  ;;  %v3289_v5 = vld [vmem:[%s6198_s3] ss:$0 sm:$0xff]  ;;  %182 = vst.msk [vmem:[#allocation3] sm:$0xff] %vm179_vm1, %v4468_v18  ;;  %183 = vst.msk [vmem:[#allocation3 + $0x8] sm:$0xff] %vm179_vm1, %v4468_v18  ;;  %s4610_s3 = sld [smem:[#allocation4 + $0x80]]  ;;  %v221_v20 = vshrl.u32 %v220_v19, 7 }
  0x12   :  { %3734 = vmatprep.subr.bf16.mxu0 %v3733_v3  ;;  %185 = vst.msk [vmem:[#allocation3 + $0x10] sm:$0xf] %vm184_vm2, %v4468_v18  ;;  %v218_v24 = vld [vmem:[%s6200_s5] sm:$0x3]  ;;  %v4625_v26 = vld [vmem:[%s6199_s4 + $0x8] sm:$0xff]  ;;  %v4641_v32 = vld [vmem:[%s6199_s4 + $0x18] sm:$0xff] }
  0x13   :  { %3736 = vmatpush3.bf16.msra.mxu0 %v3733_v3  ;;  %v222_v22 = vsub.s32 0, %v221_v20  ;;  %v226_v23 = vsub.s32 1, %v221_v20  ;;  %v4620_v25 = vld [vmem:[%s6199_s4] sm:$0xff]  ;;  %v4651_v34 = vld [vmem:[%s6199_s4 + $0x28] sm:$0xff]  ;;  %v4664_v36 = vld [vmem:[%s6199_s4 + $0x30] sm:$0xff]  ;;  %vm176_vm3 = vcmask 261120  }
  0x14   :  { %v4646_v33 = vld [vmem:[%s6199_s4 + $0x20] sm:$0xff]  ;;  %v4669_v37 = vld [vmem:[%s6199_s4 + $0x38] sm:$0xff]  ;;  %v4679_v39 = vld [vmem:[%s6199_s4 + $0x48] sm:$0xff] }
  0x15   :  { %v4632_v28 = vrot.slane %v218_v24, %v222_v22  ;;  %v4634_v29 = vrot.slane %v218_v24, %v226_v23  ;;  %v4674_v38 = vld [vmem:[%s6199_s4 + $0x40] sm:$0xff]  ;;  %v4684_v40 = vld [vmem:[%s6199_s4 + $0x50] sm:$0xff]  ;;  %v4689_v41 = vld [vmem:[%s6199_s4 + $0x58] sm:$0xff] }
  0x16   :  { %3712 = vmatmul.mubr.msk.f32.vlgmr.msra.gmra.mrb[0].mxu0 %vm54_vm0, %v44_v4  ;;  %p234_p5 = scmp.eq.s32.totalorder %s4608_s0, 1  ;;  %p232_p7 = scmp.eq.s32.totalorder %s4608_s0, 0  ;;  %v4694_v42 = vld [vmem:[%s6199_s4 + $0x60] sm:$0xff]  ;;  %v4699_v43 = vld [vmem:[%s6199_s4 + $0x68] sm:$0xff]  ;;  %v4704_v44 = vld [vmem:[%s6199_s4 + $0x70] sm:$0xff] }
  0x17   :  { %p235_p6 = scmp.eq.s32.totalorder %s4610_s3, 1  ;;  %p233_p8 = scmp.eq.s32.totalorder %s4610_s3, 0  ;;  %v4709_v46 = vld [vmem:[%s6199_s4 + $0x78] sm:$0xff]  ;;  %v4714_v47 = vld [vmem:[%s6199_s4 + $0x80] sm:$0xff]  ;;  %v4719_v48 = vld [vmem:[%s6199_s4 + $0x88] sm:$0xff] }
  0x18   :  { %v4724_v50 = vld [vmem:[%s6199_s4 + $0x90] sm:$0xff]  ;;  %v4729_v51 = vld [vmem:[%s6199_s4 + $0x98] sm:$0xff]  ;;  %v4734_v52 = vld [vmem:[%s6199_s4 + $0xa0] sm:$0xff] }
  0x19   :  { %p4657_p9 = por %p235_p6, %p234_p5  ;;  %v4739_v53 = vld [vmem:[%s6199_s4 + $0xa8] sm:$0xff]  ;;  %v4744_v54 = vld [vmem:[%s6199_s4 + $0xb0] sm:$0xff]  ;;  %v4749_v55 = vld [vmem:[%s6199_s4 + $0xb8] sm:$0xff] }
  0x1a   :  { %v4754_v56 = vld [vmem:[%s6199_s4 + $0xc0] sm:$0xff]  ;;  %v4759_v57 = vld [vmem:[%s6199_s4 + $0xc8] sm:$0xff]  ;;  %v4764_v58 = vld [vmem:[%s6199_s4 + $0xd0] sm:$0xff]  ;;  %v3755_v19 = vpack.c.bf16 (%p4657_p9), %v4724_v50, %v4714_v47  ;;  %v3757_v20 = vpack.c.bf16 (%p4657_p9), %v4749_v55, %v4739_v53  ;;  %vm257_vm4 = vcmask (%p4657_p9), 1040384   ;;  %s4473_s10 = smov (%p4657_p9), 32   ;;  %p3296_p10 = scmp.ne.s32.totalorder (%p4657_p9), %s4608_s0, 1 }
  0x1b   :  { %v4769_v59 = vld [vmem:[%s6199_s4 + $0xd8] sm:$0xff]  ;;  %v4774_v60 = vld [vmem:[%s6199_s4 + $0xe0] sm:$0xff]  ;;  %v4779_v61 = vld [vmem:[%s6199_s4 + $0xe8] sm:$0xff]  ;;  %v3763_v23 = vpack.c.bf16 (%p4657_p9), %v4764_v58, %v4754_v56 }
  0x1c   :  { %v4784_v62 = vld [vmem:[%s6199_s4 + $0xf0] sm:$0xff]  ;;  %v4789_v63 = vld [vmem:[%s6199_s4 + $0xf8] sm:$0xff]  ;;  %s4470_s4 = smov (%p4657_p9), 64   ;;  %v3761_v22 = vpack.c.bf16 (%p4657_p9), %v4769_v59, %v4759_v57 }
  0x1d   :  { %v3765_v24 = vpack.c.bf16 (%p4657_p9), %v4789_v63, %v4779_v61 }
  0xe9   :  { %v3713_v6 = vpop.f32.mrb[0].mxu0 }
  0xea   :  { %v127_v7 = vpop.f32.mrb[1].mxu0  ;;  %v4596_v9 = vadd.f32 %v3713_v6, %v3289_v5  ;;  %v248_v6 = vld [vmem:[#allocation3 + $0xb] sm:$0x1] (%p4657_p9) }
  0xeb   :  { %v128_v8 = vadd.f32 %v3289_v5, %v127_v7  ;;  %v3737_v7 = vpack.c.bf16 (%p4657_p9), %v4641_v32, %v4625_v26 }
  0xec   :  { %v3293_v12 = vmul.f32 -1.442695, %v4596_v9 }
  0xed   :  { %4296 = vtanh.f32 %v128_v8  ;;  %v3292_v13 = vmul.f32 -1.442695, %v128_v8  ;;  %3738 = vmatprep.subr.bf16.mxu0 (%p4657_p9), %v3737_v7 }
  0xee   :  { %4298 = vtanh.f32 %v4596_v9 }
  0xef   :  { %4300 = vpow2.f32 %v3293_v12  ;;  %v3745_v12 = vpack.c.bf16 (%p4657_p9), %v4689_v41, %v4679_v39 }
  0xf0   :  { %4302 = vpow2.f32 %v3292_v13  ;;  %v4471_v13 = vmov (%p4657_p9), 0.0  }
  0xf1   :  { %323 = vmatprep.mubr.f32.mxu0 (%p4657_p9), %v4471_v13 }
  0xf7   :  { %v4297_v10 = vpop.eup %4296 }
  0xf8   :  { %152 = vrot.lane.b32.xlu0 %v4297_v10, %s4467_s2  ;;  %v4299_v11 = vpop.eup %4298  ;;  %v241_v10 = vld [vmem:[#allocation3 + $0x1] sm:$0x1] (%p4657_p9) }
  0xf9   :  { %v4301_v14 = vpop.eup %4300 }
  0xfa   :  { %v143_v15 = vadd.f32 1.0, %v4301_v14  ;;  %v4303_v16 = vpop.eup %4302  ;;  %v3747_v14 = vpack.c.bf16 (%p4657_p9), %v4684_v40, %v4674_v38 }
  0xfb   :  { %v142_v17 = vadd.f32 1.0, %v4303_v16  ;;  %v3751_v16 = vpack.c.bf16 (%p4657_p9), %v4704_v44, %v4694_v42 }
  0xfc   :  { %154 = vrot.lane.b32.xlu0 %v4299_v11, %s4467_s2  ;;  %4304 = vrcp.f32 %v143_v15  ;;  %v3743_v11 = vpack.c.bf16 (%p4657_p9), %v4664_v36, %v4646_v33  ;;  %v3749_v15 = vpack.c.bf16 (%p4657_p9), %v4709_v46, %v4699_v43 }
  0xfd   :  { %4306 = vrcp.f32 %v142_v17  ;;  %v3753_v17 = vpack.c.bf16 (%p4657_p9), %v4729_v51, %v4719_v48 }
 0x100   :  { %170 = vrot.lane.b32.xlu0 %v128_v8, %s4467_s2  ;;  %v3739_v8 = vpack.c.bf16 (%p4657_p9), %v4630_v27, %v4620_v25 }
 0x102   :  { %3740 = vmatpush1.bf16.msra.mxu0 (%p4657_p9), %v3739_v8 }
 0x104   :  { %250 = vrot.lane.b32.xlu0 (%p4657_p9), %v248_v6, %s4470_s4 }
 0x106   :  { %v4305_v30 = vpop.eup %4304 }
 0x107   :  { %v4307_v45 = vpop.eup %4306 }
 0x108   :  { %243 = vrot.lane.b32.xlu0 (%p4657_p9), %v241_v10, %s4470_s4 }
 0x16a   :  { %v153_v21 = vpop.permute.xlu0 %152 }
 0x16b   :  { %v158_v49 = vmul.f32 %v4307_v45, %v153_v21  ;;  %v3759_v21 = vpack.c.bf16 (%p4657_p9), %v4744_v54, %v4734_v52 }
 0x16e   :  { %v155_v31 = vpop.permute.xlu0 %154 }
 0x16f   :  { %v159_v35 = vmul.f32 %v4305_v30, %v155_v31  ;;  %v3767_v30 = vpack.c.bf16 (%p4657_p9), %v4784_v62, %v4774_v60  ;;  %v247_v31 = vld [vmem:[#allocation3 + $0xa] sm:$0x1] (%p4657_p9) }
 0x171   :  { %164 = vrot.lane.b32.xlu1 %v159_v35, %s4469_s22 }
 0x172   :  { %v171_v1 = vpop.permute.xlu0 %170 }
 0x175   :  { %162 = vrot.lane.b32.xlu1 %v158_v49, %s4469_s22  ;;  %v240_v49 = vld [vmem:[#allocation3] sm:$0x1] (%p4657_p9) }
 0x176   :  { %v251_v35 = vpop.permute.xlu0 (%p4657_p9), %250 }
 0x177   :  { %v253_v45 = vsel (%p4657_p9), %vm179_vm1, %v247_v31, %v251_v35 }
 0x179   :  { %172 = vrot.lane.b32.xlu1 %v4596_v9, %s4467_s2  ;;  %v3741_v9 = vpack.c.bf16 (%p4657_p9), %v4669_v37, %v4651_v34  ;;  %s4472_s2 = smov (%p4657_p9), 96  }
 0x17b   :  { %3742 = vmatprep.subr.bf16.mxu0 (%p4657_p9), %v3741_v9 }
 0x17c   :  { %3744 = vmatpush1.bf16.msra.mxu0 (%p4657_p9), %v3743_v11 }
 0x17d   :  { %3746 = vmatprep.subr.bf16.mxu0 (%p4657_p9), %v3745_v12 }
 0x180   :  { %3748 = vmatpush1.bf16.msra.mxu0 (%p4657_p9), %v3747_v14 }
 0x181   :  { %3750 = vmatprep.subr.bf16.mxu0 (%p4657_p9), %v3749_v15 }
 0x184   :  { %3752 = vmatpush1.bf16.msra.mxu0 (%p4657_p9), %v3751_v16 }
 0x185   :  { %3754 = vmatprep.subr.bf16.mxu0 (%p4657_p9), %v3753_v17 }
 0x188   :  { %3756 = vmatpush1.bf16.msra.mxu0 (%p4657_p9), %v3755_v19 }
 0x189   :  { %3758 = vmatprep.subr.bf16.mxu0 (%p4657_p9), %v3757_v20 }
 0x18c   :  { %3760 = vmatpush1.bf16.msra.mxu0 (%p4657_p9), %v3759_v21 }
 0x18d   :  { %3762 = vmatprep.subr.bf16.mxu0 (%p4657_p9), %v3761_v22 }
 0x190   :  { %3764 = vmatpush1.bf16.msra.mxu0 (%p4657_p9), %v3763_v23 }
 0x191   :  { %3766 = vmatprep.subr.bf16.mxu0 (%p4657_p9), %v3765_v24 }
 0x194   :  { %3768 = vmatpush1.bf16.msra.mxu0 (%p4657_p9), %v3767_v30 }
 0x1e3   :  { %v165_v0 = vpop.permute.xlu1 %164 }
 0x1e7   :  { %v163_v2 = vpop.permute.xlu1 %162  ;;  %239 = sbr.rel (!%p4657_p9) target bundleno = 1110 (0x456), region = 41 }
 0x1e8   :  { %v177_v3 = vsel %vm176_vm3, %v163_v2, %v171_v1  ;;  %v244_v1 = vpop.permute.xlu0 (%p4657_p9), %243 }
 0x1e9   :  { %180 = vst.msk [vmem:[#allocation2] sm:$0xff] %vm179_vm1, %v177_v3  ;;  %v246_v2 = vsel (%p4657_p9), %vm179_vm1, %v240_v49, %v244_v1 }
 0x1eb   :  { %v173_v4 = vpop.permute.xlu1 %172 }
 0x1ec   :  { %v178_v5 = vsel %vm176_vm3, %v165_v0, %v173_v4  ;;  %v255_v0 = vrot.slane (%p4657_p9), %v253_v45, 7 }
 0x1ed   :  { %181 = vst.msk [vmem:[#allocation2 + $0x8] sm:$0xff] %vm179_vm1, %v178_v5 }
 0x1ee   :  { %v258_v3 = vsel %vm257_vm4, %v246_v2, %v255_v0  ;;  %vm372_vm5 = vcmask (!%p3296_p10), 516096  }
 0x1ef   :  { %345 = vrot.lane.b32.xlu1 %v258_v3, %s4472_s2  ;;  %324 = vmatmul.mubr.f32.vlgmr.msra.gmra.mrb[0].mxu0 %v258_v3 }
 0x261   :  { %v346_v11 = vpop.permute.xlu1 %345 }
 0x2c2   :  { %v325_v4 = vpop.f32.mrb[0].mxu0 }
 0x2c3   :  { %v326_v5 = vadd.f32 %v325_v4, %v4632_v28  ;;  %v327_v6 = vpop.f32.mrb[1].mxu0 }
 0x2c4   :  { %v328_v14 = vadd.f32 %v327_v6, %v4634_v29 }
 0x2c5   :  { %v3295_v7 = vmul.f32 -1.442695, %v326_v5 }
 0x2c7   :  { %4308 = vpow2.f32 %v3295_v7 }
 0x2d1   :  { %v4309_v8 = vpop.eup %4308 }
 0x2d2   :  { %v333_v9 = vadd.f32 1.0, %v4309_v8 }
 0x2d4   :  { %4310 = vrcp.f32 %v333_v9 }
 0x2d5   :  { %4312 = vtanh.f32 %v328_v14 }
 0x2de   :  { %v4311_v10 = vpop.eup %4310 }
 0x2df   :  { %v348_v12 = vmul.f32 %v4311_v10, %v346_v11  ;;  %v338_v13 = vmul.f32 %v4311_v10, %v258_v3  ;;  %v4313_v15 = vpop.eup %4312 }
 0x2e0   :  { %v337_v16 = vmul.f32 %v4313_v15, %v4311_v10 }
 0x2e1   :  { %350 = vrot.lane.b32.xlu0 %v348_v12, %s4470_s4  ;;  %340 = vrot.lane.b32.xlu1 %v338_v13, %s4472_s2 }
 0x353   :  { %v341_v17 = vpop.permute.xlu1 %340  ;;  %v351_v20 = vpop.permute.xlu0 %350 }
 0x354   :  { %v343_v19 = vadd.f32 %v341_v17, %v337_v16 }
 0x356   :  { %v353_v21 = vadd.f32 %v351_v20, %v343_v19 }
 0x358   :  { %4314 = vtanh.f32 %v353_v21 }
 0x362   :  { %v4315_v22 = vpop.eup %4314 }
 0x363   :  { %356 = vrot.lane.b32.xlu1 %v4315_v22, %s4472_s2 }
 0x367   :  { %365 = vrot.lane.b32.xlu1 %v353_v21, %s4473_s10 }
 0x3d5   :  { %v357_v23 = vpop.permute.xlu1 %356 }
 0x3d6   :  { %v359_v24 = vmul.f32 %v4311_v10, %v357_v23 }
 0x3d8   :  { %361 = vrot.lane.b32.xlu0 %v359_v24, %s4473_s10 }
 0x3d9   :  { %v366_v30 = vpop.permute.xlu1 %365 }
 0x445   :  { %371 = sbr.rel (%p3296_p10) target bundleno = 1101 (0x44d), region = 45 }
 0x44a   :  { %v362_v31 = vpop.permute.xlu0 %361 }
 0x44b   :  { %v368_v35 = vsel %vm176_vm3, %v362_v31, %v366_v30 }
 0x44c   :  { %373 = vst.msk [vmem:[#allocation3] sm:$0x1] %vm372_vm5, %v368_v35 }
 0x44d PF:  { %p3297_p11 = scmp.ne.s32.totalorder %s4610_s3, 1 }
 0x44e   :  { %vm377_vm6 = vcmask (!%p3297_p11), 517121  }
 0x44f   :  { %376 = sbr.rel (%p3297_p11) target bundleno = 1110 (0x456), region = 49  ;;  %378 = vst.msk [vmem:[#allocation3 + $0x9] sm:$0x2] (!%p3297_p11), %vm377_vm6, %v368_v35 }
 0x456 PF:  { %p3298_p12 = scmp.ne.s32.totalorder %s4608_s0, 0 }
 0x457   :  { %vm383_vm7 = vcmask (!%p3298_p12), 516096  }
 0x458   :  { %381 = sbr.rel (%p3298_p12) target bundleno = 1119 (0x45f), region = 53  ;;  %v382_v45 = vld [vmem:[#allocation2 + $0x7] sm:$0x1] (!%p3298_p12) }
 0x459   :  { %384 = vst.msk [vmem:[#allocation3 + $0x2] sm:$0x1] (!%p3298_p12), %vm383_vm7, %v382_v45 }
 0x45f PF:  { %s4844_s17 = scalar_select %p232_p7, 1, 0 }
 0x460   :  { %s387_s18 = scalar_select %p234_p5, 1, 0 }
 0x461   :  { %s386_s19 = sadd.s32 2, %s4844_s17  ;;  %s389_s20 = ssub.s32 8, %s4844_s17 }
 0x462   :  { %s4850_s21 = ssub.s32 %s386_s19, %s387_s18  ;;  %p3299_p13 = scmp.ne.s32.totalorder %s4610_s3, 0 }
 0x463   :  { %v393_v49 = vld [vmem:[#allocation2 + $0xf] sm:$0x1] (!%p3299_p13)  ;;  %vm394_vm8 = vcmask (!%p3299_p13), 516096  }
 0x464   :  { %392 = sbr.rel (%p3299_p13) target bundleno = 1131 (0x46b), region = 57  ;;  %395 = vst.msk [vmem:[#allocation3 + $0xc] sm:$0x1] (!%p3299_p13), %vm394_vm8, %v393_v49 }
 0x46b PF:  { %s4855_s23 = scalar_select %p233_p8, 1, 0 }
 0x46c   :  { %s398_s0 = scalar_select %p235_p6, 1, 0 }
 0x46d   :  { %s397_s24 = sadd.s32 2, %s4855_s23  ;;  %s400_s25 = ssub.s32 8, %s4855_s23 }
 0x46e   :  { %s4861_s26 = ssub.s32 %s397_s24, %s398_s0  ;;  %s4863_s5 = sld [smem:[#allocation4 + $0x1]] }
 0x46f   :  { %s4865_s27 = sld [smem:[#allocation4 + $0x81]] }
 0x474   :  { %p403_p0 = scmp.eq.s32.totalorder %s4863_s5, 0  ;;  %p405_p1 = scmp.eq.s32.totalorder %s4863_s5, 1 }
 0x475   :  { %p404_p2 = scmp.eq.s32.totalorder %s4865_s27, 0  ;;  %p406_p3 = scmp.eq.s32.totalorder %s4865_s27, 1 }
 0x477   :  { %p407_p4 = por %p406_p3, %p405_p1 }
 0x478   :  { %v3769_v0 = vpack.c.bf16 (%p407_p4), %v4641_v32, %v4625_v26  ;;  %v3771_v1 = vpack.c.bf16 (%p407_p4), %v4630_v27, %v4620_v25  ;;  %v3773_v2 = vpack.c.bf16 (%p407_p4), %v4669_v37, %v4651_v34  ;;  %s4882_s3 = scalar_lea.vmem (%p407_p4), [#allocation3], %s4861_s26  ;;  %s4474_s28 = smov (%p407_p4), 64   ;;  %v3775_v5 = vpack.c.bf16 (%p407_p4), %v4664_v36, %v4646_v33 }
 0x479   :  { %410 = sbr.rel (!%p407_p4) target bundleno = 1882 (0x75a), region = 61  ;;  %v3307_v3 = vld [vmem:[%s4882_s3 + $0x9] sm:$0x1] (%p407_p4)  ;;  %s4887_s29 = scalar_lea.vmem (%p407_p4), [#allocation3], %s4850_s21  ;;  %v3777_v6 = vpack.c.bf16 (%p407_p4), %v4689_v41, %v4679_v39  ;;  %v4475_v7 = vmov (%p407_p4), 0.0   ;;  %v3779_v8 = vpack.c.bf16 (%p407_p4), %v4684_v40, %v4674_v38  ;;  %v3781_v9 = vpack.c.bf16 (%p407_p4), %v4709_v46, %v4699_v43 }
 0x47a   :  { %429 = vrot.lane.b32.xlu0 (%p407_p4), %v3307_v3, %s4474_s28  ;;  %3770 = vmatprep.subr.bf16.mxu0 (%p407_p4), %v3769_v0  ;;  %v3559_v4 = vld [vmem:[%s4887_s29 - $0x1] sm:$0x1] (%p407_p4)  ;;  %v3783_v10 = vpack.c.bf16 (%p407_p4), %v4704_v44, %v4694_v42  ;;  %v3785_v11 = vpack.c.bf16 (%p407_p4), %v4729_v51, %v4719_v48  ;;  %v3787_v12 = vpack.c.bf16 (%p407_p4), %v4724_v50, %v4714_v47  ;;  %v3306_v20 = vld [vmem:[%s4882_s3 + $0x8] sm:$0x1] (%p407_p4)  ;;  %v3556_v23 = vld [vmem:[%s4887_s29 - $0x2] sm:$0x1] (%p407_p4) }
 0x47b   :  { %3772 = vmatpush1.bf16.msra.mxu0 (%p407_p4), %v3771_v1  ;;  %502 = vmatprep.mubr.f32.mxu0 (%p407_p4), %v4475_v7  ;;  %v3789_v13 = vpack.c.bf16 (%p407_p4), %v4749_v55, %v4739_v53  ;;  %v3791_v14 = vpack.c.bf16 (%p407_p4), %v4744_v54, %v4734_v52  ;;  %v3793_v15 = vpack.c.bf16 (%p407_p4), %v4769_v59, %v4759_v57  ;;  %vm436_vm9 = vcmask (%p407_p4), 1040384   ;;  %s4476_s30 = smov (%p407_p4), 96   ;;  %s4477_s9 = smov (%p407_p4), 32  }
 0x47c   :  { %3774 = vmatprep.subr.bf16.mxu0 (%p407_p4), %v3773_v2  ;;  %v3795_v16 = vpack.c.bf16 (%p407_p4), %v4764_v58, %v4754_v56  ;;  %v3797_v17 = vpack.c.bf16 (%p407_p4), %v4789_v63, %v4779_v61  ;;  %v3799_v19 = vpack.c.bf16 (%p407_p4), %v4784_v62, %v4774_v60  ;;  %p3309_p5 = scmp.ne.s32.totalorder (%p407_p4), %s4863_s5, 1 }
 0x47e   :  { %418 = vrot.lane.b32.xlu0 (%p407_p4), %v3559_v4, %s4474_s28 }
 0x47f   :  { %3776 = vmatpush1.bf16.msra.mxu0 (%p407_p4), %v3775_v5 }
 0x480   :  { %3778 = vmatprep.subr.bf16.mxu0 %v3777_v6  ;;  %vm551_vm10 = vcmask (!%p3309_p5), 516096  }
 0x483   :  { %3780 = vmatpush1.bf16.msra.mxu0 %v3779_v8 }
 0x484   :  { %3782 = vmatprep.subr.bf16.mxu0 %v3781_v9 }
 0x487   :  { %3784 = vmatpush1.bf16.msra.mxu0 %v3783_v10 }
 0x488   :  { %3786 = vmatprep.subr.bf16.mxu0 %v3785_v11 }
 0x48b   :  { %3788 = vmatpush1.bf16.msra.mxu0 %v3787_v12 }
 0x48c   :  { %3790 = vmatprep.subr.bf16.mxu0 %v3789_v13 }
 0x48f   :  { %3792 = vmatpush1.bf16.msra.mxu0 %v3791_v14 }
 0x490   :  { %3794 = vmatprep.subr.bf16.mxu0 %v3793_v15 }
 0x493   :  { %3796 = vmatpush1.bf16.msra.mxu0 %v3795_v16 }
 0x494   :  { %3798 = vmatprep.subr.bf16.mxu0 %v3797_v17 }
 0x497   :  { %3800 = vmatpush1.bf16.msra.mxu0 %v3799_v19 }
 0x4ec   :  { %v430_v21 = vpop.permute.xlu0 %429 }
 0x4ed   :  { %v432_v22 = vsel %vm179_vm1, %v3306_v20, %v430_v21 }
 0x4ee   :  { %v434_v24 = vrot.slane %v432_v22, 7 }
 0x4f0   :  { %v419_v30 = vpop.permute.xlu0 %418 }
 0x4f1   :  { %v421_v31 = vsel %vm179_vm1, %v3556_v23, %v419_v30 }
 0x4f2   :  { %v437_v35 = vsel %vm436_vm9, %v421_v31, %v434_v24 }
 0x4f3   :  { %524 = vrot.lane.b32.xlu1 %v437_v35, %s4476_s30  ;;  %503 = vmatmul.mubr.f32.vlgmr.msra.gmra.mrb[0].mxu0 %v437_v35 }
 0x565   :  { %v525_v5 = vpop.permute.xlu1 %524 }
 0x5c6   :  { %v504_v45 = vpop.f32.mrb[0].mxu0 }
 0x5c7   :  { %v505_v49 = vadd.f32 %v504_v45, %v4632_v28  ;;  %v506_v0 = vpop.f32.mrb[1].mxu0 }
 0x5c8   :  { %v507_v8 = vadd.f32 %v506_v0, %v4634_v29 }
 0x5c9   :  { %v3308_v1 = vmul.f32 -1.442695, %v505_v49 }
 0x5cb   :  { %4316 = vpow2.f32 %v3308_v1 }
 0x5d5   :  { %v4317_v2 = vpop.eup %4316 }
 0x5d6   :  { %v512_v3 = vadd.f32 1.0, %v4317_v2 }
 0x5d8   :  { %4318 = vrcp.f32 %v512_v3 }
 0x5d9   :  { %4320 = vtanh.f32 %v507_v8 }
 0x5e2   :  { %v4319_v4 = vpop.eup %4318 }
 0x5e3   :  { %v527_v6 = vmul.f32 %v4319_v4, %v525_v5  ;;  %v517_v7 = vmul.f32 %v4319_v4, %v437_v35  ;;  %v4321_v9 = vpop.eup %4320 }
 0x5e4   :  { %v516_v10 = vmul.f32 %v4321_v9, %v4319_v4 }
 0x5e5   :  { %529 = vrot.lane.b32.xlu0 %v527_v6, %s4474_s28  ;;  %519 = vrot.lane.b32.xlu1 %v517_v7, %s4476_s30 }
 0x657   :  { %v520_v11 = vpop.permute.xlu1 %519  ;;  %v530_v13 = vpop.permute.xlu0 %529 }
 0x658   :  { %v522_v12 = vadd.f32 %v520_v11, %v516_v10 }
 0x65a   :  { %v532_v14 = vadd.f32 %v530_v13, %v522_v12 }
 0x65c   :  { %4322 = vtanh.f32 %v532_v14 }
 0x666   :  { %v4323_v15 = vpop.eup %4322 }
 0x667   :  { %535 = vrot.lane.b32.xlu1 %v4323_v15, %s4476_s30 }
 0x66b   :  { %544 = vrot.lane.b32.xlu1 %v532_v14, %s4477_s9 }
 0x6d9   :  { %v536_v16 = vpop.permute.xlu1 %535 }
 0x6da   :  { %v538_v17 = vmul.f32 %v4319_v4, %v536_v16 }
 0x6dc   :  { %540 = vrot.lane.b32.xlu0 %v538_v17, %s4477_s9 }
 0x6dd   :  { %v545_v19 = vpop.permute.xlu1 %544 }
 0x749   :  { %550 = sbr.rel (%p3309_p5) target bundleno = 1873 (0x751), region = 65 }
 0x74e   :  { %v541_v20 = vpop.permute.xlu0 %540 }
 0x74f   :  { %v547_v21 = vsel %vm176_vm3, %v541_v20, %v545_v19 }
 0x750   :  { %3560 = vst.msk [vmem:[%s4887_s29 - $0x2] sm:$0x1] %vm551_vm10, %v547_v21 }
 0x751 PF:  { %p3310_p6 = scmp.ne.s32.totalorder %s4865_s27, 1 }
 0x752   :  { %vm556_vm11 = vcmask (!%p3310_p6), 517121  }
 0x753   :  { %555 = sbr.rel (%p3310_p6) target bundleno = 1882 (0x75a), region = 69  ;;  %3311 = vst.msk [vmem:[%s4882_s3 + $0x7] sm:$0x2] (!%p3310_p6), %vm556_vm11, %v547_v21 }
 0x75a PF:  { %s558_s22 = ssub.s32 7, %s4844_s17  ;;  %p3312_p7 = scmp.ne.s32.totalorder %s4863_s5, 0 }
 0x75b   :  { %vm565_vm12 = vcmask (!%p3312_p7), 516096   ;;  %s562_s11 = scalar_lea.vmem (!%p3312_p7), [#allocation2], %s558_s22  ;;  %s564_s12 = scalar_lea.vmem (!%p3312_p7), [#allocation3], %s4850_s21 }
 0x75c   :  { %561 = sbr.rel (%p3312_p7) target bundleno = 1891 (0x763), region = 73  ;;  %v563_v22 = vld [vmem:[%s562_s11] sm:$0x1] (!%p3312_p7) }
 0x75d   :  { %566 = vst.msk [vmem:[%s564_s12] sm:$0x1] (!%p3312_p7), %vm565_vm12, %v563_v22 }
 0x763 PF:  { %s567_s13 = scalar_select %p403_p0, 1, 0 }
 0x764   :  { %s569_s1 = scalar_select %p405_p1, 1, 0 }
 0x765   :  { %s568_s14 = sadd.s32 %s567_s13, %s4850_s21  ;;  %s4939_s15 = ssub.s32 %s389_s20, %s567_s13 }
 0x766   :  { %s4941_s16 = ssub.s32 %s568_s14, %s569_s1  ;;  %p3313_p8 = scmp.ne.s32.totalorder %s4865_s27, 0 }
 0x767   :  { %s575_s4 = ssub.s32 (!%p3313_p8), 15, %s4855_s23  ;;  %vm580_vm13 = vcmask (!%p3313_p8), 516096   ;;  %s3128_s10 = scalar_lea.vmem (!%p3313_p8), [#allocation3], %s4861_s26 }
 0x768   :  { %574 = sbr.rel (%p3313_p8) target bundleno = 1903 (0x76f), region = 77  ;;  %s576_s2 = scalar_lea.vmem (!%p3313_p8), [#allocation2], %s575_s4 }
 0x769   :  { %v577_v23 = vld [vmem:[%s576_s2] sm:$0x1] (!%p3313_p8) }
 0x76a   :  { %3314 = vst.msk [vmem:[%s3128_s10 + $0xa] sm:$0x1] (!%p3313_p8), %vm580_vm13, %v577_v23 }
 0x76f PF:  { %s582_s17 = scalar_select %p404_p2, 1, 0 }
 0x770   :  { %s584_s18 = scalar_select %p406_p3, 1, 0 }
 0x771   :  { %s583_s19 = sadd.s32 %s582_s17, %s4861_s26  ;;  %s4953_s20 = ssub.s32 %s400_s25, %s582_s17 }
 0x772   :  { %s4955_s21 = ssub.s32 %s583_s19, %s584_s18  ;;  %s4957_s0 = sld [smem:[#allocation4 + $0x2]] }
 0x773   :  { %s4959_s24 = sld [smem:[#allocation4 + $0x82]] }
 0x778   :  { %p589_p9 = scmp.eq.s32.totalorder %s4957_s0, 0  ;;  %p591_p10 = scmp.eq.s32.totalorder %s4957_s0, 1 }
 0x779   :  { %p590_p11 = scmp.eq.s32.totalorder %s4959_s24, 0  ;;  %p592_p12 = scmp.eq.s32.totalorder %s4959_s24, 1 }
 0x77b   :  { %p593_p13 = por %p592_p12, %p591_p10 }
 0x77c   :  { %v3801_v24 = vpack.c.bf16 (%p593_p13), %v4641_v32, %v4625_v26  ;;  %v3803_v30 = vpack.c.bf16 (%p593_p13), %v4630_v27, %v4620_v25  ;;  %v3805_v31 = vpack.c.bf16 (%p593_p13), %v4669_v37, %v4651_v34  ;;  %s4976_s23 = scalar_lea.vmem (%p593_p13), [#allocation3], %s4955_s21  ;;  %s4478_s25 = smov (%p593_p13), 64   ;;  %v3807_v49 = vpack.c.bf16 (%p593_p13), %v4664_v36, %v4646_v33 }
 0x77d   :  { %596 = sbr.rel (!%p593_p13) target bundleno = 2654 (0xa5e), region = 81  ;;  %v3322_v35 = vld [vmem:[%s4976_s23 + $0x9] sm:$0x1] (%p593_p13)  ;;  %s4981_s26 = scalar_lea.vmem (%p593_p13), [#allocation3], %s4941_s16  ;;  %v3809_v0 = vpack.c.bf16 (%p593_p13), %v4689_v41, %v4679_v39  ;;  %v4479_v1 = vmov (%p593_p13), 0.0   ;;  %v3811_v2 = vpack.c.bf16 (%p593_p13), %v4684_v40, %v4674_v38  ;;  %v3813_v3 = vpack.c.bf16 (%p593_p13), %v4709_v46, %v4699_v43 }
 0x77e   :  { %615 = vrot.lane.b32.xlu0 (%p593_p13), %v3322_v35, %s4478_s25  ;;  %3802 = vmatprep.subr.bf16.mxu0 (%p593_p13), %v3801_v24  ;;  %v3566_v45 = vld [vmem:[%s4981_s26 - $0x1] sm:$0x1] (%p593_p13)  ;;  %v3815_v4 = vpack.c.bf16 (%p593_p13), %v4704_v44, %v4694_v42  ;;  %v3817_v5 = vpack.c.bf16 (%p593_p13), %v4729_v51, %v4719_v48  ;;  %v3819_v6 = vpack.c.bf16 (%p593_p13), %v4724_v50, %v4714_v47  ;;  %v3321_v13 = vld [vmem:[%s4976_s23 + $0x8] sm:$0x1] (%p593_p13)  ;;  %v3563_v16 = vld [vmem:[%s4981_s26 - $0x2] sm:$0x1] (%p593_p13) }
 0x77f   :  { %3804 = vmatpush1.bf16.msra.mxu0 (%p593_p13), %v3803_v30  ;;  %688 = vmatprep.mubr.f32.mxu0 (%p593_p13), %v4479_v1  ;;  %v3821_v7 = vpack.c.bf16 (%p593_p13), %v4749_v55, %v4739_v53  ;;  %v3823_v8 = vpack.c.bf16 (%p593_p13), %v4744_v54, %v4734_v52  ;;  %v3825_v9 = vpack.c.bf16 (%p593_p13), %v4769_v59, %v4759_v57  ;;  %vm622_vm14 = vcmask (%p593_p13), 1040384   ;;  %s4480_s5 = smov (%p593_p13), 96   ;;  %s4481_s27 = smov (%p593_p13), 32  }
 0x780   :  { %3806 = vmatprep.subr.bf16.mxu0 (%p593_p13), %v3805_v31  ;;  %v3827_v10 = vpack.c.bf16 (%p593_p13), %v4764_v58, %v4754_v56  ;;  %v3829_v11 = vpack.c.bf16 (%p593_p13), %v4789_v63, %v4779_v61  ;;  %v3831_v12 = vpack.c.bf16 (%p593_p13), %v4784_v62, %v4774_v60  ;;  %p3324_p0 = scmp.ne.s32.totalorder (%p593_p13), %s4957_s0, 1 }
 0x782   :  { %604 = vrot.lane.b32.xlu0 (%p593_p13), %v3566_v45, %s4478_s25 }
 0x783   :  { %3808 = vmatpush1.bf16.msra.mxu0 (%p593_p13), %v3807_v49 }
 0x784   :  { %3810 = vmatprep.subr.bf16.mxu0 %v3809_v0  ;;  %vm737_vm15 = vcmask (!%p3324_p0), 516096  }
 0x787   :  { %3812 = vmatpush1.bf16.msra.mxu0 %v3811_v2 }
 0x788   :  { %3814 = vmatprep.subr.bf16.mxu0 %v3813_v3 }
 0x78b   :  { %3816 = vmatpush1.bf16.msra.mxu0 %v3815_v4 }
 0x78c   :  { %3818 = vmatprep.subr.bf16.mxu0 %v3817_v5 }
 0x78f   :  { %3820 = vmatpush1.bf16.msra.mxu0 %v3819_v6 }
 0x790   :  { %3822 = vmatprep.subr.bf16.mxu0 %v3821_v7 }
 0x793   :  { %3824 = vmatpush1.bf16.msra.mxu0 %v3823_v8 }
 0x794   :  { %3826 = vmatprep.subr.bf16.mxu0 %v3825_v9 }
 0x797   :  { %3828 = vmatpush1.bf16.msra.mxu0 %v3827_v10 }
 0x798   :  { %3830 = vmatprep.subr.bf16.mxu0 %v3829_v11 }
 0x79b   :  { %3832 = vmatpush1.bf16.msra.mxu0 %v3831_v12 }
 0x7f0   :  { %v616_v14 = vpop.permute.xlu0 %615 }
 0x7f1   :  { %v618_v15 = vsel %vm179_vm1, %v3321_v13, %v616_v14 }
 0x7f2   :  { %v620_v17 = vrot.slane %v618_v15, 7 }
 0x7f4   :  { %v605_v19 = vpop.permute.xlu0 %604 }
 0x7f5   :  { %v607_v20 = vsel %vm179_vm1, %v3563_v16, %v605_v19 }
 0x7f6   :  { %v623_v21 = vsel %vm622_vm14, %v607_v20, %v620_v17 }
 0x7f7   :  { %710 = vrot.lane.b32.xlu1 %v623_v21, %s4480_s5  ;;  %689 = vmatmul.mubr.f32.vlgmr.msra.gmra.mrb[0].mxu0 %v623_v21 }
 0x869   :  { %v711_v49 = vpop.permute.xlu1 %710 }
 0x8ca   :  { %v690_v22 = vpop.f32.mrb[0].mxu0 }
 0x8cb   :  { %v691_v23 = vadd.f32 %v690_v22, %v4632_v28  ;;  %v692_v24 = vpop.f32.mrb[1].mxu0 }
 0x8cc   :  { %v693_v2 = vadd.f32 %v692_v24, %v4634_v29 }
 0x8cd   :  { %v3323_v30 = vmul.f32 -1.442695, %v691_v23 }
 0x8cf   :  { %4324 = vpow2.f32 %v3323_v30 }
 0x8d9   :  { %v4325_v31 = vpop.eup %4324 }
 0x8da   :  { %v698_v35 = vadd.f32 1.0, %v4325_v31 }
 0x8dc   :  { %4326 = vrcp.f32 %v698_v35 }
 0x8dd   :  { %4328 = vtanh.f32 %v693_v2 }
 0x8e6   :  { %v4327_v45 = vpop.eup %4326 }
 0x8e7   :  { %v713_v0 = vmul.f32 %v4327_v45, %v711_v49  ;;  %v703_v1 = vmul.f32 %v4327_v45, %v623_v21  ;;  %v4329_v3 = vpop.eup %4328 }
 0x8e8   :  { %v702_v4 = vmul.f32 %v4329_v3, %v4327_v45 }
 0x8e9   :  { %715 = vrot.lane.b32.xlu0 %v713_v0, %s4478_s25  ;;  %705 = vrot.lane.b32.xlu1 %v703_v1, %s4480_s5 }
 0x95b   :  { %v706_v5 = vpop.permute.xlu1 %705  ;;  %v716_v7 = vpop.permute.xlu0 %715 }
 0x95c   :  { %v708_v6 = vadd.f32 %v706_v5, %v702_v4 }
 0x95e   :  { %v718_v8 = vadd.f32 %v716_v7, %v708_v6 }
 0x960   :  { %4330 = vtanh.f32 %v718_v8 }
 0x96a   :  { %v4331_v9 = vpop.eup %4330 }
 0x96b   :  { %721 = vrot.lane.b32.xlu1 %v4331_v9, %s4480_s5 }
 0x96f   :  { %730 = vrot.lane.b32.xlu1 %v718_v8, %s4481_s27 }
 0x9dd   :  { %v722_v10 = vpop.permute.xlu1 %721 }
 0x9de   :  { %v724_v11 = vmul.f32 %v4327_v45, %v722_v10 }
 0x9e0   :  { %726 = vrot.lane.b32.xlu0 %v724_v11, %s4481_s27 }
 0x9e1   :  { %v731_v12 = vpop.permute.xlu1 %730 }
 0xa4d   :  { %736 = sbr.rel (%p3324_p0) target bundleno = 2645 (0xa55), region = 85 }
 0xa52   :  { %v727_v13 = vpop.permute.xlu0 %726 }
 0xa53   :  { %v733_v14 = vsel %vm176_vm3, %v727_v13, %v731_v12 }
 0xa54   :  { %3567 = vst.msk [vmem:[%s4981_s26 - $0x2] sm:$0x1] %vm737_vm15, %v733_v14 }
 0xa55 PF:  { %p3325_p1 = scmp.ne.s32.totalorder %s4959_s24, 1 }
 0xa56   :  { %vm742_vm0 = vcmask (!%p3325_p1), 517121  }
 0xa57   :  { %741 = sbr.rel (%p3325_p1) target bundleno = 2654 (0xa5e), region = 89  ;;  %3326 = vst.msk [vmem:[%s4976_s23 + $0x7] sm:$0x2] (!%p3325_p1), %vm742_vm0, %v733_v14 }
 0xa5e PF:  { %p3328_p2 = scmp.ne.s32.totalorder %s4957_s0, 0 }
 0xa5f   :  { %vm751_vm2 = vcmask (!%p3328_p2), 516096   ;;  %s3568_s3 = scalar_lea.vmem (!%p3328_p2), [#allocation2], %s4939_s15  ;;  %s750_s28 = scalar_lea.vmem (!%p3328_p2), [#allocation3], %s4941_s16 }
 0xa60   :  { %747 = sbr.rel (%p3328_p2) target bundleno = 2663 (0xa67), region = 93  ;;  %v3570_v15 = vld [vmem:[%s3568_s3 - $0x1] sm:$0x1] (!%p3328_p2) }
 0xa61   :  { %752 = vst.msk [vmem:[%s750_s28] sm:$0x1] (!%p3328_p2), %vm751_vm2, %v3570_v15 }
 0xa67 PF:  { %s753_s29 = scalar_select %p589_p9, 1, 0 }
 0xa68   :  { %s755_s30 = scalar_select %p591_p10, 1, 0 }
 0xa69   :  { %s754_s9 = sadd.s32 %s753_s29, %s4941_s16  ;;  %s5032_s22 = ssub.s32 %s4939_s15, %s753_s29 }
 0xa6a   :  { %s5034_s11 = ssub.s32 %s754_s9, %s755_s30  ;;  %p3330_p3 = scmp.ne.s32.totalorder %s4959_s24, 0 }
 0xa6b   :  { %vm766_vm4 = vcmask (!%p3330_p3), 516096   ;;  %s3138_s12 = scalar_lea.vmem (!%p3330_p3), [#allocation2], %s4953_s20  ;;  %s3140_s13 = scalar_lea.vmem (!%p3330_p3), [#allocation3], %s4955_s21 }
 0xa6c   :  { %760 = sbr.rel (%p3330_p3) target bundleno = 2675 (0xa73), region = 97  ;;  %v3331_v16 = vld [vmem:[%s3138_s12 + $0x7] sm:$0x1] (!%p3330_p3) }
 0xa6d   :  { %3332 = vst.msk [vmem:[%s3140_s13 + $0xa] sm:$0x1] (!%p3330_p3), %vm766_vm4, %v3331_v16 }
 0xa73 PF:  { %s768_s1 = scalar_select %p590_p11, 1, 0 }
 0xa74   :  { %s770_s14 = scalar_select %p592_p12, 1, 0 }
 0xa75   :  { %s769_s15 = sadd.s32 %s768_s1, %s4955_s21  ;;  %s5045_s16 = ssub.s32 %s4953_s20, %s768_s1 }
 0xa76   :  { %s5047_s4 = ssub.s32 %s769_s15, %s770_s14  ;;  %s5049_s2 = sld [smem:[#allocation4 + $0x3]] }
 0xa77   :  { %s5051_s10 = sld [smem:[#allocation4 + $0x83]] }
 0xa7c   :  { %p775_p4 = scmp.eq.s32.totalorder %s5049_s2, 0  ;;  %p777_p5 = scmp.eq.s32.totalorder %s5049_s2, 1 }
 0xa7d   :  { %p776_p6 = scmp.eq.s32.totalorder %s5051_s10, 0  ;;  %p778_p7 = scmp.eq.s32.totalorder %s5051_s10, 1 }
 0xa7f   :  { %p779_p8 = por %p778_p7, %p777_p5 }
 0xa80   :  { %v3833_v17 = vpack.c.bf16 (%p779_p8), %v4641_v32, %v4625_v26  ;;  %v3835_v19 = vpack.c.bf16 (%p779_p8), %v4630_v27, %v4620_v25  ;;  %v3837_v20 = vpack.c.bf16 (%p779_p8), %v4669_v37, %v4651_v34  ;;  %s5068_s17 = scalar_lea.vmem (%p779_p8), [#allocation3], %s5047_s4  ;;  %s4482_s18 = smov (%p779_p8), 64   ;;  %v3839_v23 = vpack.c.bf16 (%p779_p8), %v4664_v36, %v4646_v33 }
 0xa81   :  { %782 = sbr.rel (!%p779_p8) target bundleno = 3426 (0xd62), region = 101  ;;  %v3340_v21 = vld [vmem:[%s5068_s17 + $0x9] sm:$0x1] (%p779_p8)  ;;  %s5073_s19 = scalar_lea.vmem (%p779_p8), [#allocation3], %s5034_s11  ;;  %v3841_v24 = vpack.c.bf16 (%p779_p8), %v4689_v41, %v4679_v39  ;;  %v4483_v30 = vmov (%p779_p8), 0.0   ;;  %v3843_v31 = vpack.c.bf16 (%p779_p8), %v4684_v40, %v4674_v38  ;;  %v3845_v35 = vpack.c.bf16 (%p779_p8), %v4709_v46, %v4699_v43 }
 0xa82   :  { %801 = vrot.lane.b32.xlu0 (%p779_p8), %v3340_v21, %s4482_s18  ;;  %3834 = vmatprep.subr.bf16.mxu0 (%p779_p8), %v3833_v17  ;;  %v3576_v22 = vld [vmem:[%s5073_s19 - $0x1] sm:$0x1] (%p779_p8)  ;;  %v3847_v45 = vpack.c.bf16 (%p779_p8), %v4704_v44, %v4694_v42  ;;  %v3849_v49 = vpack.c.bf16 (%p779_p8), %v4729_v51, %v4719_v48  ;;  %v3851_v0 = vpack.c.bf16 (%p779_p8), %v4724_v50, %v4714_v47  ;;  %v3339_v7 = vld [vmem:[%s5068_s17 + $0x8] sm:$0x1] (%p779_p8)  ;;  %v3573_v10 = vld [vmem:[%s5073_s19 - $0x2] sm:$0x1] (%p779_p8) }
 0xa83   :  { %3836 = vmatpush1.bf16.msra.mxu0 (%p779_p8), %v3835_v19  ;;  %874 = vmatprep.mubr.f32.mxu0 (%p779_p8), %v4483_v30  ;;  %v3853_v1 = vpack.c.bf16 (%p779_p8), %v4749_v55, %v4739_v53  ;;  %v3855_v2 = vpack.c.bf16 (%p779_p8), %v4744_v54, %v4734_v52  ;;  %v3857_v3 = vpack.c.bf16 (%p779_p8), %v4769_v59, %v4759_v57  ;;  %vm808_vm5 = vcmask (%p779_p8), 1040384   ;;  %s4484_s20 = smov (%p779_p8), 96   ;;  %s4485_s21 = smov (%p779_p8), 32  }
 0xa84   :  { %3838 = vmatprep.subr.bf16.mxu0 (%p779_p8), %v3837_v20  ;;  %v3859_v4 = vpack.c.bf16 (%p779_p8), %v4764_v58, %v4754_v56  ;;  %v3861_v5 = vpack.c.bf16 (%p779_p8), %v4789_v63, %v4779_v61  ;;  %v3863_v6 = vpack.c.bf16 (%p779_p8), %v4784_v62, %v4774_v60  ;;  %p3342_p9 = scmp.ne.s32.totalorder (%p779_p8), %s5049_s2, 1 }
 0xa86   :  { %790 = vrot.lane.b32.xlu0 (%p779_p8), %v3576_v22, %s4482_s18 }
 0xa87   :  { %3840 = vmatpush1.bf16.msra.mxu0 (%p779_p8), %v3839_v23 }
 0xa88   :  { %3842 = vmatprep.subr.bf16.mxu0 %v3841_v24  ;;  %vm923_vm6 = vcmask (!%p3342_p9), 516096  }
 0xa8b   :  { %3844 = vmatpush1.bf16.msra.mxu0 %v3843_v31 }
 0xa8c   :  { %3846 = vmatprep.subr.bf16.mxu0 %v3845_v35 }
 0xa8f   :  { %3848 = vmatpush1.bf16.msra.mxu0 %v3847_v45 }
 0xa90   :  { %3850 = vmatprep.subr.bf16.mxu0 %v3849_v49 }
 0xa93   :  { %3852 = vmatpush1.bf16.msra.mxu0 %v3851_v0 }
 0xa94   :  { %3854 = vmatprep.subr.bf16.mxu0 %v3853_v1 }
 0xa97   :  { %3856 = vmatpush1.bf16.msra.mxu0 %v3855_v2 }
 0xa98   :  { %3858 = vmatprep.subr.bf16.mxu0 %v3857_v3 }
 0xa9b   :  { %3860 = vmatpush1.bf16.msra.mxu0 %v3859_v4 }
 0xa9c   :  { %3862 = vmatprep.subr.bf16.mxu0 %v3861_v5 }
 0xa9f   :  { %3864 = vmatpush1.bf16.msra.mxu0 %v3863_v6 }
 0xaf4   :  { %v802_v8 = vpop.permute.xlu0 %801 }
 0xaf5   :  { %v804_v9 = vsel %vm179_vm1, %v3339_v7, %v802_v8 }
 0xaf6   :  { %v806_v11 = vrot.slane %v804_v9, 7 }
 0xaf8   :  { %v791_v12 = vpop.permute.xlu0 %790 }
 0xaf9   :  { %v793_v13 = vsel %vm179_vm1, %v3573_v10, %v791_v12 }
 0xafa   :  { %v809_v14 = vsel %vm808_vm5, %v793_v13, %v806_v11 }
 0xafb   :  { %896 = vrot.lane.b32.xlu1 %v809_v14, %s4484_s20  ;;  %875 = vmatmul.mubr.f32.vlgmr.msra.gmra.mrb[0].mxu0 %v809_v14 }
 0xb6d   :  { %v897_v23 = vpop.permute.xlu1 %896 }
 0xbce   :  { %v876_v15 = vpop.f32.mrb[0].mxu0 }
 0xbcf   :  { %v877_v16 = vadd.f32 %v876_v15, %v4632_v28  ;;  %v878_v17 = vpop.f32.mrb[1].mxu0 }
 0xbd0   :  { %v879_v31 = vadd.f32 %v878_v17, %v4634_v29 }
 0xbd1   :  { %v3341_v19 = vmul.f32 -1.442695, %v877_v16 }
 0xbd3   :  { %4332 = vpow2.f32 %v3341_v19 }
 0xbdd   :  { %v4333_v20 = vpop.eup %4332 }
 0xbde   :  { %v884_v21 = vadd.f32 1.0, %v4333_v20 }
 0xbe0   :  { %4334 = vrcp.f32 %v884_v21 }
 0xbe1   :  { %4336 = vtanh.f32 %v879_v31 }
 0xbea   :  { %v4335_v22 = vpop.eup %4334 }
 0xbeb   :  { %v899_v24 = vmul.f32 %v4335_v22, %v897_v23  ;;  %v889_v30 = vmul.f32 %v4335_v22, %v809_v14  ;;  %v4337_v35 = vpop.eup %4336 }
 0xbec   :  { %v888_v45 = vmul.f32 %v4337_v35, %v4335_v22 }
 0xbed   :  { %901 = vrot.lane.b32.xlu0 %v899_v24, %s4482_s18  ;;  %891 = vrot.lane.b32.xlu1 %v889_v30, %s4484_s20 }
 0xc5f   :  { %v892_v49 = vpop.permute.xlu1 %891  ;;  %v902_v1 = vpop.permute.xlu0 %901 }
 0xc60   :  { %v894_v0 = vadd.f32 %v892_v49, %v888_v45 }
 0xc62   :  { %v904_v2 = vadd.f32 %v902_v1, %v894_v0 }
 0xc64   :  { %4338 = vtanh.f32 %v904_v2 }
 0xc6e   :  { %v4339_v3 = vpop.eup %4338 }
 0xc6f   :  { %907 = vrot.lane.b32.xlu1 %v4339_v3, %s4484_s20 }
 0xc73   :  { %916 = vrot.lane.b32.xlu1 %v904_v2, %s4485_s21 }
 0xce1   :  { %v908_v4 = vpop.permute.xlu1 %907 }
 0xce2   :  { %v910_v5 = vmul.f32 %v4335_v22, %v908_v4 }
 0xce4   :  { %912 = vrot.lane.b32.xlu0 %v910_v5, %s4485_s21 }
 0xce5   :  { %v917_v6 = vpop.permute.xlu1 %916 }
 0xd51   :  { %922 = sbr.rel (%p3342_p9) target bundleno = 3417 (0xd59), region = 105 }
 0xd56   :  { %v913_v7 = vpop.permute.xlu0 %912 }
 0xd57   :  { %v919_v8 = vsel %vm176_vm3, %v913_v7, %v917_v6 }
 0xd58   :  { %3577 = vst.msk [vmem:[%s5073_s19 - $0x2] sm:$0x1] %vm923_vm6, %v919_v8 }
 0xd59 PF:  { %p3343_p10 = scmp.ne.s32.totalorder %s5051_s10, 1 }
 0xd5a   :  { %vm928_vm7 = vcmask (!%p3343_p10), 517121  }
 0xd5b   :  { %927 = sbr.rel (%p3343_p10) target bundleno = 3426 (0xd62), region = 109  ;;  %3344 = vst.msk [vmem:[%s5068_s17 + $0x7] sm:$0x2] (!%p3343_p10), %vm928_vm7, %v919_v8 }
 0xd62 PF:  { %p3346_p11 = scmp.ne.s32.totalorder %s5049_s2, 0 }
 0xd63   :  { %vm937_vm8 = vcmask (!%p3346_p11), 516096   ;;  %s3578_s0 = scalar_lea.vmem (!%p3346_p11), [#allocation2], %s5032_s22  ;;  %s936_s24 = scalar_lea.vmem (!%p3346_p11), [#allocation3], %s5034_s11 }
 0xd64   :  { %933 = sbr.rel (%p3346_p11) target bundleno = 3435 (0xd6b), region = 113  ;;  %v3580_v9 = vld [vmem:[%s3578_s0 - $0x1] sm:$0x1] (!%p3346_p11) }
 0xd65   :  { %938 = vst.msk [vmem:[%s936_s24] sm:$0x1] (!%p3346_p11), %vm937_vm8, %v3580_v9 }
 0xd6b PF:  { %s939_s23 = scalar_select %p775_p4, 1, 0 }
 0xd6c   :  { %s941_s25 = scalar_select %p777_p5, 1, 0 }
 0xd6d   :  { %s940_s26 = sadd.s32 %s939_s23, %s5034_s11  ;;  %s5124_s5 = ssub.s32 %s5032_s22, %s939_s23 }
 0xd6e   :  { %s5126_s27 = ssub.s32 %s940_s26, %s941_s25  ;;  %p3348_p12 = scmp.ne.s32.totalorder %s5051_s10, 0 }
 0xd6f   :  { %vm952_vm9 = vcmask (!%p3348_p12), 516096   ;;  %s3150_s3 = scalar_lea.vmem (!%p3348_p12), [#allocation2], %s5045_s16  ;;  %s3152_s28 = scalar_lea.vmem (!%p3348_p12), [#allocation3], %s5047_s4 }
 0xd70   :  { %946 = sbr.rel (%p3348_p12) target bundleno = 3447 (0xd77), region = 117  ;;  %v3349_v10 = vld [vmem:[%s3150_s3 + $0x7] sm:$0x1] (!%p3348_p12) }
 0xd71   :  { %3350 = vst.msk [vmem:[%s3152_s28 + $0xa] sm:$0x1] (!%p3348_p12), %vm952_vm9, %v3349_v10 }
 0xd77 PF:  { %s954_s29 = scalar_select %p776_p6, 1, 0 }
 0xd78   :  { %s956_s30 = scalar_select %p778_p7, 1, 0 }
 0xd79   :  { %s955_s9 = sadd.s32 %s954_s29, %s5047_s4  ;;  %s5137_s22 = ssub.s32 %s5045_s16, %s954_s29 }
 0xd7a   :  { %s5139_s11 = ssub.s32 %s955_s9, %s956_s30  ;;  %s5141_s12 = sld [smem:[#allocation4 + $0x4]] }
 0xd7b   :  { %s5143_s13 = sld [smem:[#allocation4 + $0x84]] }
 0xd80   :  { %p961_p13 = scmp.eq.s32.totalorder %s5141_s12, 0  ;;  %p963_p0 = scmp.eq.s32.totalorder %s5141_s12, 1 }
 0xd81   :  { %p962_p1 = scmp.eq.s32.totalorder %s5143_s13, 0  ;;  %p964_p2 = scmp.eq.s32.totalorder %s5143_s13, 1 }
 0xd83   :  { %p965_p3 = por %p964_p2, %p963_p0 }
 0xd84   :  { %v3865_v11 = vpack.c.bf16 (%p965_p3), %v4641_v32, %v4625_v26  ;;  %v3867_v12 = vpack.c.bf16 (%p965_p3), %v4630_v27, %v4620_v25  ;;  %v3869_v13 = vpack.c.bf16 (%p965_p3), %v4669_v37, %v4651_v34  ;;  %s5160_s1 = scalar_lea.vmem (%p965_p3), [#allocation3], %s5139_s11  ;;  %s4486_s14 = smov (%p965_p3), 64   ;;  %v3871_v16 = vpack.c.bf16 (%p965_p3), %v4664_v36, %v4646_v33 }
 0xd85   :  { %968 = sbr.rel (!%p965_p3) target bundleno = 4198 (0x1066), region = 121  ;;  %v3358_v14 = vld [vmem:[%s5160_s1 + $0x9] sm:$0x1] (%p965_p3)  ;;  %s5165_s15 = scalar_lea.vmem (%p965_p3), [#allocation3], %s5126_s27  ;;  %v3873_v17 = vpack.c.bf16 (%p965_p3), %v4689_v41, %v4679_v39  ;;  %v4487_v19 = vmov (%p965_p3), 0.0   ;;  %v3875_v20 = vpack.c.bf16 (%p965_p3), %v4684_v40, %v4674_v38  ;;  %v3877_v21 = vpack.c.bf16 (%p965_p3), %v4709_v46, %v4699_v43 }
 0xd86   :  { %987 = vrot.lane.b32.xlu0 (%p965_p3), %v3358_v14, %s4486_s14  ;;  %3866 = vmatprep.subr.bf16.mxu0 (%p965_p3), %v3865_v11  ;;  %v3586_v15 = vld [vmem:[%s5165_s15 - $0x1] sm:$0x1] (%p965_p3)  ;;  %v3879_v22 = vpack.c.bf16 (%p965_p3), %v4704_v44, %v4694_v42  ;;  %v3881_v23 = vpack.c.bf16 (%p965_p3), %v4729_v51, %v4719_v48  ;;  %v3883_v24 = vpack.c.bf16 (%p965_p3), %v4724_v50, %v4714_v47  ;;  %v3357_v1 = vld [vmem:[%s5160_s1 + $0x8] sm:$0x1] (%p965_p3)  ;;  %v3583_v4 = vld [vmem:[%s5165_s15 - $0x2] sm:$0x1] (%p965_p3) }
 0xd87   :  { %3868 = vmatpush1.bf16.msra.mxu0 (%p965_p3), %v3867_v12  ;;  %1060 = vmatprep.mubr.f32.mxu0 (%p965_p3), %v4487_v19  ;;  %v3885_v30 = vpack.c.bf16 (%p965_p3), %v4749_v55, %v4739_v53  ;;  %v3887_v31 = vpack.c.bf16 (%p965_p3), %v4744_v54, %v4734_v52  ;;  %v3889_v35 = vpack.c.bf16 (%p965_p3), %v4769_v59, %v4759_v57  ;;  %vm994_vm10 = vcmask (%p965_p3), 1040384   ;;  %s4488_s16 = smov (%p965_p3), 96   ;;  %s4489_s4 = smov (%p965_p3), 32  }
 0xd88   :  { %3870 = vmatprep.subr.bf16.mxu0 (%p965_p3), %v3869_v13  ;;  %v3891_v45 = vpack.c.bf16 (%p965_p3), %v4764_v58, %v4754_v56  ;;  %v3893_v49 = vpack.c.bf16 (%p965_p3), %v4789_v63, %v4779_v61  ;;  %v3895_v0 = vpack.c.bf16 (%p965_p3), %v4784_v62, %v4774_v60  ;;  %p3360_p4 = scmp.ne.s32.totalorder (%p965_p3), %s5141_s12, 1 }
 0xd8a   :  { %976 = vrot.lane.b32.xlu0 (%p965_p3), %v3586_v15, %s4486_s14 }
 0xd8b   :  { %3872 = vmatpush1.bf16.msra.mxu0 (%p965_p3), %v3871_v16 }
 0xd8c   :  { %3874 = vmatprep.subr.bf16.mxu0 %v3873_v17  ;;  %vm1109_vm11 = vcmask (!%p3360_p4), 516096  }
 0xd8f   :  { %3876 = vmatpush1.bf16.msra.mxu0 %v3875_v20 }
 0xd90   :  { %3878 = vmatprep.subr.bf16.mxu0 %v3877_v21 }
 0xd93   :  { %3880 = vmatpush1.bf16.msra.mxu0 %v3879_v22 }
 0xd94   :  { %3882 = vmatprep.subr.bf16.mxu0 %v3881_v23 }
 0xd97   :  { %3884 = vmatpush1.bf16.msra.mxu0 %v3883_v24 }
 0xd98   :  { %3886 = vmatprep.subr.bf16.mxu0 %v3885_v30 }
 0xd9b   :  { %3888 = vmatpush1.bf16.msra.mxu0 %v3887_v31 }
 0xd9c   :  { %3890 = vmatprep.subr.bf16.mxu0 %v3889_v35 }
 0xd9f   :  { %3892 = vmatpush1.bf16.msra.mxu0 %v3891_v45 }
 0xda0   :  { %3894 = vmatprep.subr.bf16.mxu0 %v3893_v49 }
 0xda3   :  { %3896 = vmatpush1.bf16.msra.mxu0 %v3895_v0 }
 0xdf8   :  { %v988_v2 = vpop.permute.xlu0 %987 }
 0xdf9   :  { %v990_v3 = vsel %vm179_vm1, %v3357_v1, %v988_v2 }
 0xdfa   :  { %v992_v5 = vrot.slane %v990_v3, 7 }
 0xdfc   :  { %v977_v6 = vpop.permute.xlu0 %976 }
 0xdfd   :  { %v979_v7 = vsel %vm179_vm1, %v3583_v4, %v977_v6 }
 0xdfe   :  { %v995_v8 = vsel %vm994_vm10, %v979_v7, %v992_v5 }
 0xdff   :  { %1082 = vrot.lane.b32.xlu1 %v995_v8, %s4488_s16  ;;  %1061 = vmatmul.mubr.f32.vlgmr.msra.gmra.mrb[0].mxu0 %v995_v8 }
 0xe71   :  { %v1083_v16 = vpop.permute.xlu1 %1082 }
 0xed2   :  { %v1062_v9 = vpop.f32.mrb[0].mxu0 }
 0xed3   :  { %v1063_v10 = vadd.f32 %v1062_v9, %v4632_v28  ;;  %v1064_v11 = vpop.f32.mrb[1].mxu0 }
 0xed4   :  { %v1065_v20 = vadd.f32 %v1064_v11, %v4634_v29 }
 0xed5   :  { %v3359_v12 = vmul.f32 -1.442695, %v1063_v10 }
 0xed7   :  { %4340 = vpow2.f32 %v3359_v12 }
 0xee1   :  { %v4341_v13 = vpop.eup %4340 }
 0xee2   :  { %v1070_v14 = vadd.f32 1.0, %v4341_v13 }
 0xee4   :  { %4342 = vrcp.f32 %v1070_v14 }
 0xee5   :  { %4344 = vtanh.f32 %v1065_v20 }
 0xeee   :  { %v4343_v15 = vpop.eup %4342 }
 0xeef   :  { %v1085_v17 = vmul.f32 %v4343_v15, %v1083_v16  ;;  %v1075_v19 = vmul.f32 %v4343_v15, %v995_v8  ;;  %v4345_v21 = vpop.eup %4344 }
 0xef0   :  { %v1074_v22 = vmul.f32 %v4345_v21, %v4343_v15 }
 0xef1   :  { %1087 = vrot.lane.b32.xlu0 %v1085_v17, %s4486_s14  ;;  %1077 = vrot.lane.b32.xlu1 %v1075_v19, %s4488_s16 }
 0xf63   :  { %v1078_v23 = vpop.permute.xlu1 %1077  ;;  %v1088_v30 = vpop.permute.xlu0 %1087 }
 0xf64   :  { %v1080_v24 = vadd.f32 %v1078_v23, %v1074_v22 }
 0xf66   :  { %v1090_v31 = vadd.f32 %v1088_v30, %v1080_v24 }
 0xf68   :  { %4346 = vtanh.f32 %v1090_v31 }
 0xf72   :  { %v4347_v35 = vpop.eup %4346 }
 0xf73   :  { %1093 = vrot.lane.b32.xlu1 %v4347_v35, %s4488_s16 }
 0xf77   :  { %1102 = vrot.lane.b32.xlu1 %v1090_v31, %s4489_s4 }
 0xfe5   :  { %v1094_v45 = vpop.permute.xlu1 %1093 }
 0xfe6   :  { %v1096_v49 = vmul.f32 %v4343_v15, %v1094_v45 }
 0xfe8   :  { %1098 = vrot.lane.b32.xlu0 %v1096_v49, %s4489_s4 }
 0xfe9   :  { %v1103_v0 = vpop.permute.xlu1 %1102 }
0x1055   :  { %1108 = sbr.rel (%p3360_p4) target bundleno = 4189 (0x105d), region = 125 }
0x105a   :  { %v1099_v1 = vpop.permute.xlu0 %1098 }
0x105b   :  { %v1105_v2 = vsel %vm176_vm3, %v1099_v1, %v1103_v0 }
0x105c   :  { %3587 = vst.msk [vmem:[%s5165_s15 - $0x2] sm:$0x1] %vm1109_vm11, %v1105_v2 }
0x105d PF:  { %p3361_p5 = scmp.ne.s32.totalorder %s5143_s13, 1 }
0x105e   :  { %vm1114_vm12 = vcmask (!%p3361_p5), 517121  }
0x105f   :  { %1113 = sbr.rel (%p3361_p5) target bundleno = 4198 (0x1066), region = 129  ;;  %3362 = vst.msk [vmem:[%s5160_s1 + $0x7] sm:$0x2] (!%p3361_p5), %vm1114_vm12, %v1105_v2 }
0x1066 PF:  { %p3364_p6 = scmp.ne.s32.totalorder %s5141_s12, 0 }
0x1067   :  { %vm1123_vm13 = vcmask (!%p3364_p6), 516096   ;;  %s3588_s2 = scalar_lea.vmem (!%p3364_p6), [#allocation2], %s5124_s5  ;;  %s1122_s10 = scalar_lea.vmem (!%p3364_p6), [#allocation3], %s5126_s27 }
0x1068   :  { %1119 = sbr.rel (%p3364_p6) target bundleno = 4207 (0x106f), region = 133  ;;  %v3590_v3 = vld [vmem:[%s3588_s2 - $0x1] sm:$0x1] (!%p3364_p6) }
0x1069   :  { %1124 = vst.msk [vmem:[%s1122_s10] sm:$0x1] (!%p3364_p6), %vm1123_vm13, %v3590_v3 }
0x106f PF:  { %s1125_s17 = scalar_select %p961_p13, 1, 0 }
0x1070   :  { %s1127_s18 = scalar_select %p963_p0, 1, 0 }
0x1071   :  { %s1126_s19 = sadd.s32 %s1125_s17, %s5126_s27  ;;  %s5216_s20 = ssub.s32 %s5124_s5, %s1125_s17 }
0x1072   :  { %s5218_s21 = ssub.s32 %s1126_s19, %s1127_s18  ;;  %p3366_p7 = scmp.ne.s32.totalorder %s5143_s13, 0 }
0x1073   :  { %vm1138_vm14 = vcmask (!%p3366_p7), 516096   ;;  %s3162_s0 = scalar_lea.vmem (!%p3366_p7), [#allocation2], %s5137_s22  ;;  %s3164_s24 = scalar_lea.vmem (!%p3366_p7), [#allocation3], %s5139_s11 }
0x1074   :  { %1132 = sbr.rel (%p3366_p7) target bundleno = 4219 (0x107b), region = 137  ;;  %v3367_v4 = vld [vmem:[%s3162_s0 + $0x7] sm:$0x1] (!%p3366_p7) }
0x1075   :  { %3368 = vst.msk [vmem:[%s3164_s24 + $0xa] sm:$0x1] (!%p3366_p7), %vm1138_vm14, %v3367_v4 }
0x107b PF:  { %s1140_s23 = scalar_select %p962_p1, 1, 0 }
0x107c   :  { %s1142_s25 = scalar_select %p964_p2, 1, 0 }
0x107d   :  { %s1141_s26 = sadd.s32 %s1140_s23, %s5139_s11  ;;  %s5229_s5 = ssub.s32 %s5137_s22, %s1140_s23 }
0x107e   :  { %s5231_s27 = ssub.s32 %s1141_s26, %s1142_s25  ;;  %s5233_s3 = sld [smem:[#allocation4 + $0x5]] }
0x107f   :  { %s5235_s28 = sld [smem:[#allocation4 + $0x85]] }
0x1084   :  { %p1147_p8 = scmp.eq.s32.totalorder %s5233_s3, 0  ;;  %p1149_p9 = scmp.eq.s32.totalorder %s5233_s3, 1 }
0x1085   :  { %p1148_p10 = scmp.eq.s32.totalorder %s5235_s28, 0  ;;  %p1150_p11 = scmp.eq.s32.totalorder %s5235_s28, 1 }
0x1087   :  { %p1151_p12 = por %p1150_p11, %p1149_p9 }
0x1088   :  { %v3897_v5 = vpack.c.bf16 (%p1151_p12), %v4641_v32, %v4625_v26  ;;  %v3899_v6 = vpack.c.bf16 (%p1151_p12), %v4630_v27, %v4620_v25  ;;  %v3901_v7 = vpack.c.bf16 (%p1151_p12), %v4669_v37, %v4651_v34  ;;  %s5252_s29 = scalar_lea.vmem (%p1151_p12), [#allocation3], %s5231_s27  ;;  %s4490_s30 = smov (%p1151_p12), 64   ;;  %v3903_v10 = vpack.c.bf16 (%p1151_p12), %v4664_v36, %v4646_v33 }
0x1089   :  { %1154 = sbr.rel (!%p1151_p12) target bundleno = 4970 (0x136a), region = 141  ;;  %v3376_v8 = vld [vmem:[%s5252_s29 + $0x9] sm:$0x1] (%p1151_p12)  ;;  %s5257_s9 = scalar_lea.vmem (%p1151_p12), [#allocation3], %s5218_s21  ;;  %v3905_v11 = vpack.c.bf16 (%p1151_p12), %v4689_v41, %v4679_v39  ;;  %v4491_v12 = vmov (%p1151_p12), 0.0   ;;  %v3907_v13 = vpack.c.bf16 (%p1151_p12), %v4684_v40, %v4674_v38  ;;  %v3909_v14 = vpack.c.bf16 (%p1151_p12), %v4709_v46, %v4699_v43 }
0x108a   :  { %1173 = vrot.lane.b32.xlu0 (%p1151_p12), %v3376_v8, %s4490_s30  ;;  %3898 = vmatprep.subr.bf16.mxu0 (%p1151_p12), %v3897_v5  ;;  %v3596_v9 = vld [vmem:[%s5257_s9 - $0x1] sm:$0x1] (%p1151_p12)  ;;  %v3911_v15 = vpack.c.bf16 (%p1151_p12), %v4704_v44, %v4694_v42  ;;  %v3913_v16 = vpack.c.bf16 (%p1151_p12), %v4729_v51, %v4719_v48  ;;  %v3915_v17 = vpack.c.bf16 (%p1151_p12), %v4724_v50, %v4714_v47  ;;  %v3375_v30 = vld [vmem:[%s5252_s29 + $0x8] sm:$0x1] (%p1151_p12)  ;;  %v3593_v45 = vld [vmem:[%s5257_s9 - $0x2] sm:$0x1] (%p1151_p12) }
0x108b   :  { %3900 = vmatpush1.bf16.msra.mxu0 (%p1151_p12), %v3899_v6  ;;  %1246 = vmatprep.mubr.f32.mxu0 (%p1151_p12), %v4491_v12  ;;  %v3917_v19 = vpack.c.bf16 (%p1151_p12), %v4749_v55, %v4739_v53  ;;  %v3919_v20 = vpack.c.bf16 (%p1151_p12), %v4744_v54, %v4734_v52  ;;  %v3921_v21 = vpack.c.bf16 (%p1151_p12), %v4769_v59, %v4759_v57  ;;  %vm1180_vm15 = vcmask (%p1151_p12), 1040384   ;;  %s4492_s22 = smov (%p1151_p12), 96   ;;  %s4493_s11 = smov (%p1151_p12), 32  }
0x108c   :  { %3902 = vmatprep.subr.bf16.mxu0 (%p1151_p12), %v3901_v7  ;;  %v3923_v22 = vpack.c.bf16 (%p1151_p12), %v4764_v58, %v4754_v56  ;;  %v3925_v23 = vpack.c.bf16 (%p1151_p12), %v4789_v63, %v4779_v61  ;;  %v3927_v24 = vpack.c.bf16 (%p1151_p12), %v4784_v62, %v4774_v60  ;;  %p3378_p13 = scmp.ne.s32.totalorder (%p1151_p12), %s5233_s3, 1 }
0x108e   :  { %1162 = vrot.lane.b32.xlu0 (%p1151_p12), %v3596_v9, %s4490_s30 }
0x108f   :  { %3904 = vmatpush1.bf16.msra.mxu0 (%p1151_p12), %v3903_v10 }
0x1090   :  { %3906 = vmatprep.subr.bf16.mxu0 %v3905_v11  ;;  %vm1295_vm0 = vcmask (!%p3378_p13), 516096  }
0x1093   :  { %3908 = vmatpush1.bf16.msra.mxu0 %v3907_v13 }
0x1094   :  { %3910 = vmatprep.subr.bf16.mxu0 %v3909_v14 }
0x1097   :  { %3912 = vmatpush1.bf16.msra.mxu0 %v3911_v15 }
0x1098   :  { %3914 = vmatprep.subr.bf16.mxu0 %v3913_v16 }
0x109b   :  { %3916 = vmatpush1.bf16.msra.mxu0 %v3915_v17 }
0x109c   :  { %3918 = vmatprep.subr.bf16.mxu0 %v3917_v19 }
0x109f   :  { %3920 = vmatpush1.bf16.msra.mxu0 %v3919_v20 }
0x10a0   :  { %3922 = vmatprep.subr.bf16.mxu0 %v3921_v21 }
0x10a3   :  { %3924 = vmatpush1.bf16.msra.mxu0 %v3923_v22 }
0x10a4   :  { %3926 = vmatprep.subr.bf16.mxu0 %v3925_v23 }
0x10a7   :  { %3928 = vmatpush1.bf16.msra.mxu0 %v3927_v24 }
0x10fc   :  { %v1174_v31 = vpop.permute.xlu0 %1173 }
0x10fd   :  { %v1176_v35 = vsel %vm179_vm1, %v3375_v30, %v1174_v31 }
0x10fe   :  { %v1178_v49 = vrot.slane %v1176_v35, 7 }
0x1100   :  { %v1163_v0 = vpop.permute.xlu0 %1162 }
0x1101   :  { %v1165_v1 = vsel %vm179_vm1, %v3593_v45, %v1163_v0 }
0x1102   :  { %v1181_v2 = vsel %vm1180_vm15, %v1165_v1, %v1178_v49 }
0x1103   :  { %1268 = vrot.lane.b32.xlu1 %v1181_v2, %s4492_s22  ;;  %1247 = vmatmul.mubr.f32.vlgmr.msra.gmra.mrb[0].mxu0 %v1181_v2 }
0x1175   :  { %v1269_v10 = vpop.permute.xlu1 %1268 }
0x11d6   :  { %v1248_v3 = vpop.f32.mrb[0].mxu0 }
0x11d7   :  { %v1249_v4 = vadd.f32 %v1248_v3, %v4632_v28  ;;  %v1250_v5 = vpop.f32.mrb[1].mxu0 }
0x11d8   :  { %v1251_v13 = vadd.f32 %v1250_v5, %v4634_v29 }
0x11d9   :  { %v3377_v6 = vmul.f32 -1.442695, %v1249_v4 }
0x11db   :  { %4348 = vpow2.f32 %v3377_v6 }
0x11e5   :  { %v4349_v7 = vpop.eup %4348 }
0x11e6   :  { %v1256_v8 = vadd.f32 1.0, %v4349_v7 }
0x11e8   :  { %4350 = vrcp.f32 %v1256_v8 }
0x11e9   :  { %4352 = vtanh.f32 %v1251_v13 }
0x11f2   :  { %v4351_v9 = vpop.eup %4350 }
0x11f3   :  { %v1271_v11 = vmul.f32 %v4351_v9, %v1269_v10  ;;  %v1261_v12 = vmul.f32 %v4351_v9, %v1181_v2  ;;  %v4353_v14 = vpop.eup %4352 }
0x11f4   :  { %v1260_v15 = vmul.f32 %v4353_v14, %v4351_v9 }
0x11f5   :  { %1273 = vrot.lane.b32.xlu0 %v1271_v11, %s4490_s30  ;;  %1263 = vrot.lane.b32.xlu1 %v1261_v12, %s4492_s22 }
0x1267   :  { %v1264_v16 = vpop.permute.xlu1 %1263  ;;  %v1274_v19 = vpop.permute.xlu0 %1273 }
0x1268   :  { %v1266_v17 = vadd.f32 %v1264_v16, %v1260_v15 }
0x126a   :  { %v1276_v20 = vadd.f32 %v1274_v19, %v1266_v17 }
0x126c   :  { %4354 = vtanh.f32 %v1276_v20 }
0x1276   :  { %v4355_v21 = vpop.eup %4354 }
0x1277   :  { %1279 = vrot.lane.b32.xlu1 %v4355_v21, %s4492_s22 }
0x127b   :  { %1288 = vrot.lane.b32.xlu1 %v1276_v20, %s4493_s11 }
0x12e9   :  { %v1280_v22 = vpop.permute.xlu1 %1279 }
0x12ea   :  { %v1282_v23 = vmul.f32 %v4351_v9, %v1280_v22 }
0x12ec   :  { %1284 = vrot.lane.b32.xlu0 %v1282_v23, %s4493_s11 }
0x12ed   :  { %v1289_v24 = vpop.permute.xlu1 %1288 }
0x1359   :  { %1294 = sbr.rel (%p3378_p13) target bundleno = 4961 (0x1361), region = 145 }
0x135e   :  { %v1285_v30 = vpop.permute.xlu0 %1284 }
0x135f   :  { %v1291_v31 = vsel %vm176_vm3, %v1285_v30, %v1289_v24 }
0x1360   :  { %3597 = vst.msk [vmem:[%s5257_s9 - $0x2] sm:$0x1] %vm1295_vm0, %v1291_v31 }
0x1361 PF:  { %p3379_p0 = scmp.ne.s32.totalorder %s5235_s28, 1 }
0x1362   :  { %vm1300_vm2 = vcmask (!%p3379_p0), 517121  }
0x1363   :  { %1299 = sbr.rel (%p3379_p0) target bundleno = 4970 (0x136a), region = 149  ;;  %3380 = vst.msk [vmem:[%s5252_s29 + $0x7] sm:$0x2] (!%p3379_p0), %vm1300_vm2, %v1291_v31 }
0x136a PF:  { %p3382_p1 = scmp.ne.s32.totalorder %s5233_s3, 0 }
0x136b   :  { %vm1309_vm4 = vcmask (!%p3382_p1), 516096   ;;  %s3598_s12 = scalar_lea.vmem (!%p3382_p1), [#allocation2], %s5216_s20  ;;  %s1308_s13 = scalar_lea.vmem (!%p3382_p1), [#allocation3], %s5218_s21 }
0x136c   :  { %1305 = sbr.rel (%p3382_p1) target bundleno = 4979 (0x1373), region = 153  ;;  %v3600_v35 = vld [vmem:[%s3598_s12 - $0x1] sm:$0x1] (!%p3382_p1) }
0x136d   :  { %1310 = vst.msk [vmem:[%s1308_s13] sm:$0x1] (!%p3382_p1), %vm1309_vm4, %v3600_v35 }
0x1373 PF:  { %s1311_s1 = scalar_select %p1147_p8, 1, 0 }
0x1374   :  { %s1313_s14 = scalar_select %p1149_p9, 1, 0 }
0x1375   :  { %s1312_s15 = sadd.s32 %s1311_s1, %s5218_s21  ;;  %s5308_s16 = ssub.s32 %s5216_s20, %s1311_s1 }
0x1376   :  { %s5310_s4 = ssub.s32 %s1312_s15, %s1313_s14  ;;  %p3384_p2 = scmp.ne.s32.totalorder %s5235_s28, 0 }
0x1377   :  { %vm1324_vm5 = vcmask (!%p3384_p2), 516096   ;;  %s3174_s2 = scalar_lea.vmem (!%p3384_p2), [#allocation2], %s5229_s5  ;;  %s3176_s10 = scalar_lea.vmem (!%p3384_p2), [#allocation3], %s5231_s27 }
0x1378   :  { %1318 = sbr.rel (%p3384_p2) target bundleno = 4991 (0x137f), region = 157  ;;  %v3385_v45 = vld [vmem:[%s3174_s2 + $0x7] sm:$0x1] (!%p3384_p2) }
0x1379   :  { %3386 = vst.msk [vmem:[%s3176_s10 + $0xa] sm:$0x1] (!%p3384_p2), %vm1324_vm5, %v3385_v45 }
0x137f PF:  { %s1326_s17 = scalar_select %p1148_p10, 1, 0 }
0x1380   :  { %s1328_s18 = scalar_select %p1150_p11, 1, 0 }
0x1381   :  { %s1327_s19 = sadd.s32 %s1326_s17, %s5231_s27  ;;  %s5321_s20 = ssub.s32 %s5229_s5, %s1326_s17 }
0x1382   :  { %s5323_s21 = ssub.s32 %s1327_s19, %s1328_s18  ;;  %s5325_s0 = sld [smem:[#allocation4 + $0x6]] }
0x1383   :  { %s5327_s24 = sld [smem:[#allocation4 + $0x86]] }
0x1388   :  { %p1333_p3 = scmp.eq.s32.totalorder %s5325_s0, 0  ;;  %p1335_p4 = scmp.eq.s32.totalorder %s5325_s0, 1 }
0x1389   :  { %p1334_p5 = scmp.eq.s32.totalorder %s5327_s24, 0  ;;  %p1336_p6 = scmp.eq.s32.totalorder %s5327_s24, 1 }
0x138b   :  { %p1337_p7 = por %p1336_p6, %p1335_p4 }
0x138c   :  { %v3929_v49 = vpack.c.bf16 (%p1337_p7), %v4641_v32, %v4625_v26  ;;  %v3931_v0 = vpack.c.bf16 (%p1337_p7), %v4630_v27, %v4620_v25  ;;  %v3933_v1 = vpack.c.bf16 (%p1337_p7), %v4669_v37, %v4651_v34  ;;  %s5344_s23 = scalar_lea.vmem (%p1337_p7), [#allocation3], %s5323_s21  ;;  %s4494_s25 = smov (%p1337_p7), 64   ;;  %v3935_v4 = vpack.c.bf16 (%p1337_p7), %v4664_v36, %v4646_v33 }
0x138d   :  { %1340 = sbr.rel (!%p1337_p7) target bundleno = 5742 (0x166e), region = 161  ;;  %v3394_v2 = vld [vmem:[%s5344_s23 + $0x9] sm:$0x1] (%p1337_p7)  ;;  %s5349_s26 = scalar_lea.vmem (%p1337_p7), [#allocation3], %s5310_s4  ;;  %v3937_v5 = vpack.c.bf16 (%p1337_p7), %v4689_v41, %v4679_v39  ;;  %v4495_v6 = vmov (%p1337_p7), 0.0   ;;  %v3939_v7 = vpack.c.bf16 (%p1337_p7), %v4684_v40, %v4674_v38  ;;  %v3941_v8 = vpack.c.bf16 (%p1337_p7), %v4709_v46, %v4699_v43 }
0x138e   :  { %1359 = vrot.lane.b32.xlu0 (%p1337_p7), %v3394_v2, %s4494_s25  ;;  %3930 = vmatprep.subr.bf16.mxu0 (%p1337_p7), %v3929_v49  ;;  %v3606_v3 = vld [vmem:[%s5349_s26 - $0x1] sm:$0x1] (%p1337_p7)  ;;  %v3943_v9 = vpack.c.bf16 (%p1337_p7), %v4704_v44, %v4694_v42  ;;  %v3945_v10 = vpack.c.bf16 (%p1337_p7), %v4729_v51, %v4719_v48  ;;  %v3947_v11 = vpack.c.bf16 (%p1337_p7), %v4724_v50, %v4714_v47  ;;  %v3393_v19 = vld [vmem:[%s5344_s23 + $0x8] sm:$0x1] (%p1337_p7)  ;;  %v3603_v22 = vld [vmem:[%s5349_s26 - $0x2] sm:$0x1] (%p1337_p7) }
0x138f   :  { %3932 = vmatpush1.bf16.msra.mxu0 (%p1337_p7), %v3931_v0  ;;  %1432 = vmatprep.mubr.f32.mxu0 (%p1337_p7), %v4495_v6  ;;  %v3949_v12 = vpack.c.bf16 (%p1337_p7), %v4749_v55, %v4739_v53  ;;  %v3951_v13 = vpack.c.bf16 (%p1337_p7), %v4744_v54, %v4734_v52  ;;  %v3953_v14 = vpack.c.bf16 (%p1337_p7), %v4769_v59, %v4759_v57  ;;  %vm1366_vm6 = vcmask (%p1337_p7), 1040384   ;;  %s4496_s5 = smov (%p1337_p7), 96   ;;  %s4497_s27 = smov (%p1337_p7), 32  }
0x1390   :  { %3934 = vmatprep.subr.bf16.mxu0 (%p1337_p7), %v3933_v1  ;;  %v3955_v15 = vpack.c.bf16 (%p1337_p7), %v4764_v58, %v4754_v56  ;;  %v3957_v16 = vpack.c.bf16 (%p1337_p7), %v4789_v63, %v4779_v61  ;;  %v3959_v17 = vpack.c.bf16 (%p1337_p7), %v4784_v62, %v4774_v60  ;;  %p3396_p8 = scmp.ne.s32.totalorder (%p1337_p7), %s5325_s0, 1 }
0x1392   :  { %1348 = vrot.lane.b32.xlu0 (%p1337_p7), %v3606_v3, %s4494_s25 }
0x1393   :  { %3936 = vmatpush1.bf16.msra.mxu0 (%p1337_p7), %v3935_v4 }
0x1394   :  { %3938 = vmatprep.subr.bf16.mxu0 %v3937_v5  ;;  %vm1481_vm7 = vcmask (!%p3396_p8), 516096  }
0x1397   :  { %3940 = vmatpush1.bf16.msra.mxu0 %v3939_v7 }
0x1398   :  { %3942 = vmatprep.subr.bf16.mxu0 %v3941_v8 }
0x139b   :  { %3944 = vmatpush1.bf16.msra.mxu0 %v3943_v9 }
0x139c   :  { %3946 = vmatprep.subr.bf16.mxu0 %v3945_v10 }
0x139f   :  { %3948 = vmatpush1.bf16.msra.mxu0 %v3947_v11 }
0x13a0   :  { %3950 = vmatprep.subr.bf16.mxu0 %v3949_v12 }
0x13a3   :  { %3952 = vmatpush1.bf16.msra.mxu0 %v3951_v13 }
0x13a4   :  { %3954 = vmatprep.subr.bf16.mxu0 %v3953_v14 }
0x13a7   :  { %3956 = vmatpush1.bf16.msra.mxu0 %v3955_v15 }
0x13a8   :  { %3958 = vmatprep.subr.bf16.mxu0 %v3957_v16 }
0x13ab   :  { %3960 = vmatpush1.bf16.msra.mxu0 %v3959_v17 }
0x1400   :  { %v1360_v20 = vpop.permute.xlu0 %1359 }
0x1401   :  { %v1362_v21 = vsel %vm179_vm1, %v3393_v19, %v1360_v20 }
0x1402   :  { %v1364_v23 = vrot.slane %v1362_v21, 7 }
0x1404   :  { %v1349_v24 = vpop.permute.xlu0 %1348 }
0x1405   :  { %v1351_v30 = vsel %vm179_vm1, %v3603_v22, %v1349_v24 }
0x1406   :  { %v1367_v31 = vsel %vm1366_vm6, %v1351_v30, %v1364_v23 }
0x1407   :  { %1454 = vrot.lane.b32.xlu1 %v1367_v31, %s4496_s5  ;;  %1433 = vmatmul.mubr.f32.vlgmr.msra.gmra.mrb[0].mxu0 %v1367_v31 }
0x1479   :  { %v1455_v4 = vpop.permute.xlu1 %1454 }
0x14da   :  { %v1434_v35 = vpop.f32.mrb[0].mxu0 }
0x14db   :  { %v1435_v45 = vadd.f32 %v1434_v35, %v4632_v28  ;;  %v1436_v49 = vpop.f32.mrb[1].mxu0 }
0x14dc   :  { %v1437_v7 = vadd.f32 %v1436_v49, %v4634_v29 }
0x14dd   :  { %v3395_v0 = vmul.f32 -1.442695, %v1435_v45 }
0x14df   :  { %4356 = vpow2.f32 %v3395_v0 }
0x14e9   :  { %v4357_v1 = vpop.eup %4356 }
0x14ea   :  { %v1442_v2 = vadd.f32 1.0, %v4357_v1 }
0x14ec   :  { %4358 = vrcp.f32 %v1442_v2 }
0x14ed   :  { %4360 = vtanh.f32 %v1437_v7 }
0x14f6   :  { %v4359_v3 = vpop.eup %4358 }
0x14f7   :  { %v1457_v5 = vmul.f32 %v4359_v3, %v1455_v4  ;;  %v1447_v6 = vmul.f32 %v4359_v3, %v1367_v31  ;;  %v4361_v8 = vpop.eup %4360 }
0x14f8   :  { %v1446_v9 = vmul.f32 %v4361_v8, %v4359_v3 }
0x14f9   :  { %1459 = vrot.lane.b32.xlu0 %v1457_v5, %s4494_s25  ;;  %1449 = vrot.lane.b32.xlu1 %v1447_v6, %s4496_s5 }
0x156b   :  { %v1450_v10 = vpop.permute.xlu1 %1449  ;;  %v1460_v12 = vpop.permute.xlu0 %1459 }
0x156c   :  { %v1452_v11 = vadd.f32 %v1450_v10, %v1446_v9 }
0x156e   :  { %v1462_v13 = vadd.f32 %v1460_v12, %v1452_v11 }
0x1570   :  { %4362 = vtanh.f32 %v1462_v13 }
0x157a   :  { %v4363_v14 = vpop.eup %4362 }
0x157b   :  { %1465 = vrot.lane.b32.xlu1 %v4363_v14, %s4496_s5 }
0x157f   :  { %1474 = vrot.lane.b32.xlu1 %v1462_v13, %s4497_s27 }
0x15ed   :  { %v1466_v15 = vpop.permute.xlu1 %1465 }
0x15ee   :  { %v1468_v16 = vmul.f32 %v4359_v3, %v1466_v15 }
0x15f0   :  { %1470 = vrot.lane.b32.xlu0 %v1468_v16, %s4497_s27 }
0x15f1   :  { %v1475_v17 = vpop.permute.xlu1 %1474 }
0x165d   :  { %1480 = sbr.rel (%p3396_p8) target bundleno = 5733 (0x1665), region = 165 }
0x1662   :  { %v1471_v19 = vpop.permute.xlu0 %1470 }
0x1663   :  { %v1477_v20 = vsel %vm176_vm3, %v1471_v19, %v1475_v17 }
0x1664   :  { %3607 = vst.msk [vmem:[%s5349_s26 - $0x2] sm:$0x1] %vm1481_vm7, %v1477_v20 }
0x1665 PF:  { %p3397_p9 = scmp.ne.s32.totalorder %s5327_s24, 1 }
0x1666   :  { %vm1486_vm8 = vcmask (!%p3397_p9), 517121  }
0x1667   :  { %1485 = sbr.rel (%p3397_p9) target bundleno = 5742 (0x166e), region = 169  ;;  %3398 = vst.msk [vmem:[%s5344_s23 + $0x7] sm:$0x2] (!%p3397_p9), %vm1486_vm8, %v1477_v20 }
0x166e PF:  { %p3400_p10 = scmp.ne.s32.totalorder %s5325_s0, 0 }
0x166f   :  { %vm1495_vm9 = vcmask (!%p3400_p10), 516096   ;;  %s3608_s3 = scalar_lea.vmem (!%p3400_p10), [#allocation2], %s5308_s16  ;;  %s1494_s28 = scalar_lea.vmem (!%p3400_p10), [#allocation3], %s5310_s4 }
0x1670   :  { %1491 = sbr.rel (%p3400_p10) target bundleno = 5751 (0x1677), region = 173  ;;  %v3610_v21 = vld [vmem:[%s3608_s3 - $0x1] sm:$0x1] (!%p3400_p10) }
0x1671   :  { %1496 = vst.msk [vmem:[%s1494_s28] sm:$0x1] (!%p3400_p10), %vm1495_vm9, %v3610_v21 }
0x1677 PF:  { %s1497_s29 = scalar_select %p1333_p3, 1, 0 }
0x1678   :  { %s1499_s30 = scalar_select %p1335_p4, 1, 0 }
0x1679   :  { %s1498_s9 = sadd.s32 %s1497_s29, %s5310_s4  ;;  %s5400_s22 = ssub.s32 %s5308_s16, %s1497_s29 }
0x167a   :  { %s5402_s11 = ssub.s32 %s1498_s9, %s1499_s30  ;;  %p3402_p11 = scmp.ne.s32.totalorder %s5327_s24, 0 }
0x167b   :  { %vm1510_vm10 = vcmask (!%p3402_p11), 516096   ;;  %s3186_s12 = scalar_lea.vmem (!%p3402_p11), [#allocation2], %s5321_s20  ;;  %s3188_s13 = scalar_lea.vmem (!%p3402_p11), [#allocation3], %s5323_s21 }
0x167c   :  { %1504 = sbr.rel (%p3402_p11) target bundleno = 5763 (0x1683), region = 177  ;;  %v3403_v22 = vld [vmem:[%s3186_s12 + $0x7] sm:$0x1] (!%p3402_p11) }
0x167d   :  { %3404 = vst.msk [vmem:[%s3188_s13 + $0xa] sm:$0x1] (!%p3402_p11), %vm1510_vm10, %v3403_v22 }
0x1683 PF:  { %s1512_s1 = scalar_select %p1334_p5, 1, 0 }
0x1684   :  { %s1514_s14 = scalar_select %p1336_p6, 1, 0 }
0x1685   :  { %s1513_s15 = sadd.s32 %s1512_s1, %s5323_s21  ;;  %s5413_s16 = ssub.s32 %s5321_s20, %s1512_s1 }
0x1686   :  { %s5415_s4 = ssub.s32 %s1513_s15, %s1514_s14  ;;  %s5417_s2 = sld [smem:[#allocation4 + $0x7]] }
0x1687   :  { %s5419_s10 = sld [smem:[#allocation4 + $0x87]] }
0x168c   :  { %p1519_p12 = scmp.eq.s32.totalorder %s5417_s2, 0  ;;  %p1521_p13 = scmp.eq.s32.totalorder %s5417_s2, 1 }
0x168d   :  { %p1520_p0 = scmp.eq.s32.totalorder %s5419_s10, 0  ;;  %p1522_p1 = scmp.eq.s32.totalorder %s5419_s10, 1 }
0x168f   :  { %p1523_p2 = por %p1522_p1, %p1521_p13 }
0x1690   :  { %v3961_v23 = vpack.c.bf16 (%p1523_p2), %v4641_v32, %v4625_v26  ;;  %v3963_v24 = vpack.c.bf16 (%p1523_p2), %v4630_v27, %v4620_v25  ;;  %v3965_v30 = vpack.c.bf16 (%p1523_p2), %v4669_v37, %v4651_v34  ;;  %s5436_s17 = scalar_lea.vmem (%p1523_p2), [#allocation3], %s5415_s4  ;;  %s4498_s18 = smov (%p1523_p2), 64   ;;  %v3967_v45 = vpack.c.bf16 (%p1523_p2), %v4664_v36, %v4646_v33 }
0x1691   :  { %1526 = sbr.rel (!%p1523_p2) target bundleno = 6514 (0x1972), region = 181  ;;  %v3412_v31 = vld [vmem:[%s5436_s17 + $0x9] sm:$0x1] (%p1523_p2)  ;;  %s5441_s19 = scalar_lea.vmem (%p1523_p2), [#allocation3], %s5402_s11  ;;  %v3969_v49 = vpack.c.bf16 (%p1523_p2), %v4689_v41, %v4679_v39  ;;  %v4499_v0 = vmov (%p1523_p2), 0.0   ;;  %v3971_v1 = vpack.c.bf16 (%p1523_p2), %v4684_v40, %v4674_v38  ;;  %v3973_v2 = vpack.c.bf16 (%p1523_p2), %v4709_v46, %v4699_v43 }
0x1692   :  { %1545 = vrot.lane.b32.xlu0 (%p1523_p2), %v3412_v31, %s4498_s18  ;;  %3962 = vmatprep.subr.bf16.mxu0 (%p1523_p2), %v3961_v23  ;;  %v3616_v35 = vld [vmem:[%s5441_s19 - $0x1] sm:$0x1] (%p1523_p2)  ;;  %v3975_v3 = vpack.c.bf16 (%p1523_p2), %v4704_v44, %v4694_v42  ;;  %v3977_v4 = vpack.c.bf16 (%p1523_p2), %v4729_v51, %v4719_v48  ;;  %v3979_v5 = vpack.c.bf16 (%p1523_p2), %v4724_v50, %v4714_v47  ;;  %v3411_v12 = vld [vmem:[%s5436_s17 + $0x8] sm:$0x1] (%p1523_p2)  ;;  %v3613_v15 = vld [vmem:[%s5441_s19 - $0x2] sm:$0x1] (%p1523_p2) }
0x1693   :  { %3964 = vmatpush1.bf16.msra.mxu0 (%p1523_p2), %v3963_v24  ;;  %1618 = vmatprep.mubr.f32.mxu0 (%p1523_p2), %v4499_v0  ;;  %v3981_v6 = vpack.c.bf16 (%p1523_p2), %v4749_v55, %v4739_v53  ;;  %v3983_v7 = vpack.c.bf16 (%p1523_p2), %v4744_v54, %v4734_v52  ;;  %v3985_v8 = vpack.c.bf16 (%p1523_p2), %v4769_v59, %v4759_v57  ;;  %vm1552_vm11 = vcmask (%p1523_p2), 1040384   ;;  %s4500_s20 = smov (%p1523_p2), 96   ;;  %s4501_s21 = smov (%p1523_p2), 32  }
0x1694   :  { %3966 = vmatprep.subr.bf16.mxu0 (%p1523_p2), %v3965_v30  ;;  %v3987_v9 = vpack.c.bf16 (%p1523_p2), %v4764_v58, %v4754_v56  ;;  %v3989_v10 = vpack.c.bf16 (%p1523_p2), %v4789_v63, %v4779_v61  ;;  %v3991_v11 = vpack.c.bf16 (%p1523_p2), %v4784_v62, %v4774_v60  ;;  %p3414_p3 = scmp.ne.s32.totalorder (%p1523_p2), %s5417_s2, 1 }
0x1696   :  { %1534 = vrot.lane.b32.xlu0 (%p1523_p2), %v3616_v35, %s4498_s18 }
0x1697   :  { %3968 = vmatpush1.bf16.msra.mxu0 (%p1523_p2), %v3967_v45 }
0x1698   :  { %3970 = vmatprep.subr.bf16.mxu0 %v3969_v49  ;;  %vm1667_vm12 = vcmask (!%p3414_p3), 516096  }
0x169b   :  { %3972 = vmatpush1.bf16.msra.mxu0 %v3971_v1 }
0x169c   :  { %3974 = vmatprep.subr.bf16.mxu0 %v3973_v2 }
0x169f   :  { %3976 = vmatpush1.bf16.msra.mxu0 %v3975_v3 }
0x16a0   :  { %3978 = vmatprep.subr.bf16.mxu0 %v3977_v4 }
0x16a3   :  { %3980 = vmatpush1.bf16.msra.mxu0 %v3979_v5 }
0x16a4   :  { %3982 = vmatprep.subr.bf16.mxu0 %v3981_v6 }
0x16a7   :  { %3984 = vmatpush1.bf16.msra.mxu0 %v3983_v7 }
0x16a8   :  { %3986 = vmatprep.subr.bf16.mxu0 %v3985_v8 }
0x16ab   :  { %3988 = vmatpush1.bf16.msra.mxu0 %v3987_v9 }
0x16ac   :  { %3990 = vmatprep.subr.bf16.mxu0 %v3989_v10 }
0x16af   :  { %3992 = vmatpush1.bf16.msra.mxu0 %v3991_v11 }
0x1704   :  { %v1546_v13 = vpop.permute.xlu0 %1545 }
0x1705   :  { %v1548_v14 = vsel %vm179_vm1, %v3411_v12, %v1546_v13 }
0x1706   :  { %v1550_v16 = vrot.slane %v1548_v14, 7 }
0x1708   :  { %v1535_v17 = vpop.permute.xlu0 %1534 }
0x1709   :  { %v1537_v19 = vsel %vm179_vm1, %v3613_v15, %v1535_v17 }
0x170a   :  { %v1553_v20 = vsel %vm1552_vm11, %v1537_v19, %v1550_v16 }
0x170b   :  { %1640 = vrot.lane.b32.xlu1 %v1553_v20, %s4500_s20  ;;  %1619 = vmatmul.mubr.f32.vlgmr.msra.gmra.mrb[0].mxu0 %v1553_v20 }
0x177d   :  { %v1641_v45 = vpop.permute.xlu1 %1640 }
0x17de   :  { %v1620_v21 = vpop.f32.mrb[0].mxu0 }
0x17df   :  { %v1621_v22 = vadd.f32 %v1620_v21, %v4632_v28  ;;  %v1622_v23 = vpop.f32.mrb[1].mxu0 }
0x17e0   :  { %v1623_v1 = vadd.f32 %v1622_v23, %v4634_v29 }
0x17e1   :  { %v3413_v24 = vmul.f32 -1.442695, %v1621_v22 }
0x17e3   :  { %4364 = vpow2.f32 %v3413_v24 }
0x17ed   :  { %v4365_v30 = vpop.eup %4364 }
0x17ee   :  { %v1628_v31 = vadd.f32 1.0, %v4365_v30 }
0x17f0   :  { %4366 = vrcp.f32 %v1628_v31 }
0x17f1   :  { %4368 = vtanh.f32 %v1623_v1 }
0x17fa   :  { %v4367_v35 = vpop.eup %4366 }
0x17fb   :  { %v1643_v49 = vmul.f32 %v4367_v35, %v1641_v45  ;;  %v1633_v0 = vmul.f32 %v4367_v35, %v1553_v20  ;;  %v4369_v2 = vpop.eup %4368 }
0x17fc   :  { %v1632_v3 = vmul.f32 %v4369_v2, %v4367_v35 }
0x17fd   :  { %1645 = vrot.lane.b32.xlu0 %v1643_v49, %s4498_s18  ;;  %1635 = vrot.lane.b32.xlu1 %v1633_v0, %s4500_s20 }
0x186f   :  { %v1636_v4 = vpop.permute.xlu1 %1635  ;;  %v1646_v6 = vpop.permute.xlu0 %1645 }
0x1870   :  { %v1638_v5 = vadd.f32 %v1636_v4, %v1632_v3 }
0x1872   :  { %v1648_v7 = vadd.f32 %v1646_v6, %v1638_v5 }
0x1874   :  { %4370 = vtanh.f32 %v1648_v7 }
0x187e   :  { %v4371_v8 = vpop.eup %4370 }
0x187f   :  { %1651 = vrot.lane.b32.xlu1 %v4371_v8, %s4500_s20 }
0x1883   :  { %1660 = vrot.lane.b32.xlu1 %v1648_v7, %s4501_s21 }
0x18f1   :  { %v1652_v9 = vpop.permute.xlu1 %1651 }
0x18f2   :  { %v1654_v10 = vmul.f32 %v4367_v35, %v1652_v9 }
0x18f4   :  { %1656 = vrot.lane.b32.xlu0 %v1654_v10, %s4501_s21 }
0x18f5   :  { %v1661_v11 = vpop.permute.xlu1 %1660 }
0x1961   :  { %1666 = sbr.rel (%p3414_p3) target bundleno = 6505 (0x1969), region = 185 }
0x1966   :  { %v1657_v12 = vpop.permute.xlu0 %1656 }
0x1967   :  { %v1663_v13 = vsel %vm176_vm3, %v1657_v12, %v1661_v11 }
0x1968   :  { %3617 = vst.msk [vmem:[%s5441_s19 - $0x2] sm:$0x1] %vm1667_vm12, %v1663_v13 }
0x1969 PF:  { %p3415_p4 = scmp.ne.s32.totalorder %s5419_s10, 1 }
0x196a   :  { %vm1672_vm13 = vcmask (!%p3415_p4), 517121  }
0x196b   :  { %1671 = sbr.rel (%p3415_p4) target bundleno = 6514 (0x1972), region = 189  ;;  %3416 = vst.msk [vmem:[%s5436_s17 + $0x7] sm:$0x2] (!%p3415_p4), %vm1672_vm13, %v1663_v13 }
0x1972 PF:  { %p3418_p5 = scmp.ne.s32.totalorder %s5417_s2, 0 }
0x1973   :  { %vm1681_vm14 = vcmask (!%p3418_p5), 516096   ;;  %s3618_s0 = scalar_lea.vmem (!%p3418_p5), [#allocation2], %s5400_s22  ;;  %s1680_s24 = scalar_lea.vmem (!%p3418_p5), [#allocation3], %s5402_s11 }
0x1974   :  { %1677 = sbr.rel (%p3418_p5) target bundleno = 6523 (0x197b), region = 193  ;;  %v3620_v14 = vld [vmem:[%s3618_s0 - $0x1] sm:$0x1] (!%p3418_p5) }
0x1975   :  { %1682 = vst.msk [vmem:[%s1680_s24] sm:$0x1] (!%p3418_p5), %vm1681_vm14, %v3620_v14 }
0x197b PF:  { %s1683_s23 = scalar_select %p1519_p12, 1, 0 }
0x197c   :  { %s1685_s25 = scalar_select %p1521_p13, 1, 0 }
0x197d   :  { %s1684_s26 = sadd.s32 %s1683_s23, %s5402_s11  ;;  %s5492_s5 = ssub.s32 %s5400_s22, %s1683_s23 }
0x197e   :  { %s5494_s27 = ssub.s32 %s1684_s26, %s1685_s25  ;;  %p3420_p6 = scmp.ne.s32.totalorder %s5419_s10, 0 }
0x197f   :  { %vm1696_vm15 = vcmask (!%p3420_p6), 516096   ;;  %s3198_s3 = scalar_lea.vmem (!%p3420_p6), [#allocation2], %s5413_s16  ;;  %s3200_s28 = scalar_lea.vmem (!%p3420_p6), [#allocation3], %s5415_s4 }
0x1980   :  { %1690 = sbr.rel (%p3420_p6) target bundleno = 6535 (0x1987), region = 197  ;;  %v3421_v15 = vld [vmem:[%s3198_s3 + $0x7] sm:$0x1] (!%p3420_p6) }
0x1981   :  { %3422 = vst.msk [vmem:[%s3200_s28 + $0xa] sm:$0x1] (!%p3420_p6), %vm1696_vm15, %v3421_v15 }
0x1987 PF:  { %s1698_s29 = scalar_select %p1520_p0, 1, 0 }
0x1988   :  { %s1700_s30 = scalar_select %p1522_p1, 1, 0 }
0x1989   :  { %s1699_s9 = sadd.s32 %s1698_s29, %s5415_s4  ;;  %s5505_s22 = ssub.s32 %s5413_s16, %s1698_s29 }
0x198a   :  { %s5507_s11 = ssub.s32 %s1699_s9, %s1700_s30  ;;  %s5509_s12 = sld [smem:[#allocation4 + $0x8]] }
0x198b   :  { %s5511_s13 = sld [smem:[#allocation4 + $0x88]] }
0x1990   :  { %p1705_p7 = scmp.eq.s32.totalorder %s5509_s12, 0  ;;  %p1707_p8 = scmp.eq.s32.totalorder %s5509_s12, 1 }
0x1991   :  { %p1706_p9 = scmp.eq.s32.totalorder %s5511_s13, 0  ;;  %p1708_p10 = scmp.eq.s32.totalorder %s5511_s13, 1 }
0x1993   :  { %p1709_p11 = por %p1708_p10, %p1707_p8 }
0x1994   :  { %v3993_v16 = vpack.c.bf16 (%p1709_p11), %v4641_v32, %v4625_v26  ;;  %v3995_v17 = vpack.c.bf16 (%p1709_p11), %v4630_v27, %v4620_v25  ;;  %v3997_v19 = vpack.c.bf16 (%p1709_p11), %v4669_v37, %v4651_v34  ;;  %s5528_s1 = scalar_lea.vmem (%p1709_p11), [#allocation3], %s5507_s11  ;;  %s4502_s14 = smov (%p1709_p11), 64   ;;  %v3999_v22 = vpack.c.bf16 (%p1709_p11), %v4664_v36, %v4646_v33 }
0x1995   :  { %1712 = sbr.rel (!%p1709_p11) target bundleno = 7286 (0x1c76), region = 201  ;;  %v3430_v20 = vld [vmem:[%s5528_s1 + $0x9] sm:$0x1] (%p1709_p11)  ;;  %s5533_s15 = scalar_lea.vmem (%p1709_p11), [#allocation3], %s5494_s27  ;;  %v4001_v23 = vpack.c.bf16 (%p1709_p11), %v4689_v41, %v4679_v39  ;;  %v4503_v24 = vmov (%p1709_p11), 0.0   ;;  %v4003_v30 = vpack.c.bf16 (%p1709_p11), %v4684_v40, %v4674_v38  ;;  %v4005_v31 = vpack.c.bf16 (%p1709_p11), %v4709_v46, %v4699_v43 }
0x1996   :  { %1731 = vrot.lane.b32.xlu0 (%p1709_p11), %v3430_v20, %s4502_s14  ;;  %3994 = vmatprep.subr.bf16.mxu0 (%p1709_p11), %v3993_v16  ;;  %v3626_v21 = vld [vmem:[%s5533_s15 - $0x1] sm:$0x1] (%p1709_p11)  ;;  %v4007_v35 = vpack.c.bf16 (%p1709_p11), %v4704_v44, %v4694_v42  ;;  %v4009_v45 = vpack.c.bf16 (%p1709_p11), %v4729_v51, %v4719_v48  ;;  %v4011_v49 = vpack.c.bf16 (%p1709_p11), %v4724_v50, %v4714_v47  ;;  %v3429_v6 = vld [vmem:[%s5528_s1 + $0x8] sm:$0x1] (%p1709_p11)  ;;  %v3623_v9 = vld [vmem:[%s5533_s15 - $0x2] sm:$0x1] (%p1709_p11) }
0x1997   :  { %3996 = vmatpush1.bf16.msra.mxu0 (%p1709_p11), %v3995_v17  ;;  %1804 = vmatprep.mubr.f32.mxu0 (%p1709_p11), %v4503_v24  ;;  %v4013_v0 = vpack.c.bf16 (%p1709_p11), %v4749_v55, %v4739_v53  ;;  %v4015_v1 = vpack.c.bf16 (%p1709_p11), %v4744_v54, %v4734_v52  ;;  %v4017_v2 = vpack.c.bf16 (%p1709_p11), %v4769_v59, %v4759_v57  ;;  %vm1738_vm0 = vcmask (%p1709_p11), 1040384   ;;  %s4504_s16 = smov (%p1709_p11), 96   ;;  %s4505_s4 = smov (%p1709_p11), 32  }
0x1998   :  { %3998 = vmatprep.subr.bf16.mxu0 (%p1709_p11), %v3997_v19  ;;  %v4019_v3 = vpack.c.bf16 (%p1709_p11), %v4764_v58, %v4754_v56  ;;  %v4021_v4 = vpack.c.bf16 (%p1709_p11), %v4789_v63, %v4779_v61  ;;  %v4023_v5 = vpack.c.bf16 (%p1709_p11), %v4784_v62, %v4774_v60  ;;  %p3432_p12 = scmp.ne.s32.totalorder (%p1709_p11), %s5509_s12, 1 }
0x199a   :  { %1720 = vrot.lane.b32.xlu0 (%p1709_p11), %v3626_v21, %s4502_s14 }
0x199b   :  { %4000 = vmatpush1.bf16.msra.mxu0 (%p1709_p11), %v3999_v22 }
0x199c   :  { %4002 = vmatprep.subr.bf16.mxu0 %v4001_v23  ;;  %vm1853_vm2 = vcmask (!%p3432_p12), 516096  }
0x199f   :  { %4004 = vmatpush1.bf16.msra.mxu0 %v4003_v30 }
0x19a0   :  { %4006 = vmatprep.subr.bf16.mxu0 %v4005_v31 }
0x19a3   :  { %4008 = vmatpush1.bf16.msra.mxu0 %v4007_v35 }
0x19a4   :  { %4010 = vmatprep.subr.bf16.mxu0 %v4009_v45 }
0x19a7   :  { %4012 = vmatpush1.bf16.msra.mxu0 %v4011_v49 }
0x19a8   :  { %4014 = vmatprep.subr.bf16.mxu0 %v4013_v0 }
0x19ab   :  { %4016 = vmatpush1.bf16.msra.mxu0 %v4015_v1 }
0x19ac   :  { %4018 = vmatprep.subr.bf16.mxu0 %v4017_v2 }
0x19af   :  { %4020 = vmatpush1.bf16.msra.mxu0 %v4019_v3 }
0x19b0   :  { %4022 = vmatprep.subr.bf16.mxu0 %v4021_v4 }
0x19b3   :  { %4024 = vmatpush1.bf16.msra.mxu0 %v4023_v5 }
0x1a08   :  { %v1732_v7 = vpop.permute.xlu0 %1731 }
0x1a09   :  { %v1734_v8 = vsel %vm179_vm1, %v3429_v6, %v1732_v7 }
0x1a0a   :  { %v1736_v10 = vrot.slane %v1734_v8, 7 }
0x1a0c   :  { %v1721_v11 = vpop.permute.xlu0 %1720 }
0x1a0d   :  { %v1723_v12 = vsel %vm179_vm1, %v3623_v9, %v1721_v11 }
0x1a0e   :  { %v1739_v13 = vsel %vm1738_vm0, %v1723_v12, %v1736_v10 }
0x1a0f   :  { %1826 = vrot.lane.b32.xlu1 %v1739_v13, %s4504_s16  ;;  %1805 = vmatmul.mubr.f32.vlgmr.msra.gmra.mrb[0].mxu0 %v1739_v13 }
0x1a81   :  { %v1827_v22 = vpop.permute.xlu1 %1826 }
0x1ae2   :  { %v1806_v14 = vpop.f32.mrb[0].mxu0 }
0x1ae3   :  { %v1807_v15 = vadd.f32 %v1806_v14, %v4632_v28  ;;  %v1808_v16 = vpop.f32.mrb[1].mxu0 }
0x1ae4   :  { %v1809_v30 = vadd.f32 %v1808_v16, %v4634_v29 }
0x1ae5   :  { %v3431_v17 = vmul.f32 -1.442695, %v1807_v15 }
0x1ae7   :  { %4372 = vpow2.f32 %v3431_v17 }
0x1af1   :  { %v4373_v19 = vpop.eup %4372 }
0x1af2   :  { %v1814_v20 = vadd.f32 1.0, %v4373_v19 }
0x1af4   :  { %4374 = vrcp.f32 %v1814_v20 }
0x1af5   :  { %4376 = vtanh.f32 %v1809_v30 }
0x1afe   :  { %v4375_v21 = vpop.eup %4374 }
0x1aff   :  { %v1829_v23 = vmul.f32 %v4375_v21, %v1827_v22  ;;  %v1819_v24 = vmul.f32 %v4375_v21, %v1739_v13  ;;  %v4377_v31 = vpop.eup %4376 }
0x1b00   :  { %v1818_v35 = vmul.f32 %v4377_v31, %v4375_v21 }
0x1b01   :  { %1831 = vrot.lane.b32.xlu0 %v1829_v23, %s4502_s14  ;;  %1821 = vrot.lane.b32.xlu1 %v1819_v24, %s4504_s16 }
0x1b73   :  { %v1822_v45 = vpop.permute.xlu1 %1821  ;;  %v1832_v0 = vpop.permute.xlu0 %1831 }
0x1b74   :  { %v1824_v49 = vadd.f32 %v1822_v45, %v1818_v35 }
0x1b76   :  { %v1834_v1 = vadd.f32 %v1832_v0, %v1824_v49 }
0x1b78   :  { %4378 = vtanh.f32 %v1834_v1 }
0x1b82   :  { %v4379_v2 = vpop.eup %4378 }
0x1b83   :  { %1837 = vrot.lane.b32.xlu1 %v4379_v2, %s4504_s16 }
0x1b87   :  { %1846 = vrot.lane.b32.xlu1 %v1834_v1, %s4505_s4 }
0x1bf5   :  { %v1838_v3 = vpop.permute.xlu1 %1837 }
0x1bf6   :  { %v1840_v4 = vmul.f32 %v4375_v21, %v1838_v3 }
0x1bf8   :  { %1842 = vrot.lane.b32.xlu0 %v1840_v4, %s4505_s4 }
0x1bf9   :  { %v1847_v5 = vpop.permute.xlu1 %1846 }
0x1c65   :  { %1852 = sbr.rel (%p3432_p12) target bundleno = 7277 (0x1c6d), region = 205 }
0x1c6a   :  { %v1843_v6 = vpop.permute.xlu0 %1842 }
0x1c6b   :  { %v1849_v7 = vsel %vm176_vm3, %v1843_v6, %v1847_v5 }
0x1c6c   :  { %3627 = vst.msk [vmem:[%s5533_s15 - $0x2] sm:$0x1] %vm1853_vm2, %v1849_v7 }
0x1c6d PF:  { %p3433_p13 = scmp.ne.s32.totalorder %s5511_s13, 1 }
0x1c6e   :  { %vm1858_vm4 = vcmask (!%p3433_p13), 517121  }
0x1c6f   :  { %1857 = sbr.rel (%p3433_p13) target bundleno = 7286 (0x1c76), region = 209  ;;  %3434 = vst.msk [vmem:[%s5528_s1 + $0x7] sm:$0x2] (!%p3433_p13), %vm1858_vm4, %v1849_v7 }
0x1c76 PF:  { %p3436_p0 = scmp.ne.s32.totalorder %s5509_s12, 0 }
0x1c77   :  { %vm1867_vm5 = vcmask (!%p3436_p0), 516096   ;;  %s3628_s2 = scalar_lea.vmem (!%p3436_p0), [#allocation2], %s5492_s5  ;;  %s1866_s10 = scalar_lea.vmem (!%p3436_p0), [#allocation3], %s5494_s27 }
0x1c78   :  { %1863 = sbr.rel (%p3436_p0) target bundleno = 7295 (0x1c7f), region = 213  ;;  %v3630_v8 = vld [vmem:[%s3628_s2 - $0x1] sm:$0x1] (!%p3436_p0) }
0x1c79   :  { %1868 = vst.msk [vmem:[%s1866_s10] sm:$0x1] (!%p3436_p0), %vm1867_vm5, %v3630_v8 }
0x1c7f PF:  { %s1869_s17 = scalar_select %p1705_p7, 1, 0 }
0x1c80   :  { %s1871_s18 = scalar_select %p1707_p8, 1, 0 }
0x1c81   :  { %s1870_s19 = sadd.s32 %s1869_s17, %s5494_s27  ;;  %s5584_s20 = ssub.s32 %s5492_s5, %s1869_s17 }
0x1c82   :  { %s5586_s21 = ssub.s32 %s1870_s19, %s1871_s18  ;;  %p3438_p1 = scmp.ne.s32.totalorder %s5511_s13, 0 }
0x1c83   :  { %vm1882_vm6 = vcmask (!%p3438_p1), 516096   ;;  %s3210_s0 = scalar_lea.vmem (!%p3438_p1), [#allocation2], %s5505_s22  ;;  %s3212_s24 = scalar_lea.vmem (!%p3438_p1), [#allocation3], %s5507_s11 }
0x1c84   :  { %1876 = sbr.rel (%p3438_p1) target bundleno = 7307 (0x1c8b), region = 217  ;;  %v3439_v9 = vld [vmem:[%s3210_s0 + $0x7] sm:$0x1] (!%p3438_p1) }
0x1c85   :  { %3440 = vst.msk [vmem:[%s3212_s24 + $0xa] sm:$0x1] (!%p3438_p1), %vm1882_vm6, %v3439_v9 }
0x1c8b PF:  { %s1884_s23 = scalar_select %p1706_p9, 1, 0 }
0x1c8c   :  { %s1886_s25 = scalar_select %p1708_p10, 1, 0 }
0x1c8d   :  { %s1885_s26 = sadd.s32 %s1884_s23, %s5507_s11  ;;  %s5597_s5 = ssub.s32 %s5505_s22, %s1884_s23 }
0x1c8e   :  { %s5599_s27 = ssub.s32 %s1885_s26, %s1886_s25  ;;  %s5601_s3 = sld [smem:[#allocation4 + $0x9]] }
0x1c8f   :  { %s5603_s28 = sld [smem:[#allocation4 + $0x89]] }
0x1c94   :  { %p1891_p2 = scmp.eq.s32.totalorder %s5601_s3, 0  ;;  %p1893_p3 = scmp.eq.s32.totalorder %s5601_s3, 1 }
0x1c95   :  { %p1892_p4 = scmp.eq.s32.totalorder %s5603_s28, 0  ;;  %p1894_p5 = scmp.eq.s32.totalorder %s5603_s28, 1 }
0x1c97   :  { %p1895_p6 = por %p1894_p5, %p1893_p3 }
0x1c98   :  { %v4025_v10 = vpack.c.bf16 (%p1895_p6), %v4641_v32, %v4625_v26  ;;  %v4027_v11 = vpack.c.bf16 (%p1895_p6), %v4630_v27, %v4620_v25  ;;  %v4029_v12 = vpack.c.bf16 (%p1895_p6), %v4669_v37, %v4651_v34  ;;  %s5620_s29 = scalar_lea.vmem (%p1895_p6), [#allocation3], %s5599_s27  ;;  %s4506_s30 = smov (%p1895_p6), 64   ;;  %v4031_v15 = vpack.c.bf16 (%p1895_p6), %v4664_v36, %v4646_v33 }
0x1c99   :  { %1898 = sbr.rel (!%p1895_p6) target bundleno = 8058 (0x1f7a), region = 221  ;;  %v3448_v13 = vld [vmem:[%s5620_s29 + $0x9] sm:$0x1] (%p1895_p6)  ;;  %s5625_s9 = scalar_lea.vmem (%p1895_p6), [#allocation3], %s5586_s21  ;;  %v4033_v16 = vpack.c.bf16 (%p1895_p6), %v4689_v41, %v4679_v39  ;;  %v4507_v17 = vmov (%p1895_p6), 0.0   ;;  %v4035_v19 = vpack.c.bf16 (%p1895_p6), %v4684_v40, %v4674_v38  ;;  %v4037_v20 = vpack.c.bf16 (%p1895_p6), %v4709_v46, %v4699_v43 }
0x1c9a   :  { %1917 = vrot.lane.b32.xlu0 (%p1895_p6), %v3448_v13, %s4506_s30  ;;  %4026 = vmatprep.subr.bf16.mxu0 (%p1895_p6), %v4025_v10  ;;  %v3636_v14 = vld [vmem:[%s5625_s9 - $0x1] sm:$0x1] (%p1895_p6)  ;;  %v4039_v21 = vpack.c.bf16 (%p1895_p6), %v4704_v44, %v4694_v42  ;;  %v4041_v22 = vpack.c.bf16 (%p1895_p6), %v4729_v51, %v4719_v48  ;;  %v4043_v23 = vpack.c.bf16 (%p1895_p6), %v4724_v50, %v4714_v47  ;;  %v3447_v0 = vld [vmem:[%s5620_s29 + $0x8] sm:$0x1] (%p1895_p6)  ;;  %v3633_v3 = vld [vmem:[%s5625_s9 - $0x2] sm:$0x1] (%p1895_p6) }
0x1c9b   :  { %4028 = vmatpush1.bf16.msra.mxu0 (%p1895_p6), %v4027_v11  ;;  %1990 = vmatprep.mubr.f32.mxu0 (%p1895_p6), %v4507_v17  ;;  %v4045_v24 = vpack.c.bf16 (%p1895_p6), %v4749_v55, %v4739_v53  ;;  %v4047_v30 = vpack.c.bf16 (%p1895_p6), %v4744_v54, %v4734_v52  ;;  %v4049_v31 = vpack.c.bf16 (%p1895_p6), %v4769_v59, %v4759_v57  ;;  %vm1924_vm7 = vcmask (%p1895_p6), 1040384   ;;  %s4508_s22 = smov (%p1895_p6), 96   ;;  %s4509_s11 = smov (%p1895_p6), 32  }
0x1c9c   :  { %4030 = vmatprep.subr.bf16.mxu0 (%p1895_p6), %v4029_v12  ;;  %v4051_v35 = vpack.c.bf16 (%p1895_p6), %v4764_v58, %v4754_v56  ;;  %v4053_v45 = vpack.c.bf16 (%p1895_p6), %v4789_v63, %v4779_v61  ;;  %v4055_v49 = vpack.c.bf16 (%p1895_p6), %v4784_v62, %v4774_v60  ;;  %p3450_p7 = scmp.ne.s32.totalorder (%p1895_p6), %s5601_s3, 1 }
0x1c9e   :  { %1906 = vrot.lane.b32.xlu0 (%p1895_p6), %v3636_v14, %s4506_s30 }
0x1c9f   :  { %4032 = vmatpush1.bf16.msra.mxu0 (%p1895_p6), %v4031_v15 }
0x1ca0   :  { %4034 = vmatprep.subr.bf16.mxu0 %v4033_v16  ;;  %vm2039_vm8 = vcmask (!%p3450_p7), 516096  }
0x1ca3   :  { %4036 = vmatpush1.bf16.msra.mxu0 %v4035_v19 }
0x1ca4   :  { %4038 = vmatprep.subr.bf16.mxu0 %v4037_v20 }
0x1ca7   :  { %4040 = vmatpush1.bf16.msra.mxu0 %v4039_v21 }
0x1ca8   :  { %4042 = vmatprep.subr.bf16.mxu0 %v4041_v22 }
0x1cab   :  { %4044 = vmatpush1.bf16.msra.mxu0 %v4043_v23 }
0x1cac   :  { %4046 = vmatprep.subr.bf16.mxu0 %v4045_v24 }
0x1caf   :  { %4048 = vmatpush1.bf16.msra.mxu0 %v4047_v30 }
0x1cb0   :  { %4050 = vmatprep.subr.bf16.mxu0 %v4049_v31 }
0x1cb3   :  { %4052 = vmatpush1.bf16.msra.mxu0 %v4051_v35 }
0x1cb4   :  { %4054 = vmatprep.subr.bf16.mxu0 %v4053_v45 }
0x1cb7   :  { %4056 = vmatpush1.bf16.msra.mxu0 %v4055_v49 }
0x1d0c   :  { %v1918_v1 = vpop.permute.xlu0 %1917 }
0x1d0d   :  { %v1920_v2 = vsel %vm179_vm1, %v3447_v0, %v1918_v1 }
0x1d0e   :  { %v1922_v4 = vrot.slane %v1920_v2, 7 }
0x1d10   :  { %v1907_v5 = vpop.permute.xlu0 %1906 }
0x1d11   :  { %v1909_v6 = vsel %vm179_vm1, %v3633_v3, %v1907_v5 }
0x1d12   :  { %v1925_v7 = vsel %vm1924_vm7, %v1909_v6, %v1922_v4 }
0x1d13   :  { %2012 = vrot.lane.b32.xlu1 %v1925_v7, %s4508_s22  ;;  %1991 = vmatmul.mubr.f32.vlgmr.msra.gmra.mrb[0].mxu0 %v1925_v7 }
0x1d85   :  { %v2013_v15 = vpop.permute.xlu1 %2012 }
0x1de6   :  { %v1992_v8 = vpop.f32.mrb[0].mxu0 }
0x1de7   :  { %v1993_v9 = vadd.f32 %v1992_v8, %v4632_v28  ;;  %v1994_v10 = vpop.f32.mrb[1].mxu0 }
0x1de8   :  { %v1995_v19 = vadd.f32 %v1994_v10, %v4634_v29 }
0x1de9   :  { %v3449_v11 = vmul.f32 -1.442695, %v1993_v9 }
0x1deb   :  { %4380 = vpow2.f32 %v3449_v11 }
0x1df5   :  { %v4381_v12 = vpop.eup %4380 }
0x1df6   :  { %v2000_v13 = vadd.f32 1.0, %v4381_v12 }
0x1df8   :  { %4382 = vrcp.f32 %v2000_v13 }
0x1df9   :  { %4384 = vtanh.f32 %v1995_v19 }
0x1e02   :  { %v4383_v14 = vpop.eup %4382 }
0x1e03   :  { %v2015_v16 = vmul.f32 %v4383_v14, %v2013_v15  ;;  %v2005_v17 = vmul.f32 %v4383_v14, %v1925_v7  ;;  %v4385_v20 = vpop.eup %4384 }
0x1e04   :  { %v2004_v21 = vmul.f32 %v4385_v20, %v4383_v14 }
0x1e05   :  { %2017 = vrot.lane.b32.xlu0 %v2015_v16, %s4506_s30  ;;  %2007 = vrot.lane.b32.xlu1 %v2005_v17, %s4508_s22 }
0x1e77   :  { %v2008_v22 = vpop.permute.xlu1 %2007  ;;  %v2018_v24 = vpop.permute.xlu0 %2017 }
0x1e78   :  { %v2010_v23 = vadd.f32 %v2008_v22, %v2004_v21 }
0x1e7a   :  { %v2020_v30 = vadd.f32 %v2018_v24, %v2010_v23 }
0x1e7c   :  { %4386 = vtanh.f32 %v2020_v30 }
0x1e86   :  { %v4387_v31 = vpop.eup %4386 }
0x1e87   :  { %2023 = vrot.lane.b32.xlu1 %v4387_v31, %s4508_s22 }
0x1e8b   :  { %2032 = vrot.lane.b32.xlu1 %v2020_v30, %s4509_s11 }
0x1ef9   :  { %v2024_v35 = vpop.permute.xlu1 %2023 }
0x1efa   :  { %v2026_v45 = vmul.f32 %v4383_v14, %v2024_v35 }
0x1efc   :  { %2028 = vrot.lane.b32.xlu0 %v2026_v45, %s4509_s11 }
0x1efd   :  { %v2033_v49 = vpop.permute.xlu1 %2032 }
0x1f69   :  { %2038 = sbr.rel (%p3450_p7) target bundleno = 8049 (0x1f71), region = 225 }
0x1f6e   :  { %v2029_v0 = vpop.permute.xlu0 %2028 }
0x1f6f   :  { %v2035_v1 = vsel %vm176_vm3, %v2029_v0, %v2033_v49 }
0x1f70   :  { %3637 = vst.msk [vmem:[%s5625_s9 - $0x2] sm:$0x1] %vm2039_vm8, %v2035_v1 }
0x1f71 PF:  { %p3451_p8 = scmp.ne.s32.totalorder %s5603_s28, 1 }
0x1f72   :  { %vm2044_vm9 = vcmask (!%p3451_p8), 517121  }
0x1f73   :  { %2043 = sbr.rel (%p3451_p8) target bundleno = 8058 (0x1f7a), region = 229  ;;  %3452 = vst.msk [vmem:[%s5620_s29 + $0x7] sm:$0x2] (!%p3451_p8), %vm2044_vm9, %v2035_v1 }
0x1f7a PF:  { %p3454_p9 = scmp.ne.s32.totalorder %s5601_s3, 0 }
0x1f7b   :  { %vm2053_vm10 = vcmask (!%p3454_p9), 516096   ;;  %s3638_s12 = scalar_lea.vmem (!%p3454_p9), [#allocation2], %s5584_s20  ;;  %s2052_s13 = scalar_lea.vmem (!%p3454_p9), [#allocation3], %s5586_s21 }
0x1f7c   :  { %2049 = sbr.rel (%p3454_p9) target bundleno = 8067 (0x1f83), region = 233  ;;  %v3640_v2 = vld [vmem:[%s3638_s12 - $0x1] sm:$0x1] (!%p3454_p9) }
0x1f7d   :  { %2054 = vst.msk [vmem:[%s2052_s13] sm:$0x1] (!%p3454_p9), %vm2053_vm10, %v3640_v2 }
0x1f83 PF:  { %s2055_s1 = scalar_select %p1891_p2, 1, 0 }
0x1f84   :  { %s2057_s14 = scalar_select %p1893_p3, 1, 0 }
0x1f85   :  { %s2056_s15 = sadd.s32 %s2055_s1, %s5586_s21  ;;  %s5676_s16 = ssub.s32 %s5584_s20, %s2055_s1 }
0x1f86   :  { %s5678_s4 = ssub.s32 %s2056_s15, %s2057_s14  ;;  %p3456_p10 = scmp.ne.s32.totalorder %s5603_s28, 0 }
0x1f87   :  { %vm2068_vm11 = vcmask (!%p3456_p10), 516096   ;;  %s3222_s2 = scalar_lea.vmem (!%p3456_p10), [#allocation2], %s5597_s5  ;;  %s3224_s10 = scalar_lea.vmem (!%p3456_p10), [#allocation3], %s5599_s27 }
0x1f88   :  { %2062 = sbr.rel (%p3456_p10) target bundleno = 8079 (0x1f8f), region = 237  ;;  %v3457_v3 = vld [vmem:[%s3222_s2 + $0x7] sm:$0x1] (!%p3456_p10) }
0x1f89   :  { %3458 = vst.msk [vmem:[%s3224_s10 + $0xa] sm:$0x1] (!%p3456_p10), %vm2068_vm11, %v3457_v3 }
0x1f8f PF:  { %s2070_s17 = scalar_select %p1892_p4, 1, 0 }
0x1f90   :  { %s2072_s18 = scalar_select %p1894_p5, 1, 0 }
0x1f91   :  { %s2071_s19 = sadd.s32 %s2070_s17, %s5599_s27  ;;  %s5689_s20 = ssub.s32 %s5597_s5, %s2070_s17 }
0x1f92   :  { %s5691_s21 = ssub.s32 %s2071_s19, %s2072_s18  ;;  %s5693_s0 = sld [smem:[#allocation4 + $0xa]] }
0x1f93   :  { %s5695_s24 = sld [smem:[#allocation4 + $0x8a]] }
0x1f98   :  { %p2077_p11 = scmp.eq.s32.totalorder %s5693_s0, 0  ;;  %p2079_p12 = scmp.eq.s32.totalorder %s5693_s0, 1 }
0x1f99   :  { %p2078_p13 = scmp.eq.s32.totalorder %s5695_s24, 0  ;;  %p2080_p0 = scmp.eq.s32.totalorder %s5695_s24, 1 }
0x1f9b   :  { %p2081_p1 = por %p2080_p0, %p2079_p12 }
0x1f9c   :  { %v4057_v4 = vpack.c.bf16 (%p2081_p1), %v4641_v32, %v4625_v26  ;;  %v4059_v5 = vpack.c.bf16 (%p2081_p1), %v4630_v27, %v4620_v25  ;;  %v4061_v6 = vpack.c.bf16 (%p2081_p1), %v4669_v37, %v4651_v34  ;;  %s5712_s23 = scalar_lea.vmem (%p2081_p1), [#allocation3], %s5691_s21  ;;  %s4510_s25 = smov (%p2081_p1), 64   ;;  %v4063_v9 = vpack.c.bf16 (%p2081_p1), %v4664_v36, %v4646_v33 }
0x1f9d   :  { %2084 = sbr.rel (!%p2081_p1) target bundleno = 8830 (0x227e), region = 241  ;;  %v3466_v7 = vld [vmem:[%s5712_s23 + $0x9] sm:$0x1] (%p2081_p1)  ;;  %s5717_s26 = scalar_lea.vmem (%p2081_p1), [#allocation3], %s5678_s4  ;;  %v4065_v10 = vpack.c.bf16 (%p2081_p1), %v4689_v41, %v4679_v39  ;;  %v4511_v11 = vmov (%p2081_p1), 0.0   ;;  %v4067_v12 = vpack.c.bf16 (%p2081_p1), %v4684_v40, %v4674_v38  ;;  %v4069_v13 = vpack.c.bf16 (%p2081_p1), %v4709_v46, %v4699_v43 }
0x1f9e   :  { %2103 = vrot.lane.b32.xlu0 (%p2081_p1), %v3466_v7, %s4510_s25  ;;  %4058 = vmatprep.subr.bf16.mxu0 (%p2081_p1), %v4057_v4  ;;  %v3646_v8 = vld [vmem:[%s5717_s26 - $0x1] sm:$0x1] (%p2081_p1)  ;;  %v4071_v14 = vpack.c.bf16 (%p2081_p1), %v4704_v44, %v4694_v42  ;;  %v4073_v15 = vpack.c.bf16 (%p2081_p1), %v4729_v51, %v4719_v48  ;;  %v4075_v16 = vpack.c.bf16 (%p2081_p1), %v4724_v50, %v4714_v47  ;;  %v3465_v24 = vld [vmem:[%s5712_s23 + $0x8] sm:$0x1] (%p2081_p1)  ;;  %v3643_v35 = vld [vmem:[%s5717_s26 - $0x2] sm:$0x1] (%p2081_p1) }
0x1f9f   :  { %4060 = vmatpush1.bf16.msra.mxu0 (%p2081_p1), %v4059_v5  ;;  %2176 = vmatprep.mubr.f32.mxu0 (%p2081_p1), %v4511_v11  ;;  %v4077_v17 = vpack.c.bf16 (%p2081_p1), %v4749_v55, %v4739_v53  ;;  %v4079_v19 = vpack.c.bf16 (%p2081_p1), %v4744_v54, %v4734_v52  ;;  %v4081_v20 = vpack.c.bf16 (%p2081_p1), %v4769_v59, %v4759_v57  ;;  %vm2110_vm12 = vcmask (%p2081_p1), 1040384   ;;  %s4512_s5 = smov (%p2081_p1), 96   ;;  %s4513_s27 = smov (%p2081_p1), 32  }
0x1fa0   :  { %4062 = vmatprep.subr.bf16.mxu0 (%p2081_p1), %v4061_v6  ;;  %v4083_v21 = vpack.c.bf16 (%p2081_p1), %v4764_v58, %v4754_v56  ;;  %v4085_v22 = vpack.c.bf16 (%p2081_p1), %v4789_v63, %v4779_v61  ;;  %v4087_v23 = vpack.c.bf16 (%p2081_p1), %v4784_v62, %v4774_v60  ;;  %p3468_p2 = scmp.ne.s32.totalorder (%p2081_p1), %s5693_s0, 1 }
0x1fa2   :  { %2092 = vrot.lane.b32.xlu0 (%p2081_p1), %v3646_v8, %s4510_s25 }
0x1fa3   :  { %4064 = vmatpush1.bf16.msra.mxu0 (%p2081_p1), %v4063_v9 }
0x1fa4   :  { %4066 = vmatprep.subr.bf16.mxu0 %v4065_v10  ;;  %vm2225_vm13 = vcmask (!%p3468_p2), 516096  }
0x1fa7   :  { %4068 = vmatpush1.bf16.msra.mxu0 %v4067_v12 }
0x1fa8   :  { %4070 = vmatprep.subr.bf16.mxu0 %v4069_v13 }
0x1fab   :  { %4072 = vmatpush1.bf16.msra.mxu0 %v4071_v14 }
0x1fac   :  { %4074 = vmatprep.subr.bf16.mxu0 %v4073_v15 }
0x1faf   :  { %4076 = vmatpush1.bf16.msra.mxu0 %v4075_v16 }
0x1fb0   :  { %4078 = vmatprep.subr.bf16.mxu0 %v4077_v17 }
0x1fb3   :  { %4080 = vmatpush1.bf16.msra.mxu0 %v4079_v19 }
0x1fb4   :  { %4082 = vmatprep.subr.bf16.mxu0 %v4081_v20 }
0x1fb7   :  { %4084 = vmatpush1.bf16.msra.mxu0 %v4083_v21 }
0x1fb8   :  { %4086 = vmatprep.subr.bf16.mxu0 %v4085_v22 }
0x1fbb   :  { %4088 = vmatpush1.bf16.msra.mxu0 %v4087_v23 }
0x2010   :  { %v2104_v30 = vpop.permute.xlu0 %2103 }
0x2011   :  { %v2106_v31 = vsel %vm179_vm1, %v3465_v24, %v2104_v30 }
0x2012   :  { %v2108_v45 = vrot.slane %v2106_v31, 7 }
0x2014   :  { %v2093_v49 = vpop.permute.xlu0 %2092 }
0x2015   :  { %v2095_v0 = vsel %vm179_vm1, %v3643_v35, %v2093_v49 }
0x2016   :  { %v2111_v1 = vsel %vm2110_vm12, %v2095_v0, %v2108_v45 }
0x2017   :  { %2198 = vrot.lane.b32.xlu1 %v2111_v1, %s4512_s5  ;;  %2177 = vmatmul.mubr.f32.vlgmr.msra.gmra.mrb[0].mxu0 %v2111_v1 }
0x2089   :  { %v2199_v9 = vpop.permute.xlu1 %2198 }
0x20ea   :  { %v2178_v2 = vpop.f32.mrb[0].mxu0 }
0x20eb   :  { %v2179_v3 = vadd.f32 %v2178_v2, %v4632_v28  ;;  %v2180_v4 = vpop.f32.mrb[1].mxu0 }
0x20ec   :  { %v2181_v12 = vadd.f32 %v2180_v4, %v4634_v29 }
0x20ed   :  { %v3467_v5 = vmul.f32 -1.442695, %v2179_v3 }
0x20ef   :  { %4388 = vpow2.f32 %v3467_v5 }
0x20f9   :  { %v4389_v6 = vpop.eup %4388 }
0x20fa   :  { %v2186_v7 = vadd.f32 1.0, %v4389_v6 }
0x20fc   :  { %4390 = vrcp.f32 %v2186_v7 }
0x20fd   :  { %4392 = vtanh.f32 %v2181_v12 }
0x2106   :  { %v4391_v8 = vpop.eup %4390 }
0x2107   :  { %v2201_v10 = vmul.f32 %v4391_v8, %v2199_v9  ;;  %v2191_v11 = vmul.f32 %v4391_v8, %v2111_v1  ;;  %v4393_v13 = vpop.eup %4392 }
0x2108   :  { %v2190_v14 = vmul.f32 %v4393_v13, %v4391_v8 }
0x2109   :  { %2203 = vrot.lane.b32.xlu0 %v2201_v10, %s4510_s25  ;;  %2193 = vrot.lane.b32.xlu1 %v2191_v11, %s4512_s5 }
0x217b   :  { %v2194_v15 = vpop.permute.xlu1 %2193  ;;  %v2204_v17 = vpop.permute.xlu0 %2203 }
0x217c   :  { %v2196_v16 = vadd.f32 %v2194_v15, %v2190_v14 }
0x217e   :  { %v2206_v19 = vadd.f32 %v2204_v17, %v2196_v16 }
0x2180   :  { %4394 = vtanh.f32 %v2206_v19 }
0x218a   :  { %v4395_v20 = vpop.eup %4394 }
0x218b   :  { %2209 = vrot.lane.b32.xlu1 %v4395_v20, %s4512_s5 }
0x218f   :  { %2218 = vrot.lane.b32.xlu1 %v2206_v19, %s4513_s27 }
0x21fd   :  { %v2210_v21 = vpop.permute.xlu1 %2209 }
0x21fe   :  { %v2212_v22 = vmul.f32 %v4391_v8, %v2210_v21 }
0x2200   :  { %2214 = vrot.lane.b32.xlu0 %v2212_v22, %s4513_s27 }
0x2201   :  { %v2219_v23 = vpop.permute.xlu1 %2218 }
0x226d   :  { %2224 = sbr.rel (%p3468_p2) target bundleno = 8821 (0x2275), region = 245 }
0x2272   :  { %v2215_v24 = vpop.permute.xlu0 %2214 }
0x2273   :  { %v2221_v30 = vsel %vm176_vm3, %v2215_v24, %v2219_v23 }
0x2274   :  { %3647 = vst.msk [vmem:[%s5717_s26 - $0x2] sm:$0x1] %vm2225_vm13, %v2221_v30 }
0x2275 PF:  { %p3469_p3 = scmp.ne.s32.totalorder %s5695_s24, 1 }
0x2276   :  { %vm2230_vm14 = vcmask (!%p3469_p3), 517121  }
0x2277   :  { %2229 = sbr.rel (%p3469_p3) target bundleno = 8830 (0x227e), region = 249  ;;  %3470 = vst.msk [vmem:[%s5712_s23 + $0x7] sm:$0x2] (!%p3469_p3), %vm2230_vm14, %v2221_v30 }
0x227e PF:  { %p3472_p4 = scmp.ne.s32.totalorder %s5693_s0, 0 }
0x227f   :  { %vm2239_vm15 = vcmask (!%p3472_p4), 516096   ;;  %s3648_s3 = scalar_lea.vmem (!%p3472_p4), [#allocation2], %s5676_s16  ;;  %s2238_s28 = scalar_lea.vmem (!%p3472_p4), [#allocation3], %s5678_s4 }
0x2280   :  { %2235 = sbr.rel (%p3472_p4) target bundleno = 8839 (0x2287), region = 253  ;;  %v3650_v31 = vld [vmem:[%s3648_s3 - $0x1] sm:$0x1] (!%p3472_p4) }
0x2281   :  { %2240 = vst.msk [vmem:[%s2238_s28] sm:$0x1] (!%p3472_p4), %vm2239_vm15, %v3650_v31 }
0x2287 PF:  { %s2241_s29 = scalar_select %p2077_p11, 1, 0 }
0x2288   :  { %s2243_s30 = scalar_select %p2079_p12, 1, 0 }
0x2289   :  { %s2242_s9 = sadd.s32 %s2241_s29, %s5678_s4  ;;  %s5768_s22 = ssub.s32 %s5676_s16, %s2241_s29 }
0x228a   :  { %s5770_s11 = ssub.s32 %s2242_s9, %s2243_s30  ;;  %p3474_p5 = scmp.ne.s32.totalorder %s5695_s24, 0 }
0x228b   :  { %vm2254_vm0 = vcmask (!%p3474_p5), 516096   ;;  %s3234_s12 = scalar_lea.vmem (!%p3474_p5), [#allocation2], %s5689_s20  ;;  %s3236_s13 = scalar_lea.vmem (!%p3474_p5), [#allocation3], %s5691_s21 }
0x228c   :  { %2248 = sbr.rel (%p3474_p5) target bundleno = 8851 (0x2293), region = 257  ;;  %v3475_v35 = vld [vmem:[%s3234_s12 + $0x7] sm:$0x1] (!%p3474_p5) }
0x228d   :  { %3476 = vst.msk [vmem:[%s3236_s13 + $0xa] sm:$0x1] (!%p3474_p5), %vm2254_vm0, %v3475_v35 }
0x2293 PF:  { %s2256_s1 = scalar_select %p2078_p13, 1, 0 }
0x2294   :  { %s2258_s14 = scalar_select %p2080_p0, 1, 0 }
0x2295   :  { %s2257_s15 = sadd.s32 %s2256_s1, %s5691_s21  ;;  %s5781_s16 = ssub.s32 %s5689_s20, %s2256_s1 }
0x2296   :  { %s5783_s4 = ssub.s32 %s2257_s15, %s2258_s14  ;;  %s5785_s2 = sld [smem:[#allocation4 + $0xb]] }
0x2297   :  { %s5787_s10 = sld [smem:[#allocation4 + $0x8b]] }
0x229c   :  { %p2263_p6 = scmp.eq.s32.totalorder %s5785_s2, 0  ;;  %p2265_p7 = scmp.eq.s32.totalorder %s5785_s2, 1 }
0x229d   :  { %p2264_p8 = scmp.eq.s32.totalorder %s5787_s10, 0  ;;  %p2266_p9 = scmp.eq.s32.totalorder %s5787_s10, 1 }
0x229f   :  { %p2267_p10 = por %p2266_p9, %p2265_p7 }
0x22a0   :  { %v4089_v45 = vpack.c.bf16 (%p2267_p10), %v4641_v32, %v4625_v26  ;;  %v4091_v49 = vpack.c.bf16 (%p2267_p10), %v4630_v27, %v4620_v25  ;;  %v4093_v0 = vpack.c.bf16 (%p2267_p10), %v4669_v37, %v4651_v34  ;;  %s5804_s17 = scalar_lea.vmem (%p2267_p10), [#allocation3], %s5783_s4  ;;  %s4514_s18 = smov (%p2267_p10), 64   ;;  %v4095_v3 = vpack.c.bf16 (%p2267_p10), %v4664_v36, %v4646_v33 }
0x22a1   :  { %2270 = sbr.rel (!%p2267_p10) target bundleno = 9602 (0x2582), region = 261  ;;  %v3484_v1 = vld [vmem:[%s5804_s17 + $0x9] sm:$0x1] (%p2267_p10)  ;;  %s5809_s19 = scalar_lea.vmem (%p2267_p10), [#allocation3], %s5770_s11  ;;  %v4097_v4 = vpack.c.bf16 (%p2267_p10), %v4689_v41, %v4679_v39  ;;  %v4515_v5 = vmov (%p2267_p10), 0.0   ;;  %v4099_v6 = vpack.c.bf16 (%p2267_p10), %v4684_v40, %v4674_v38  ;;  %v4101_v7 = vpack.c.bf16 (%p2267_p10), %v4709_v46, %v4699_v43 }
0x22a2   :  { %2289 = vrot.lane.b32.xlu0 (%p2267_p10), %v3484_v1, %s4514_s18  ;;  %4090 = vmatprep.subr.bf16.mxu0 (%p2267_p10), %v4089_v45  ;;  %v3656_v2 = vld [vmem:[%s5809_s19 - $0x1] sm:$0x1] (%p2267_p10)  ;;  %v4103_v8 = vpack.c.bf16 (%p2267_p10), %v4704_v44, %v4694_v42  ;;  %v4105_v9 = vpack.c.bf16 (%p2267_p10), %v4729_v51, %v4719_v48  ;;  %v4107_v10 = vpack.c.bf16 (%p2267_p10), %v4724_v50, %v4714_v47  ;;  %v3483_v17 = vld [vmem:[%s5804_s17 + $0x8] sm:$0x1] (%p2267_p10)  ;;  %v3653_v21 = vld [vmem:[%s5809_s19 - $0x2] sm:$0x1] (%p2267_p10) }
0x22a3   :  { %4092 = vmatpush1.bf16.msra.mxu0 (%p2267_p10), %v4091_v49  ;;  %2362 = vmatprep.mubr.f32.mxu0 (%p2267_p10), %v4515_v5  ;;  %v4109_v11 = vpack.c.bf16 (%p2267_p10), %v4749_v55, %v4739_v53  ;;  %v4111_v12 = vpack.c.bf16 (%p2267_p10), %v4744_v54, %v4734_v52  ;;  %v4113_v13 = vpack.c.bf16 (%p2267_p10), %v4769_v59, %v4759_v57  ;;  %vm2296_vm2 = vcmask (%p2267_p10), 1040384   ;;  %s4516_s20 = smov (%p2267_p10), 96   ;;  %s4517_s21 = smov (%p2267_p10), 32  }
0x22a4   :  { %4094 = vmatprep.subr.bf16.mxu0 (%p2267_p10), %v4093_v0  ;;  %v4115_v14 = vpack.c.bf16 (%p2267_p10), %v4764_v58, %v4754_v56  ;;  %v4117_v15 = vpack.c.bf16 (%p2267_p10), %v4789_v63, %v4779_v61  ;;  %v4119_v16 = vpack.c.bf16 (%p2267_p10), %v4784_v62, %v4774_v60  ;;  %p3486_p11 = scmp.ne.s32.totalorder (%p2267_p10), %s5785_s2, 1 }
0x22a6   :  { %2278 = vrot.lane.b32.xlu0 (%p2267_p10), %v3656_v2, %s4514_s18 }
0x22a7   :  { %4096 = vmatpush1.bf16.msra.mxu0 (%p2267_p10), %v4095_v3 }
0x22a8   :  { %4098 = vmatprep.subr.bf16.mxu0 %v4097_v4  ;;  %vm2411_vm4 = vcmask (!%p3486_p11), 516096  }
0x22ab   :  { %4100 = vmatpush1.bf16.msra.mxu0 %v4099_v6 }
0x22ac   :  { %4102 = vmatprep.subr.bf16.mxu0 %v4101_v7 }
0x22af   :  { %4104 = vmatpush1.bf16.msra.mxu0 %v4103_v8 }
0x22b0   :  { %4106 = vmatprep.subr.bf16.mxu0 %v4105_v9 }
0x22b3   :  { %4108 = vmatpush1.bf16.msra.mxu0 %v4107_v10 }
0x22b4   :  { %4110 = vmatprep.subr.bf16.mxu0 %v4109_v11 }
0x22b7   :  { %4112 = vmatpush1.bf16.msra.mxu0 %v4111_v12 }
0x22b8   :  { %4114 = vmatprep.subr.bf16.mxu0 %v4113_v13 }
0x22bb   :  { %4116 = vmatpush1.bf16.msra.mxu0 %v4115_v14 }
0x22bc   :  { %4118 = vmatprep.subr.bf16.mxu0 %v4117_v15 }
0x22bf   :  { %4120 = vmatpush1.bf16.msra.mxu0 %v4119_v16 }
0x2314   :  { %v2290_v19 = vpop.permute.xlu0 %2289 }
0x2315   :  { %v2292_v20 = vsel %vm179_vm1, %v3483_v17, %v2290_v19 }
0x2316   :  { %v2294_v22 = vrot.slane %v2292_v20, 7 }
0x2318   :  { %v2279_v23 = vpop.permute.xlu0 %2278 }
0x2319   :  { %v2281_v24 = vsel %vm179_vm1, %v3653_v21, %v2279_v23 }
0x231a   :  { %v2297_v30 = vsel %vm2296_vm2, %v2281_v24, %v2294_v22 }
0x231b   :  { %2384 = vrot.lane.b32.xlu1 %v2297_v30, %s4516_s20  ;;  %2363 = vmatmul.mubr.f32.vlgmr.msra.gmra.mrb[0].mxu0 %v2297_v30 }
0x238d   :  { %v2385_v3 = vpop.permute.xlu1 %2384 }
0x23ee   :  { %v2364_v31 = vpop.f32.mrb[0].mxu0 }
0x23ef   :  { %v2365_v35 = vadd.f32 %v2364_v31, %v4632_v28  ;;  %v2366_v45 = vpop.f32.mrb[1].mxu0 }
0x23f0   :  { %v2367_v6 = vadd.f32 %v2366_v45, %v4634_v29 }
0x23f1   :  { %v3485_v49 = vmul.f32 -1.442695, %v2365_v35 }
0x23f3   :  { %4396 = vpow2.f32 %v3485_v49 }
0x23fd   :  { %v4397_v0 = vpop.eup %4396 }
0x23fe   :  { %v2372_v1 = vadd.f32 1.0, %v4397_v0 }
0x2400   :  { %4398 = vrcp.f32 %v2372_v1 }
0x2401   :  { %4400 = vtanh.f32 %v2367_v6 }
0x240a   :  { %v4399_v2 = vpop.eup %4398 }
0x240b   :  { %v2387_v4 = vmul.f32 %v4399_v2, %v2385_v3  ;;  %v2377_v5 = vmul.f32 %v4399_v2, %v2297_v30  ;;  %v4401_v7 = vpop.eup %4400 }
0x240c   :  { %v2376_v8 = vmul.f32 %v4401_v7, %v4399_v2 }
0x240d   :  { %2389 = vrot.lane.b32.xlu0 %v2387_v4, %s4514_s18  ;;  %2379 = vrot.lane.b32.xlu1 %v2377_v5, %s4516_s20 }
0x247f   :  { %v2380_v9 = vpop.permute.xlu1 %2379  ;;  %v2390_v11 = vpop.permute.xlu0 %2389 }
0x2480   :  { %v2382_v10 = vadd.f32 %v2380_v9, %v2376_v8 }
0x2482   :  { %v2392_v12 = vadd.f32 %v2390_v11, %v2382_v10 }
0x2484   :  { %4402 = vtanh.f32 %v2392_v12 }
0x248e   :  { %v4403_v13 = vpop.eup %4402 }
0x248f   :  { %2395 = vrot.lane.b32.xlu1 %v4403_v13, %s4516_s20 }
0x2493   :  { %2404 = vrot.lane.b32.xlu1 %v2392_v12, %s4517_s21 }
0x2501   :  { %v2396_v14 = vpop.permute.xlu1 %2395 }
0x2502   :  { %v2398_v15 = vmul.f32 %v4399_v2, %v2396_v14 }
0x2504   :  { %2400 = vrot.lane.b32.xlu0 %v2398_v15, %s4517_s21 }
0x2505   :  { %v2405_v16 = vpop.permute.xlu1 %2404 }
0x2571   :  { %2410 = sbr.rel (%p3486_p11) target bundleno = 9593 (0x2579), region = 265 }
0x2576   :  { %v2401_v17 = vpop.permute.xlu0 %2400 }
0x2577   :  { %v2407_v19 = vsel %vm176_vm3, %v2401_v17, %v2405_v16 }
0x2578   :  { %3657 = vst.msk [vmem:[%s5809_s19 - $0x2] sm:$0x1] %vm2411_vm4, %v2407_v19 }
0x2579 PF:  { %p3487_p12 = scmp.ne.s32.totalorder %s5787_s10, 1 }
0x257a   :  { %vm2416_vm5 = vcmask (!%p3487_p12), 517121  }
0x257b   :  { %2415 = sbr.rel (%p3487_p12) target bundleno = 9602 (0x2582), region = 269  ;;  %3488 = vst.msk [vmem:[%s5804_s17 + $0x7] sm:$0x2] (!%p3487_p12), %vm2416_vm5, %v2407_v19 }
0x2582 PF:  { %p3490_p13 = scmp.ne.s32.totalorder %s5785_s2, 0 }
0x2583   :  { %vm2425_vm6 = vcmask (!%p3490_p13), 516096   ;;  %s3658_s0 = scalar_lea.vmem (!%p3490_p13), [#allocation2], %s5768_s22  ;;  %s2424_s24 = scalar_lea.vmem (!%p3490_p13), [#allocation3], %s5770_s11 }
0x2584   :  { %2421 = sbr.rel (%p3490_p13) target bundleno = 9611 (0x258b), region = 273  ;;  %v3660_v20 = vld [vmem:[%s3658_s0 - $0x1] sm:$0x1] (!%p3490_p13) }
0x2585   :  { %2426 = vst.msk [vmem:[%s2424_s24] sm:$0x1] (!%p3490_p13), %vm2425_vm6, %v3660_v20 }
0x258b PF:  { %s2427_s23 = scalar_select %p2263_p6, 1, 0 }
0x258c   :  { %s2429_s25 = scalar_select %p2265_p7, 1, 0 }
0x258d   :  { %s2428_s26 = sadd.s32 %s2427_s23, %s5770_s11  ;;  %s5860_s5 = ssub.s32 %s5768_s22, %s2427_s23 }
0x258e   :  { %s5862_s27 = ssub.s32 %s2428_s26, %s2429_s25  ;;  %p3492_p0 = scmp.ne.s32.totalorder %s5787_s10, 0 }
0x258f   :  { %vm2440_vm7 = vcmask (!%p3492_p0), 516096   ;;  %s3246_s3 = scalar_lea.vmem (!%p3492_p0), [#allocation2], %s5781_s16  ;;  %s3248_s28 = scalar_lea.vmem (!%p3492_p0), [#allocation3], %s5783_s4 }
0x2590   :  { %2434 = sbr.rel (%p3492_p0) target bundleno = 9623 (0x2597), region = 277  ;;  %v3493_v21 = vld [vmem:[%s3246_s3 + $0x7] sm:$0x1] (!%p3492_p0) }
0x2591   :  { %3494 = vst.msk [vmem:[%s3248_s28 + $0xa] sm:$0x1] (!%p3492_p0), %vm2440_vm7, %v3493_v21 }
0x2597 PF:  { %s2442_s29 = scalar_select %p2264_p8, 1, 0 }
0x2598   :  { %s2444_s30 = scalar_select %p2266_p9, 1, 0 }
0x2599   :  { %s2443_s9 = sadd.s32 %s2442_s29, %s5783_s4  ;;  %s5873_s22 = ssub.s32 %s5781_s16, %s2442_s29 }
0x259a   :  { %s5875_s11 = ssub.s32 %s2443_s9, %s2444_s30  ;;  %s5877_s12 = sld [smem:[#allocation4 + $0xc]] }
0x259b   :  { %s5879_s13 = sld [smem:[#allocation4 + $0x8c]] }
0x25a0   :  { %p2449_p1 = scmp.eq.s32.totalorder %s5877_s12, 0  ;;  %p2451_p2 = scmp.eq.s32.totalorder %s5877_s12, 1 }
0x25a1   :  { %p2450_p3 = scmp.eq.s32.totalorder %s5879_s13, 0  ;;  %p2452_p4 = scmp.eq.s32.totalorder %s5879_s13, 1 }
0x25a3   :  { %p2453_p5 = por %p2452_p4, %p2451_p2 }
0x25a4   :  { %v4121_v22 = vpack.c.bf16 (%p2453_p5), %v4641_v32, %v4625_v26  ;;  %v4123_v23 = vpack.c.bf16 (%p2453_p5), %v4630_v27, %v4620_v25  ;;  %v4125_v24 = vpack.c.bf16 (%p2453_p5), %v4669_v37, %v4651_v34  ;;  %s5896_s1 = scalar_lea.vmem (%p2453_p5), [#allocation3], %s5875_s11  ;;  %s4518_s14 = smov (%p2453_p5), 64   ;;  %v4127_v35 = vpack.c.bf16 (%p2453_p5), %v4664_v36, %v4646_v33 }
0x25a5   :  { %2456 = sbr.rel (!%p2453_p5) target bundleno = 10374 (0x2886), region = 281  ;;  %v3502_v30 = vld [vmem:[%s5896_s1 + $0x9] sm:$0x1] (%p2453_p5)  ;;  %s5901_s15 = scalar_lea.vmem (%p2453_p5), [#allocation3], %s5862_s27  ;;  %v4129_v45 = vpack.c.bf16 (%p2453_p5), %v4689_v41, %v4679_v39  ;;  %v4519_v49 = vmov (%p2453_p5), 0.0   ;;  %v4131_v0 = vpack.c.bf16 (%p2453_p5), %v4684_v40, %v4674_v38  ;;  %v4133_v1 = vpack.c.bf16 (%p2453_p5), %v4709_v46, %v4699_v43 }
0x25a6   :  { %2475 = vrot.lane.b32.xlu0 (%p2453_p5), %v3502_v30, %s4518_s14  ;;  %4122 = vmatprep.subr.bf16.mxu0 (%p2453_p5), %v4121_v22  ;;  %v3666_v31 = vld [vmem:[%s5901_s15 - $0x1] sm:$0x1] (%p2453_p5)  ;;  %v4135_v2 = vpack.c.bf16 (%p2453_p5), %v4704_v44, %v4694_v42  ;;  %v4137_v3 = vpack.c.bf16 (%p2453_p5), %v4729_v51, %v4719_v48  ;;  %v4139_v4 = vpack.c.bf16 (%p2453_p5), %v4724_v50, %v4714_v47  ;;  %v3501_v11 = vld [vmem:[%s5896_s1 + $0x8] sm:$0x1] (%p2453_p5)  ;;  %v3663_v14 = vld [vmem:[%s5901_s15 - $0x2] sm:$0x1] (%p2453_p5) }
0x25a7   :  { %4124 = vmatpush1.bf16.msra.mxu0 (%p2453_p5), %v4123_v23  ;;  %2548 = vmatprep.mubr.f32.mxu0 (%p2453_p5), %v4519_v49  ;;  %v4141_v5 = vpack.c.bf16 (%p2453_p5), %v4749_v55, %v4739_v53  ;;  %v4143_v6 = vpack.c.bf16 (%p2453_p5), %v4744_v54, %v4734_v52  ;;  %v4145_v7 = vpack.c.bf16 (%p2453_p5), %v4769_v59, %v4759_v57  ;;  %vm2482_vm8 = vcmask (%p2453_p5), 1040384   ;;  %s4520_s16 = smov (%p2453_p5), 96   ;;  %s4521_s4 = smov (%p2453_p5), 32  }
0x25a8   :  { %4126 = vmatprep.subr.bf16.mxu0 (%p2453_p5), %v4125_v24  ;;  %v4147_v8 = vpack.c.bf16 (%p2453_p5), %v4764_v58, %v4754_v56  ;;  %v4149_v9 = vpack.c.bf16 (%p2453_p5), %v4789_v63, %v4779_v61  ;;  %v4151_v10 = vpack.c.bf16 (%p2453_p5), %v4784_v62, %v4774_v60  ;;  %p3504_p6 = scmp.ne.s32.totalorder (%p2453_p5), %s5877_s12, 1 }
0x25aa   :  { %2464 = vrot.lane.b32.xlu0 (%p2453_p5), %v3666_v31, %s4518_s14 }
0x25ab   :  { %4128 = vmatpush1.bf16.msra.mxu0 (%p2453_p5), %v4127_v35 }
0x25ac   :  { %4130 = vmatprep.subr.bf16.mxu0 %v4129_v45  ;;  %vm2597_vm9 = vcmask (!%p3504_p6), 516096  }
0x25af   :  { %4132 = vmatpush1.bf16.msra.mxu0 %v4131_v0 }
0x25b0   :  { %4134 = vmatprep.subr.bf16.mxu0 %v4133_v1 }
0x25b3   :  { %4136 = vmatpush1.bf16.msra.mxu0 %v4135_v2 }
0x25b4   :  { %4138 = vmatprep.subr.bf16.mxu0 %v4137_v3 }
0x25b7   :  { %4140 = vmatpush1.bf16.msra.mxu0 %v4139_v4 }
0x25b8   :  { %4142 = vmatprep.subr.bf16.mxu0 %v4141_v5 }
0x25bb   :  { %4144 = vmatpush1.bf16.msra.mxu0 %v4143_v6 }
0x25bc   :  { %4146 = vmatprep.subr.bf16.mxu0 %v4145_v7 }
0x25bf   :  { %4148 = vmatpush1.bf16.msra.mxu0 %v4147_v8 }
0x25c0   :  { %4150 = vmatprep.subr.bf16.mxu0 %v4149_v9 }
0x25c3   :  { %4152 = vmatpush1.bf16.msra.mxu0 %v4151_v10 }
0x2618   :  { %v2476_v12 = vpop.permute.xlu0 %2475 }
0x2619   :  { %v2478_v13 = vsel %vm179_vm1, %v3501_v11, %v2476_v12 }
0x261a   :  { %v2480_v15 = vrot.slane %v2478_v13, 7 }
0x261c   :  { %v2465_v16 = vpop.permute.xlu0 %2464 }
0x261d   :  { %v2467_v17 = vsel %vm179_vm1, %v3663_v14, %v2465_v16 }
0x261e   :  { %v2483_v19 = vsel %vm2482_vm8, %v2467_v17, %v2480_v15 }
0x261f   :  { %2570 = vrot.lane.b32.xlu1 %v2483_v19, %s4520_s16  ;;  %2549 = vmatmul.mubr.f32.vlgmr.msra.gmra.mrb[0].mxu0 %v2483_v19 }
0x2691   :  { %v2571_v35 = vpop.permute.xlu1 %2570 }
0x26f2   :  { %v2550_v20 = vpop.f32.mrb[0].mxu0 }
0x26f3   :  { %v2551_v21 = vadd.f32 %v2550_v20, %v4632_v28  ;;  %v2552_v22 = vpop.f32.mrb[1].mxu0 }
0x26f4   :  { %v2553_v0 = vadd.f32 %v2552_v22, %v4634_v29 }
0x26f5   :  { %v3503_v23 = vmul.f32 -1.442695, %v2551_v21 }
0x26f7   :  { %4404 = vpow2.f32 %v3503_v23 }
0x2701   :  { %v4405_v24 = vpop.eup %4404 }
0x2702   :  { %v2558_v30 = vadd.f32 1.0, %v4405_v24 }
0x2704   :  { %4406 = vrcp.f32 %v2558_v30 }
0x2705   :  { %4408 = vtanh.f32 %v2553_v0 }
0x270e   :  { %v4407_v31 = vpop.eup %4406 }
0x270f   :  { %v2573_v45 = vmul.f32 %v4407_v31, %v2571_v35  ;;  %v2563_v49 = vmul.f32 %v4407_v31, %v2483_v19  ;;  %v4409_v1 = vpop.eup %4408 }
0x2710   :  { %v2562_v2 = vmul.f32 %v4409_v1, %v4407_v31 }
0x2711   :  { %2575 = vrot.lane.b32.xlu0 %v2573_v45, %s4518_s14  ;;  %2565 = vrot.lane.b32.xlu1 %v2563_v49, %s4520_s16 }
0x2783   :  { %v2566_v3 = vpop.permute.xlu1 %2565  ;;  %v2576_v5 = vpop.permute.xlu0 %2575 }
0x2784   :  { %v2568_v4 = vadd.f32 %v2566_v3, %v2562_v2 }
0x2786   :  { %v2578_v6 = vadd.f32 %v2576_v5, %v2568_v4 }
0x2788   :  { %4410 = vtanh.f32 %v2578_v6 }
0x2792   :  { %v4411_v7 = vpop.eup %4410 }
0x2793   :  { %2581 = vrot.lane.b32.xlu1 %v4411_v7, %s4520_s16 }
0x2797   :  { %2590 = vrot.lane.b32.xlu1 %v2578_v6, %s4521_s4 }
0x2805   :  { %v2582_v8 = vpop.permute.xlu1 %2581 }
0x2806   :  { %v2584_v9 = vmul.f32 %v4407_v31, %v2582_v8 }
0x2808   :  { %2586 = vrot.lane.b32.xlu0 %v2584_v9, %s4521_s4 }
0x2809   :  { %v2591_v10 = vpop.permute.xlu1 %2590 }
0x2875   :  { %2596 = sbr.rel (%p3504_p6) target bundleno = 10365 (0x287d), region = 285 }
0x287a   :  { %v2587_v11 = vpop.permute.xlu0 %2586 }
0x287b   :  { %v2593_v12 = vsel %vm176_vm3, %v2587_v11, %v2591_v10 }
0x287c   :  { %3667 = vst.msk [vmem:[%s5901_s15 - $0x2] sm:$0x1] %vm2597_vm9, %v2593_v12 }
0x287d PF:  { %p3505_p7 = scmp.ne.s32.totalorder %s5879_s13, 1 }
0x287e   :  { %vm2602_vm10 = vcmask (!%p3505_p7), 517121  }
0x287f   :  { %2601 = sbr.rel (%p3505_p7) target bundleno = 10374 (0x2886), region = 289  ;;  %3506 = vst.msk [vmem:[%s5896_s1 + $0x7] sm:$0x2] (!%p3505_p7), %vm2602_vm10, %v2593_v12 }
0x2886 PF:  { %p3508_p8 = scmp.ne.s32.totalorder %s5877_s12, 0 }
0x2887   :  { %vm2611_vm11 = vcmask (!%p3508_p8), 516096   ;;  %s3668_s2 = scalar_lea.vmem (!%p3508_p8), [#allocation2], %s5860_s5  ;;  %s2610_s10 = scalar_lea.vmem (!%p3508_p8), [#allocation3], %s5862_s27 }
0x2888   :  { %2607 = sbr.rel (%p3508_p8) target bundleno = 10383 (0x288f), region = 293  ;;  %v3670_v13 = vld [vmem:[%s3668_s2 - $0x1] sm:$0x1] (!%p3508_p8) }
0x2889   :  { %2612 = vst.msk [vmem:[%s2610_s10] sm:$0x1] (!%p3508_p8), %vm2611_vm11, %v3670_v13 }
0x288f PF:  { %s2613_s17 = scalar_select %p2449_p1, 1, 0 }
0x2890   :  { %s2615_s18 = scalar_select %p2451_p2, 1, 0 }
0x2891   :  { %s2614_s19 = sadd.s32 %s2613_s17, %s5862_s27  ;;  %s5952_s20 = ssub.s32 %s5860_s5, %s2613_s17 }
0x2892   :  { %s5954_s21 = ssub.s32 %s2614_s19, %s2615_s18  ;;  %p3510_p9 = scmp.ne.s32.totalorder %s5879_s13, 0 }
0x2893   :  { %vm2626_vm12 = vcmask (!%p3510_p9), 516096   ;;  %s3258_s0 = scalar_lea.vmem (!%p3510_p9), [#allocation2], %s5873_s22  ;;  %s3260_s24 = scalar_lea.vmem (!%p3510_p9), [#allocation3], %s5875_s11 }
0x2894   :  { %2620 = sbr.rel (%p3510_p9) target bundleno = 10395 (0x289b), region = 297  ;;  %v3511_v14 = vld [vmem:[%s3258_s0 + $0x7] sm:$0x1] (!%p3510_p9) }
0x2895   :  { %3512 = vst.msk [vmem:[%s3260_s24 + $0xa] sm:$0x1] (!%p3510_p9), %vm2626_vm12, %v3511_v14 }
0x289b PF:  { %s2628_s23 = scalar_select %p2450_p3, 1, 0 }
0x289c   :  { %s2630_s25 = scalar_select %p2452_p4, 1, 0 }
0x289d   :  { %s2629_s26 = sadd.s32 %s2628_s23, %s5875_s11  ;;  %s5965_s5 = ssub.s32 %s5873_s22, %s2628_s23 }
0x289e   :  { %s5967_s27 = ssub.s32 %s2629_s26, %s2630_s25  ;;  %s5969_s3 = sld [smem:[#allocation4 + $0xd]] }
0x289f   :  { %s5971_s28 = sld [smem:[#allocation4 + $0x8d]] }
0x28a4   :  { %p2635_p10 = scmp.eq.s32.totalorder %s5969_s3, 0  ;;  %p2637_p11 = scmp.eq.s32.totalorder %s5969_s3, 1 }
0x28a5   :  { %p2636_p12 = scmp.eq.s32.totalorder %s5971_s28, 0  ;;  %p2638_p13 = scmp.eq.s32.totalorder %s5971_s28, 1 }
0x28a7   :  { %p2639_p0 = por %p2638_p13, %p2637_p11 }
0x28a8   :  { %v4153_v15 = vpack.c.bf16 (%p2639_p0), %v4641_v32, %v4625_v26  ;;  %v4155_v16 = vpack.c.bf16 (%p2639_p0), %v4630_v27, %v4620_v25  ;;  %v4157_v17 = vpack.c.bf16 (%p2639_p0), %v4669_v37, %v4651_v34  ;;  %s5988_s29 = scalar_lea.vmem (%p2639_p0), [#allocation3], %s5967_s27  ;;  %s4522_s30 = smov (%p2639_p0), 64   ;;  %v4159_v21 = vpack.c.bf16 (%p2639_p0), %v4664_v36, %v4646_v33 }
0x28a9   :  { %2642 = sbr.rel (!%p2639_p0) target bundleno = 11146 (0x2b8a), region = 301  ;;  %v3520_v19 = vld [vmem:[%s5988_s29 + $0x9] sm:$0x1] (%p2639_p0)  ;;  %s5993_s9 = scalar_lea.vmem (%p2639_p0), [#allocation3], %s5954_s21  ;;  %v4161_v22 = vpack.c.bf16 (%p2639_p0), %v4689_v41, %v4679_v39  ;;  %v4523_v23 = vmov (%p2639_p0), 0.0   ;;  %v4163_v24 = vpack.c.bf16 (%p2639_p0), %v4684_v40, %v4674_v38  ;;  %v4165_v30 = vpack.c.bf16 (%p2639_p0), %v4709_v46, %v4699_v43 }
0x28aa   :  { %2661 = vrot.lane.b32.xlu0 (%p2639_p0), %v3520_v19, %s4522_s30  ;;  %4154 = vmatprep.subr.bf16.mxu0 (%p2639_p0), %v4153_v15  ;;  %v3676_v20 = vld [vmem:[%s5993_s9 - $0x1] sm:$0x1] (%p2639_p0)  ;;  %v4167_v31 = vpack.c.bf16 (%p2639_p0), %v4704_v44, %v4694_v42  ;;  %v4169_v35 = vpack.c.bf16 (%p2639_p0), %v4729_v51, %v4719_v48  ;;  %v4171_v45 = vpack.c.bf16 (%p2639_p0), %v4724_v50, %v4714_v47  ;;  %v3519_v5 = vld [vmem:[%s5988_s29 + $0x8] sm:$0x1] (%p2639_p0)  ;;  %v3673_v8 = vld [vmem:[%s5993_s9 - $0x2] sm:$0x1] (%p2639_p0) }
0x28ab   :  { %4156 = vmatpush1.bf16.msra.mxu0 (%p2639_p0), %v4155_v16  ;;  %2734 = vmatprep.mubr.f32.mxu0 (%p2639_p0), %v4523_v23  ;;  %v4173_v49 = vpack.c.bf16 (%p2639_p0), %v4749_v55, %v4739_v53  ;;  %v4175_v0 = vpack.c.bf16 (%p2639_p0), %v4744_v54, %v4734_v52  ;;  %v4177_v1 = vpack.c.bf16 (%p2639_p0), %v4769_v59, %v4759_v57  ;;  %vm2668_vm13 = vcmask (%p2639_p0), 1040384   ;;  %s4524_s22 = smov (%p2639_p0), 96   ;;  %s4525_s11 = smov (%p2639_p0), 32  }
0x28ac   :  { %4158 = vmatprep.subr.bf16.mxu0 (%p2639_p0), %v4157_v17  ;;  %v4179_v2 = vpack.c.bf16 (%p2639_p0), %v4764_v58, %v4754_v56  ;;  %v4181_v3 = vpack.c.bf16 (%p2639_p0), %v4789_v63, %v4779_v61  ;;  %v4183_v4 = vpack.c.bf16 (%p2639_p0), %v4784_v62, %v4774_v60  ;;  %p3522_p1 = scmp.ne.s32.totalorder (%p2639_p0), %s5969_s3, 1 }
0x28ae   :  { %2650 = vrot.lane.b32.xlu0 (%p2639_p0), %v3676_v20, %s4522_s30 }
0x28af   :  { %4160 = vmatpush1.bf16.msra.mxu0 (%p2639_p0), %v4159_v21 }
0x28b0   :  { %4162 = vmatprep.subr.bf16.mxu0 %v4161_v22  ;;  %vm2783_vm14 = vcmask (!%p3522_p1), 516096  }
0x28b3   :  { %4164 = vmatpush1.bf16.msra.mxu0 %v4163_v24 }
0x28b4   :  { %4166 = vmatprep.subr.bf16.mxu0 %v4165_v30 }
0x28b7   :  { %4168 = vmatpush1.bf16.msra.mxu0 %v4167_v31 }
0x28b8   :  { %4170 = vmatprep.subr.bf16.mxu0 %v4169_v35 }
0x28bb   :  { %4172 = vmatpush1.bf16.msra.mxu0 %v4171_v45 }
0x28bc   :  { %4174 = vmatprep.subr.bf16.mxu0 %v4173_v49 }
0x28bf   :  { %4176 = vmatpush1.bf16.msra.mxu0 %v4175_v0 }
0x28c0   :  { %4178 = vmatprep.subr.bf16.mxu0 %v4177_v1 }
0x28c3   :  { %4180 = vmatpush1.bf16.msra.mxu0 %v4179_v2 }
0x28c4   :  { %4182 = vmatprep.subr.bf16.mxu0 %v4181_v3 }
0x28c7   :  { %4184 = vmatpush1.bf16.msra.mxu0 %v4183_v4 }
0x291c   :  { %v2662_v6 = vpop.permute.xlu0 %2661 }
0x291d   :  { %v2664_v7 = vsel %vm179_vm1, %v3519_v5, %v2662_v6 }
0x291e   :  { %v2666_v9 = vrot.slane %v2664_v7, 7 }
0x2920   :  { %v2651_v10 = vpop.permute.xlu0 %2650 }
0x2921   :  { %v2653_v11 = vsel %vm179_vm1, %v3673_v8, %v2651_v10 }
0x2922   :  { %v2669_v12 = vsel %vm2668_vm13, %v2653_v11, %v2666_v9 }
0x2923   :  { %2756 = vrot.lane.b32.xlu1 %v2669_v12, %s4524_s22  ;;  %2735 = vmatmul.mubr.f32.vlgmr.msra.gmra.mrb[0].mxu0 %v2669_v12 }
0x2995   :  { %v2757_v21 = vpop.permute.xlu1 %2756 }
0x29f6   :  { %v2736_v13 = vpop.f32.mrb[0].mxu0 }
0x29f7   :  { %v2737_v14 = vadd.f32 %v2736_v13, %v4632_v28  ;;  %v2738_v15 = vpop.f32.mrb[1].mxu0 }
0x29f8   :  { %v2739_v24 = vadd.f32 %v2738_v15, %v4634_v29 }
0x29f9   :  { %v3521_v16 = vmul.f32 -1.442695, %v2737_v14 }
0x29fb   :  { %4412 = vpow2.f32 %v3521_v16 }
0x2a05   :  { %v4413_v17 = vpop.eup %4412 }
0x2a06   :  { %v2744_v19 = vadd.f32 1.0, %v4413_v17 }
0x2a08   :  { %4414 = vrcp.f32 %v2744_v19 }
0x2a09   :  { %4416 = vtanh.f32 %v2739_v24 }
0x2a12   :  { %v4415_v20 = vpop.eup %4414 }
0x2a13   :  { %v2759_v22 = vmul.f32 %v4415_v20, %v2757_v21  ;;  %v2749_v23 = vmul.f32 %v4415_v20, %v2669_v12  ;;  %v4417_v30 = vpop.eup %4416 }
0x2a14   :  { %v2748_v31 = vmul.f32 %v4417_v30, %v4415_v20 }
0x2a15   :  { %2761 = vrot.lane.b32.xlu0 %v2759_v22, %s4522_s30  ;;  %2751 = vrot.lane.b32.xlu1 %v2749_v23, %s4524_s22 }
0x2a87   :  { %v2752_v35 = vpop.permute.xlu1 %2751  ;;  %v2762_v49 = vpop.permute.xlu0 %2761 }
0x2a88   :  { %v2754_v45 = vadd.f32 %v2752_v35, %v2748_v31 }
0x2a8a   :  { %v2764_v0 = vadd.f32 %v2762_v49, %v2754_v45 }
0x2a8c   :  { %4418 = vtanh.f32 %v2764_v0 }
0x2a96   :  { %v4419_v1 = vpop.eup %4418 }
0x2a97   :  { %2767 = vrot.lane.b32.xlu1 %v4419_v1, %s4524_s22 }
0x2a9b   :  { %2776 = vrot.lane.b32.xlu1 %v2764_v0, %s4525_s11 }
0x2b09   :  { %v2768_v2 = vpop.permute.xlu1 %2767 }
0x2b0a   :  { %v2770_v3 = vmul.f32 %v4415_v20, %v2768_v2 }
0x2b0c   :  { %2772 = vrot.lane.b32.xlu0 %v2770_v3, %s4525_s11 }
0x2b0d   :  { %v2777_v4 = vpop.permute.xlu1 %2776 }
0x2b79   :  { %2782 = sbr.rel (%p3522_p1) target bundleno = 11137 (0x2b81), region = 305 }
0x2b7e   :  { %v2773_v5 = vpop.permute.xlu0 %2772 }
0x2b7f   :  { %v2779_v6 = vsel %vm176_vm3, %v2773_v5, %v2777_v4 }
0x2b80   :  { %3677 = vst.msk [vmem:[%s5993_s9 - $0x2] sm:$0x1] %vm2783_vm14, %v2779_v6 }
0x2b81 PF:  { %p3523_p2 = scmp.ne.s32.totalorder %s5971_s28, 1 }
0x2b82   :  { %vm2788_vm15 = vcmask (!%p3523_p2), 517121  }
0x2b83   :  { %2787 = sbr.rel (%p3523_p2) target bundleno = 11146 (0x2b8a), region = 309  ;;  %3524 = vst.msk [vmem:[%s5988_s29 + $0x7] sm:$0x2] (!%p3523_p2), %vm2788_vm15, %v2779_v6 }
0x2b8a PF:  { %p3526_p3 = scmp.ne.s32.totalorder %s5969_s3, 0 }
0x2b8b   :  { %vm2797_vm0 = vcmask (!%p3526_p3), 516096   ;;  %s3678_s12 = scalar_lea.vmem (!%p3526_p3), [#allocation2], %s5952_s20  ;;  %s2796_s13 = scalar_lea.vmem (!%p3526_p3), [#allocation3], %s5954_s21 }
0x2b8c   :  { %2793 = sbr.rel (%p3526_p3) target bundleno = 11155 (0x2b93), region = 313  ;;  %v3680_v7 = vld [vmem:[%s3678_s12 - $0x1] sm:$0x1] (!%p3526_p3) }
0x2b8d   :  { %2798 = vst.msk [vmem:[%s2796_s13] sm:$0x1] (!%p3526_p3), %vm2797_vm0, %v3680_v7 }
0x2b93 PF:  { %s6040_s1 = scalar_select %p2635_p10, 1, 0 }
0x2b94   :  { %s2801_s14 = scalar_select %p2637_p11, 1, 0 }
0x2b95   :  { %s2800_s15 = sadd.s32 %s6040_s1, %s5954_s21  ;;  %s2803_s16 = ssub.s32 %s5952_s20, %s6040_s1 }
0x2b96   :  { %s6048_s4 = ssub.s32 %s2800_s15, %s2801_s14  ;;  %p3528_p4 = scmp.ne.s32.totalorder %s5971_s28, 0 }
0x2b97   :  { %vm2812_vm2 = vcmask (!%p3528_p4), 516096   ;;  %s3270_s2 = scalar_lea.vmem (!%p3528_p4), [#allocation2], %s5965_s5  ;;  %s3272_s10 = scalar_lea.vmem (!%p3528_p4), [#allocation3], %s5967_s27 }
0x2b98   :  { %2806 = sbr.rel (%p3528_p4) target bundleno = 11167 (0x2b9f), region = 317  ;;  %v3529_v8 = vld [vmem:[%s3270_s2 + $0x7] sm:$0x1] (!%p3528_p4) }
0x2b99   :  { %3530 = vst.msk [vmem:[%s3272_s10 + $0xa] sm:$0x1] (!%p3528_p4), %vm2812_vm2, %v3529_v8 }
0x2b9f PF:  { %s6055_s17 = scalar_select %p2636_p12, 1, 0 }
0x2ba0   :  { %s2816_s18 = scalar_select %p2638_p13, 1, 0 }
0x2ba1   :  { %s2815_s19 = sadd.s32 %s6055_s17, %s5967_s27  ;;  %s2818_s21 = ssub.s32 %s5965_s5, %s6055_s17 }
0x2ba2   :  { %s6063_s0 = ssub.s32 %s2815_s19, %s2816_s18  ;;  %s6065_s24 = sld [smem:[#allocation4 + $0xe]] }
0x2ba3   :  { %s6067_s23 = sld [smem:[#allocation4 + $0x8e]] }
0x2ba8   :  { %p2821_p5 = scmp.eq.s32.totalorder %s6065_s24, 0  ;;  %p2823_p6 = scmp.eq.s32.totalorder %s6065_s24, 1 }
0x2ba9   :  { %p2822_p7 = scmp.eq.s32.totalorder %s6067_s23, 0  ;;  %p2824_p8 = scmp.eq.s32.totalorder %s6067_s23, 1 }
0x2bab   :  { %p2825_p9 = por %p2824_p8, %p2823_p6 }
0x2bac   :  { %v4185_v9 = vpack.c.bf16 (%p2825_p9), %v4641_v32, %v4625_v26  ;;  %v4187_v10 = vpack.c.bf16 (%p2825_p9), %v4630_v27, %v4620_v25  ;;  %v4189_v11 = vpack.c.bf16 (%p2825_p9), %v4669_v37, %v4651_v34  ;;  %s6084_s25 = scalar_lea.vmem (%p2825_p9), [#allocation3], %s6063_s0  ;;  %s4526_s26 = smov (%p2825_p9), 64   ;;  %v4191_v26 = vpack.c.bf16 (%p2825_p9), %v4664_v36, %v4646_v33 }
0x2bad   :  { %2828 = sbr.rel (!%p2825_p9) target bundleno = 11918 (0x2e8e), region = 321  ;;  %v3538_v12 = vld [vmem:[%s6084_s25 + $0x9] sm:$0x1] (%p2825_p9)  ;;  %s6089_s27 = scalar_lea.vmem (%p2825_p9), [#allocation3], %s6048_s4  ;;  %v4193_v25 = vpack.c.bf16 (%p2825_p9), %v4689_v41, %v4679_v39  ;;  %v4527_v27 = vmov (%p2825_p9), 0.0   ;;  %v4195_v32 = vpack.c.bf16 (%p2825_p9), %v4684_v40, %v4674_v38  ;;  %v4197_v34 = vpack.c.bf16 (%p2825_p9), %v4709_v46, %v4699_v43 }
0x2bae   :  { %2847 = vrot.lane.b32.xlu0 (%p2825_p9), %v3538_v12, %s4526_s26  ;;  %4186 = vmatprep.subr.bf16.mxu0 (%p2825_p9), %v4185_v9  ;;  %v3686_v13 = vld [vmem:[%s6089_s27 - $0x1] sm:$0x1] (%p2825_p9)  ;;  %v4199_v33 = vpack.c.bf16 (%p2825_p9), %v4704_v44, %v4694_v42  ;;  %v4201_v36 = vpack.c.bf16 (%p2825_p9), %v4729_v51, %v4719_v48  ;;  %v4203_v37 = vpack.c.bf16 (%p2825_p9), %v4724_v50, %v4714_v47  ;;  %v3537_v44 = vld [vmem:[%s6084_s25 + $0x8] sm:$0x1] (%p2825_p9)  ;;  %v3683_v48 = vld [vmem:[%s6089_s27 - $0x2] sm:$0x1] (%p2825_p9) }
0x2baf   :  { %4188 = vmatpush1.bf16.msra.mxu0 (%p2825_p9), %v4187_v10  ;;  %2920 = vmatprep.mubr.f32.mxu0 (%p2825_p9), %v4527_v27  ;;  %v4205_v38 = vpack.c.bf16 (%p2825_p9), %v4749_v55, %v4739_v53  ;;  %v4207_v39 = vpack.c.bf16 (%p2825_p9), %v4744_v54, %v4734_v52  ;;  %v4209_v40 = vpack.c.bf16 (%p2825_p9), %v4769_v59, %v4759_v57  ;;  %vm2854_vm4 = vcmask (%p2825_p9), 1040384   ;;  %s4528_s3 = smov (%p2825_p9), 96   ;;  %s4529_s28 = smov (%p2825_p9), 32  }
0x2bb0   :  { %4190 = vmatprep.subr.bf16.mxu0 (%p2825_p9), %v4189_v11  ;;  %v4211_v41 = vpack.c.bf16 (%p2825_p9), %v4764_v58, %v4754_v56  ;;  %v4213_v42 = vpack.c.bf16 (%p2825_p9), %v4789_v63, %v4779_v61  ;;  %v4215_v43 = vpack.c.bf16 (%p2825_p9), %v4784_v62, %v4774_v60  ;;  %p3540_p10 = scmp.ne.s32.totalorder (%p2825_p9), %s6065_s24, 1 }
0x2bb2   :  { %2836 = vrot.lane.b32.xlu0 (%p2825_p9), %v3686_v13, %s4526_s26 }
0x2bb3   :  { %4192 = vmatpush1.bf16.msra.mxu0 (%p2825_p9), %v4191_v26 }
0x2bb4   :  { %4194 = vmatprep.subr.bf16.mxu0 %v4193_v25  ;;  %vm2969_vm5 = vcmask (!%p3540_p10), 516096  }
0x2bb7   :  { %4196 = vmatpush1.bf16.msra.mxu0 %v4195_v32 }
0x2bb8   :  { %4198 = vmatprep.subr.bf16.mxu0 %v4197_v34 }
0x2bbb   :  { %4200 = vmatpush1.bf16.msra.mxu0 %v4199_v33 }
0x2bbc   :  { %4202 = vmatprep.subr.bf16.mxu0 %v4201_v36 }
0x2bbf   :  { %4204 = vmatpush1.bf16.msra.mxu0 %v4203_v37 }
0x2bc0   :  { %4206 = vmatprep.subr.bf16.mxu0 %v4205_v38 }
0x2bc3   :  { %4208 = vmatpush1.bf16.msra.mxu0 %v4207_v39 }
0x2bc4   :  { %4210 = vmatprep.subr.bf16.mxu0 %v4209_v40 }
0x2bc7   :  { %4212 = vmatpush1.bf16.msra.mxu0 %v4211_v41 }
0x2bc8   :  { %4214 = vmatprep.subr.bf16.mxu0 %v4213_v42 }
0x2bcb   :  { %4216 = vmatpush1.bf16.msra.mxu0 %v4215_v43 }
0x2c20   :  { %v2848_v46 = vpop.permute.xlu0 %2847 }
0x2c21   :  { %v2850_v47 = vsel %vm179_vm1, %v3537_v44, %v2848_v46 }
0x2c22   :  { %v2852_v50 = vrot.slane %v2850_v47, 7 }
0x2c24   :  { %v2837_v51 = vpop.permute.xlu0 %2836 }
0x2c25   :  { %v2839_v52 = vsel %vm179_vm1, %v3683_v48, %v2837_v51 }
0x2c26   :  { %v2855_v53 = vsel %vm2854_vm4, %v2839_v52, %v2852_v50 }
0x2c27   :  { %2942 = vrot.lane.b32.xlu1 %v2855_v53, %s4528_s3  ;;  %2921 = vmatmul.mubr.f32.vlgmr.msra.gmra.mrb[0].mxu0 %v2855_v53 }
0x2c99   :  { %v2943_v61 = vpop.permute.xlu1 %2942 }
0x2cfa   :  { %v2922_v54 = vpop.f32.mrb[0].mxu0 }
0x2cfb   :  { %v2923_v55 = vadd.f32 %v2922_v54, %v4632_v28  ;;  %v2924_v56 = vpop.f32.mrb[1].mxu0 }
0x2cfc   :  { %v2925_v14 = vadd.f32 %v2924_v56, %v4634_v29 }
0x2cfd   :  { %v3539_v57 = vmul.f32 -1.442695, %v2923_v55 }
0x2cff   :  { %4420 = vpow2.f32 %v3539_v57 }
0x2d09   :  { %v4421_v58 = vpop.eup %4420 }
0x2d0a   :  { %v2930_v59 = vadd.f32 1.0, %v4421_v58 }
0x2d0c   :  { %4422 = vrcp.f32 %v2930_v59 }
0x2d0d   :  { %4424 = vtanh.f32 %v2925_v14 }
0x2d16   :  { %v4423_v60 = vpop.eup %4422 }
0x2d17   :  { %v2945_v62 = vmul.f32 %v4423_v60, %v2943_v61  ;;  %v2935_v63 = vmul.f32 %v4423_v60, %v2855_v53  ;;  %v4425_v15 = vpop.eup %4424 }
0x2d18   :  { %v2934_v16 = vmul.f32 %v4425_v15, %v4423_v60 }
0x2d19   :  { %2947 = vrot.lane.b32.xlu0 %v2945_v62, %s4526_s26  ;;  %2937 = vrot.lane.b32.xlu1 %v2935_v63, %s4528_s3 }
0x2d8b   :  { %v2938_v17 = vpop.permute.xlu1 %2937  ;;  %v2948_v19 = vpop.permute.xlu0 %2947 }
0x2d8c   :  { %v2940_v28 = vadd.f32 %v2938_v17, %v2934_v16 }
0x2d8e   :  { %v2950_v20 = vadd.f32 %v2948_v19, %v2940_v28 }
0x2d90   :  { %4426 = vtanh.f32 %v2950_v20 }
0x2d9a   :  { %v4427_v21 = vpop.eup %4426 }
0x2d9b   :  { %2953 = vrot.lane.b32.xlu1 %v4427_v21, %s4528_s3 }
0x2d9f   :  { %2962 = vrot.lane.b32.xlu1 %v2950_v20, %s4529_s28 }
0x2e0d   :  { %v2954_v22 = vpop.permute.xlu1 %2953 }
0x2e0e   :  { %v2956_v23 = vmul.f32 %v4423_v60, %v2954_v22 }
0x2e10   :  { %2958 = vrot.lane.b32.xlu0 %v2956_v23, %s4529_s28 }
0x2e11   :  { %v2963_v24 = vpop.permute.xlu1 %2962 }
0x2e7d   :  { %2968 = sbr.rel (%p3540_p10) target bundleno = 11909 (0x2e85), region = 325 }
0x2e82   :  { %v2959_v30 = vpop.permute.xlu0 %2958 }
0x2e83   :  { %v2965_v31 = vsel %vm176_vm3, %v2959_v30, %v2963_v24 }
0x2e84   :  { %3687 = vst.msk [vmem:[%s6089_s27 - $0x2] sm:$0x1] %vm2969_vm5, %v2965_v31 }
0x2e85 PF:  { %p3541_p11 = scmp.ne.s32.totalorder %s6067_s23, 1 }
0x2e86   :  { %vm2974_vm6 = vcmask (!%p3541_p11), 517121  }
0x2e87   :  { %2973 = sbr.rel (%p3541_p11) target bundleno = 11918 (0x2e8e), region = 329  ;;  %3542 = vst.msk [vmem:[%s6084_s25 + $0x7] sm:$0x2] (!%p3541_p11), %vm2974_vm6, %v2965_v31 }
0x2e8e PF:  { %p3544_p12 = scmp.ne.s32.totalorder %s6065_s24, 0 }
0x2e8f   :  { %vm2983_vm7 = vcmask (!%p3544_p12), 516096   ;;  %s3688_s29 = scalar_lea.vmem (!%p3544_p12), [#allocation2], %s2803_s16  ;;  %s2982_s30 = scalar_lea.vmem (!%p3544_p12), [#allocation3], %s6048_s4 }
0x2e90   :  { %2979 = sbr.rel (%p3544_p12) target bundleno = 11927 (0x2e97), region = 333  ;;  %v3690_v29 = vld [vmem:[%s3688_s29 - $0x1] sm:$0x1] (!%p3544_p12) }
0x2e91   :  { %2984 = vst.msk [vmem:[%s2982_s30] sm:$0x1] (!%p3544_p12), %vm2983_vm7, %v3690_v29 }
0x2e97 PF:  { %s2985_s9 = scalar_select %p2821_p5, 1, 0 }
0x2e98   :  { %s2987_s22 = scalar_select %p2823_p6, 1, 0 }
0x2e99   :  { %s2986_s11 = sadd.s32 %s2985_s9, %s6048_s4  ;;  %p3546_p13 = scmp.ne.s32.totalorder %s6067_s23, 0 }
0x2e9a   :  { %s6141_s12 = ssub.s32 %s2986_s11, %s2987_s22  ;;  %vm2997_vm3 = vcmask (!%p3546_p13), 516096   ;;  %s3282_s20 = scalar_lea.vmem (!%p3546_p13), [#allocation2], %s2818_s21 }
0x2e9b   :  { %2991 = sbr.rel (%p3546_p13) target bundleno = 11938 (0x2ea2), region = 337  ;;  %v3547_v35 = vld [vmem:[%s3282_s20 + $0x7] sm:$0x1] (!%p3546_p13)  ;;  %s3284_s13 = scalar_lea.vmem (!%p3546_p13), [#allocation3], %s6063_s0 }
0x2e9c   :  { %3548 = vst.msk [vmem:[%s3284_s13 + $0xa] sm:$0x1] (!%p3546_p13), %vm2997_vm3, %v3547_v35 }
0x2ea2 PF:  { %v3014_v45 = vld [vmem:[%s6201_s6] sm:$0xff]  ;;  %v3015_v49 = vld [vmem:[%s6201_s6 + $0x8] sm:$0xff]  ;;  %v3016_v0 = vld [vmem:[%s6201_s6 + $0x10] sm:$0xff]  ;;  %v4530_v1 = vmov 0.0|0.0   ;;  %vm4531_vm8 = vmmov 0   ;;  %s3691_s30 = scalar_lea.vmem [#allocation3], %s6141_s12 }
0x2ea3   :  { %4217 = vmatprep.subr.bf16.mxu0 %v4530_v1  ;;  %v4218_v2 = vpack.c.bf16 %v3015_v49, %v3014_v45  ;;  %v3017_v3 = vld [vmem:[%s6201_s6 + $0x18] sm:$0xff]  ;;  %3730 = vmatprep.mubr.msk.f32.mxu0 %vm4531_vm8, %v4468_v18  ;;  %s2999_s17 = scalar_select %p2822_p7, 1, 0  ;;  %v3018_v5 = vld [vmem:[%s6201_s6 + $0x20] sm:$0xff]  ;;  %v3019_v6 = vld [vmem:[%s6201_s6 + $0x28] sm:$0xff]  ;;  %vm3012_vm9 = vcmask 1040384  }
0x2ea4   :  { %s3001_s18 = scalar_select %p2824_p8, 1, 0  ;;  %v4221_v4 = vpack.c.bf16 %v3017_v3, %v3016_v0  ;;  %v4224_v18 = vpack.c.bf16 %v3019_v6, %v3018_v5  ;;  %v3020_v7 = vld [vmem:[%s6201_s6 + $0x30] sm:$0xff]  ;;  %v3021_v8 = vld [vmem:[%s6201_s6 + $0x38] sm:$0xff]  ;;  %v3552_v26 = vld [vmem:[%s6202_s7] ss:$0 sm:$0xff] }
0x2ea5   :  { %4219 = vmatpush3.bf16.msra.mxu0 %v4218_v2  ;;  %s3000_s19 = sadd.s32 %s2999_s17, %s6063_s0  ;;  %v4227_v10 = vpack.c.bf16 %v3021_v8, %v3020_v7  ;;  %v3693_v12 = vld [vmem:[%s3691_s30 - $0x1] sm:$0x1]  ;;  %s4532_s11 = smov [#allocation7]   ;;  %vm3102_vm10 = vcmask 33792  }
0x2ea6   :  { %4220 = vmatprep.subr.bf16.mxu0 %v4530_v1  ;;  %s3002_s27 = ssub.s32 %s3000_s19, %s3001_s18  ;;  %s3110_s20 = sshll.u32 %s4532_s11, 4  ;;  %s3111_s20 = int_to_ptr.vmem [resolvable:$true] %s3110_s20 }
0x2ea7   :  { %s3287_s29 = scalar_lea.vmem [#allocation3], %s3002_s27  ;;  %s4440_s6 = scalar_lea.vmem %s3111_s20, 32 }
0x2ea8   :  { %v3551_v9 = vld [vmem:[%s3287_s29 + $0x9] sm:$0x1]  ;;  %p4441_p0 = scmp.ne.s32.totalorder %s3111_s20, %s4440_s6  ;;  %p4445_p1 = scmp.lt.s32.totalorder %s3111_s20, %s3111_s20 }
0x2ea9   :  { %4222 = vmatpush3.bf16.msra.mxu0 %v4221_v4  ;;  %v3010_v11 = vrot.slane %v3551_v9, 7  ;;  %p4446_p2 = scmp.lt.s32.totalorder %s4440_s6, %s4440_s6 }
0x2eaa   :  { %4223 = vmatprep.subr.bf16.mxu0 %v4530_v1 }
0x2eab   :  { %v3013_v13 = vsel %vm3012_vm9, %v3693_v12, %v3010_v11  ;;  %p4447_p3 = por %p4446_p2, %p4445_p1 }
0x2ead   :  { %4225 = vmatpush3.bf16.msra.mxu0 %v4224_v18  ;;  %p4448_p4 = pnand %p4447_p3, %p4441_p0 }
0x2eae   :  { %4226 = vmatprep.subr.bf16.mxu0 %v4530_v1 }
0x2eb1   :  { %4228 = vmatpush3.bf16.msra.mxu0 %v4227_v10 }
0x2eb4   :  { %3731 = vmatmul.mubr.msk.f32.vlgmr.msra.gmra.mrb[0].mxu0 %vm179_vm1, %v3013_v13 }
0x2f87   :  { %v3098_v25 = vpop.f32.mrb[0].mxu0 }
0x2f88   :  { %v3099_v27 = vadd.f32 %v3552_v26, %v3098_v25  ;;  %v3732_v32 = vpop.f32.mrb[1].mxu0 }
0x2f8a   :  { %3103 = vst.msk [vmem:[#allocation7] sm:$0x3] %vm3102_vm10, %v3099_v27 }
0x2f8b   :  { %4451 = shalt.err (!%p4448_p4)
}
0x2f8c   :  { %s4452_s1 = scalar_lea.hbm %s6203_s8, 32 }
0x2f8d   :  { %p4453_p5 = scmp.ne.s32.totalorder %s6203_s8, %s4452_s1  ;;  %p4456_p6 = scmp.lt.u32.totalorder %s4452_s1, %s6203_s8 }
0x2f8f   :  { %p4458_p7 = pnand %p4456_p6, %p4453_p5 }
0x2f91   :  { %4461 = shalt.err (!%p4458_p7)
}
0x2f92   :  { %3113 = dma.vmem_to_hbm [thread:$0]  %s3111_s20, 32, %s6203_s8, [#allocation5]  }
0x2f93   :  { %4464 = dma.done.wait [#allocation5], 32  }
0x2f94   :  { %4465 = vsyncadd [#allocation5], 4294967264 }
0x2f95   :  { %3117 = vsyncpa [#allocation5], 1 }
0x2f96   :  { %3118 = vsyncpa [#allocation6], 1 }

</bundles_post_ra>
